<compile_context>
chip_gen: v5e
topology: v5e:2x2
jax: 0.10.0
libtpu: 0.0.40
codegen_flags: <defaults>
</compile_context>

<pallas_src>
import functools

import jax
import jax.numpy as jnp
from jax.experimental import pallas as pl
from jax.experimental.pallas import tpu as pltpu


def _layer_norm(x, g, b, eps=1e-5):
    mu = jnp.mean(x, axis=-1, keepdims=True)
    var = jnp.mean((x - mu) ** 2, axis=-1, keepdims=True)
    return (x - mu) * jax.lax.rsqrt(var + eps) * g + b


def char_encoder_kernel(x_ref, mask_ref,
                        wqkv_ref, bqkv_ref, wo_ref, bo_ref,
                        ln1_g_ref, ln1_b_ref, ln2_g_ref, ln2_b_ref,
                        w1_ref, b1_ref, w2_ref, b2_ref,
                        o_ref, *, num_layers, num_heads, ff_chunk, matmul_dtype):
    Nb, S, H = x_ref.shape
    dh = H // num_heads
    F = w1_ref.shape[-1]

    # Residual stream kept as a 2-D (Nb*S, H) f32 slab across the whole layer stack;
    # only matmul operands are cast to `matmul_dtype` (bf16 by default).
    x = x_ref[...].astype(jnp.float32).reshape(Nb * S, H)

    for l in range(num_layers):                          # static unroll over layers
        # ---- fused QKV projection: one (Nb*S, H) @ (H, 3H) matmul ----------------
        # (1/sqrt(dh) already folded into the Q columns of wqkv/bqkv host-side)
        qkv = jnp.dot(x.astype(matmul_dtype), wqkv_ref[l],
                      preferred_element_type=jnp.float32) + bqkv_ref[l]

        # ---- multi-head attention; per-head contexts collected in registers ------
        heads = []
        for h in range(num_heads):
            qh = qkv[:, h * dh:(h + 1) * dh].reshape(Nb, S, dh).astype(matmul_dtype)
            kh = qkv[:, H + h * dh:H + (h + 1) * dh].reshape(Nb, S, dh).astype(matmul_dtype)
            vh = qkv[:, 2 * H + h * dh:2 * H + (h + 1) * dh].reshape(Nb, S, dh).astype(matmul_dtype)
            s = jnp.einsum('nsd,ntd->nst', qh, kh,
                           preferred_element_type=jnp.float32)
            s = s - jnp.max(s, axis=-1, keepdims=True)
            p = jnp.exp(s)
            p = p * pl.reciprocal(jnp.sum(p, axis=-1, keepdims=True), approx=True)
            oh = jnp.einsum('nst,ntd->nsd', p.astype(matmul_dtype), vh,
                            preferred_element_type=jnp.float32)
            heads.append(oh.reshape(Nb * S, dh))
        ctx = jnp.concatenate(heads, axis=-1)            # (Nb*S, H), stays in vregs

        # ---- single attention output projection: (Nb*S, H) @ (H, H) --------------
        attn = jnp.dot(ctx.astype(matmul_dtype), wo_ref[l],
                       preferred_element_type=jnp.float32) + bo_ref[l]
        # residual + post-LayerNorm (dropout == identity in eval mode)
        x = _layer_norm(x + attn, ln1_g_ref[l], ln1_b_ref[l])

        # ---- feed-forward (ReLU), chunked over F to bound the live intermediate --
        xb = x.astype(matmul_dtype)
        y = jnp.zeros((Nb * S, H), jnp.float32)
        for f0 in range(0, F, ff_chunk):
            f1 = min(f0 + ff_chunk, F)
            h1 = jnp.maximum(
                jnp.dot(xb, w1_ref[l, :, f0:f1],
                        preferred_element_type=jnp.float32) + b1_ref[l, :, f0:f1],
                0.0)
            y = y + jnp.dot(h1.astype(matmul_dtype), w2_ref[l, f0:f1, :],
                            preferred_element_type=jnp.float32)
        y = y + b2_ref[l]
        x = _layer_norm(x + y, ln2_g_ref[l], ln2_b_ref[l])

    # ---- masked mean pooling over the sequence axis (exact divide) ----------------
    x3 = x.reshape(Nb, S, H)
    m = mask_ref[...].astype(jnp.float32)                # (Nb, S)
    num = jnp.sum(x3 * m[:, :, None], axis=1)            # (Nb, H)
    den = jnp.maximum(jnp.sum(m, axis=1, keepdims=True), 1e-9)
    o_ref[...] = (num / den).astype(o_ref.dtype)


def _prepare_params(params, *, num_heads, matmul_dtype):
    """Host-side, one-time prep: pre-transpose weights (kernel never transposes),
    fold the 1/sqrt(dh) attention scale into the Q columns, cast matmul weights to
    the MXU dtype; LN params and biases stay f32 (they only feed f32 VPU adds)."""
    H = params['out_w'].shape[-1]
    dh = H // num_heads
    scale = 1.0 / float(dh) ** 0.5
    f32 = jnp.float32

    wqkv = jnp.swapaxes(params['in_w'], 1, 2).astype(f32)   # (L, H, 3H)
    bqkv = params['in_b'].astype(f32)                       # (L, 1, 3H)
    wqkv = wqkv.at[:, :, :H].multiply(scale)                 # fold scale into Q
    bqkv = bqkv.at[:, :, :H].multiply(scale)

    return dict(
        wqkv=wqkv.astype(matmul_dtype),
        bqkv=bqkv,
        wo=jnp.swapaxes(params['out_w'], 1, 2).astype(matmul_dtype),  # (L, H, H)
        bo=params['out_b'].astype(f32),                               # (L, 1, H)
        ln1_g=params['ln1_g'].astype(f32), ln1_b=params['ln1_b'].astype(f32),
        ln2_g=params['ln2_g'].astype(f32), ln2_b=params['ln2_b'].astype(f32),
        w1=jnp.swapaxes(params['w1'], 1, 2).astype(matmul_dtype),     # (L, H, F)
        b1=params['b1'].astype(f32),                                  # (L, 1, F)
        w2=jnp.swapaxes(params['w2'], 1, 2).astype(matmul_dtype),     # (L, F, H)
        b2=params['b2'].astype(f32),                                  # (L, 1, H)
    )


def _vmem_limit_bytes():
    """Generation-aware scoped-VMEM limit: ~96 MiB on 128-MiB chips (v5e/v6e),
    ~48 MiB on 64-MiB-per-TC chips (v7x)."""
    try:
        cap = int(getattr(pltpu.get_tpu_info(), "vmem_capacity_bytes",
                          64 * 1024 * 1024))
    except Exception:
        cap = 64 * 1024 * 1024
    return 48 * 1024 * 1024 if cap <= 64 * 1024 * 1024 else 96 * 1024 * 1024


def _pick_n_block(N, S, vmem_limit):
    """Largest multiple of 8 dividing N with M = n_block*S in an MXU/VMEM friendly
    range; prefers a grid >= 2 (input pipelining + v7x dual-TC sharding)."""
    if N <= 8:
        return N
    max_rows = 2048 if vmem_limit > 64 * 1024 * 1024 else 1024
    divisors = [b for b in range(8, N + 1, 8) if N % b == 0]
    if not divisors:
        return N                                         # one full-array block
    good = [b for b in divisors if b * S <= max_rows] or divisors[:1]
    for b in reversed(good):
        if N // b >= 2:
            return b
    return good[-1]


def char_encoder_forward(embeddings, mask, params, *, num_heads, n_block=None,
                         matmul_dtype=jnp.bfloat16, ff_chunk=512):
    N, S, H = embeddings.shape
    L = params['in_w'].shape[0]
    F = params['w1'].shape[1]
    p = _prepare_params(params, num_heads=num_heads, matmul_dtype=matmul_dtype)

    vmem_limit = _vmem_limit_bytes()
    if n_block is None:
        n_block = _pick_n_block(N, S, vmem_limit)
    n_block = min(n_block, N)
    assert N % n_block == 0, "N must be divisible by n_block"

    ff_chunk = F if (ff_chunk is None or ff_chunk <= 0) else min(ff_chunk, F)

    kernel = functools.partial(char_encoder_kernel, num_layers=L,
                               num_heads=num_heads, ff_chunk=ff_chunk,
                               matmul_dtype=matmul_dtype)

    weights = (p['wqkv'], p['bqkv'], p['wo'], p['bo'],
               p['ln1_g'], p['ln1_b'], p['ln2_g'], p['ln2_b'],
               p['w1'], p['b1'], p['w2'], p['b2'])

    def resident(w):
        # Grid-invariant block index: Pallas skips the re-DMA on every grid step.
        # (pl.Buffered(1) would also drop the second buffer allocation; left at the
        # default for lowering robustness — bf16 weights already halve the footprint.)
        nd = w.ndim
        return pl.BlockSpec(w.shape, lambda i, _nd=nd: (0,) * _nd)

    in_specs = ([pl.BlockSpec((n_block, S, H), lambda i: (i, 0, 0)),
                 pl.BlockSpec((n_block, S), lambda i: (i, 0))]
                + [resident(w) for w in weights])

    # TODO(synk): for large L (or much larger F) stream per-layer weights via a
    # second "arbitrary" grid axis over L instead of keeping all layers resident.
    return pl.pallas_call(
        kernel,
        out_shape=jax.ShapeDtypeStruct((N, H), jnp.float32),
        grid=(N // n_block,),
        in_specs=in_specs,
        out_specs=pl.BlockSpec((n_block, H), lambda i: (i, 0)),
        compiler_params=pltpu.CompilerParams(
            dimension_semantics=("parallel",),
            vmem_limit_bytes=vmem_limit),
    )(embeddings, mask, *weights)


def init_params(key, layer_num, hidden_num, ff_num):
    """Deterministic synthetic weights (shapes match nn.TransformerEncoderLayer)."""
    H, F, L = hidden_num, ff_num, layer_num
    ks = jax.random.split(key, 6)

    def u(k, shape, fan_in):
        bound = 1.0 / float(fan_in) ** 0.5
        return jax.random.uniform(k, shape, jnp.float32, -bound, bound)

    return dict(
        in_w=u(ks[0], (L, 3 * H, H), H),          # MHA in_proj_weight
        in_b=jnp.zeros((L, 1, 3 * H), jnp.float32),
        out_w=u(ks[1], (L, H, H), H),             # MHA out_proj.weight
        out_b=jnp.zeros((L, 1, H), jnp.float32),
        ln1_g=jnp.ones((L, 1, H), jnp.float32),
        ln1_b=jnp.zeros((L, 1, H), jnp.float32),
        ln2_g=jnp.ones((L, 1, H), jnp.float32),
        ln2_b=jnp.zeros((L, 1, H), jnp.float32),
        w1=u(ks[2], (L, F, H), H),                # linear1.weight
        b1=u(ks[3], (L, 1, F), H),
        w2=u(ks[4], (L, H, F), F),                # linear2.weight
        b2=u(ks[5], (L, 1, H), F),
    )


def reference_forward(embeddings, mask, params, *, num_heads):
    """Plain-JAX f32 reference of the same math for a correctness check."""
    hp = jax.lax.Precision.HIGHEST
    x = embeddings.astype(jnp.float32)
    N, S, H = x.shape
    L = params['in_w'].shape[0]
    dh = H // num_heads
    scale = 1.0 / float(dh) ** 0.5

    def ln(x, g, b, eps=1e-5):
        mu = jnp.mean(x, -1, keepdims=True)
        var = jnp.mean((x - mu) ** 2, -1, keepdims=True)
        return (x - mu) / jnp.sqrt(var + eps) * g + b

    for l in range(L):
        Wi, bi = params['in_w'][l], params['in_b'][l][0]
        q = jnp.einsum('nsk,hk->nsh', x, Wi[:H], precision=hp) + bi[:H]
        k = jnp.einsum('nsk,hk->nsh', x, Wi[H:2 * H], precision=hp) + bi[H:2 * H]
        v = jnp.einsum('nsk,hk->nsh', x, Wi[2 * H:], precision=hp) + bi[2 * H:]
        qh = q.reshape(N, S, num_heads, dh)
        kh = k.reshape(N, S, num_heads, dh)
        vh = v.reshape(N, S, num_heads, dh)
        s = jnp.einsum('nihd,njhd->nhij', qh, kh, precision=hp) * scale
        p = jax.nn.softmax(s, axis=-1)
        o = jnp.einsum('nhij,njhd->nihd', p, vh, precision=hp).reshape(N, S, H)
        a = jnp.einsum('nsd,od->nso', o, params['out_w'][l], precision=hp) + params['out_b'][l][0]
        x = ln(x + a, params['ln1_g'][l][0], params['ln1_b'][l][0])
        h1 = jax.nn.relu(jnp.einsum('nsh,fh->nsf', x, params['w1'][l], precision=hp)
                         + params['b1'][l][0])
        y = jnp.einsum('nsf,hf->nsh', h1, params['w2'][l], precision=hp) + params['b2'][l][0]
        x = ln(x + y, params['ln2_g'][l][0], params['ln2_b'][l][0])

    m = mask.astype(jnp.float32)
    num = jnp.sum(x * m[:, :, None], axis=1)
    den = jnp.maximum(jnp.sum(m, axis=1, keepdims=True), 1e-9)
    return num / den


if __name__ == "__main__":
    layer_num, hidden_num, head_num = 2, 32, 4
    ff_num = 2048                       # nn.TransformerEncoderLayer default dim_feedforward
    N, S = 16, 8                        # (Batch*CharNum, MaxMentNum)

    key = jax.random.PRNGKey(0)
    k_emb, k_mask, k_par = jax.random.split(key, 3)
    embeddings = jax.random.normal(k_emb, (N, S, hidden_num), jnp.float32)
    mask = (jax.random.uniform(k_mask, (N, S)) > 0.3).astype(jnp.float32)
    mask = mask.at[:, 0].set(1.0)       # at least one valid token per sequence
    params = init_params(k_par, layer_num, hidden_num, ff_num)

    # n_block=8 -> grid of 2 blocks over N, exercising the pipelined / parallel path.
    out = char_encoder_forward(embeddings, mask, params, num_heads=head_num, n_block=8)
    out = jax.block_until_ready(out)

    ref = reference_forward(embeddings, mask, params, num_heads=head_num)
    assert out.shape == (N, hidden_num)
    assert bool(jnp.all(jnp.isfinite(out)))
    # bf16 MXU operands (perf-review recommendation) => looser tolerance vs f32 ref.
    assert bool(jnp.allclose(out, ref, atol=5e-2, rtol=5e-2))
    print("KERNEL_OK")
</pallas_src>

<mosaic_0001>
module attributes {stable_mosaic.version = 11 : i64} {
  func.func @char_encoder_kernel(%arg0: i32, %arg1: memref<8x8x32xf32, #tpu.memory_space<vmem>>, %arg2: memref<8x8xf32, #tpu.memory_space<vmem>>, %arg3: memref<2x32x96xbf16, #tpu.memory_space<vmem>>, %arg4: memref<2x1x96xf32, #tpu.memory_space<vmem>>, %arg5: memref<2x32x32xbf16, #tpu.memory_space<vmem>>, %arg6: memref<2x1x32xf32, #tpu.memory_space<vmem>>, %arg7: memref<2x1x32xf32, #tpu.memory_space<vmem>>, %arg8: memref<2x1x32xf32, #tpu.memory_space<vmem>>, %arg9: memref<2x1x32xf32, #tpu.memory_space<vmem>>, %arg10: memref<2x1x32xf32, #tpu.memory_space<vmem>>, %arg11: memref<2x32x2048xbf16, #tpu.memory_space<vmem>>, %arg12: memref<2x1x2048xf32, #tpu.memory_space<vmem>>, %arg13: memref<2x2048x32xbf16, #tpu.memory_space<vmem>>, %arg14: memref<2x1x32xf32, #tpu.memory_space<vmem>>, %arg15: memref<8x32xf32, #tpu.memory_space<vmem>>) attributes {dimension_semantics = [#tpu.dimension_semantics<parallel>], iteration_bounds = array<i64: 2>, scalar_prefetch = 0 : i64, scratch_operands = 0 : i64, tpu.core_type = #tpu.core_type<tc>, window_params = [{transform_indices = @transform_0, window_bounds = array<i64: 8, 8, 32>}, {transform_indices = @transform_1, window_bounds = array<i64: 8, 8>}, {pipeline_mode = #tpu.pipeline_mode<synchronous>, transform_indices = @transform_2, window_bounds = array<i64: 2, 32, 96>}, {pipeline_mode = #tpu.pipeline_mode<synchronous>, transform_indices = @transform_3, window_bounds = array<i64: 2, 1, 96>}, {pipeline_mode = #tpu.pipeline_mode<synchronous>, transform_indices = @transform_4, window_bounds = array<i64: 2, 32, 32>}, {pipeline_mode = #tpu.pipeline_mode<synchronous>, transform_indices = @transform_5, window_bounds = array<i64: 2, 1, 32>}, {pipeline_mode = #tpu.pipeline_mode<synchronous>, transform_indices = @transform_6, window_bounds = array<i64: 2, 1, 32>}, {pipeline_mode = #tpu.pipeline_mode<synchronous>, transform_indices = @transform_7, window_bounds = array<i64: 2, 1, 32>}, {pipeline_mode = #tpu.pipeline_mode<synchronous>, transform_indices = @transform_8, window_bounds = array<i64: 2, 1, 32>}, {pipeline_mode = #tpu.pipeline_mode<synchronous>, transform_indices = @transform_9, window_bounds = array<i64: 2, 1, 32>}, {pipeline_mode = #tpu.pipeline_mode<synchronous>, transform_indices = @transform_10, window_bounds = array<i64: 2, 32, 2048>}, {pipeline_mode = #tpu.pipeline_mode<synchronous>, transform_indices = @transform_11, window_bounds = array<i64: 2, 1, 2048>}, {pipeline_mode = #tpu.pipeline_mode<synchronous>, transform_indices = @transform_12, window_bounds = array<i64: 2, 2048, 32>}, {pipeline_mode = #tpu.pipeline_mode<synchronous>, transform_indices = @transform_13, window_bounds = array<i64: 2, 1, 32>}, {transform_indices = @transform_14, window_bounds = array<i64: 8, 32>}]} {
    %c0 = arith.constant 0 : index
    %c0_0 = arith.constant 0 : index
    %c0_1 = arith.constant 0 : index
    %0 = vector.load %arg1[%c0, %c0_0, %c0_1] : memref<8x8x32xf32, #tpu.memory_space<vmem>>, vector<8x8x32xf32>
    %1 = vector.shape_cast %0 : vector<8x8x32xf32> to vector<64x32xf32>
    %2 = arith.truncf %1 : vector<64x32xf32> to vector<64x32xbf16>
    %c0_2 = arith.constant 0 : index
    %c0_3 = arith.constant 0 : index
    %c0_4 = arith.constant 0 : index
    %3 = vector.load %arg3[%c0_2, %c0_3, %c0_4] : memref<2x32x96xbf16, #tpu.memory_space<vmem>>, vector<1x32x96xbf16>
    %4 = vector.shape_cast %3 : vector<1x32x96xbf16> to vector<32x96xbf16>
    %cst = arith.constant dense<0.000000e+00> : vector<64x96xf32>
    %5 = tpu.matmul %2, %4, %cst {dimension_numbers = #tpu.dot_dimension_numbers<[1], [0], [0], [1], [0, 0, 1, 1], [], []>} : vector<64x32xbf16>, vector<32x96xbf16>, vector<64x96xf32> -> vector<64x96xf32>
    %c0_5 = arith.constant 0 : index
    %c0_6 = arith.constant 0 : index
    %c0_7 = arith.constant 0 : index
    %6 = vector.load %arg4[%c0_5, %c0_6, %c0_7] : memref<2x1x96xf32, #tpu.memory_space<vmem>>, vector<1x1x96xf32>
    %7 = vector.shape_cast %6 : vector<1x1x96xf32> to vector<1x96xf32>
    %8 = vector.broadcast %7 : vector<1x96xf32> to vector<64x96xf32>
    %9 = arith.addf %5, %8 : vector<64x96xf32>
    %10 = vector.extract_strided_slice %9 {offsets = [0, 0], sizes = [64, 8], strides = [1, 1]} : vector<64x96xf32> to vector<64x8xf32>
    %11 = vector.shape_cast %10 : vector<64x8xf32> to vector<8x8x8xf32>
    %12 = arith.truncf %11 : vector<8x8x8xf32> to vector<8x8x8xbf16>
    %13 = vector.extract_strided_slice %9 {offsets = [0, 32], sizes = [64, 8], strides = [1, 1]} : vector<64x96xf32> to vector<64x8xf32>
    %14 = vector.shape_cast %13 : vector<64x8xf32> to vector<8x8x8xf32>
    %15 = arith.truncf %14 : vector<8x8x8xf32> to vector<8x8x8xbf16>
    %16 = vector.extract_strided_slice %9 {offsets = [0, 64], sizes = [64, 8], strides = [1, 1]} : vector<64x96xf32> to vector<64x8xf32>
    %17 = vector.shape_cast %16 : vector<64x8xf32> to vector<8x8x8xf32>
    %18 = arith.truncf %17 : vector<8x8x8xf32> to vector<8x8x8xbf16>
    "tpu.trace_start"() <{level = 10 : i32, message = "nsd,ntd->nst"}> : () -> ()
    %cst_8 = arith.constant dense<0.000000e+00> : vector<8x8x8xf32>
    %19 = tpu.matmul %12, %15, %cst_8 {dimension_numbers = #tpu.dot_dimension_numbers<[2], [2], [1], [1], [0, 0, 0, 1, 1, 1], [0], [0]>} : vector<8x8x8xbf16>, vector<8x8x8xbf16>, vector<8x8x8xf32> -> vector<8x8x8xf32>
    "tpu.trace_stop"() : () -> ()
    %cst_9 = arith.constant dense<0xFF800000> : vector<8x8xf32>
    %20 = vector.multi_reduction <maximumf>, %19, %cst_9 [2] : vector<8x8x8xf32> to vector<8x8xf32>
    %21 = vector.shape_cast %20 : vector<8x8xf32> to vector<8x8x1xf32>
    %22 = vector.broadcast %21 : vector<8x8x1xf32> to vector<8x8x8xf32>
    %23 = arith.subf %19, %22 : vector<8x8x8xf32>
    %24 = math.exp %23 : vector<8x8x8xf32>
    %cst_10 = arith.constant dense<0.000000e+00> : vector<8x8xf32>
    %25 = vector.multi_reduction <add>, %24, %cst_10 [2] : vector<8x8x8xf32> to vector<8x8xf32>
    %26 = vector.shape_cast %25 : vector<8x8xf32> to vector<8x8x1xf32>
    %27 = tpu.reciprocal %26 {approx = true} : vector<8x8x1xf32> -> vector<8x8x1xf32>
    %28 = vector.broadcast %27 : vector<8x8x1xf32> to vector<8x8x8xf32>
    %29 = arith.mulf %24, %28 : vector<8x8x8xf32>
    %30 = arith.truncf %29 : vector<8x8x8xf32> to vector<8x8x8xbf16>
    "tpu.trace_start"() <{level = 10 : i32, message = "nst,ntd->nsd"}> : () -> ()
    %cst_11 = arith.constant dense<0.000000e+00> : vector<8x8x8xf32>
    %31 = tpu.matmul %30, %18, %cst_11 {dimension_numbers = #tpu.dot_dimension_numbers<[2], [1], [1], [2], [0, 0, 0, 1, 1, 2], [0], [0]>} : vector<8x8x8xbf16>, vector<8x8x8xbf16>, vector<8x8x8xf32> -> vector<8x8x8xf32>
    "tpu.trace_stop"() : () -> ()
    %32 = vector.shape_cast %31 : vector<8x8x8xf32> to vector<64x8xf32>
    %33 = vector.extract_strided_slice %9 {offsets = [0, 8], sizes = [64, 8], strides = [1, 1]} : vector<64x96xf32> to vector<64x8xf32>
    %34 = vector.shape_cast %33 : vector<64x8xf32> to vector<8x8x8xf32>
    %35 = arith.truncf %34 : vector<8x8x8xf32> to vector<8x8x8xbf16>
    %36 = vector.extract_strided_slice %9 {offsets = [0, 40], sizes = [64, 8], strides = [1, 1]} : vector<64x96xf32> to vector<64x8xf32>
    %37 = vector.shape_cast %36 : vector<64x8xf32> to vector<8x8x8xf32>
    %38 = arith.truncf %37 : vector<8x8x8xf32> to vector<8x8x8xbf16>
    %39 = vector.extract_strided_slice %9 {offsets = [0, 72], sizes = [64, 8], strides = [1, 1]} : vector<64x96xf32> to vector<64x8xf32>
    %40 = vector.shape_cast %39 : vector<64x8xf32> to vector<8x8x8xf32>
    %41 = arith.truncf %40 : vector<8x8x8xf32> to vector<8x8x8xbf16>
    "tpu.trace_start"() <{level = 10 : i32, message = "nsd,ntd->nst"}> : () -> ()
    %cst_12 = arith.constant dense<0.000000e+00> : vector<8x8x8xf32>
    %42 = tpu.matmul %35, %38, %cst_12 {dimension_numbers = #tpu.dot_dimension_numbers<[2], [2], [1], [1], [0, 0, 0, 1, 1, 1], [0], [0]>} : vector<8x8x8xbf16>, vector<8x8x8xbf16>, vector<8x8x8xf32> -> vector<8x8x8xf32>
    "tpu.trace_stop"() : () -> ()
    %cst_13 = arith.constant dense<0xFF800000> : vector<8x8xf32>
    %43 = vector.multi_reduction <maximumf>, %42, %cst_13 [2] : vector<8x8x8xf32> to vector<8x8xf32>
    %44 = vector.shape_cast %43 : vector<8x8xf32> to vector<8x8x1xf32>
    %45 = vector.broadcast %44 : vector<8x8x1xf32> to vector<8x8x8xf32>
    %46 = arith.subf %42, %45 : vector<8x8x8xf32>
    %47 = math.exp %46 : vector<8x8x8xf32>
    %cst_14 = arith.constant dense<0.000000e+00> : vector<8x8xf32>
    %48 = vector.multi_reduction <add>, %47, %cst_14 [2] : vector<8x8x8xf32> to vector<8x8xf32>
    %49 = vector.shape_cast %48 : vector<8x8xf32> to vector<8x8x1xf32>
    %50 = tpu.reciprocal %49 {approx = true} : vector<8x8x1xf32> -> vector<8x8x1xf32>
    %51 = vector.broadcast %50 : vector<8x8x1xf32> to vector<8x8x8xf32>
    %52 = arith.mulf %47, %51 : vector<8x8x8xf32>
    %53 = arith.truncf %52 : vector<8x8x8xf32> to vector<8x8x8xbf16>
    "tpu.trace_start"() <{level = 10 : i32, message = "nst,ntd->nsd"}> : () -> ()
    %cst_15 = arith.constant dense<0.000000e+00> : vector<8x8x8xf32>
    %54 = tpu.matmul %53, %41, %cst_15 {dimension_numbers = #tpu.dot_dimension_numbers<[2], [1], [1], [2], [0, 0, 0, 1, 1, 2], [0], [0]>} : vector<8x8x8xbf16>, vector<8x8x8xbf16>, vector<8x8x8xf32> -> vector<8x8x8xf32>
    "tpu.trace_stop"() : () -> ()
    %55 = vector.shape_cast %54 : vector<8x8x8xf32> to vector<64x8xf32>
    %56 = vector.extract_strided_slice %9 {offsets = [0, 16], sizes = [64, 8], strides = [1, 1]} : vector<64x96xf32> to vector<64x8xf32>
    %57 = vector.shape_cast %56 : vector<64x8xf32> to vector<8x8x8xf32>
    %58 = arith.truncf %57 : vector<8x8x8xf32> to vector<8x8x8xbf16>
    %59 = vector.extract_strided_slice %9 {offsets = [0, 48], sizes = [64, 8], strides = [1, 1]} : vector<64x96xf32> to vector<64x8xf32>
    %60 = vector.shape_cast %59 : vector<64x8xf32> to vector<8x8x8xf32>
    %61 = arith.truncf %60 : vector<8x8x8xf32> to vector<8x8x8xbf16>
    %62 = vector.extract_strided_slice %9 {offsets = [0, 80], sizes = [64, 8], strides = [1, 1]} : vector<64x96xf32> to vector<64x8xf32>
    %63 = vector.shape_cast %62 : vector<64x8xf32> to vector<8x8x8xf32>
    %64 = arith.truncf %63 : vector<8x8x8xf32> to vector<8x8x8xbf16>
    "tpu.trace_start"() <{level = 10 : i32, message = "nsd,ntd->nst"}> : () -> ()
    %cst_16 = arith.constant dense<0.000000e+00> : vector<8x8x8xf32>
    %65 = tpu.matmul %58, %61, %cst_16 {dimension_numbers = #tpu.dot_dimension_numbers<[2], [2], [1], [1], [0, 0, 0, 1, 1, 1], [0], [0]>} : vector<8x8x8xbf16>, vector<8x8x8xbf16>, vector<8x8x8xf32> -> vector<8x8x8xf32>
    "tpu.trace_stop"() : () -> ()
    %cst_17 = arith.constant dense<0xFF800000> : vector<8x8xf32>
    %66 = vector.multi_reduction <maximumf>, %65, %cst_17 [2] : vector<8x8x8xf32> to vector<8x8xf32>
    %67 = vector.shape_cast %66 : vector<8x8xf32> to vector<8x8x1xf32>
    %68 = vector.broadcast %67 : vector<8x8x1xf32> to vector<8x8x8xf32>
    %69 = arith.subf %65, %68 : vector<8x8x8xf32>
    %70 = math.exp %69 : vector<8x8x8xf32>
    %cst_18 = arith.constant dense<0.000000e+00> : vector<8x8xf32>
    %71 = vector.multi_reduction <add>, %70, %cst_18 [2] : vector<8x8x8xf32> to vector<8x8xf32>
    %72 = vector.shape_cast %71 : vector<8x8xf32> to vector<8x8x1xf32>
    %73 = tpu.reciprocal %72 {approx = true} : vector<8x8x1xf32> -> vector<8x8x1xf32>
    %74 = vector.broadcast %73 : vector<8x8x1xf32> to vector<8x8x8xf32>
    %75 = arith.mulf %70, %74 : vector<8x8x8xf32>
    %76 = arith.truncf %75 : vector<8x8x8xf32> to vector<8x8x8xbf16>
    "tpu.trace_start"() <{level = 10 : i32, message = "nst,ntd->nsd"}> : () -> ()
    %cst_19 = arith.constant dense<0.000000e+00> : vector<8x8x8xf32>
    %77 = tpu.matmul %76, %64, %cst_19 {dimension_numbers = #tpu.dot_dimension_numbers<[2], [1], [1], [2], [0, 0, 0, 1, 1, 2], [0], [0]>} : vector<8x8x8xbf16>, vector<8x8x8xbf16>, vector<8x8x8xf32> -> vector<8x8x8xf32>
    "tpu.trace_stop"() : () -> ()
    %78 = vector.shape_cast %77 : vector<8x8x8xf32> to vector<64x8xf32>
    %79 = vector.extract_strided_slice %9 {offsets = [0, 24], sizes = [64, 8], strides = [1, 1]} : vector<64x96xf32> to vector<64x8xf32>
    %80 = vector.shape_cast %79 : vector<64x8xf32> to vector<8x8x8xf32>
    %81 = arith.truncf %80 : vector<8x8x8xf32> to vector<8x8x8xbf16>
    %82 = vector.extract_strided_slice %9 {offsets = [0, 56], sizes = [64, 8], strides = [1, 1]} : vector<64x96xf32> to vector<64x8xf32>
    %83 = vector.shape_cast %82 : vector<64x8xf32> to vector<8x8x8xf32>
    %84 = arith.truncf %83 : vector<8x8x8xf32> to vector<8x8x8xbf16>
    %85 = vector.extract_strided_slice %9 {offsets = [0, 88], sizes = [64, 8], strides = [1, 1]} : vector<64x96xf32> to vector<64x8xf32>
    %86 = vector.shape_cast %85 : vector<64x8xf32> to vector<8x8x8xf32>
    %87 = arith.truncf %86 : vector<8x8x8xf32> to vector<8x8x8xbf16>
    "tpu.trace_start"() <{level = 10 : i32, message = "nsd,ntd->nst"}> : () -> ()
    %cst_20 = arith.constant dense<0.000000e+00> : vector<8x8x8xf32>
    %88 = tpu.matmul %81, %84, %cst_20 {dimension_numbers = #tpu.dot_dimension_numbers<[2], [2], [1], [1], [0, 0, 0, 1, 1, 1], [0], [0]>} : vector<8x8x8xbf16>, vector<8x8x8xbf16>, vector<8x8x8xf32> -> vector<8x8x8xf32>
    "tpu.trace_stop"() : () -> ()
    %cst_21 = arith.constant dense<0xFF800000> : vector<8x8xf32>
    %89 = vector.multi_reduction <maximumf>, %88, %cst_21 [2] : vector<8x8x8xf32> to vector<8x8xf32>
    %90 = vector.shape_cast %89 : vector<8x8xf32> to vector<8x8x1xf32>
    %91 = vector.broadcast %90 : vector<8x8x1xf32> to vector<8x8x8xf32>
    %92 = arith.subf %88, %91 : vector<8x8x8xf32>
    %93 = math.exp %92 : vector<8x8x8xf32>
    %cst_22 = arith.constant dense<0.000000e+00> : vector<8x8xf32>
    %94 = vector.multi_reduction <add>, %93, %cst_22 [2] : vector<8x8x8xf32> to vector<8x8xf32>
    %95 = vector.shape_cast %94 : vector<8x8xf32> to vector<8x8x1xf32>
    %96 = tpu.reciprocal %95 {approx = true} : vector<8x8x1xf32> -> vector<8x8x1xf32>
    %97 = vector.broadcast %96 : vector<8x8x1xf32> to vector<8x8x8xf32>
    %98 = arith.mulf %93, %97 : vector<8x8x8xf32>
    %99 = arith.truncf %98 : vector<8x8x8xf32> to vector<8x8x8xbf16>
    "tpu.trace_start"() <{level = 10 : i32, message = "nst,ntd->nsd"}> : () -> ()
    %cst_23 = arith.constant dense<0.000000e+00> : vector<8x8x8xf32>
    %100 = tpu.matmul %99, %87, %cst_23 {dimension_numbers = #tpu.dot_dimension_numbers<[2], [1], [1], [2], [0, 0, 0, 1, 1, 2], [0], [0]>} : vector<8x8x8xbf16>, vector<8x8x8xbf16>, vector<8x8x8xf32> -> vector<8x8x8xf32>
    "tpu.trace_stop"() : () -> ()
    %101 = vector.shape_cast %100 : vector<8x8x8xf32> to vector<64x8xf32>
    %102 = tpu.concatenate %32, %55, %78, %101 in 1 : vector<64x8xf32>, vector<64x8xf32>, vector<64x8xf32>, vector<64x8xf32> -> vector<64x32xf32>
    %103 = arith.truncf %102 : vector<64x32xf32> to vector<64x32xbf16>
    %c0_24 = arith.constant 0 : index
    %c0_25 = arith.constant 0 : index
    %c0_26 = arith.constant 0 : index
    %104 = vector.load %arg5[%c0_24, %c0_25, %c0_26] : memref<2x32x32xbf16, #tpu.memory_space<vmem>>, vector<1x32x32xbf16>
    %105 = vector.shape_cast %104 : vector<1x32x32xbf16> to vector<32x32xbf16>
    %cst_27 = arith.constant dense<0.000000e+00> : vector<64x32xf32>
    %106 = tpu.matmul %103, %105, %cst_27 {dimension_numbers = #tpu.dot_dimension_numbers<[1], [0], [0], [1], [0, 0, 1, 1], [], []>} : vector<64x32xbf16>, vector<32x32xbf16>, vector<64x32xf32> -> vector<64x32xf32>
    %c0_28 = arith.constant 0 : index
    %c0_29 = arith.constant 0 : index
    %c0_30 = arith.constant 0 : index
    %107 = vector.load %arg6[%c0_28, %c0_29, %c0_30] : memref<2x1x32xf32, #tpu.memory_space<vmem>>, vector<1x1x32xf32>
    %108 = vector.shape_cast %107 : vector<1x1x32xf32> to vector<1x32xf32>
    %109 = vector.broadcast %108 : vector<1x32xf32> to vector<64x32xf32>
    %110 = arith.addf %106, %109 : vector<64x32xf32>
    %111 = arith.addf %1, %110 : vector<64x32xf32>
    %c0_31 = arith.constant 0 : index
    %c0_32 = arith.constant 0 : index
    %c0_33 = arith.constant 0 : index
    %112 = vector.load %arg7[%c0_31, %c0_32, %c0_33] : memref<2x1x32xf32, #tpu.memory_space<vmem>>, vector<1x1x32xf32>
    %113 = vector.shape_cast %112 : vector<1x1x32xf32> to vector<1x32xf32>
    %c0_34 = arith.constant 0 : index
    %c0_35 = arith.constant 0 : index
    %c0_36 = arith.constant 0 : index
    %114 = vector.load %arg8[%c0_34, %c0_35, %c0_36] : memref<2x1x32xf32, #tpu.memory_space<vmem>>, vector<1x1x32xf32>
    %115 = vector.shape_cast %114 : vector<1x1x32xf32> to vector<1x32xf32>
    %cst_37 = arith.constant dense<0.000000e+00> : vector<64xf32>
    %116 = vector.multi_reduction <add>, %111, %cst_37 [1] : vector<64x32xf32> to vector<64xf32>
    %117 = vector.shape_cast %116 : vector<64xf32> to vector<64x1xf32>
    %cst_38 = arith.constant 3.200000e+01 : f32
    %118 = vector.broadcast %cst_38 : f32 to vector<64x1xf32>
    %119 = arith.divf %117, %118 : vector<64x1xf32>
    %120 = vector.broadcast %119 : vector<64x1xf32> to vector<64x32xf32>
    %121 = arith.subf %111, %120 : vector<64x32xf32>
    %122 = arith.mulf %121, %121 : vector<64x32xf32>
    %cst_39 = arith.constant dense<0.000000e+00> : vector<64xf32>
    %123 = vector.multi_reduction <add>, %122, %cst_39 [1] : vector<64x32xf32> to vector<64xf32>
    %124 = vector.shape_cast %123 : vector<64xf32> to vector<64x1xf32>
    %cst_40 = arith.constant 3.200000e+01 : f32
    %125 = vector.broadcast %cst_40 : f32 to vector<64x1xf32>
    %126 = arith.divf %124, %125 : vector<64x1xf32>
    %127 = vector.broadcast %119 : vector<64x1xf32> to vector<64x32xf32>
    %128 = arith.subf %111, %127 : vector<64x32xf32>
    %cst_41 = arith.constant 9.99999974E-6 : f32
    %129 = vector.broadcast %cst_41 : f32 to vector<64x1xf32>
    %130 = arith.addf %126, %129 : vector<64x1xf32>
    %131 = math.rsqrt %130 : vector<64x1xf32>
    %132 = vector.broadcast %131 : vector<64x1xf32> to vector<64x32xf32>
    %133 = arith.mulf %128, %132 : vector<64x32xf32>
    %134 = vector.broadcast %113 : vector<1x32xf32> to vector<64x32xf32>
    %135 = arith.mulf %133, %134 : vector<64x32xf32>
    %136 = vector.broadcast %115 : vector<1x32xf32> to vector<64x32xf32>
    %137 = arith.addf %135, %136 : vector<64x32xf32>
    %138 = arith.truncf %137 : vector<64x32xf32> to vector<64x32xbf16>
    %cst_42 = arith.constant 0.000000e+00 : f32
    %139 = vector.broadcast %cst_42 : f32 to vector<64x32xf32>
    %c0_43 = arith.constant 0 : index
    %c0_44 = arith.constant 0 : index
    %c0_45 = arith.constant 0 : index
    %140 = vector.load %arg11[%c0_43, %c0_44, %c0_45] : memref<2x32x2048xbf16, #tpu.memory_space<vmem>>, vector<1x32x512xbf16>
    %141 = vector.shape_cast %140 : vector<1x32x512xbf16> to vector<32x512xbf16>
    %cst_46 = arith.constant dense<0.000000e+00> : vector<64x512xf32>
    %142 = tpu.matmul %138, %141, %cst_46 {dimension_numbers = #tpu.dot_dimension_numbers<[1], [0], [0], [1], [0, 0, 1, 1], [], []>} : vector<64x32xbf16>, vector<32x512xbf16>, vector<64x512xf32> -> vector<64x512xf32>
    %c0_47 = arith.constant 0 : index
    %c0_48 = arith.constant 0 : index
    %c0_49 = arith.constant 0 : index
    %143 = vector.load %arg12[%c0_47, %c0_48, %c0_49] : memref<2x1x2048xf32, #tpu.memory_space<vmem>>, vector<1x1x512xf32>
    %144 = vector.shape_cast %143 : vector<1x1x512xf32> to vector<1x512xf32>
    %145 = vector.broadcast %144 : vector<1x512xf32> to vector<64x512xf32>
    %146 = arith.addf %142, %145 : vector<64x512xf32>
    %cst_50 = arith.constant 0.000000e+00 : f32
    %147 = vector.broadcast %cst_50 : f32 to vector<64x512xf32>
    %148 = arith.maximumf %146, %147 : vector<64x512xf32>
    %149 = arith.truncf %148 : vector<64x512xf32> to vector<64x512xbf16>
    %c0_51 = arith.constant 0 : index
    %c0_52 = arith.constant 0 : index
    %c0_53 = arith.constant 0 : index
    %150 = vector.load %arg13[%c0_51, %c0_52, %c0_53] : memref<2x2048x32xbf16, #tpu.memory_space<vmem>>, vector<1x512x32xbf16>
    %151 = vector.shape_cast %150 : vector<1x512x32xbf16> to vector<512x32xbf16>
    %cst_54 = arith.constant dense<0.000000e+00> : vector<64x32xf32>
    %152 = tpu.matmul %149, %151, %cst_54 {dimension_numbers = #tpu.dot_dimension_numbers<[1], [0], [0], [1], [0, 0, 1, 1], [], []>} : vector<64x512xbf16>, vector<512x32xbf16>, vector<64x32xf32> -> vector<64x32xf32>
    %153 = arith.addf %139, %152 : vector<64x32xf32>
    %c0_55 = arith.constant 0 : index
    %c0_56 = arith.constant 0 : index
    %c512 = arith.constant 512 : index
    %154 = vector.load %arg11[%c0_55, %c0_56, %c512] : memref<2x32x2048xbf16, #tpu.memory_space<vmem>>, vector<1x32x512xbf16>
    %155 = vector.shape_cast %154 : vector<1x32x512xbf16> to vector<32x512xbf16>
    %cst_57 = arith.constant dense<0.000000e+00> : vector<64x512xf32>
    %156 = tpu.matmul %138, %155, %cst_57 {dimension_numbers = #tpu.dot_dimension_numbers<[1], [0], [0], [1], [0, 0, 1, 1], [], []>} : vector<64x32xbf16>, vector<32x512xbf16>, vector<64x512xf32> -> vector<64x512xf32>
    %c0_58 = arith.constant 0 : index
    %c0_59 = arith.constant 0 : index
    %c512_60 = arith.constant 512 : index
    %157 = vector.load %arg12[%c0_58, %c0_59, %c512_60] : memref<2x1x2048xf32, #tpu.memory_space<vmem>>, vector<1x1x512xf32>
    %158 = vector.shape_cast %157 : vector<1x1x512xf32> to vector<1x512xf32>
    %159 = vector.broadcast %158 : vector<1x512xf32> to vector<64x512xf32>
    %160 = arith.addf %156, %159 : vector<64x512xf32>
    %cst_61 = arith.constant 0.000000e+00 : f32
    %161 = vector.broadcast %cst_61 : f32 to vector<64x512xf32>
    %162 = arith.maximumf %160, %161 : vector<64x512xf32>
    %163 = arith.truncf %162 : vector<64x512xf32> to vector<64x512xbf16>
    %c0_62 = arith.constant 0 : index
    %c512_63 = arith.constant 512 : index
    %c0_64 = arith.constant 0 : index
    %164 = vector.load %arg13[%c0_62, %c512_63, %c0_64] : memref<2x2048x32xbf16, #tpu.memory_space<vmem>>, vector<1x512x32xbf16>
    %165 = vector.shape_cast %164 : vector<1x512x32xbf16> to vector<512x32xbf16>
    %cst_65 = arith.constant dense<0.000000e+00> : vector<64x32xf32>
    %166 = tpu.matmul %163, %165, %cst_65 {dimension_numbers = #tpu.dot_dimension_numbers<[1], [0], [0], [1], [0, 0, 1, 1], [], []>} : vector<64x512xbf16>, vector<512x32xbf16>, vector<64x32xf32> -> vector<64x32xf32>
    %167 = arith.addf %153, %166 : vector<64x32xf32>
    %c0_66 = arith.constant 0 : index
    %c0_67 = arith.constant 0 : index
    %c1024 = arith.constant 1024 : index
    %168 = vector.load %arg11[%c0_66, %c0_67, %c1024] : memref<2x32x2048xbf16, #tpu.memory_space<vmem>>, vector<1x32x512xbf16>
    %169 = vector.shape_cast %168 : vector<1x32x512xbf16> to vector<32x512xbf16>
    %cst_68 = arith.constant dense<0.000000e+00> : vector<64x512xf32>
    %170 = tpu.matmul %138, %169, %cst_68 {dimension_numbers = #tpu.dot_dimension_numbers<[1], [0], [0], [1], [0, 0, 1, 1], [], []>} : vector<64x32xbf16>, vector<32x512xbf16>, vector<64x512xf32> -> vector<64x512xf32>
    %c0_69 = arith.constant 0 : index
    %c0_70 = arith.constant 0 : index
    %c1024_71 = arith.constant 1024 : index
    %171 = vector.load %arg12[%c0_69, %c0_70, %c1024_71] : memref<2x1x2048xf32, #tpu.memory_space<vmem>>, vector<1x1x512xf32>
    %172 = vector.shape_cast %171 : vector<1x1x512xf32> to vector<1x512xf32>
    %173 = vector.broadcast %172 : vector<1x512xf32> to vector<64x512xf32>
    %174 = arith.addf %170, %173 : vector<64x512xf32>
    %cst_72 = arith.constant 0.000000e+00 : f32
    %175 = vector.broadcast %cst_72 : f32 to vector<64x512xf32>
    %176 = arith.maximumf %174, %175 : vector<64x512xf32>
    %177 = arith.truncf %176 : vector<64x512xf32> to vector<64x512xbf16>
    %c0_73 = arith.constant 0 : index
    %c1024_74 = arith.constant 1024 : index
    %c0_75 = arith.constant 0 : index
    %178 = vector.load %arg13[%c0_73, %c1024_74, %c0_75] : memref<2x2048x32xbf16, #tpu.memory_space<vmem>>, vector<1x512x32xbf16>
    %179 = vector.shape_cast %178 : vector<1x512x32xbf16> to vector<512x32xbf16>
    %cst_76 = arith.constant dense<0.000000e+00> : vector<64x32xf32>
    %180 = tpu.matmul %177, %179, %cst_76 {dimension_numbers = #tpu.dot_dimension_numbers<[1], [0], [0], [1], [0, 0, 1, 1], [], []>} : vector<64x512xbf16>, vector<512x32xbf16>, vector<64x32xf32> -> vector<64x32xf32>
    %181 = arith.addf %167, %180 : vector<64x32xf32>
    %c0_77 = arith.constant 0 : index
    %c0_78 = arith.constant 0 : index
    %c1536 = arith.constant 1536 : index
    %182 = vector.load %arg11[%c0_77, %c0_78, %c1536] : memref<2x32x2048xbf16, #tpu.memory_space<vmem>>, vector<1x32x512xbf16>
    %183 = vector.shape_cast %182 : vector<1x32x512xbf16> to vector<32x512xbf16>
    %cst_79 = arith.constant dense<0.000000e+00> : vector<64x512xf32>
    %184 = tpu.matmul %138, %183, %cst_79 {dimension_numbers = #tpu.dot_dimension_numbers<[1], [0], [0], [1], [0, 0, 1, 1], [], []>} : vector<64x32xbf16>, vector<32x512xbf16>, vector<64x512xf32> -> vector<64x512xf32>
    %c0_80 = arith.constant 0 : index
    %c0_81 = arith.constant 0 : index
    %c1536_82 = arith.constant 1536 : index
    %185 = vector.load %arg12[%c0_80, %c0_81, %c1536_82] : memref<2x1x2048xf32, #tpu.memory_space<vmem>>, vector<1x1x512xf32>
    %186 = vector.shape_cast %185 : vector<1x1x512xf32> to vector<1x512xf32>
    %187 = vector.broadcast %186 : vector<1x512xf32> to vector<64x512xf32>
    %188 = arith.addf %184, %187 : vector<64x512xf32>
    %cst_83 = arith.constant 0.000000e+00 : f32
    %189 = vector.broadcast %cst_83 : f32 to vector<64x512xf32>
    %190 = arith.maximumf %188, %189 : vector<64x512xf32>
    %191 = arith.truncf %190 : vector<64x512xf32> to vector<64x512xbf16>
    %c0_84 = arith.constant 0 : index
    %c1536_85 = arith.constant 1536 : index
    %c0_86 = arith.constant 0 : index
    %192 = vector.load %arg13[%c0_84, %c1536_85, %c0_86] : memref<2x2048x32xbf16, #tpu.memory_space<vmem>>, vector<1x512x32xbf16>
    %193 = vector.shape_cast %192 : vector<1x512x32xbf16> to vector<512x32xbf16>
    %cst_87 = arith.constant dense<0.000000e+00> : vector<64x32xf32>
    %194 = tpu.matmul %191, %193, %cst_87 {dimension_numbers = #tpu.dot_dimension_numbers<[1], [0], [0], [1], [0, 0, 1, 1], [], []>} : vector<64x512xbf16>, vector<512x32xbf16>, vector<64x32xf32> -> vector<64x32xf32>
    %195 = arith.addf %181, %194 : vector<64x32xf32>
    %c0_88 = arith.constant 0 : index
    %c0_89 = arith.constant 0 : index
    %c0_90 = arith.constant 0 : index
    %196 = vector.load %arg14[%c0_88, %c0_89, %c0_90] : memref<2x1x32xf32, #tpu.memory_space<vmem>>, vector<1x1x32xf32>
    %197 = vector.shape_cast %196 : vector<1x1x32xf32> to vector<1x32xf32>
    %198 = vector.broadcast %197 : vector<1x32xf32> to vector<64x32xf32>
    %199 = arith.addf %195, %198 : vector<64x32xf32>
    %200 = arith.addf %137, %199 : vector<64x32xf32>
    %c0_91 = arith.constant 0 : index
    %c0_92 = arith.constant 0 : index
    %c0_93 = arith.constant 0 : index
    %201 = vector.load %arg9[%c0_91, %c0_92, %c0_93] : memref<2x1x32xf32, #tpu.memory_space<vmem>>, vector<1x1x32xf32>
    %202 = vector.shape_cast %201 : vector<1x1x32xf32> to vector<1x32xf32>
    %c0_94 = arith.constant 0 : index
    %c0_95 = arith.constant 0 : index
    %c0_96 = arith.constant 0 : index
    %203 = vector.load %arg10[%c0_94, %c0_95, %c0_96] : memref<2x1x32xf32, #tpu.memory_space<vmem>>, vector<1x1x32xf32>
    %204 = vector.shape_cast %203 : vector<1x1x32xf32> to vector<1x32xf32>
    %cst_97 = arith.constant dense<0.000000e+00> : vector<64xf32>
    %205 = vector.multi_reduction <add>, %200, %cst_97 [1] : vector<64x32xf32> to vector<64xf32>
    %206 = vector.shape_cast %205 : vector<64xf32> to vector<64x1xf32>
    %cst_98 = arith.constant 3.200000e+01 : f32
    %207 = vector.broadcast %cst_98 : f32 to vector<64x1xf32>
    %208 = arith.divf %206, %207 : vector<64x1xf32>
    %209 = vector.broadcast %208 : vector<64x1xf32> to vector<64x32xf32>
    %210 = arith.subf %200, %209 : vector<64x32xf32>
    %211 = arith.mulf %210, %210 : vector<64x32xf32>
    %cst_99 = arith.constant dense<0.000000e+00> : vector<64xf32>
    %212 = vector.multi_reduction <add>, %211, %cst_99 [1] : vector<64x32xf32> to vector<64xf32>
    %213 = vector.shape_cast %212 : vector<64xf32> to vector<64x1xf32>
    %cst_100 = arith.constant 3.200000e+01 : f32
    %214 = vector.broadcast %cst_100 : f32 to vector<64x1xf32>
    %215 = arith.divf %213, %214 : vector<64x1xf32>
    %216 = vector.broadcast %208 : vector<64x1xf32> to vector<64x32xf32>
    %217 = arith.subf %200, %216 : vector<64x32xf32>
    %cst_101 = arith.constant 9.99999974E-6 : f32
    %218 = vector.broadcast %cst_101 : f32 to vector<64x1xf32>
    %219 = arith.addf %215, %218 : vector<64x1xf32>
    %220 = math.rsqrt %219 : vector<64x1xf32>
    %221 = vector.broadcast %220 : vector<64x1xf32> to vector<64x32xf32>
    %222 = arith.mulf %217, %221 : vector<64x32xf32>
    %223 = vector.broadcast %202 : vector<1x32xf32> to vector<64x32xf32>
    %224 = arith.mulf %222, %223 : vector<64x32xf32>
    %225 = vector.broadcast %204 : vector<1x32xf32> to vector<64x32xf32>
    %226 = arith.addf %224, %225 : vector<64x32xf32>
    %227 = arith.truncf %226 : vector<64x32xf32> to vector<64x32xbf16>
    %c1 = arith.constant 1 : index
    %c0_102 = arith.constant 0 : index
    %c0_103 = arith.constant 0 : index
    %228 = vector.load %arg3[%c1, %c0_102, %c0_103] : memref<2x32x96xbf16, #tpu.memory_space<vmem>>, vector<1x32x96xbf16>
    %229 = vector.shape_cast %228 : vector<1x32x96xbf16> to vector<32x96xbf16>
    %cst_104 = arith.constant dense<0.000000e+00> : vector<64x96xf32>
    %230 = tpu.matmul %227, %229, %cst_104 {dimension_numbers = #tpu.dot_dimension_numbers<[1], [0], [0], [1], [0, 0, 1, 1], [], []>} : vector<64x32xbf16>, vector<32x96xbf16>, vector<64x96xf32> -> vector<64x96xf32>
    %c1_105 = arith.constant 1 : index
    %c0_106 = arith.constant 0 : index
    %c0_107 = arith.constant 0 : index
    %231 = vector.load %arg4[%c1_105, %c0_106, %c0_107] : memref<2x1x96xf32, #tpu.memory_space<vmem>>, vector<1x1x96xf32>
    %232 = vector.shape_cast %231 : vector<1x1x96xf32> to vector<1x96xf32>
    %233 = vector.broadcast %232 : vector<1x96xf32> to vector<64x96xf32>
    %234 = arith.addf %230, %233 : vector<64x96xf32>
    %235 = vector.extract_strided_slice %234 {offsets = [0, 0], sizes = [64, 8], strides = [1, 1]} : vector<64x96xf32> to vector<64x8xf32>
    %236 = vector.shape_cast %235 : vector<64x8xf32> to vector<8x8x8xf32>
    %237 = arith.truncf %236 : vector<8x8x8xf32> to vector<8x8x8xbf16>
    %238 = vector.extract_strided_slice %234 {offsets = [0, 32], sizes = [64, 8], strides = [1, 1]} : vector<64x96xf32> to vector<64x8xf32>
    %239 = vector.shape_cast %238 : vector<64x8xf32> to vector<8x8x8xf32>
    %240 = arith.truncf %239 : vector<8x8x8xf32> to vector<8x8x8xbf16>
    %241 = vector.extract_strided_slice %234 {offsets = [0, 64], sizes = [64, 8], strides = [1, 1]} : vector<64x96xf32> to vector<64x8xf32>
    %242 = vector.shape_cast %241 : vector<64x8xf32> to vector<8x8x8xf32>
    %243 = arith.truncf %242 : vector<8x8x8xf32> to vector<8x8x8xbf16>
    "tpu.trace_start"() <{level = 10 : i32, message = "nsd,ntd->nst"}> : () -> ()
    %cst_108 = arith.constant dense<0.000000e+00> : vector<8x8x8xf32>
    %244 = tpu.matmul %237, %240, %cst_108 {dimension_numbers = #tpu.dot_dimension_numbers<[2], [2], [1], [1], [0, 0, 0, 1, 1, 1], [0], [0]>} : vector<8x8x8xbf16>, vector<8x8x8xbf16>, vector<8x8x8xf32> -> vector<8x8x8xf32>
    "tpu.trace_stop"() : () -> ()
    %cst_109 = arith.constant dense<0xFF800000> : vector<8x8xf32>
    %245 = vector.multi_reduction <maximumf>, %244, %cst_109 [2] : vector<8x8x8xf32> to vector<8x8xf32>
    %246 = vector.shape_cast %245 : vector<8x8xf32> to vector<8x8x1xf32>
    %247 = vector.broadcast %246 : vector<8x8x1xf32> to vector<8x8x8xf32>
    %248 = arith.subf %244, %247 : vector<8x8x8xf32>
    %249 = math.exp %248 : vector<8x8x8xf32>
    %cst_110 = arith.constant dense<0.000000e+00> : vector<8x8xf32>
    %250 = vector.multi_reduction <add>, %249, %cst_110 [2] : vector<8x8x8xf32> to vector<8x8xf32>
    %251 = vector.shape_cast %250 : vector<8x8xf32> to vector<8x8x1xf32>
    %252 = tpu.reciprocal %251 {approx = true} : vector<8x8x1xf32> -> vector<8x8x1xf32>
    %253 = vector.broadcast %252 : vector<8x8x1xf32> to vector<8x8x8xf32>
    %254 = arith.mulf %249, %253 : vector<8x8x8xf32>
    %255 = arith.truncf %254 : vector<8x8x8xf32> to vector<8x8x8xbf16>
    "tpu.trace_start"() <{level = 10 : i32, message = "nst,ntd->nsd"}> : () -> ()
    %cst_111 = arith.constant dense<0.000000e+00> : vector<8x8x8xf32>
    %256 = tpu.matmul %255, %243, %cst_111 {dimension_numbers = #tpu.dot_dimension_numbers<[2], [1], [1], [2], [0, 0, 0, 1, 1, 2], [0], [0]>} : vector<8x8x8xbf16>, vector<8x8x8xbf16>, vector<8x8x8xf32> -> vector<8x8x8xf32>
    "tpu.trace_stop"() : () -> ()
    %257 = vector.shape_cast %256 : vector<8x8x8xf32> to vector<64x8xf32>
    %258 = vector.extract_strided_slice %234 {offsets = [0, 8], sizes = [64, 8], strides = [1, 1]} : vector<64x96xf32> to vector<64x8xf32>
    %259 = vector.shape_cast %258 : vector<64x8xf32> to vector<8x8x8xf32>
    %260 = arith.truncf %259 : vector<8x8x8xf32> to vector<8x8x8xbf16>
    %261 = vector.extract_strided_slice %234 {offsets = [0, 40], sizes = [64, 8], strides = [1, 1]} : vector<64x96xf32> to vector<64x8xf32>
    %262 = vector.shape_cast %261 : vector<64x8xf32> to vector<8x8x8xf32>
    %263 = arith.truncf %262 : vector<8x8x8xf32> to vector<8x8x8xbf16>
    %264 = vector.extract_strided_slice %234 {offsets = [0, 72], sizes = [64, 8], strides = [1, 1]} : vector<64x96xf32> to vector<64x8xf32>
    %265 = vector.shape_cast %264 : vector<64x8xf32> to vector<8x8x8xf32>
    %266 = arith.truncf %265 : vector<8x8x8xf32> to vector<8x8x8xbf16>
    "tpu.trace_start"() <{level = 10 : i32, message = "nsd,ntd->nst"}> : () -> ()
    %cst_112 = arith.constant dense<0.000000e+00> : vector<8x8x8xf32>
    %267 = tpu.matmul %260, %263, %cst_112 {dimension_numbers = #tpu.dot_dimension_numbers<[2], [2], [1], [1], [0, 0, 0, 1, 1, 1], [0], [0]>} : vector<8x8x8xbf16>, vector<8x8x8xbf16>, vector<8x8x8xf32> -> vector<8x8x8xf32>
    "tpu.trace_stop"() : () -> ()
    %cst_113 = arith.constant dense<0xFF800000> : vector<8x8xf32>
    %268 = vector.multi_reduction <maximumf>, %267, %cst_113 [2] : vector<8x8x8xf32> to vector<8x8xf32>
    %269 = vector.shape_cast %268 : vector<8x8xf32> to vector<8x8x1xf32>
    %270 = vector.broadcast %269 : vector<8x8x1xf32> to vector<8x8x8xf32>
    %271 = arith.subf %267, %270 : vector<8x8x8xf32>
    %272 = math.exp %271 : vector<8x8x8xf32>
    %cst_114 = arith.constant dense<0.000000e+00> : vector<8x8xf32>
    %273 = vector.multi_reduction <add>, %272, %cst_114 [2] : vector<8x8x8xf32> to vector<8x8xf32>
    %274 = vector.shape_cast %273 : vector<8x8xf32> to vector<8x8x1xf32>
    %275 = tpu.reciprocal %274 {approx = true} : vector<8x8x1xf32> -> vector<8x8x1xf32>
    %276 = vector.broadcast %275 : vector<8x8x1xf32> to vector<8x8x8xf32>
    %277 = arith.mulf %272, %276 : vector<8x8x8xf32>
    %278 = arith.truncf %277 : vector<8x8x8xf32> to vector<8x8x8xbf16>
    "tpu.trace_start"() <{level = 10 : i32, message = "nst,ntd->nsd"}> : () -> ()
    %cst_115 = arith.constant dense<0.000000e+00> : vector<8x8x8xf32>
    %279 = tpu.matmul %278, %266, %cst_115 {dimension_numbers = #tpu.dot_dimension_numbers<[2], [1], [1], [2], [0, 0, 0, 1, 1, 2], [0], [0]>} : vector<8x8x8xbf16>, vector<8x8x8xbf16>, vector<8x8x8xf32> -> vector<8x8x8xf32>
    "tpu.trace_stop"() : () -> ()
    %280 = vector.shape_cast %279 : vector<8x8x8xf32> to vector<64x8xf32>
    %281 = vector.extract_strided_slice %234 {offsets = [0, 16], sizes = [64, 8], strides = [1, 1]} : vector<64x96xf32> to vector<64x8xf32>
    %282 = vector.shape_cast %281 : vector<64x8xf32> to vector<8x8x8xf32>
    %283 = arith.truncf %282 : vector<8x8x8xf32> to vector<8x8x8xbf16>
    %284 = vector.extract_strided_slice %234 {offsets = [0, 48], sizes = [64, 8], strides = [1, 1]} : vector<64x96xf32> to vector<64x8xf32>
    %285 = vector.shape_cast %284 : vector<64x8xf32> to vector<8x8x8xf32>
    %286 = arith.truncf %285 : vector<8x8x8xf32> to vector<8x8x8xbf16>
    %287 = vector.extract_strided_slice %234 {offsets = [0, 80], sizes = [64, 8], strides = [1, 1]} : vector<64x96xf32> to vector<64x8xf32>
    %288 = vector.shape_cast %287 : vector<64x8xf32> to vector<8x8x8xf32>
    %289 = arith.truncf %288 : vector<8x8x8xf32> to vector<8x8x8xbf16>
    "tpu.trace_start"() <{level = 10 : i32, message = "nsd,ntd->nst"}> : () -> ()
    %cst_116 = arith.constant dense<0.000000e+00> : vector<8x8x8xf32>
    %290 = tpu.matmul %283, %286, %cst_116 {dimension_numbers = #tpu.dot_dimension_numbers<[2], [2], [1], [1], [0, 0, 0, 1, 1, 1], [0], [0]>} : vector<8x8x8xbf16>, vector<8x8x8xbf16>, vector<8x8x8xf32> -> vector<8x8x8xf32>
    "tpu.trace_stop"() : () -> ()
    %cst_117 = arith.constant dense<0xFF800000> : vector<8x8xf32>
    %291 = vector.multi_reduction <maximumf>, %290, %cst_117 [2] : vector<8x8x8xf32> to vector<8x8xf32>
    %292 = vector.shape_cast %291 : vector<8x8xf32> to vector<8x8x1xf32>
    %293 = vector.broadcast %292 : vector<8x8x1xf32> to vector<8x8x8xf32>
    %294 = arith.subf %290, %293 : vector<8x8x8xf32>
    %295 = math.exp %294 : vector<8x8x8xf32>
    %cst_118 = arith.constant dense<0.000000e+00> : vector<8x8xf32>
    %296 = vector.multi_reduction <add>, %295, %cst_118 [2] : vector<8x8x8xf32> to vector<8x8xf32>
    %297 = vector.shape_cast %296 : vector<8x8xf32> to vector<8x8x1xf32>
    %298 = tpu.reciprocal %297 {approx = true} : vector<8x8x1xf32> -> vector<8x8x1xf32>
    %299 = vector.broadcast %298 : vector<8x8x1xf32> to vector<8x8x8xf32>
    %300 = arith.mulf %295, %299 : vector<8x8x8xf32>
    %301 = arith.truncf %300 : vector<8x8x8xf32> to vector<8x8x8xbf16>
    "tpu.trace_start"() <{level = 10 : i32, message = "nst,ntd->nsd"}> : () -> ()
    %cst_119 = arith.constant dense<0.000000e+00> : vector<8x8x8xf32>
    %302 = tpu.matmul %301, %289, %cst_119 {dimension_numbers = #tpu.dot_dimension_numbers<[2], [1], [1], [2], [0, 0, 0, 1, 1, 2], [0], [0]>} : vector<8x8x8xbf16>, vector<8x8x8xbf16>, vector<8x8x8xf32> -> vector<8x8x8xf32>
    "tpu.trace_stop"() : () -> ()
    %303 = vector.shape_cast %302 : vector<8x8x8xf32> to vector<64x8xf32>
    %304 = vector.extract_strided_slice %234 {offsets = [0, 24], sizes = [64, 8], strides = [1, 1]} : vector<64x96xf32> to vector<64x8xf32>
    %305 = vector.shape_cast %304 : vector<64x8xf32> to vector<8x8x8xf32>
    %306 = arith.truncf %305 : vector<8x8x8xf32> to vector<8x8x8xbf16>
    %307 = vector.extract_strided_slice %234 {offsets = [0, 56], sizes = [64, 8], strides = [1, 1]} : vector<64x96xf32> to vector<64x8xf32>
    %308 = vector.shape_cast %307 : vector<64x8xf32> to vector<8x8x8xf32>
    %309 = arith.truncf %308 : vector<8x8x8xf32> to vector<8x8x8xbf16>
    %310 = vector.extract_strided_slice %234 {offsets = [0, 88], sizes = [64, 8], strides = [1, 1]} : vector<64x96xf32> to vector<64x8xf32>
    %311 = vector.shape_cast %310 : vector<64x8xf32> to vector<8x8x8xf32>
    %312 = arith.truncf %311 : vector<8x8x8xf32> to vector<8x8x8xbf16>
    "tpu.trace_start"() <{level = 10 : i32, message = "nsd,ntd->nst"}> : () -> ()
    %cst_120 = arith.constant dense<0.000000e+00> : vector<8x8x8xf32>
    %313 = tpu.matmul %306, %309, %cst_120 {dimension_numbers = #tpu.dot_dimension_numbers<[2], [2], [1], [1], [0, 0, 0, 1, 1, 1], [0], [0]>} : vector<8x8x8xbf16>, vector<8x8x8xbf16>, vector<8x8x8xf32> -> vector<8x8x8xf32>
    "tpu.trace_stop"() : () -> ()
    %cst_121 = arith.constant dense<0xFF800000> : vector<8x8xf32>
    %314 = vector.multi_reduction <maximumf>, %313, %cst_121 [2] : vector<8x8x8xf32> to vector<8x8xf32>
    %315 = vector.shape_cast %314 : vector<8x8xf32> to vector<8x8x1xf32>
    %316 = vector.broadcast %315 : vector<8x8x1xf32> to vector<8x8x8xf32>
    %317 = arith.subf %313, %316 : vector<8x8x8xf32>
    %318 = math.exp %317 : vector<8x8x8xf32>
    %cst_122 = arith.constant dense<0.000000e+00> : vector<8x8xf32>
    %319 = vector.multi_reduction <add>, %318, %cst_122 [2] : vector<8x8x8xf32> to vector<8x8xf32>
    %320 = vector.shape_cast %319 : vector<8x8xf32> to vector<8x8x1xf32>
    %321 = tpu.reciprocal %320 {approx = true} : vector<8x8x1xf32> -> vector<8x8x1xf32>
    %322 = vector.broadcast %321 : vector<8x8x1xf32> to vector<8x8x8xf32>
    %323 = arith.mulf %318, %322 : vector<8x8x8xf32>
    %324 = arith.truncf %323 : vector<8x8x8xf32> to vector<8x8x8xbf16>
    "tpu.trace_start"() <{level = 10 : i32, message = "nst,ntd->nsd"}> : () -> ()
    %cst_123 = arith.constant dense<0.000000e+00> : vector<8x8x8xf32>
    %325 = tpu.matmul %324, %312, %cst_123 {dimension_numbers = #tpu.dot_dimension_numbers<[2], [1], [1], [2], [0, 0, 0, 1, 1, 2], [0], [0]>} : vector<8x8x8xbf16>, vector<8x8x8xbf16>, vector<8x8x8xf32> -> vector<8x8x8xf32>
    "tpu.trace_stop"() : () -> ()
    %326 = vector.shape_cast %325 : vector<8x8x8xf32> to vector<64x8xf32>
    %327 = tpu.concatenate %257, %280, %303, %326 in 1 : vector<64x8xf32>, vector<64x8xf32>, vector<64x8xf32>, vector<64x8xf32> -> vector<64x32xf32>
    %328 = arith.truncf %327 : vector<64x32xf32> to vector<64x32xbf16>
    %c1_124 = arith.constant 1 : index
    %c0_125 = arith.constant 0 : index
    %c0_126 = arith.constant 0 : index
    %329 = vector.load %arg5[%c1_124, %c0_125, %c0_126] : memref<2x32x32xbf16, #tpu.memory_space<vmem>>, vector<1x32x32xbf16>
    %330 = vector.shape_cast %329 : vector<1x32x32xbf16> to vector<32x32xbf16>
    %cst_127 = arith.constant dense<0.000000e+00> : vector<64x32xf32>
    %331 = tpu.matmul %328, %330, %cst_127 {dimension_numbers = #tpu.dot_dimension_numbers<[1], [0], [0], [1], [0, 0, 1, 1], [], []>} : vector<64x32xbf16>, vector<32x32xbf16>, vector<64x32xf32> -> vector<64x32xf32>
    %c1_128 = arith.constant 1 : index
    %c0_129 = arith.constant 0 : index
    %c0_130 = arith.constant 0 : index
    %332 = vector.load %arg6[%c1_128, %c0_129, %c0_130] : memref<2x1x32xf32, #tpu.memory_space<vmem>>, vector<1x1x32xf32>
    %333 = vector.shape_cast %332 : vector<1x1x32xf32> to vector<1x32xf32>
    %334 = vector.broadcast %333 : vector<1x32xf32> to vector<64x32xf32>
    %335 = arith.addf %331, %334 : vector<64x32xf32>
    %336 = arith.addf %226, %335 : vector<64x32xf32>
    %c1_131 = arith.constant 1 : index
    %c0_132 = arith.constant 0 : index
    %c0_133 = arith.constant 0 : index
    %337 = vector.load %arg7[%c1_131, %c0_132, %c0_133] : memref<2x1x32xf32, #tpu.memory_space<vmem>>, vector<1x1x32xf32>
    %338 = vector.shape_cast %337 : vector<1x1x32xf32> to vector<1x32xf32>
    %c1_134 = arith.constant 1 : index
    %c0_135 = arith.constant 0 : index
    %c0_136 = arith.constant 0 : index
    %339 = vector.load %arg8[%c1_134, %c0_135, %c0_136] : memref<2x1x32xf32, #tpu.memory_space<vmem>>, vector<1x1x32xf32>
    %340 = vector.shape_cast %339 : vector<1x1x32xf32> to vector<1x32xf32>
    %cst_137 = arith.constant dense<0.000000e+00> : vector<64xf32>
    %341 = vector.multi_reduction <add>, %336, %cst_137 [1] : vector<64x32xf32> to vector<64xf32>
    %342 = vector.shape_cast %341 : vector<64xf32> to vector<64x1xf32>
    %cst_138 = arith.constant 3.200000e+01 : f32
    %343 = vector.broadcast %cst_138 : f32 to vector<64x1xf32>
    %344 = arith.divf %342, %343 : vector<64x1xf32>
    %345 = vector.broadcast %344 : vector<64x1xf32> to vector<64x32xf32>
    %346 = arith.subf %336, %345 : vector<64x32xf32>
    %347 = arith.mulf %346, %346 : vector<64x32xf32>
    %cst_139 = arith.constant dense<0.000000e+00> : vector<64xf32>
    %348 = vector.multi_reduction <add>, %347, %cst_139 [1] : vector<64x32xf32> to vector<64xf32>
    %349 = vector.shape_cast %348 : vector<64xf32> to vector<64x1xf32>
    %cst_140 = arith.constant 3.200000e+01 : f32
    %350 = vector.broadcast %cst_140 : f32 to vector<64x1xf32>
    %351 = arith.divf %349, %350 : vector<64x1xf32>
    %352 = vector.broadcast %344 : vector<64x1xf32> to vector<64x32xf32>
    %353 = arith.subf %336, %352 : vector<64x32xf32>
    %cst_141 = arith.constant 9.99999974E-6 : f32
    %354 = vector.broadcast %cst_141 : f32 to vector<64x1xf32>
    %355 = arith.addf %351, %354 : vector<64x1xf32>
    %356 = math.rsqrt %355 : vector<64x1xf32>
    %357 = vector.broadcast %356 : vector<64x1xf32> to vector<64x32xf32>
    %358 = arith.mulf %353, %357 : vector<64x32xf32>
    %359 = vector.broadcast %338 : vector<1x32xf32> to vector<64x32xf32>
    %360 = arith.mulf %358, %359 : vector<64x32xf32>
    %361 = vector.broadcast %340 : vector<1x32xf32> to vector<64x32xf32>
    %362 = arith.addf %360, %361 : vector<64x32xf32>
    %363 = arith.truncf %362 : vector<64x32xf32> to vector<64x32xbf16>
    %cst_142 = arith.constant 0.000000e+00 : f32
    %364 = vector.broadcast %cst_142 : f32 to vector<64x32xf32>
    %c1_143 = arith.constant 1 : index
    %c0_144 = arith.constant 0 : index
    %c0_145 = arith.constant 0 : index
    %365 = vector.load %arg11[%c1_143, %c0_144, %c0_145] : memref<2x32x2048xbf16, #tpu.memory_space<vmem>>, vector<1x32x512xbf16>
    %366 = vector.shape_cast %365 : vector<1x32x512xbf16> to vector<32x512xbf16>
    %cst_146 = arith.constant dense<0.000000e+00> : vector<64x512xf32>
    %367 = tpu.matmul %363, %366, %cst_146 {dimension_numbers = #tpu.dot_dimension_numbers<[1], [0], [0], [1], [0, 0, 1, 1], [], []>} : vector<64x32xbf16>, vector<32x512xbf16>, vector<64x512xf32> -> vector<64x512xf32>
    %c1_147 = arith.constant 1 : index
    %c0_148 = arith.constant 0 : index
    %c0_149 = arith.constant 0 : index
    %368 = vector.load %arg12[%c1_147, %c0_148, %c0_149] : memref<2x1x2048xf32, #tpu.memory_space<vmem>>, vector<1x1x512xf32>
    %369 = vector.shape_cast %368 : vector<1x1x512xf32> to vector<1x512xf32>
    %370 = vector.broadcast %369 : vector<1x512xf32> to vector<64x512xf32>
    %371 = arith.addf %367, %370 : vector<64x512xf32>
    %cst_150 = arith.constant 0.000000e+00 : f32
    %372 = vector.broadcast %cst_150 : f32 to vector<64x512xf32>
    %373 = arith.maximumf %371, %372 : vector<64x512xf32>
    %374 = arith.truncf %373 : vector<64x512xf32> to vector<64x512xbf16>
    %c1_151 = arith.constant 1 : index
    %c0_152 = arith.constant 0 : index
    %c0_153 = arith.constant 0 : index
    %375 = vector.load %arg13[%c1_151, %c0_152, %c0_153] : memref<2x2048x32xbf16, #tpu.memory_space<vmem>>, vector<1x512x32xbf16>
    %376 = vector.shape_cast %375 : vector<1x512x32xbf16> to vector<512x32xbf16>
    %cst_154 = arith.constant dense<0.000000e+00> : vector<64x32xf32>
    %377 = tpu.matmul %374, %376, %cst_154 {dimension_numbers = #tpu.dot_dimension_numbers<[1], [0], [0], [1], [0, 0, 1, 1], [], []>} : vector<64x512xbf16>, vector<512x32xbf16>, vector<64x32xf32> -> vector<64x32xf32>
    %378 = arith.addf %364, %377 : vector<64x32xf32>
    %c1_155 = arith.constant 1 : index
    %c0_156 = arith.constant 0 : index
    %c512_157 = arith.constant 512 : index
    %379 = vector.load %arg11[%c1_155, %c0_156, %c512_157] : memref<2x32x2048xbf16, #tpu.memory_space<vmem>>, vector<1x32x512xbf16>
    %380 = vector.shape_cast %379 : vector<1x32x512xbf16> to vector<32x512xbf16>
    %cst_158 = arith.constant dense<0.000000e+00> : vector<64x512xf32>
    %381 = tpu.matmul %363, %380, %cst_158 {dimension_numbers = #tpu.dot_dimension_numbers<[1], [0], [0], [1], [0, 0, 1, 1], [], []>} : vector<64x32xbf16>, vector<32x512xbf16>, vector<64x512xf32> -> vector<64x512xf32>
    %c1_159 = arith.constant 1 : index
    %c0_160 = arith.constant 0 : index
    %c512_161 = arith.constant 512 : index
    %382 = vector.load %arg12[%c1_159, %c0_160, %c512_161] : memref<2x1x2048xf32, #tpu.memory_space<vmem>>, vector<1x1x512xf32>
    %383 = vector.shape_cast %382 : vector<1x1x512xf32> to vector<1x512xf32>
    %384 = vector.broadcast %383 : vector<1x512xf32> to vector<64x512xf32>
    %385 = arith.addf %381, %384 : vector<64x512xf32>
    %cst_162 = arith.constant 0.000000e+00 : f32
    %386 = vector.broadcast %cst_162 : f32 to vector<64x512xf32>
    %387 = arith.maximumf %385, %386 : vector<64x512xf32>
    %388 = arith.truncf %387 : vector<64x512xf32> to vector<64x512xbf16>
    %c1_163 = arith.constant 1 : index
    %c512_164 = arith.constant 512 : index
    %c0_165 = arith.constant 0 : index
    %389 = vector.load %arg13[%c1_163, %c512_164, %c0_165] : memref<2x2048x32xbf16, #tpu.memory_space<vmem>>, vector<1x512x32xbf16>
    %390 = vector.shape_cast %389 : vector<1x512x32xbf16> to vector<512x32xbf16>
    %cst_166 = arith.constant dense<0.000000e+00> : vector<64x32xf32>
    %391 = tpu.matmul %388, %390, %cst_166 {dimension_numbers = #tpu.dot_dimension_numbers<[1], [0], [0], [1], [0, 0, 1, 1], [], []>} : vector<64x512xbf16>, vector<512x32xbf16>, vector<64x32xf32> -> vector<64x32xf32>
    %392 = arith.addf %378, %391 : vector<64x32xf32>
    %c1_167 = arith.constant 1 : index
    %c0_168 = arith.constant 0 : index
    %c1024_169 = arith.constant 1024 : index
    %393 = vector.load %arg11[%c1_167, %c0_168, %c1024_169] : memref<2x32x2048xbf16, #tpu.memory_space<vmem>>, vector<1x32x512xbf16>
    %394 = vector.shape_cast %393 : vector<1x32x512xbf16> to vector<32x512xbf16>
    %cst_170 = arith.constant dense<0.000000e+00> : vector<64x512xf32>
    %395 = tpu.matmul %363, %394, %cst_170 {dimension_numbers = #tpu.dot_dimension_numbers<[1], [0], [0], [1], [0, 0, 1, 1], [], []>} : vector<64x32xbf16>, vector<32x512xbf16>, vector<64x512xf32> -> vector<64x512xf32>
    %c1_171 = arith.constant 1 : index
    %c0_172 = arith.constant 0 : index
    %c1024_173 = arith.constant 1024 : index
    %396 = vector.load %arg12[%c1_171, %c0_172, %c1024_173] : memref<2x1x2048xf32, #tpu.memory_space<vmem>>, vector<1x1x512xf32>
    %397 = vector.shape_cast %396 : vector<1x1x512xf32> to vector<1x512xf32>
    %398 = vector.broadcast %397 : vector<1x512xf32> to vector<64x512xf32>
    %399 = arith.addf %395, %398 : vector<64x512xf32>
    %cst_174 = arith.constant 0.000000e+00 : f32
    %400 = vector.broadcast %cst_174 : f32 to vector<64x512xf32>
    %401 = arith.maximumf %399, %400 : vector<64x512xf32>
    %402 = arith.truncf %401 : vector<64x512xf32> to vector<64x512xbf16>
    %c1_175 = arith.constant 1 : index
    %c1024_176 = arith.constant 1024 : index
    %c0_177 = arith.constant 0 : index
    %403 = vector.load %arg13[%c1_175, %c1024_176, %c0_177] : memref<2x2048x32xbf16, #tpu.memory_space<vmem>>, vector<1x512x32xbf16>
    %404 = vector.shape_cast %403 : vector<1x512x32xbf16> to vector<512x32xbf16>
    %cst_178 = arith.constant dense<0.000000e+00> : vector<64x32xf32>
    %405 = tpu.matmul %402, %404, %cst_178 {dimension_numbers = #tpu.dot_dimension_numbers<[1], [0], [0], [1], [0, 0, 1, 1], [], []>} : vector<64x512xbf16>, vector<512x32xbf16>, vector<64x32xf32> -> vector<64x32xf32>
    %406 = arith.addf %392, %405 : vector<64x32xf32>
    %c1_179 = arith.constant 1 : index
    %c0_180 = arith.constant 0 : index
    %c1536_181 = arith.constant 1536 : index
    %407 = vector.load %arg11[%c1_179, %c0_180, %c1536_181] : memref<2x32x2048xbf16, #tpu.memory_space<vmem>>, vector<1x32x512xbf16>
    %408 = vector.shape_cast %407 : vector<1x32x512xbf16> to vector<32x512xbf16>
    %cst_182 = arith.constant dense<0.000000e+00> : vector<64x512xf32>
    %409 = tpu.matmul %363, %408, %cst_182 {dimension_numbers = #tpu.dot_dimension_numbers<[1], [0], [0], [1], [0, 0, 1, 1], [], []>} : vector<64x32xbf16>, vector<32x512xbf16>, vector<64x512xf32> -> vector<64x512xf32>
    %c1_183 = arith.constant 1 : index
    %c0_184 = arith.constant 0 : index
    %c1536_185 = arith.constant 1536 : index
    %410 = vector.load %arg12[%c1_183, %c0_184, %c1536_185] : memref<2x1x2048xf32, #tpu.memory_space<vmem>>, vector<1x1x512xf32>
    %411 = vector.shape_cast %410 : vector<1x1x512xf32> to vector<1x512xf32>
    %412 = vector.broadcast %411 : vector<1x512xf32> to vector<64x512xf32>
    %413 = arith.addf %409, %412 : vector<64x512xf32>
    %cst_186 = arith.constant 0.000000e+00 : f32
    %414 = vector.broadcast %cst_186 : f32 to vector<64x512xf32>
    %415 = arith.maximumf %413, %414 : vector<64x512xf32>
    %416 = arith.truncf %415 : vector<64x512xf32> to vector<64x512xbf16>
    %c1_187 = arith.constant 1 : index
    %c1536_188 = arith.constant 1536 : index
    %c0_189 = arith.constant 0 : index
    %417 = vector.load %arg13[%c1_187, %c1536_188, %c0_189] : memref<2x2048x32xbf16, #tpu.memory_space<vmem>>, vector<1x512x32xbf16>
    %418 = vector.shape_cast %417 : vector<1x512x32xbf16> to vector<512x32xbf16>
    %cst_190 = arith.constant dense<0.000000e+00> : vector<64x32xf32>
    %419 = tpu.matmul %416, %418, %cst_190 {dimension_numbers = #tpu.dot_dimension_numbers<[1], [0], [0], [1], [0, 0, 1, 1], [], []>} : vector<64x512xbf16>, vector<512x32xbf16>, vector<64x32xf32> -> vector<64x32xf32>
    %420 = arith.addf %406, %419 : vector<64x32xf32>
    %c1_191 = arith.constant 1 : index
    %c0_192 = arith.constant 0 : index
    %c0_193 = arith.constant 0 : index
    %421 = vector.load %arg14[%c1_191, %c0_192, %c0_193] : memref<2x1x32xf32, #tpu.memory_space<vmem>>, vector<1x1x32xf32>
    %422 = vector.shape_cast %421 : vector<1x1x32xf32> to vector<1x32xf32>
    %423 = vector.broadcast %422 : vector<1x32xf32> to vector<64x32xf32>
    %424 = arith.addf %420, %423 : vector<64x32xf32>
    %425 = arith.addf %362, %424 : vector<64x32xf32>
    %c1_194 = arith.constant 1 : index
    %c0_195 = arith.constant 0 : index
    %c0_196 = arith.constant 0 : index
    %426 = vector.load %arg9[%c1_194, %c0_195, %c0_196] : memref<2x1x32xf32, #tpu.memory_space<vmem>>, vector<1x1x32xf32>
    %427 = vector.shape_cast %426 : vector<1x1x32xf32> to vector<1x32xf32>
    %c1_197 = arith.constant 1 : index
    %c0_198 = arith.constant 0 : index
    %c0_199 = arith.constant 0 : index
    %428 = vector.load %arg10[%c1_197, %c0_198, %c0_199] : memref<2x1x32xf32, #tpu.memory_space<vmem>>, vector<1x1x32xf32>
    %429 = vector.shape_cast %428 : vector<1x1x32xf32> to vector<1x32xf32>
    %cst_200 = arith.constant dense<0.000000e+00> : vector<64xf32>
    %430 = vector.multi_reduction <add>, %425, %cst_200 [1] : vector<64x32xf32> to vector<64xf32>
    %431 = vector.shape_cast %430 : vector<64xf32> to vector<64x1xf32>
    %cst_201 = arith.constant 3.200000e+01 : f32
    %432 = vector.broadcast %cst_201 : f32 to vector<64x1xf32>
    %433 = arith.divf %431, %432 : vector<64x1xf32>
    %434 = vector.broadcast %433 : vector<64x1xf32> to vector<64x32xf32>
    %435 = arith.subf %425, %434 : vector<64x32xf32>
    %436 = arith.mulf %435, %435 : vector<64x32xf32>
    %cst_202 = arith.constant dense<0.000000e+00> : vector<64xf32>
    %437 = vector.multi_reduction <add>, %436, %cst_202 [1] : vector<64x32xf32> to vector<64xf32>
    %438 = vector.shape_cast %437 : vector<64xf32> to vector<64x1xf32>
    %cst_203 = arith.constant 3.200000e+01 : f32
    %439 = vector.broadcast %cst_203 : f32 to vector<64x1xf32>
    %440 = arith.divf %438, %439 : vector<64x1xf32>
    %441 = vector.broadcast %433 : vector<64x1xf32> to vector<64x32xf32>
    %442 = arith.subf %425, %441 : vector<64x32xf32>
    %cst_204 = arith.constant 9.99999974E-6 : f32
    %443 = vector.broadcast %cst_204 : f32 to vector<64x1xf32>
    %444 = arith.addf %440, %443 : vector<64x1xf32>
    %445 = math.rsqrt %444 : vector<64x1xf32>
    %446 = vector.broadcast %445 : vector<64x1xf32> to vector<64x32xf32>
    %447 = arith.mulf %442, %446 : vector<64x32xf32>
    %448 = vector.broadcast %427 : vector<1x32xf32> to vector<64x32xf32>
    %449 = arith.mulf %447, %448 : vector<64x32xf32>
    %450 = vector.broadcast %429 : vector<1x32xf32> to vector<64x32xf32>
    %451 = arith.addf %449, %450 : vector<64x32xf32>
    %452 = vector.shape_cast %451 : vector<64x32xf32> to vector<8x8x32xf32>
    %c0_205 = arith.constant 0 : index
    %c0_206 = arith.constant 0 : index
    %453 = vector.load %arg2[%c0_205, %c0_206] : memref<8x8xf32, #tpu.memory_space<vmem>>, vector<8x8xf32>
    %454 = vector.shape_cast %453 : vector<8x8xf32> to vector<8x8x1xf32>
    %455 = vector.broadcast %454 : vector<8x8x1xf32> to vector<8x8x32xf32>
    %456 = arith.mulf %452, %455 : vector<8x8x32xf32>
    %cst_207 = arith.constant dense<0.000000e+00> : vector<8x32xf32>
    %457 = vector.multi_reduction <add>, %456, %cst_207 [1] : vector<8x8x32xf32> to vector<8x32xf32>
    %cst_208 = arith.constant dense<0.000000e+00> : vector<8xf32>
    %458 = vector.multi_reduction <add>, %453, %cst_208 [1] : vector<8x8xf32> to vector<8xf32>
    %459 = vector.shape_cast %458 : vector<8xf32> to vector<8x1xf32>
    %cst_209 = arith.constant 9.99999971E-10 : f32
    %460 = vector.broadcast %cst_209 : f32 to vector<8x1xf32>
    %461 = arith.maximumf %459, %460 : vector<8x1xf32>
    %462 = vector.broadcast %461 : vector<8x1xf32> to vector<8x32xf32>
    %463 = arith.divf %457, %462 : vector<8x32xf32>
    %c0_210 = arith.constant 0 : index
    %c0_211 = arith.constant 0 : index
    %464 = vector.load %arg15[%c0_210, %c0_211] : memref<8x32xf32, #tpu.memory_space<vmem>>, vector<8x32xf32>
    tpu.vector_store %arg15[%c0_210, %c0_211], %463 {strides = array<i32>} : memref<8x32xf32, #tpu.memory_space<vmem>>, vector<8x32xf32>,
    return
  }
  func.func @transform_0(%arg0: i32) -> (i32, i32, i32) {
    %c0_i32 = arith.constant 0 : i32
    %c0_i32_0 = arith.constant 0 : i32
    %c0_i32_1 = arith.constant 0 : i32
    return %arg0, %c0_i32, %c0_i32_0 : i32, i32, i32
  }
  func.func @transform_1(%arg0: i32) -> (i32, i32) {
    %c0_i32 = arith.constant 0 : i32
    %c0_i32_0 = arith.constant 0 : i32
    return %arg0, %c0_i32 : i32, i32
  }
  func.func @transform_2(%arg0: i32) -> (i32, i32, i32) {
    %c0_i32 = arith.constant 0 : i32
    %c0_i32_0 = arith.constant 0 : i32
    %c0_i32_1 = arith.constant 0 : i32
    %c0_i32_2 = arith.constant 0 : i32
    return %c0_i32, %c0_i32_0, %c0_i32_1 : i32, i32, i32
  }
  func.func @transform_3(%arg0: i32) -> (i32, i32, i32) {
    %c0_i32 = arith.constant 0 : i32
    %c0_i32_0 = arith.constant 0 : i32
    %c0_i32_1 = arith.constant 0 : i32
    %c0_i32_2 = arith.constant 0 : i32
    return %c0_i32, %c0_i32_0, %c0_i32_1 : i32, i32, i32
  }
  func.func @transform_4(%arg0: i32) -> (i32, i32, i32) {
    %c0_i32 = arith.constant 0 : i32
    %c0_i32_0 = arith.constant 0 : i32
    %c0_i32_1 = arith.constant 0 : i32
    %c0_i32_2 = arith.constant 0 : i32
    return %c0_i32, %c0_i32_0, %c0_i32_1 : i32, i32, i32
  }
  func.func @transform_5(%arg0: i32) -> (i32, i32, i32) {
    %c0_i32 = arith.constant 0 : i32
    %c0_i32_0 = arith.constant 0 : i32
    %c0_i32_1 = arith.constant 0 : i32
    %c0_i32_2 = arith.constant 0 : i32
    return %c0_i32, %c0_i32_0, %c0_i32_1 : i32, i32, i32
  }
  func.func @transform_6(%arg0: i32) -> (i32, i32, i32) {
    %c0_i32 = arith.constant 0 : i32
    %c0_i32_0 = arith.constant 0 : i32
    %c0_i32_1 = arith.constant 0 : i32
    %c0_i32_2 = arith.constant 0 : i32
    return %c0_i32, %c0_i32_0, %c0_i32_1 : i32, i32, i32
  }
  func.func @transform_7(%arg0: i32) -> (i32, i32, i32) {
    %c0_i32 = arith.constant 0 : i32
    %c0_i32_0 = arith.constant 0 : i32
    %c0_i32_1 = arith.constant 0 : i32
    %c0_i32_2 = arith.constant 0 : i32
    return %c0_i32, %c0_i32_0, %c0_i32_1 : i32, i32, i32
  }
  func.func @transform_8(%arg0: i32) -> (i32, i32, i32) {
    %c0_i32 = arith.constant 0 : i32
    %c0_i32_0 = arith.constant 0 : i32
    %c0_i32_1 = arith.constant 0 : i32
    %c0_i32_2 = arith.constant 0 : i32
    return %c0_i32, %c0_i32_0, %c0_i32_1 : i32, i32, i32
  }
  func.func @transform_9(%arg0: i32) -> (i32, i32, i32) {
    %c0_i32 = arith.constant 0 : i32
    %c0_i32_0 = arith.constant 0 : i32
    %c0_i32_1 = arith.constant 0 : i32
    %c0_i32_2 = arith.constant 0 : i32
    return %c0_i32, %c0_i32_0, %c0_i32_1 : i32, i32, i32
  }
  func.func @transform_10(%arg0: i32) -> (i32, i32, i32) {
    %c0_i32 = arith.constant 0 : i32
    %c0_i32_0 = arith.constant 0 : i32
    %c0_i32_1 = arith.constant 0 : i32
    %c0_i32_2 = arith.constant 0 : i32
    return %c0_i32, %c0_i32_0, %c0_i32_1 : i32, i32, i32
  }
  func.func @transform_11(%arg0: i32) -> (i32, i32, i32) {
    %c0_i32 = arith.constant 0 : i32
    %c0_i32_0 = arith.constant 0 : i32
    %c0_i32_1 = arith.constant 0 : i32
    %c0_i32_2 = arith.constant 0 : i32
    return %c0_i32, %c0_i32_0, %c0_i32_1 : i32, i32, i32
  }
  func.func @transform_12(%arg0: i32) -> (i32, i32, i32) {
    %c0_i32 = arith.constant 0 : i32
    %c0_i32_0 = arith.constant 0 : i32
    %c0_i32_1 = arith.constant 0 : i32
    %c0_i32_2 = arith.constant 0 : i32
    return %c0_i32, %c0_i32_0, %c0_i32_1 : i32, i32, i32
  }
  func.func @transform_13(%arg0: i32) -> (i32, i32, i32) {
    %c0_i32 = arith.constant 0 : i32
    %c0_i32_0 = arith.constant 0 : i32
    %c0_i32_1 = arith.constant 0 : i32
    %c0_i32_2 = arith.constant 0 : i32
    return %c0_i32, %c0_i32_0, %c0_i32_1 : i32, i32, i32
  }
  func.func @transform_14(%arg0: i32) -> (i32, i32) {
    %c0_i32 = arith.constant 0 : i32
    %c0_i32_0 = arith.constant 0 : i32
    return %arg0, %c0_i32 : i32, i32
  }
}

</mosaic_0001>

<bundles_post_ra>
// kernel: tpu_custom_call.1
= control target key start
LH: loop header
LB: loop body
LE: loop exit
PB: predicated region body
PF: predicated region fallthrough
CT: control target
= control target key end

     0   :  { %s18433_s0 = inlined_call_operand.vmem [shape: f32[16,8,32], index: 0, kind: input, shape index: {}]   ;;  %s18434_s1 = inlined_call_operand.vmem [shape: f32[16,8], index: 1, kind: input, shape index: {}]   ;;  %s18435_s2 = inlined_call_operand.vmem [shape: bf16[2,32,96], index: 2, kind: input, shape index: {}]   ;;  %s18436_s3 = inlined_call_operand.vmem [shape: f32[2,1,96], index: 3, kind: input, shape index: {}]   ;;  %s18437_s4 = inlined_call_operand.vmem [shape: bf16[2,32,32], index: 4, kind: input, shape index: {}]   ;;  %s18438_s5 = inlined_call_operand.vmem [shape: f32[2,1,32], index: 5, kind: input, shape index: {}]   ;;  %s18439_s6 = inlined_call_operand.vmem [shape: f32[2,1,32], index: 6, kind: input, shape index: {}]   ;;  %s18440_s7 = inlined_call_operand.vmem [shape: f32[2,1,32], index: 7, kind: input, shape index: {}]   ;;  %s18441_s8 = inlined_call_operand.vmem [shape: f32[2,1,32], index: 8, kind: input, shape index: {}]   ;;  %s18442_s9 = inlined_call_operand.vmem [shape: f32[2,1,32], index: 9, kind: input, shape index: {}]   ;;  %s18443_s10 = inlined_call_operand.vmem [shape: bf16[2,32,2048], index: 10, kind: input, shape index: {}]   ;;  %s18444_s11 = inlined_call_operand.vmem [shape: f32[2,1,2048], index: 11, kind: input, shape index: {}]   ;;  %s18445_s12 = inlined_call_operand.vmem [shape: bf16[2,2048,32], index: 12, kind: input, shape index: {}]   ;;  %s18446_s13 = inlined_call_operand.vmem [shape: f32[2,1,32], index: 13, kind: input, shape index: {}]   ;;  %s18447_s14 = inlined_call_operand.hbm [shape: f32[16,32], index: 14, kind: output, shape index: {}]  }
   0x1   :  { %18491 = sst [smem:[#allocation33_spill]] %s18433_s0 }
   0x2   :  { %19 = vsyncpa [#allocation3], 0 }
   0x3   :  { %21 = vsyncpa [#allocation3 + $0x1], 0  ;;  %s13611_s29 = smov 0   ;;  %s13613_s30 = smov 0  }
   0x4   :  { %s13615_s15 = smov 0   ;;  %s13617_s16 = smov 0  }
   0x5 LB: > { %18492 = sst [smem:[#allocation5_spill]] %s13515_s15  ;;  %s13632_s17 = sadd.s32 4294967295, %s13519_s16   ;;  %s13519_s16 = sphi %s13617_s16, %s18623_s16   ;;  %s13515_s15 = sphi %s13615_s15, %s18625_s15   ;;  %s13511_s30 = sphi %s13613_s30, %s18627_s30   ;;  %s13507_s29 = sphi %s13611_s29, %s18626_s29  }
   0x6   : > { %s10685_s18 = sadd.s32 4294967294, %s13519_s16   ;;  %s13636_s19 = sadd.s32 1, %s13519_s16  }
   0x7   : > { %18493 = sst [smem:[#allocation6_spill]] %s13636_s19  ;;  %s338_s20 = sadd.s32 1, %s13515_s15 }
   0x8   : > { %s335_s21 = ssub.s32 %s13519_s16, %s13636_s19  ;;  %p348_p0 = scmp.ne.s32.totalorder %s13515_s15, %s13511_s30 }
   0x9   : > { %p336_p1 = scmp.eq.s32.totalorder %s335_s21, 0  ;;  %p349_p2 = scmp.eq.s32.totalorder %s13632_s17, 1 }
   0xa   : > { %p354_p3 = scmp.ne.s32.totalorder %s13511_s30, %s13507_s29  ;;  %p355_p4 = scmp.eq.s32.totalorder %s10685_s18, 1 }
   0xb   : > { %s13647_s22 = scalar_select %p336_p1, %s13515_s15, %s338_s20  }
   0xc   : > { %p13649_p5 = por %p349_p2, %p348_p0  ;;  %p13653_p6 = por %p355_p4, %p354_p3 }
   0xd   : > { %18494 = sst [smem:[#allocation7_spill]] %s13647_s22  ;;  %p10688_p7 = scmp.ge.s32.totalorder %s13519_s16, 1 }
   0xe   : > { %s18496_s24 = scalar_select %p13653_p6, 1, 0 }
   0xf   : > { %p425_p8 = scmp.lt.s32.totalorder %s13519_s16, 3 }
  0x10   : > { %18497 = sst [smem:[#allocation8_spill]] %s18496_s24 }
  0x11   : > { %p426_p9 = pnand %p10688_p7, %p425_p8 }
  0x13   : > { %429 = sbr.rel (%p426_p9) target bundleno = 7869 (0x1ebd), region = 76 }
  0x18   : > { %v12589_v0 = vld [vmem:[%s18435_s2 + $0x8] sm:$0xff]  ;;  %s13663_s27 = sshll.u32 %s13632_s17, 3  ;;  %v12588_v1 = vld [vmem:[%s18435_s2] sm:$0xff]  ;;  %s18498_s0 = sld [smem:[#allocation33_spill]]  ;;  %vm518_vm0 = vcmask 261120   ;;  %vm573_vm1 = vcmask 64512  }
  0x19   : > { %p476_p10 = scmp.lt.s32.totalorder %s13663_s27, 15  ;;  %537 = vmatpush.bf16.msra.mxu0 %v12589_v0  ;;  %12916 = vmatpush.bf16.msra.mxu2 %v12589_v0  ;;  %v13097_v14 = vld [vmem:[%s18436_s3] ss:$0 sm:$0xff]  ;;  %s18469_s26 = smov 96   ;;  %vm862_vm2 = vcmask 1043456   ;;  %vm2474_vm3 = vcmask 130048  }
  0x1a   : > { %s18467_s28 = smov 64   ;;  %s18451_s18 = smov 88   ;;  %vm2483_vm4 = vcmask 195584  }
  0x1b   : > { %s477_s20 = scalar_select %p476_p10, %s13663_s27, 15 }
  0x1c   : > { %s18463_s15 = smov 80   ;;  %s18459_s22 = smov 112  }
  0x1d   : > { %s10691_s21 = sshll.u32 %s477_s20, 3  ;;  %538 = vmatpush.bf16.msra.mxu0 %v12588_v1  ;;  %12917 = vmatpush.bf16.msra.mxu2 %v12588_v1  ;;  %s18465_s20 = smov 120  }
  0x1e   : > { %s13673_s25 = scalar_lea.vmem %s18498_s0, %s10691_s21  ;;  %s18449_s21 = smov 56  }
  0x1f   : > { %v486_v2 = vld [vmem:[%s13673_s25] sm:$0xff]  ;;  %v487_v3 = vld [vmem:[%s13673_s25 + $0x8] sm:$0xff]  ;;  %v492_v4 = vld [vmem:[%s13673_s25 + $0x30] sm:$0xff]  ;;  %s18551_s0 = smov 56   ;;  %s18552_s19 = smov 80  }
  0x20   : > { %v494_v5 = vpack.c.bf16 %v487_v3, %v486_v2  ;;  %v493_v6 = vld [vmem:[%s13673_s25 + $0x38] sm:$0xff]  ;;  %v488_v8 = vld [vmem:[%s13673_s25 + $0x10] sm:$0xff]  ;;  %v490_v11 = vld [vmem:[%s13673_s25 + $0x20] sm:$0xff]  ;;  %s18553_s24 = smov 112   ;;  %p481_p11 = scmp.lt.s32.totalorder %s13632_s17, 1 }
  0x21   : > { %v497_v7 = vpack.c.bf16 %v493_v6, %v492_v4  ;;  %v489_v9 = vld [vmem:[%s13673_s25 + $0x18] sm:$0xff]  ;;  %v491_v12 = vld [vmem:[%s13673_s25 + $0x28] sm:$0xff] }
  0x22   : > { %10701 = vmatmul.msk.bf16.vlgmr.msra.gmra.mxu0 %vm518_vm0, %v494_v5  ;;  %v495_v10 = vpack.c.bf16 %v489_v9, %v488_v8  ;;  %v496_v13 = vpack.c.bf16 %v491_v12, %v490_v11  ;;  %s18629_s17 = smov (!%p481_p11, %s13632_s17), 1 }
  0x23   : > { %10704 = vmatmul.msk.bf16.vlgmr.msra.gmra.mxu2 %vm518_vm0, %v497_v7 }
  0x32   : > { %10702 = vmatmul.msk.bf16.gmra.mxu0 %vm518_vm0, %v495_v10 }
  0x42   : > { %10703 = vmatmul.msk.bf16.gmra.mxu0 %vm518_vm0, %v496_v13 }
  0x9f   : > { %v540_v15 = vpop.f32.mrf.mxu0 }
  0xa0   : > { %v541_v16 = vadd.f32 %v13097_v14, %v540_v15 }
  0xa2   : > { %v13690_v17 = vpack.c.bf16 %v541_v16, %v541_v16 }
  0xa4   : > { %v569_v18 = vunpack.c.l.b16 %v13690_v17 }
  0xa6   : > { %v13693_v19 = vpack.c.b16 %v569_v18, %v569_v18  ;;  %v555_v20 = vpop.f32.mrf.mxu2 }
  0xa7   : > { %v542_v21 = vpop.f32.mrf.mxu0  ;;  %v556_v23 = vadd.f32 %v13097_v14, %v555_v20 }
  0xa8   : > { %v543_v22 = vadd.f32 %v13097_v14, %v542_v21  ;;  %571 = vrot.lane.b32.xlu0 %v13693_v19, %s18469_s26 }
  0xa9   : > { %v13700_v26 = vpack.c.bf16 %v556_v23, %v556_v23 }
  0xaa   : > { %v13697_v24 = vpack.c.bf16 %v543_v22, %v543_v22 }
  0xab   : > { %v714_v30 = vunpack.c.l.b16 %v13700_v26 }
  0xac   : > { %v594_v25 = vunpack.c.l.b16 %v13697_v24 }
  0xad   : > { %v13710_v33 = vpack.c.b16 %v714_v30, %v714_v30 }
  0xae   : > { %v13702_v27 = vpack.c.b16 %v594_v25, %v594_v25  ;;  %v557_v34 = vpop.f32.mrf.mxu2 }
  0xaf   : > { %v545_v28 = vpop.f32.mrf.mxu0  ;;  %v558_v38 = vadd.f32 %v13097_v14, %v557_v34 }
  0xb0   : > { %v546_v29 = vadd.f32 %v13097_v14, %v545_v28  ;;  %596 = vrot.lane.b32.xlu0 %v13702_v27, %s18469_s26 }
  0xb1   : > { %v13718_v41 = vpack.c.bf16 %v558_v38, %v558_v38 }
  0xb2   : > { %v13707_v31 = vpack.c.bf16 %v546_v29, %v546_v29 }
  0xb3   : > { %v738_v45 = vunpack.c.l.b16 %v13718_v41 }
  0xb4   : > { %v618_v32 = vunpack.c.l.b16 %v13707_v31 }
  0xb5   : > { %v13730_v48 = vpack.c.b16 %v738_v45, %v738_v45 }
  0xb6   : > { %v13712_v35 = vpack.c.b16 %v618_v32, %v618_v32 }
  0xb7   : > { %v547_v36 = vpop.f32.mrf.mxu0 }
  0xb8   : > { %v548_v37 = vadd.f32 %v13097_v14, %v547_v36  ;;  %620 = vrot.lane.b32.xlu1 %v13712_v35, %s18469_s26  ;;  %716 = vrot.lane.b32.xlu0 %v13710_v33, %s18469_s26 }
  0xba   : > { %v563_v39 = vpack.c.bf16 %v548_v37, %v548_v37 }
  0xbc   : > { %v642_v40 = vunpack.c.l.b16 %v563_v39 }
  0xbe   : > { %v13720_v42 = vpack.c.b16 %v642_v40, %v642_v40 }
  0xbf   : > { %v550_v43 = vpop.f32.mrf.mxu0 }
  0xc0   : > { %v551_v44 = vadd.f32 %v13097_v14, %v550_v43  ;;  %644 = vrot.lane.b32.xlu2 %v13720_v42, %s18469_s26  ;;  %900 = vrot.lane.b32.xlu0 %v13712_v35, %s18467_s28 }
  0xc2   : > { %v13727_v46 = vpack.c.bf16 %v551_v44, %v551_v44 }
  0xc4   : > { %v666_v47 = vunpack.c.l.b16 %v13727_v46 }
  0xc6   : > { %v13732_v49 = vpack.c.b16 %v666_v47, %v666_v47 }
  0xc7   : > { %v552_v50 = vpop.f32.mrf.mxu0 }
  0xc8   : > { %v553_v51 = vadd.f32 %v13097_v14, %v552_v50  ;;  %740 = vrot.lane.b32.xlu2 %v13730_v48, %s18469_s26  ;;  %668 = vrot.lane.b32.xlu1 %v13732_v49, %s18469_s26 }
  0xc9   : > { %1005 = vrot.lane.b32.xlu0 %v13730_v48, %s18467_s28 }
  0xca   : > { %v13740_v52 = vpack.c.bf16 %v553_v51, %v553_v51 }
  0xcc   : > { %v690_v53 = vunpack.c.l.b16 %v13740_v52 }
  0xce   : > { %v13743_v54 = vpack.c.b16 %v690_v53, %v690_v53 }
  0xd0   : > { %921 = vrot.lane.b32.xlu2 %v13720_v42, %s18467_s28  ;;  %692 = vrot.lane.b32.xlu1 %v13743_v54, %s18469_s26  ;;  %s18550_s26 = smov 88  }
  0xd1   : > { %1097 = vrot.lane.b32.xlu0 %v13720_v42, %s18451_s18 }
  0xd8   : > { %879 = vrot.lane.b32.xlu2 %v13702_v27, %s18467_s28  ;;  %857 = vrot.lane.b32.xlu1 %v13693_v19, %s18467_s28 }
  0xd9   : > { %1051 = vrot.lane.b32.xlu0 %v13702_v27, %s18451_s18 }
  0xe0   : > { %942 = vrot.lane.b32.xlu2 %v13732_v49, %s18467_s28  ;;  %984 = vrot.lane.b32.xlu1 %v13710_v33, %s18467_s28 }
  0xe1   : > { %963 = vrot.lane.b32.xlu0 %v13743_v54, %s18467_s28  ;;  %s18556_s28 = smov 104  }
  0xe8   : > { %1095 = vrot.lane.b32.xlu2 %v13720_v42, %s18465_s20  ;;  %1074 = vrot.lane.b32.xlu1 %v13712_v35, %s18451_s18 }
  0xf0   : > { %1028 = vrot.lane.b32.xlu1 %v13693_v19, %s18451_s18 }
  0xf8   : > { %1072 = vrot.lane.b32.xlu1 %v13712_v35, %s18465_s20 }
 0x11a   : > { %v645_v55 = vpop.permute.xlu2 %644  ;;  %v572_v56 = vpop.permute.xlu0 %571 }
 0x11b   : > { %v578_v57 = vsel %vm573_vm1, %v572_v56, 0  ;;  %v650_v58 = vsel %vm573_vm1, %v645_v55, 0 }
 0x11c   : > { %587 = vmatpush.bf16.xpose.msra.mxu3 %v578_v57  ;;  %659 = vmatpush.bf16.xpose.msra.mxu1 %v650_v58 }
 0x122   : > { %v741_v59 = vpop.permute.xlu2 %740  ;;  %v597_v60 = vpop.permute.xlu0 %596 }
 0x123   : > { %10705 = vmatmul.msk.bf16.vlgmr.msra.gmra.mxu3 %vm573_vm1, %v13690_v17  ;;  %10708 = vmatmul.msk.bf16.vlgmr.msra.gmra.mxu1 %vm573_vm1, %v563_v39  ;;  %v602_v61 = vsel %vm573_vm1, %v597_v60, 0  ;;  %v746_v11 = vsel %vm573_vm1, %v741_v59, 0 }
 0x124   : > { %611 = vmatpush.bf16.xpose.msrb.mxu2 %v602_v61 }
 0x12a   : > { %v922_v62 = vpop.permute.xlu2 %921  ;;  %v621_v63 = vpop.permute.xlu1 %620 }
 0x12b   : > { %v717_v0 = vpop.permute.xlu0 %716  ;;  %10706 = vmatmul.msk.bf16.vlgmr.msrb.gmra.mxu2 %vm573_vm1, %v13697_v24  ;;  %v626_v1 = vsel %vm573_vm1, %v621_v63, 0  ;;  %v927_v20 = vsel %vm862_vm2, %v922_v62, 0 }
 0x12c   : > { %635 = vmatpush.bf16.xpose.msrb.mxu3 %v626_v1  ;;  %v722_v2 = vsel %vm573_vm1, %v717_v0, 0 }
 0x12d   : > { %731 = vmatpush.bf16.xpose.msrb.mxu1 %v722_v2 }
 0x132   : > { %v880_v3 = vpop.permute.xlu2 %879 }
 0x133   : > { %v885_v4 = vsel %vm862_vm2, %v880_v3, 0  ;;  %v901_v5 = vpop.permute.xlu0 %900  ;;  %10707 = vmatmul.msk.bf16.vlgmr.msrb.gmra.mxu3 %vm573_vm1, %v13707_v31 }
 0x134   : > { %10711 = vmatmul.msk.bf16.vlgmr.msrb.gmra.mxu1 %vm573_vm1, %v13700_v26  ;;  %v906_v13 = vsel %vm862_vm2, %v901_v5, 0 }
 0x135   : > { %894 = vmatpush.bf16.msra.mxu1 %v885_v4 }
 0x13a   : > { %v669_v6 = vpop.permute.xlu1 %668  ;;  %v943_v7 = vpop.permute.xlu2 %942 }
 0x13b   : > { %v674_v8 = vsel %vm573_vm1, %v669_v6, 0  ;;  %v13787_v9 = vpop.permute.xlu0 %1005  ;;  %v948_v10 = vsel %vm862_vm2, %v943_v7, 0 }
 0x13c   : > { %683 = vmatpush.bf16.xpose.msra.mxu2 %v674_v8  ;;  %957 = vmatpush.bf16.msrb.mxu0 %v948_v10 }
 0x142   : > { %v693_v12 = vpop.permute.xlu1 %692  ;;  %v13823_v59 = vpop.permute.xlu2 %1095 }
 0x143   : > { %v698_v14 = vsel %vm573_vm1, %v693_v12, 0  ;;  %v13793_v15 = vpop.permute.xlu0 %1097  ;;  %10709 = vmatmul.msk.bf16.vlgmr.msra.gmra.mxu2 %vm573_vm1, %v13727_v46 }
 0x144   : > { %755 = vmatpush.bf16.xpose.msrb.mxu2 %v746_v11  ;;  %707 = vmatpush.bf16.xpose.msra.mxu3 %v698_v14 }
 0x14a   : > { %v858_v16 = vpop.permute.xlu1 %857 }
 0x14b   : > { %v864_v17 = vsel %vm862_vm2, %v858_v16, 0  ;;  %v13798_v18 = vpop.permute.xlu0 %1051  ;;  %10710 = vmatmul.msk.bf16.vlgmr.msra.gmra.mxu3 %vm573_vm1, %v13740_v52 }
 0x14c   : > { %915 = vmatpush.bf16.msra.mxu2 %v906_v13  ;;  %873 = vmatpush.bf16.msrb.mxu3 %v864_v17 }
 0x150   : > { %936 = vmatpush.bf16.msra.mxu3 %v927_v20 }
 0x152   : > { %v985_v21 = vpop.permute.xlu1 %984 }
 0x153   : > { %v990_v22 = vsel %vm862_vm2, %v985_v21, 0  ;;  %v964_v23 = vpop.permute.xlu0 %963  ;;  %10712 = vmatmul.msk.bf16.vlgmr.msrb.gmra.mxu2 %vm573_vm1, %v13718_v41 }
 0x154   : > { %v969_v24 = vsel %vm862_vm2, %v964_v23, 0  ;;  %999 = vmatpush.bf16.msrb.mxu2 %v990_v22 }
 0x155   : > { %978 = vmatpush.bf16.msrb.mxu1 %v969_v24 }
 0x15a   : > { %v13807_v25 = vpop.permute.xlu1 %1074 }
 0x162   : > { %v1029_v26 = vpop.permute.xlu1 %1028 }
 0x163   : > { %v1034_v28 = vsel %vm573_vm1, %v1029_v26, 0 }
 0x164   : > { %1043 = vmatpush.bf16.xpose.msra.mxu0 %v1034_v28 }
 0x16a   : > { %v13825_v60 = vpop.permute.xlu1 %1072 }
 0x1a0   : > { %v661_v29 = vpop.f32.mrf.mxu1 }
 0x1a1   : > { %v770_v30 = vsel %vm573_vm1, %v661_v29, -inf }
 0x1a2   : > { %771 = vmax.xlane.f32.xlu1 %v770_v30 }
 0x1a6   : > { %v589_v31 = vpop.f32.mrf.mxu3 }
 0x1a7   : > { %v761_v32 = vsel %vm573_vm1, %v589_v31, -inf }
 0x1a8   : > { %v663_v34 = vpop.f32.mrf.mxu1  ;;  %762 = vmax.xlane.f32.xlu2 %v761_v32 }
 0x1ae   : > { %v591_v36 = vpop.f32.mrf.mxu3  ;;  %v613_v37 = vpop.f32.mrf.mxu2 }
 0x1af   : > { %v764_v38 = vsel %vm573_vm1, %v613_v37, -inf }
 0x1b0   : > { %765 = vmax.xlane.f32.xlu2 %v764_v38 }
 0x1b1   : > { %v733_v39 = vpop.f32.mrf.mxu1 }
 0x1b2   : > { %v779_v44 = vsel %vm573_vm1, %v733_v39, -inf }
 0x1b6   : > { %v615_v40 = vpop.f32.mrf.mxu2  ;;  %v637_v41 = vpop.f32.mrf.mxu3 }
 0x1b7   : > { %v767_v43 = vsel %vm573_vm1, %v637_v41, -inf }
 0x1b8   : > { %768 = vmax.xlane.f32.xlu0 %v767_v43  ;;  %780 = vmax.xlane.f32.xlu2 %v779_v44 }
 0x1b9   : > { %v735_v45 = vpop.f32.mrf.mxu1 }
 0x1be   : > { %v639_v46 = vpop.f32.mrf.mxu3 }
 0x1c6   : > { %v13815_v47 = vpop.f32.mrf.mxu2 }
 0x1c7   : > { %v773_v50 = vsel %vm573_vm1, %v13815_v47, -inf }
 0x1c8   : > { %774 = vmax.xlane.f32.xlu1 %v773_v50 }
 0x1ce   : > { %v687_v51 = vpop.f32.mrf.mxu2  ;;  %v709_v52 = vpop.f32.mrf.mxu3 }
 0x1cf   : > { %v776_v53 = vsel %vm573_vm1, %v709_v52, -inf }
 0x1d0   : > { %777 = vmax.xlane.f32.xlu2 %v776_v53 }
 0x1d6   : > { %v711_v55 = vpop.f32.mrf.mxu3  ;;  %v757_v56 = vpop.f32.mrf.mxu2 }
 0x1d7   : > { %v782_v57 = vsel %vm573_vm1, %v757_v56, -inf  ;;  %v1011_v55 = vsel %vm862_vm2, %v13787_v9, 0  ;;  %v1057_v9 = vsel %vm573_vm1, %v13798_v18, 0  ;;  %v1080_v18 = vsel %vm573_vm1, %v13807_v25, 0 }
 0x1d8   : > { %783 = vmax.xlane.f32.xlu0 %v782_v57 }
 0x1de   : > { %v759_v58 = vpop.f32.mrf.mxu2 }
 0x1e1   : > { %1049 = vrot.lane.b32.xlu1 %v13702_v27, %s18465_s20 }
 0x215   : > { %v772_v61 = vpop.xlane.xlu1 %771 }
 0x216   : > { %v788_v0 = vsub.f32 %v661_v29, %v772_v61 }
 0x218   : > { %v799_v2 = vmul.f32 1.442695, %v788_v0 }
 0x21b   : > { %v763_v62 = vpop.xlane.xlu2 %762 }
 0x21c   : > { %v785_v63 = vsub.f32 %v589_v31, %v763_v62 }
 0x21e   : > { %v793_v1 = vmul.f32 1.442695, %v785_v63 }
 0x220   : > { %13111 = vpow2.f32 %v793_v1 }
 0x221   : > { %13113 = vpow2.f32 %v799_v2 }
 0x223   : > { %v766_v3 = vpop.xlane.xlu2 %765 }
 0x224   : > { %v786_v4 = vsub.f32 %v613_v37, %v766_v3 }
 0x226   : > { %v13827_v5 = vpop.eup %13111  ;;  %v795_v6 = vmul.f32 1.442695, %v786_v4 }
 0x227   : > { %v809_v7 = vsel %vm573_vm1, %v13827_v5, 0.0  ;;  %v13831_v11 = vpop.eup %13113 }
 0x228   : > { %13115 = vpow2.f32 %v795_v6  ;;  %810 = vadd.xlane.f32.xlu0 %v809_v7  ;;  %v818_v20 = vsel %vm573_vm1, %v13831_v11, 0.0  ;;  %v1103_v6 = vsel %vm573_vm1, %v13793_v15, 0 }
 0x22b   : > { %v781_v8 = vpop.xlane.xlu2 %780  ;;  %v769_v10 = vpop.xlane.xlu0 %768 }
 0x22c   : > { %v791_v12 = vsub.f32 %v733_v39, %v781_v8  ;;  %v787_v13 = vsub.f32 %v637_v41, %v769_v10 }
 0x22e   : > { %v13833_v14 = vpop.eup %13115  ;;  %v805_v16 = vmul.f32 1.442695, %v791_v12  ;;  %v797_v17 = vmul.f32 1.442695, %v787_v13 }
 0x22f   : > { %v812_v21 = vsel %vm573_vm1, %v13833_v14, 0.0 }
 0x230   : > { %13117 = vpow2.f32 %v805_v16  ;;  %819 = vadd.xlane.f32.xlu0 %v818_v20  ;;  %813 = vadd.xlane.f32.xlu2 %v812_v21 }
 0x231   : > { %13119 = vpow2.f32 %v797_v17 }
 0x236   : > { %v13839_v22 = vpop.eup %13117 }
 0x237   : > { %v13841_v23 = vpop.eup %13119  ;;  %v827_v24 = vsel %vm573_vm1, %v13839_v22, 0.0 }
 0x238   : > { %828 = vadd.xlane.f32.xlu1 %v827_v24  ;;  %v815_v26 = vsel %vm573_vm1, %v13841_v23, 0.0 }
 0x239   : > { %816 = vadd.xlane.f32.xlu2 %v815_v26 }
 0x23b   : > { %v775_v38 = vpop.xlane.xlu1 %774 }
 0x23c   : > { %v789_v39 = vsub.f32 %v13815_v47, %v775_v38 }
 0x23e   : > { %v801_v41 = vmul.f32 1.442695, %v789_v39 }
 0x243   : > { %v778_v28 = vpop.xlane.xlu2 %777 }
 0x244   : > { %v790_v29 = vsub.f32 %v709_v52, %v778_v28  ;;  %1026 = vrot.lane.b32.xlu0 %v13693_v19, %s18465_s20 }
 0x246   : > { %v803_v30 = vmul.f32 1.442695, %v790_v29 }
 0x248   : > { %13121 = vpow2.f32 %v803_v30 }
 0x24b   : > { %v784_v34 = vpop.xlane.xlu0 %783 }
 0x24c   : > { %v792_v36 = vsub.f32 %v757_v56, %v784_v34 }
 0x24e   : > { %v13849_v31 = vpop.eup %13121  ;;  %v807_v37 = vmul.f32 1.442695, %v792_v36 }
 0x24f   : > { %v824_v32 = vsel %vm573_vm1, %v13849_v31, 0.0 }
 0x250   : > { %825 = vadd.xlane.f32.xlu1 %v824_v32  ;;  %13123 = vpow2.f32 %v807_v37 }
 0x251   : > { %1166 = vrot.lane.b32.xlu2 %v13710_v33, %s18451_s18  ;;  %13125 = vpow2.f32 %v801_v41 }
 0x253   : > { %v1050_v63 = vpop.permute.xlu1 %1049 }
 0x256   : > { %v13858_v40 = vpop.eup %13123 }
 0x257   : > { %v830_v43 = vsel %vm573_vm1, %v13858_v40, 0.0  ;;  %v13864_v44 = vpop.eup %13125 }
 0x258   : > { %v821_v45 = vsel %vm573_vm1, %v13864_v44, 0.0 }
 0x269   : > { %1120 = vrot.lane.b32.xlu1 %v13732_v49, %s18451_s18 }
 0x26e   : > { %831 = vadd.xlane.f32.xlu0 %v830_v43 }
 0x271   : > { %1187 = vrot.lane.b32.xlu1 %v13730_v48, %s18465_s20 }
 0x279   : > { %1348 = vrot.lane.b32.xlu1 %v13712_v35, %s18449_s21 }
 0x27a   : > { %822 = vadd.xlane.f32.xlu2 %v821_v45 }
 0x281   : > { %1327 = vrot.lane.b32.xlu1 %v13702_v27, %s18449_s21 }
 0x282   : > { %1189 = vrot.lane.b32.xlu0 %v13730_v48, %s18451_s18 }
 0x289   : > { %1453 = vrot.lane.b32.xlu1 %v13730_v48, %s18449_s21 }
 0x28a   : > { %1164 = vrot.lane.b32.xlu0 %v13710_v33, %s18465_s20 }
 0x292   : > { %1143 = vrot.lane.b32.xlu2 %v13743_v54, %s18451_s18  ;;  %1141 = vrot.lane.b32.xlu0 %v13743_v54, %s18465_s20  ;;  %s18457_s18 = smov 72  }
 0x29a   : > { %1118 = vrot.lane.b32.xlu2 %v13732_v49, %s18465_s20  ;;  %1306 = vrot.lane.b32.xlu0 %v13693_v19, %s18449_s21  ;;  %s18547_s20 = smov 96  }
 0x29b   : > { %v811_v46 = vpop.xlane.xlu0 %810 }
 0x29c   : > { %13127 = vrcp.f32 %v811_v46 }
 0x2a2   : > { %v13128_v47 = vpop.eup %13127  ;;  %1369 = vrot.lane.b32.xlu2 %v13720_v42, %s18449_s21  ;;  %1390 = vrot.lane.b32.xlu0 %v13732_v49, %s18449_s21 }
 0x2a3   : > { %v841_v50 = vmul.f32 %v13128_v47, %v13827_v5  ;;  %v814_v51 = vpop.xlane.xlu2 %813  ;;  %v820_v53 = vpop.xlane.xlu0 %819 }
 0x2a4   : > { %13129 = vrcp.f32 %v814_v51 }
 0x2a5   : > { %v849_v52 = vpack.c.bf16 %v841_v50, %v841_v50  ;;  %13131 = vrcp.f32 %v820_v53 }
 0x2a7   : > { %10713 = vmatmul.msk.bf16.vlgmr.msrb.gmra.mxu3 %vm573_vm1, %v849_v52 }
 0x2a8   : > { %1020 = vmatpush.bf16.msrb.mxu3 %v1011_v55 }
 0x2aa   : > { %v13130_v56 = vpop.eup %13129  ;;  %1432 = vrot.lane.b32.xlu2 %v13710_v33, %s18449_s21  ;;  %1522 = vrot.lane.b32.xlu0 %v13712_v35, %s18463_s15 }
 0x2ab   : > { %v842_v57 = vmul.f32 %v13130_v56, %v13833_v14  ;;  %v13132_v62 = vpop.eup %13131  ;;  %v829_v4 = vpop.xlane.xlu1 %828 }
 0x2ac   : > { %v817_v58 = vpop.xlane.xlu2 %816  ;;  %v844_v0 = vmul.f32 %v13132_v62, %v13831_v11 }
 0x2ad   : > { %v850_v61 = vpack.c.bf16 %v842_v57, %v842_v57  ;;  %13133 = vrcp.f32 %v817_v58 }
 0x2ae   : > { %v852_v3 = vpack.c.bf16 %v844_v0, %v844_v0  ;;  %13135 = vrcp.f32 %v829_v4 }
 0x2af   : > { %10714 = vmatmul.msk.bf16.vlgmr.msra.gmra.mxu1 %vm573_vm1, %v850_v61 }
 0x2b0   : > { %1066 = vmatpush.bf16.xpose.msra.mxu1 %v1057_v9 }
 0x2b2   : > { %1411 = vrot.lane.b32.xlu2 %v13743_v54, %s18449_s21  ;;  %s18453_s21 = smov 48  }
 0x2b3   : > { %v13134_v1 = vpop.eup %13133 }
 0x2b4   : > { %v843_v2 = vmul.f32 %v13134_v1, %v13841_v23  ;;  %v13136_v7 = vpop.eup %13135  ;;  %v1167_v11 = vpop.permute.xlu2 %1166 }
 0x2b5   : > { %v847_v8 = vmul.f32 %v13136_v7, %v13839_v22  ;;  %v1172_v12 = vsel %vm573_vm1, %v1167_v11, 0 }
 0x2b6   : > { %v851_v5 = vpack.c.bf16 %v843_v2, %v843_v2  ;;  %v1027_v16 = vpop.permute.xlu0 %1026 }
 0x2b7   : > { %10716 = vmatmul.msk.bf16.vlgmr.msra.gmra.mxu3 %vm573_vm1, %v852_v3  ;;  %v855_v15 = vpack.c.bf16 %v847_v8, %v847_v8 }
 0x2b8   : > { %10715 = vmatmul.msk.bf16.vlgmr.msra.gmra.mxu2 %vm573_vm1, %v851_v5  ;;  %1112 = vmatpush.bf16.xpose.msra.mxu3 %v1103_v6 }
 0x2b9   : > { %1089 = vmatpush.bf16.xpose.msra.mxu2 %v1080_v18 }
 0x2ba   : > { %1476 = vrot.lane.b32.xlu2 %v13693_v19, %s18463_s15 }
 0x2c3   : > { %v826_v10 = vpop.xlane.xlu1 %825 }
 0x2c4   : > { %13137 = vrcp.f32 %v826_v10 }
 0x2c8   : > { %10719 = vmatmul.msk.bf16.vlgmr.msrb.gmra.mxu2 %vm573_vm1, %v855_v15 }
 0x2c9   : > { %1181 = vmatpush.bf16.xpose.msrb.mxu2 %v1172_v12 }
 0x2ca   : > { %v13138_v25 = vpop.eup %13137 }
 0x2cb   : > { %v846_v13 = vmul.f32 %v13138_v25, %v13849_v31 }
 0x2cd   : > { %v854_v14 = vpack.c.bf16 %v846_v13, %v846_v13 }
 0x2cf   : > { %10718 = vmatmul.msk.bf16.vlgmr.msrb.gmra.mxu1 %vm573_vm1, %v854_v14 }
 0x2d8   : > { %10723 = vmatmul.msk.bf16.vlgmr.msra.gmra.mxu2 %vm573_vm1, %v13825_v60 }
 0x2db   : > { %v1121_v17 = vpop.permute.xlu1 %1120 }
 0x2df   : > { %10722 = vmatmul.msk.bf16.vlgmr.msra.gmra.mxu1 %vm573_vm1, %v1050_v63 }
 0x2e1   : > { %v832_v20 = vpop.xlane.xlu0 %831 }
 0x2e2   : > { %13139 = vrcp.f32 %v832_v20 }
 0x2e3   : > { %v1188_v21 = vpop.permute.xlu1 %1187 }
 0x2e8   : > { %v13140_v22 = vpop.eup %13139 }
 0x2e9   : > { %v848_v23 = vmul.f32 %v13140_v22, %v13858_v40  ;;  %v1126_v40 = vsel %vm573_vm1, %v1121_v17, 0 }
 0x2eb   : > { %v856_v24 = vpack.c.bf16 %v848_v23, %v848_v23  ;;  %v1349_v26 = vpop.permute.xlu1 %1348 }
 0x2ec   : > { %v1354_v28 = vsel %vm862_vm2, %v1349_v26, 0 }
 0x2ed   : > { %v823_v29 = vpop.xlane.xlu2 %822  ;;  %10720 = vmatmul.msk.bf16.vlgmr.msrb.gmra.mxu3 %vm573_vm1, %v856_v24  ;;  %1363 = vmatpush.bf16.msra.mxu2 %v1354_v28 }
 0x2ee   : > { %13141 = vrcp.f32 %v823_v29 }
 0x2f3   : > { %v1328_v30 = vpop.permute.xlu1 %1327 }
 0x2f4   : > { %v13142_v60 = vpop.eup %13141  ;;  %v1190_v31 = vpop.permute.xlu0 %1189  ;;  %v1333_v38 = vsel %vm862_vm2, %v1328_v30, 0 }
 0x2f5   : > { %v1144_v32 = vpop.permute.xlu2 %1143  ;;  %v1195_v34 = vsel %vm573_vm1, %v1190_v31, 0  ;;  %v845_v36 = vmul.f32 %v13142_v60, %v13864_v44 }
 0x2f6   : > { %v1149_v37 = vsel %vm573_vm1, %v1144_v32, 0  ;;  %1204 = vmatpush.bf16.xpose.msrb.mxu3 %v1195_v34 }
 0x2f7   : > { %1158 = vmatpush.bf16.xpose.msrb.mxu1 %v1149_v37  ;;  %v853_v39 = vpack.c.bf16 %v845_v36, %v845_v36 }
 0x2f9   : > { %10717 = vmatmul.msk.bf16.vlgmr.msrb.gmra.mxu0 %vm573_vm1, %v853_v39 }
 0x2fa   : > { %1135 = vmatpush.bf16.xpose.msrb.mxu0 %v1126_v40 }
 0x2fb   : > { %v1454_v47 = vpop.permute.xlu1 %1453 }
 0x2fc   : > { %v1165_v41 = vpop.permute.xlu0 %1164  ;;  %v1459_v51 = vsel %vm862_vm2, %v1454_v47, 0 }
 0x2fd   : > { %v1119_v43 = vpop.permute.xlu2 %1118  ;;  %10724 = vmatmul.msk.bf16.vlgmr.msra.gmra.mxu3 %vm573_vm1, %v13823_v59  ;;  %10727 = vmatmul.msk.bf16.vlgmr.msrb.gmra.mxu2 %vm573_vm1, %v1165_v41 }
 0x2ff   : > { %1342 = vmatpush.bf16.msra.mxu1 %v1333_v38 }
 0x304   : > { %v1142_v44 = vpop.permute.xlu0 %1141 }
 0x305   : > { %v1370_v45 = vpop.permute.xlu2 %1369  ;;  %10726 = vmatmul.msk.bf16.vlgmr.msrb.gmra.mxu1 %vm573_vm1, %v1142_v44 }
 0x306   : > { %v1375_v46 = vsel %vm862_vm2, %v1370_v45, 0 }
 0x307   : > { %1384 = vmatpush.bf16.msra.mxu3 %v1375_v46 }
 0x309   : > { %10721 = vmatmul.msk.bf16.vlgmr.msra.gmra.mxu0 %vm573_vm1, %v1027_v16 }
 0x30c   : > { %v1307_v50 = vpop.permute.xlu0 %1306 }
 0x30d   : > { %v1433_v52 = vpop.permute.xlu2 %1432  ;;  %v1312_v53 = vsel %vm862_vm2, %v1307_v50, 0  ;;  %10728 = vmatmul.msk.bf16.vlgmr.msrb.gmra.mxu3 %vm573_vm1, %v1188_v21 }
 0x30e   : > { %v1438_v59 = vsel %vm862_vm2, %v1433_v52, 0  ;;  %1468 = vmatpush.bf16.msrb.mxu3 %v1459_v51  ;;  %1321 = vmatpush.bf16.msra.mxu0 %v1312_v53 }
 0x30f   : > { %1447 = vmatpush.bf16.msrb.mxu2 %v1438_v59 }
 0x314   : > { %v1391_v57 = vpop.permute.xlu0 %1390 }
 0x315   : > { %v1412_v55 = vpop.permute.xlu2 %1411  ;;  %v1396_v58 = vsel %vm862_vm2, %v1391_v57, 0 }
 0x316   : > { %v1417_v56 = vsel %vm862_vm2, %v1412_v55, 0 }
 0x317   : > { %1426 = vmatpush.bf16.msrb.mxu1 %v1417_v56 }
 0x319   : > { %10725 = vmatmul.msk.bf16.vlgmr.msrb.gmra.mxu0 %vm573_vm1, %v1119_v43 }
 0x31a   : > { %1405 = vmatpush.bf16.msrb.mxu0 %v1396_v58 }
 0x31c   : > { %v13989_v53 = vpop.permute.xlu0 %1522 }
 0x31d   : > { %v13995_v57 = vpop.permute.xlu2 %1476 }
 0x32a   : > { %v13944_v61 = vpop.f32.mrf.mxu3 }
 0x32c   : > { %v13946_v62 = vpop.f32.mrf.mxu1 }
 0x332   : > { %v877_v63 = vpop.f32.mrf.mxu3 }
 0x334   : > { %v898_v9 = vpop.f32.mrf.mxu1 }
 0x33a   : > { %v13948_v0 = vpop.f32.mrf.mxu3 }
 0x33b   : > { %v13950_v1 = vpop.f32.mrf.mxu2 }
 0x342   : > { %v940_v2 = vpop.f32.mrf.mxu3 }
 0x343   : > { %v919_v3 = vpop.f32.mrf.mxu2 }
 0x34b   : > { %v13952_v4 = vpop.f32.mrf.mxu2 }
 0x34c   : > { %v13954_v5 = vpop.f32.mrf.mxu1 }
 0x353   : > { %v1003_v6 = vpop.f32.mrf.mxu2 }
 0x354   : > { %v982_v18 = vpop.f32.mrf.mxu1 }
 0x35b   : > { %v1091_v7 = vpop.f32.mrf.mxu2 }
 0x35c   : > { %v1068_v8 = vpop.f32.mrf.mxu1  ;;  %v1216_v10 = vsel %vm573_vm1, %v1091_v7, -inf }
 0x35d   : > { %1217 = vmax.xlane.f32.xlu1 %v1216_v10  ;;  %v1213_v12 = vsel %vm573_vm1, %v1068_v8, -inf }
 0x363   : > { %v1093_v11 = vpop.f32.mrf.mxu2 }
 0x364   : > { %v1070_v15 = vpop.f32.mrf.mxu1 }
 0x365   : > { %1214 = vmax.xlane.f32.xlu1 %v1213_v12 }
 0x370   : > { %v13958_v25 = vpop.f32.mrf.mxu3 }
 0x376   : > { %v13960_v13 = vpop.f32.mrf.mxu0 }
 0x378   : > { %v1024_v14 = vpop.f32.mrf.mxu3 }
 0x37e   : > { %v961_v16 = vpop.f32.mrf.mxu0 }
 0x380   : > { %v1114_v17 = vpop.f32.mrf.mxu3  ;;  %v13962_v20 = vpop.f32.mrf.mxu2 }
 0x381   : > { %v1219_v21 = vsel %vm573_vm1, %v1114_v17, -inf  ;;  %v1228_v29 = vsel %vm573_vm1, %v13962_v20, -inf }
 0x382   : > { %1220 = vmax.xlane.f32.xlu2 %v1219_v21  ;;  %v13965_v22 = vpop.f32.mrf.mxu1 }
 0x383   : > { %v1225_v32 = vsel %vm573_vm1, %v13965_v22, -inf }
 0x386   : > { %v1045_v23 = vpop.f32.mrf.mxu0 }
 0x387   : > { %v1210_v24 = vsel %vm573_vm1, %v1045_v23, -inf }
 0x388   : > { %1211 = vmax.xlane.f32.xlu0 %v1210_v24  ;;  %v1116_v26 = vpop.f32.mrf.mxu3  ;;  %v1185_v28 = vpop.f32.mrf.mxu2 }
 0x38a   : > { %1229 = vmax.xlane.f32.xlu2 %v1228_v29  ;;  %v1162_v60 = vpop.f32.mrf.mxu1 }
 0x38e   : > { %v1047_v30 = vpop.f32.mrf.mxu0 }
 0x390   : > { %v13970_v31 = vpop.f32.mrf.mxu3 }
 0x391   : > { %v1231_v39 = vsel %vm573_vm1, %v13970_v31, -inf }
 0x392   : > { %1226 = vmax.xlane.f32.xlu2 %v1225_v32 }
 0x396   : > { %v1137_v34 = vpop.f32.mrf.mxu0 }
 0x397   : > { %v1222_v36 = vsel %vm573_vm1, %v1137_v34, -inf }
 0x398   : > { %1223 = vmax.xlane.f32.xlu1 %v1222_v36  ;;  %v1208_v37 = vpop.f32.mrf.mxu3 }
 0x39c   : > { %1499 = vrot.lane.b32.xlu0 %v13702_v27, %s18463_s15 }
 0x39e   : > { %v1139_v38 = vpop.f32.mrf.mxu0 }
 0x3b1   : > { %1545 = vrot.lane.b32.xlu1 %v13720_v42, %s18463_s15 }
 0x3c6   : > { %1232 = vmax.xlane.f32.xlu0 %v1231_v39 }
 0x3d0   : > { %v1218_v40 = vpop.xlane.xlu1 %1217 }
 0x3d1   : > { %v1236_v41 = vsub.f32 %v1091_v7, %v1218_v40  ;;  %v1528_v40 = vsel %vm573_vm1, %v13989_v53, 0  ;;  %v1482_v53 = vsel %vm573_vm1, %v13995_v57, 0 }
 0x3d3   : > { %v1246_v43 = vmul.f32 1.442695, %v1236_v41 }
 0x3d5   : > { %13143 = vpow2.f32 %v1246_v43 }
 0x3d8   : > { %v1215_v44 = vpop.xlane.xlu1 %1214 }
 0x3d9   : > { %v1235_v45 = vsub.f32 %v1068_v8, %v1215_v44 }
 0x3db   : > { %v13981_v46 = vpop.eup %13143  ;;  %v1244_v47 = vmul.f32 1.442695, %v1235_v45 }
 0x3dc   : > { %v1264_v50 = vsel %vm573_vm1, %v13981_v46, 0.0 }
 0x3dd   : > { %13145 = vpow2.f32 %v1244_v47  ;;  %1265 = vadd.xlane.f32.xlu0 %v1264_v50 }
 0x3e3   : > { %v13985_v51 = vpop.eup %13145 }
 0x3e4   : > { %v1261_v52 = vsel %vm573_vm1, %v13985_v51, 0.0 }
 0x3e5   : > { %1262 = vadd.xlane.f32.xlu0 %v1261_v52 }
 0x3f5   : > { %v1221_v9 = vpop.xlane.xlu2 %1220 }
 0x3f6   : > { %v1237_v6 = vsub.f32 %v1114_v17, %v1221_v9 }
 0x3f8   : > { %v1248_v7 = vmul.f32 1.442695, %v1237_v6 }
 0x3f9   : > { %1474 = vrot.lane.b32.xlu0 %v13693_v19, %s18459_s22 }
 0x3fb   : > { %v1212_v59 = vpop.xlane.xlu0 %1211 }
 0x3fc   : > { %v1234_v55 = vsub.f32 %v1045_v23, %v1212_v59 }
 0x3fd   : > { %v1230_v8 = vpop.xlane.xlu2 %1229 }
 0x3fe   : > { %v1242_v56 = vmul.f32 1.442695, %v1234_v55  ;;  %v1240_v15 = vsub.f32 %v13962_v20, %v1230_v8 }
 0x400   : > { %13147 = vpow2.f32 %v1242_v56  ;;  %v1254_v14 = vmul.f32 1.442695, %v1240_v15 }
 0x401   : > { %1637 = vrot.lane.b32.xlu0 %v13730_v48, %s18463_s15 }
 0x405   : > { %v1227_v16 = vpop.xlane.xlu2 %1226 }
 0x406   : > { %v13997_v58 = vpop.eup %13147  ;;  %v1239_v21 = vsub.f32 %v13965_v22, %v1227_v16 }
 0x407   : > { %v1258_v63 = vsel %vm573_vm1, %v13997_v58, 0.0 }
 0x408   : > { %1259 = vadd.xlane.f32.xlu2 %v1258_v63  ;;  %v1252_v23 = vmul.f32 1.442695, %v1239_v21 }
 0x40b   : > { %v1224_v2 = vpop.xlane.xlu1 %1223 }
 0x40c   : > { %v1238_v3 = vsub.f32 %v1137_v34, %v1224_v2 }
 0x40e   : > { %v1250_v18 = vmul.f32 1.442695, %v1238_v3  ;;  %v1500_v29 = vpop.permute.xlu0 %1499 }
 0x40f   : > { %v1505_v45 = vsel %vm573_vm1, %v1500_v29, 0 }
 0x410   : > { %13149 = vpow2.f32 %v1250_v18 }
 0x411   : > { %13151 = vpow2.f32 %v1248_v7 }
 0x412   : > { %13153 = vpow2.f32 %v1254_v14 }
 0x413   : > { %13155 = vpow2.f32 %v1252_v23 }
 0x416   : > { %v14001_v10 = vpop.eup %13149 }
 0x417   : > { %v1270_v11 = vsel %vm573_vm1, %v14001_v10, 0.0  ;;  %v14006_v12 = vpop.eup %13151 }
 0x418   : > { %1271 = vadd.xlane.f32.xlu1 %v1270_v11  ;;  %v1267_v17 = vsel %vm573_vm1, %v14006_v12, 0.0  ;;  %v14013_v24 = vpop.eup %13153 }
 0x419   : > { %v1276_v20 = vsel %vm573_vm1, %v14013_v24, 0.0  ;;  %v14019_v26 = vpop.eup %13155 }
 0x41a   : > { %v1273_v28 = vsel %vm573_vm1, %v14019_v26, 0.0 }
 0x420   : > { %1268 = vadd.xlane.f32.xlu1 %v1267_v17  ;;  %1543 = vrot.lane.b32.xlu2 %v13720_v42, %s18459_s22 }
 0x423   : > { %v1546_v50 = vpop.permute.xlu1 %1545 }
 0x424   : > { %v1551_v8 = vsel %vm573_vm1, %v1546_v50, 0 }
 0x428   : > { %1614 = vrot.lane.b32.xlu2 %v13710_v33, %s18463_s15 }
 0x42b   : > { %1277 = vadd.xlane.f32.xlu0 %v1276_v20 }
 0x433   : > { %1274 = vadd.xlane.f32.xlu0 %v1273_v28 }
 0x439   : > { %1520 = vrot.lane.b32.xlu1 %v13712_v35, %s18459_s22  ;;  %v1233_v22 = vpop.xlane.xlu0 %1232 }
 0x43a   : > { %v1241_v60 = vsub.f32 %v13970_v31, %v1233_v22 }
 0x43c   : > { %v1256_v30 = vmul.f32 1.442695, %v1241_v60 }
 0x43e   : > { %13157 = vpow2.f32 %v1256_v30 }
 0x441   : > { %1497 = vrot.lane.b32.xlu1 %v13702_v27, %s18459_s22 }
 0x444   : > { %v14032_v32 = vpop.eup %13157 }
 0x445   : > { %v1279_v31 = vsel %vm573_vm1, %v14032_v32, 0.0 }
 0x447   : > { %1612 = vrot.lane.b32.xlu0 %v13710_v33, %s18459_s22 }
 0x449   : > { %1568 = vrot.lane.b32.xlu1 %v13732_v49, %s18463_s15 }
 0x44f   : > { %1589 = vrot.lane.b32.xlu0 %v13743_v54, %s18459_s22 }
 0x450   : > { %v1266_v34 = vpop.xlane.xlu0 %1265 }
 0x451   : > { %13159 = vrcp.f32 %v1266_v34  ;;  %1635 = vrot.lane.b32.xlu1 %v13730_v48, %s18459_s22  ;;  %1280 = vadd.xlane.f32.xlu2 %v1279_v31 }
 0x457   : > { %v13160_v36 = vpop.eup %13159  ;;  %1796 = vrot.lane.b32.xlu0 %v13712_v35, %s18453_s21 }
 0x458   : > { %v1292_v37 = vmul.f32 %v13160_v36, %v13981_v46  ;;  %v1263_v38 = vpop.xlane.xlu0 %1262 }
 0x459   : > { %13161 = vrcp.f32 %v1263_v38  ;;  %1775 = vrot.lane.b32.xlu1 %v13702_v27, %s18453_s21 }
 0x45a   : > { %v1300_v39 = vpack.c.bf16 %v1292_v37, %v1292_v37 }
 0x45c   : > { %10731 = vmatmul.msk.bf16.vlgmr.msra.gmra.mxu2 %vm573_vm1, %v1300_v39 }
 0x45d   : > { %1537 = vmatpush.bf16.xpose.msra.mxu2 %v1528_v40 }
 0x45f   : > { %v13162_v41 = vpop.eup %13161  ;;  %1880 = vrot.lane.b32.xlu0 %v13710_v33, %s18453_s21 }
 0x460   : > { %v1291_v43 = vmul.f32 %v13162_v41, %v13985_v51 }
 0x461   : > { %1838 = vrot.lane.b32.xlu1 %v13732_v49, %s18453_s21 }
 0x462   : > { %v1299_v44 = vpack.c.bf16 %v1291_v43, %v1291_v43 }
 0x464   : > { %10730 = vmatmul.msk.bf16.vlgmr.msra.gmra.mxu1 %vm573_vm1, %v1299_v44 }
 0x465   : > { %1514 = vmatpush.bf16.xpose.msra.mxu1 %v1505_v45 }
 0x467   : > { %1924 = vrot.lane.b32.xlu0 %v13693_v19, %s18457_s18 }
 0x469   : > { %1901 = vrot.lane.b32.xlu1 %v13730_v48, %s18453_s21  ;;  %1591 = vrot.lane.b32.xlu2 %v13743_v54, %s18463_s15  ;;  %s18548_s15 = smov 64  }
 0x46b   : > { %v1475_v55 = vpop.permute.xlu0 %1474 }
 0x471   : > { %1566 = vrot.lane.b32.xlu2 %v13732_v49, %s18459_s22  ;;  %s18473_s22 = smov 16  }
 0x473   : > { %v1638_v2 = vpop.permute.xlu0 %1637 }
 0x474   : > { %v1643_v44 = vsel %vm573_vm1, %v1638_v2, 0 }
 0x479   : > { %1754 = vrot.lane.b32.xlu2 %v13693_v19, %s18453_s21 }
 0x47b   : > { %v1260_v46 = vpop.xlane.xlu2 %1259 }
 0x47c   : > { %13163 = vrcp.f32 %v1260_v46 }
 0x481   : > { %1817 = vrot.lane.b32.xlu2 %v13720_v42, %s18453_s21 }
 0x482   : > { %v13164_v47 = vpop.eup %13163 }
 0x483   : > { %v1290_v51 = vmul.f32 %v13164_v47, %v13997_v58  ;;  %v1544_v6 = vpop.permute.xlu2 %1543 }
 0x485   : > { %v1298_v52 = vpack.c.bf16 %v1290_v51, %v1290_v51 }
 0x487   : > { %10729 = vmatmul.msk.bf16.vlgmr.msra.gmra.mxu0 %vm573_vm1, %v1298_v52 }
 0x488   : > { %1491 = vmatpush.bf16.xpose.msra.mxu0 %v1482_v53 }
 0x489   : > { %1859 = vrot.lane.b32.xlu2 %v13743_v54, %s18453_s21  ;;  %s18455_s21 = smov 104  }
 0x48b   : > { %v1272_v59 = vpop.xlane.xlu1 %1271  ;;  %v1615_v14 = vpop.permute.xlu2 %1614 }
 0x48c   : > { %13165 = vrcp.f32 %v1272_v59 }
 0x491   : > { %1947 = vrot.lane.b32.xlu2 %v13702_v27, %s18457_s18 }
 0x492   : > { %v13166_v56 = vpop.eup %13165 }
 0x493   : > { %v1294_v63 = vmul.f32 %v13166_v56, %v14001_v10  ;;  %v1269_v58 = vpop.xlane.xlu1 %1268 }
 0x494   : > { %13167 = vrcp.f32 %v1269_v58 }
 0x495   : > { %v1302_v9 = vpack.c.bf16 %v1294_v63, %v1294_v63 }
 0x497   : > { %10733 = vmatmul.msk.bf16.vlgmr.msrb.gmra.mxu0 %vm573_vm1, %v1302_v9 }
 0x49a   : > { %v13168_v57 = vpop.eup %13167 }
 0x49b   : > { %v1293_v3 = vmul.f32 %v13168_v57, %v14006_v12  ;;  %v1620_v12 = vsel %vm573_vm1, %v1615_v14, 0 }
 0x49d   : > { %v1301_v18 = vpack.c.bf16 %v1293_v3, %v1293_v3 }
 0x49e   : > { %v1278_v7 = vpop.xlane.xlu0 %1277 }
 0x49f   : > { %13169 = vrcp.f32 %v1278_v7  ;;  %10732 = vmatmul.msk.bf16.vlgmr.msra.gmra.mxu3 %vm573_vm1, %v1301_v18 }
 0x4a0   : > { %1560 = vmatpush.bf16.xpose.msra.mxu3 %v1551_v8 }
 0x4a5   : > { %v13170_v11 = vpop.eup %13169 }
 0x4a6   : > { %v1296_v10 = vmul.f32 %v13170_v11, %v14013_v24  ;;  %v1275_v15 = vpop.xlane.xlu0 %1274 }
 0x4a7   : > { %13171 = vrcp.f32 %v1275_v15  ;;  %10737 = vmatmul.msk.bf16.vlgmr.msra.gmra.mxu0 %vm573_vm1, %v1475_v55 }
 0x4a8   : > { %v1304_v16 = vpack.c.bf16 %v1296_v10, %v1296_v10 }
 0x4aa   : > { %10735 = vmatmul.msk.bf16.vlgmr.msrb.gmra.mxu2 %vm573_vm1, %v1304_v16 }
 0x4ab   : > { %1629 = vmatpush.bf16.xpose.msrb.mxu2 %v1620_v12  ;;  %v1521_v17 = vpop.permute.xlu1 %1520 }
 0x4ad   : > { %v13172_v21 = vpop.eup %13171 }
 0x4ae   : > { %v1295_v23 = vmul.f32 %v13172_v21, %v14019_v26 }
 0x4b0   : > { %v1303_v20 = vpack.c.bf16 %v1295_v23, %v1295_v23 }
 0x4b2   : > { %10734 = vmatmul.msk.bf16.vlgmr.msrb.gmra.mxu1 %vm573_vm1, %v1303_v20 }
 0x4b3   : > { %v1498_v28 = vpop.permute.xlu1 %1497 }
 0x4b9   : > { %v1613_v24 = vpop.permute.xlu0 %1612 }
 0x4ba   : > { %10739 = vmatmul.msk.bf16.vlgmr.msra.gmra.mxu2 %vm573_vm1, %v1521_v17 }
 0x4bb   : > { %v1569_v29 = vpop.permute.xlu1 %1568 }
 0x4bc   : > { %v1574_v22 = vsel %vm573_vm1, %v1569_v29, 0 }
 0x4bd   : > { %1583 = vmatpush.bf16.xpose.msrb.mxu0 %v1574_v22 }
 0x4c1   : > { %v1590_v60 = vpop.permute.xlu0 %1589 }
 0x4c2   : > { %10738 = vmatmul.msk.bf16.vlgmr.msra.gmra.mxu1 %vm573_vm1, %v1498_v28 }
 0x4c3   : > { %v1636_v30 = vpop.permute.xlu1 %1635 }
 0x4c4   : > { %v1281_v34 = vpop.xlane.xlu2 %1280 }
 0x4c5   : > { %13173 = vrcp.f32 %v1281_v34 }
 0x4c9   : > { %v1797_v31 = vpop.permute.xlu0 %1796 }
 0x4ca   : > { %v1802_v26 = vsel %vm862_vm2, %v1797_v31, 0  ;;  %10743 = vmatmul.msk.bf16.vlgmr.msrb.gmra.mxu2 %vm573_vm1, %v1613_v24 }
 0x4cb   : > { %v13174_v36 = vpop.eup %13173  ;;  %v1776_v37 = vpop.permute.xlu1 %1775  ;;  %1811 = vmatpush.bf16.msra.mxu2 %v1802_v26 }
 0x4cc   : > { %v1297_v38 = vmul.f32 %v13174_v36, %v14032_v32  ;;  %v1592_v39 = vpop.permute.xlu2 %1591  ;;  %v1781_v43 = vsel %vm862_vm2, %v1776_v37, 0 }
 0x4cd   : > { %v1597_v40 = vsel %vm573_vm1, %v1592_v39, 0 }
 0x4ce   : > { %v1305_v41 = vpack.c.bf16 %v1297_v38, %v1297_v38  ;;  %1606 = vmatpush.bf16.xpose.msrb.mxu1 %v1597_v40 }
 0x4d0   : > { %10736 = vmatmul.msk.bf16.vlgmr.msrb.gmra.mxu3 %vm573_vm1, %v1305_v41 }
 0x4d1   : > { %1652 = vmatpush.bf16.xpose.msrb.mxu3 %v1643_v44  ;;  %v1881_v45 = vpop.permute.xlu0 %1880 }
 0x4d2   : > { %v1886_v46 = vsel %vm862_vm2, %v1881_v45, 0 }
 0x4d3   : > { %1895 = vmatpush.bf16.msrb.mxu2 %v1886_v46  ;;  %v1839_v32 = vpop.permute.xlu1 %1838 }
 0x4d4   : > { %v1567_v47 = vpop.permute.xlu2 %1566  ;;  %v1844_v52 = vsel %vm862_vm2, %v1839_v32, 0 }
 0x4d5   : > { %10741 = vmatmul.msk.bf16.vlgmr.msrb.gmra.mxu0 %vm573_vm1, %v1567_v47  ;;  %10742 = vmatmul.msk.bf16.vlgmr.msrb.gmra.mxu1 %vm573_vm1, %v1590_v60 }
 0x4d6   : > { %1790 = vmatpush.bf16.msra.mxu1 %v1781_v43 }
 0x4db   : > { %v1902_v2 = vpop.permute.xlu1 %1901 }
 0x4dc   : > { %v1755_v50 = vpop.permute.xlu2 %1754  ;;  %v1907_v3 = vsel %vm862_vm2, %v1902_v2, 0 }
 0x4dd   : > { %v1760_v51 = vsel %vm862_vm2, %v1755_v50, 0 }
 0x4de   : > { %1769 = vmatpush.bf16.msra.mxu0 %v1760_v51 }
 0x4df   : > { %v14101_v53 = vpop.f32.mrf.mxu2 }
 0x4e0   : > { %10740 = vmatmul.msk.bf16.vlgmr.msra.gmra.mxu3 %vm573_vm1, %v1544_v6 }
 0x4e1   : > { %v14104_v59 = vpop.f32.mrf.mxu1 }
 0x4e2   : > { %1853 = vmatpush.bf16.msrb.mxu0 %v1844_v52 }
 0x4e4   : > { %v1818_v55 = vpop.permute.xlu2 %1817 }
 0x4e5   : > { %v1823_v56 = vsel %vm862_vm2, %v1818_v55, 0 }
 0x4e6   : > { %1832 = vmatpush.bf16.msra.mxu3 %v1823_v56 }
 0x4e7   : > { %v1367_v63 = vpop.f32.mrf.mxu2 }
 0x4e9   : > { %v1346_v58 = vpop.f32.mrf.mxu1 }
 0x4ec   : > { %v1860_v9 = vpop.permute.xlu2 %1859 }
 0x4ed   : > { %v1865_v57 = vsel %vm862_vm2, %v1860_v9, 0 }
 0x4ee   : > { %1874 = vmatpush.bf16.msrb.mxu1 %v1865_v57 }
 0x4f0   : > { %10744 = vmatmul.msk.bf16.vlgmr.msrb.gmra.mxu3 %vm573_vm1, %v1636_v30 }
 0x4f1   : > { %1916 = vmatpush.bf16.msrb.mxu3 %v1907_v3  ;;  %v14151_v3 = vpop.permute.xlu0 %1924 }
 0x504   : > { %v14110_v18 = vpop.f32.mrf.mxu0 }
 0x505   : > { %v12974_v6 = vpack.i.bf16 %v14104_v59, %v14110_v18 }
 0x50c   : > { %v1325_v7 = vpop.f32.mrf.mxu0 }
 0x50d   : > { %v14153_v7 = vpop.permute.xlu2 %1947 }
 0x514   : > { %v14114_v8 = vpop.f32.mrf.mxu0 }
 0x51c   : > { %v1409_v11 = vpop.f32.mrf.mxu0 }
 0x522   : > { %v14116_v10 = vpop.f32.mrf.mxu3 }
 0x523   : > { %v12989_v15 = vpack.i.bf16 %v14116_v10, %v14101_v53 }
 0x524   : > { %v1493_v14 = vpop.f32.mrf.mxu0 }
 0x525   : > { %v1658_v16 = vsel %vm573_vm1, %v1493_v14, -inf }
 0x526   : > { %1659 = vmax.xlane.f32.xlu1 %v1658_v16 }
 0x52a   : > { %v1388_v12 = vpop.f32.mrf.mxu3 }
 0x52c   : > { %v1495_v17 = vpop.f32.mrf.mxu0 }
 0x52d   : > { %v14121_v21 = vpop.f32.mrf.mxu2 }
 0x52f   : > { %v14123_v23 = vpop.f32.mrf.mxu1 }
 0x530   : > { %v13004_v20 = vpack.i.bf16 %v14123_v23, %v14114_v8 }
 0x535   : > { %v1451_v28 = vpop.f32.mrf.mxu2 }
 0x537   : > { %v1430_v24 = vpop.f32.mrf.mxu1 }
 0x53d   : > { %v1539_v29 = vpop.f32.mrf.mxu2 }
 0x53e   : > { %v1664_v22 = vsel %vm573_vm1, %v1539_v29, -inf }
 0x53f   : > { %1665 = vmax.xlane.f32.xlu0 %v1664_v22  ;;  %v1516_v60 = vpop.f32.mrf.mxu1 }
 0x540   : > { %v1661_v30 = vsel %vm573_vm1, %v1516_v60, -inf }
 0x541   : > { %1662 = vmax.xlane.f32.xlu2 %v1661_v30 }
 0x545   : > { %v1541_v34 = vpop.f32.mrf.mxu2 }
 0x547   : > { %v1518_v31 = vpop.f32.mrf.mxu1 }
 0x54d   : > { %v14129_v26 = vpop.f32.mrf.mxu2 }
 0x54e   : > { %v1676_v51 = vsel %vm573_vm1, %v14129_v26, -inf }
 0x552   : > { %v1585_v36 = vpop.f32.mrf.mxu0  ;;  %v1608_v37 = vpop.f32.mrf.mxu1 }
 0x553   : > { %v14131_v38 = vpop.f32.mrf.mxu3  ;;  %v1670_v39 = vsel %vm573_vm1, %v1585_v36, -inf  ;;  %v1673_v40 = vsel %vm573_vm1, %v1608_v37, -inf }
 0x554   : > { %v13019_v41 = vpack.i.bf16 %v14131_v38, %v14121_v21  ;;  %1671 = vmax.xlane.f32.xlu1 %v1670_v39  ;;  %1674 = vmax.xlane.f32.xlu0 %v1673_v40 }
 0x555   : > { %v1633_v43 = vpop.f32.mrf.mxu2 }
 0x55a   : > { %v1587_v44 = vpop.f32.mrf.mxu0  ;;  %v1610_v45 = vpop.f32.mrf.mxu1 }
 0x55b   : > { %v1472_v46 = vpop.f32.mrf.mxu3 }
 0x563   : > { %v1562_v47 = vpop.f32.mrf.mxu3 }
 0x564   : > { %v1667_v32 = vsel %vm573_vm1, %v1562_v47, -inf }
 0x565   : > { %1668 = vmax.xlane.f32.xlu2 %v1667_v32 }
 0x568   : > { %1993 = vrot.lane.b32.xlu0 %v13720_v42, %s18457_s18 }
 0x56b   : > { %v1564_v50 = vpop.f32.mrf.mxu3 }
 0x56d   : > { %1677 = vmax.xlane.f32.xlu2 %v1676_v51 }
 0x573   : > { %v1654_v52 = vpop.f32.mrf.mxu3 }
 0x574   : > { %v1679_v55 = vsel %vm573_vm1, %v1654_v52, -inf }
 0x575   : > { %1680 = vmax.xlane.f32.xlu1 %v1679_v55 }
 0x57b   : > { %v1656_v56 = vpop.f32.mrf.mxu3 }
 0x585   : > { %1922 = vrot.lane.b32.xlu2 %v13693_v19, %s18455_s21 }
 0x58e   : > { %1970 = vrot.lane.b32.xlu1 %v13712_v35, %s18457_s18 }
 0x599   : > { %v1660_v63 = vpop.xlane.xlu1 %1659 }
 0x59a   : > { %v1682_v58 = vsub.f32 %v1493_v14, %v1660_v63 }
 0x59c   : > { %v1690_v9 = vmul.f32 1.442695, %v1682_v58 }
 0x59e   : > { %13175 = vpow2.f32 %v1690_v9 }
 0x5a4   : > { %v14147_v2 = vpop.eup %13175 }
 0x5a5   : > { %v1706_v57 = vsel %vm573_vm1, %v14147_v2, 0.0 }
 0x5a6   : > { %1707 = vadd.xlane.f32.xlu0 %v1706_v57 }
 0x5b2   : > { %v1666_v11 = vpop.xlane.xlu0 %1665 }
 0x5b3   : > { %v1684_v16 = vsub.f32 %v1539_v29, %v1666_v11 }
 0x5b4   : > { %v1663_v12 = vpop.xlane.xlu2 %1662 }
 0x5b5   : > { %v1694_v17 = vmul.f32 1.442695, %v1684_v16  ;;  %v1683_v28 = vsub.f32 %v1516_v60, %v1663_v12 }
 0x5b7   : > { %13177 = vpow2.f32 %v1694_v17  ;;  %v1692_v24 = vmul.f32 1.442695, %v1683_v28 }
 0x5b9   : > { %13179 = vpow2.f32 %v1692_v24 }
 0x5bd   : > { %v14155_v14 = vpop.eup %13177 }
 0x5be   : > { %v1712_v22 = vsel %vm573_vm1, %v14155_v14, 0.0 }
 0x5bf   : > { %v14159_v30 = vpop.eup %13179  ;;  %1713 = vadd.xlane.f32.xlu1 %v1712_v22 }
 0x5c0   : > { %v1709_v34 = vsel %vm573_vm1, %v14159_v30, 0.0 }
 0x5c1   : > { %1710 = vadd.xlane.f32.xlu2 %v1709_v34  ;;  %v1930_v34 = vsel %vm573_vm1, %v14151_v3, 0  ;;  %v1953_v3 = vsel %vm573_vm1, %v14153_v7, 0 }
 0x5c7   : > { %v1672_v31 = vpop.xlane.xlu1 %1671  ;;  %v1675_v29 = vpop.xlane.xlu0 %1674 }
 0x5c8   : > { %v1686_v39 = vsub.f32 %v1585_v36, %v1672_v31  ;;  %v1687_v40 = vsub.f32 %v1608_v37, %v1675_v29 }
 0x5ca   : > { %v1698_v60 = vmul.f32 1.442695, %v1686_v39  ;;  %v1700_v43 = vmul.f32 1.442695, %v1687_v40 }
 0x5cc   : > { %13181 = vpow2.f32 %v1698_v60 }
 0x5cd   : > { %13183 = vpow2.f32 %v1700_v43 }
 0x5d2   : > { %v14163_v44 = vpop.eup %13181 }
 0x5d3   : > { %v14165_v45 = vpop.eup %13183  ;;  %v1718_v46 = vsel %vm573_vm1, %v14163_v44, 0.0 }
 0x5d4   : > { %1719 = vadd.xlane.f32.xlu0 %v1718_v46  ;;  %v1721_v32 = vsel %vm573_vm1, %v14165_v45, 0.0 }
 0x5d5   : > { %1722 = vadd.xlane.f32.xlu1 %v1721_v32 }
 0x5d8   : > { %v1669_v50 = vpop.xlane.xlu2 %1668 }
 0x5d9   : > { %v1685_v51 = vsub.f32 %v1562_v47, %v1669_v50 }
 0x5db   : > { %v1696_v36 = vmul.f32 1.442695, %v1685_v51 }
 0x5dd   : > { %13185 = vpow2.f32 %v1696_v36 }
 0x5e0   : > { %v1678_v37 = vpop.xlane.xlu2 %1677 }
 0x5e1   : > { %v1688_v55 = vsub.f32 %v14129_v26, %v1678_v37 }
 0x5e3   : > { %v14172_v56 = vpop.eup %13185  ;;  %v1702_v63 = vmul.f32 1.442695, %v1688_v55 }
 0x5e4   : > { %v1715_v58 = vsel %vm573_vm1, %v14172_v56, 0.0 }
 0x5e5   : > { %13187 = vpow2.f32 %v1702_v63  ;;  %1716 = vadd.xlane.f32.xlu0 %v1715_v58 }
 0x5e8   : > { %v1681_v9 = vpop.xlane.xlu1 %1680  ;;  %v1923_v29 = vpop.permute.xlu2 %1922 }
 0x5e9   : > { %v1689_v57 = vsub.f32 %v1654_v52, %v1681_v9  ;;  %v1994_v52 = vpop.permute.xlu0 %1993 }
 0x5eb   : > { %v14176_v11 = vpop.eup %13187  ;;  %v1704_v16 = vmul.f32 1.442695, %v1689_v57 }
 0x5ec   : > { %v1724_v47 = vsel %vm573_vm1, %v14176_v11, 0.0 }
 0x5ed   : > { %13189 = vpow2.f32 %v1704_v16  ;;  %1725 = vadd.xlane.f32.xlu2 %v1724_v47 }
 0x5ee   : > { %1945 = vrot.lane.b32.xlu1 %v13702_v27, %s18455_s21 }
 0x5f3   : > { %v14182_v26 = vpop.eup %13189 }
 0x5f4   : > { %v1727_v12 = vsel %vm573_vm1, %v14182_v26, 0.0 }
 0x5f5   : > { %1728 = vadd.xlane.f32.xlu0 %v1727_v12 }
 0x5f6   : > { %2016 = vrot.lane.b32.xlu1 %v13732_v49, %s18457_s18 }
 0x5fe   : > { %2085 = vrot.lane.b32.xlu1 %v13730_v48, %s18457_s18 }
 0x600   : > { %v1971_v31 = vpop.permute.xlu1 %1970 }
 0x601   : > { %v1976_v50 = vsel %vm573_vm1, %v1971_v31, 0 }
 0x605   : > { %1991 = vrot.lane.b32.xlu2 %v13720_v42, %s18455_s21 }
 0x606   : > { %2060 = vrot.lane.b32.xlu1 %v13710_v33, %s18455_s21 }
 0x609   : > { %1968 = vrot.lane.b32.xlu0 %v13712_v35, %s18455_s21 }
 0x60d   : > { %2062 = vrot.lane.b32.xlu2 %v13710_v33, %s18457_s18 }
 0x611   : > { %2039 = vrot.lane.b32.xlu0 %v13743_v54, %s18457_s18  ;;  %s18475_s18 = smov 8  }
 0x615   : > { %2037 = vrot.lane.b32.xlu2 %v13743_v54, %s18455_s21 }
 0x619   : > { %2014 = vrot.lane.b32.xlu0 %v13732_v49, %s18455_s21  ;;  %v1708_v17 = vpop.xlane.xlu0 %1707 }
 0x61a   : > { %13191 = vrcp.f32 %v1708_v17 }
 0x620   : > { %v13192_v28 = vpop.eup %13191 }
 0x621   : > { %v1738_v24 = vmul.f32 %v13192_v28, %v14147_v2  ;;  %2083 = vrot.lane.b32.xlu0 %v13730_v48, %s18455_s21  ;;  %s18461_s21 = smov 40  }
 0x623   : > { %v1746_v22 = vpack.c.bf16 %v1738_v24, %v1738_v24 }
 0x625   : > { %10745 = vmatmul.msk.bf16.vlgmr.msra.gmra.mxu0 %vm573_vm1, %v1746_v22 }
 0x626   : > { %1939 = vmatpush.bf16.xpose.msra.mxu0 %v1930_v34 }
 0x632   : > { %v1714_v39 = vpop.xlane.xlu1 %1713 }
 0x633   : > { %13193 = vrcp.f32 %v1714_v39 }
 0x634   : > { %v1711_v40 = vpop.xlane.xlu2 %1710 }
 0x635   : > { %13195 = vrcp.f32 %v1711_v40 }
 0x639   : > { %v13194_v60 = vpop.eup %13193 }
 0x63a   : > { %v1740_v43 = vmul.f32 %v13194_v60, %v14155_v14 }
 0x63b   : > { %v13196_v2 = vpop.eup %13195 }
 0x63c   : > { %v1748_v46 = vpack.c.bf16 %v1740_v43, %v1740_v43  ;;  %v1739_v32 = vmul.f32 %v13196_v2, %v14159_v30 }
 0x63e   : > { %v1747_v51 = vpack.c.bf16 %v1739_v32, %v1739_v32  ;;  %10747 = vmatmul.msk.bf16.vlgmr.msra.gmra.mxu2 %vm573_vm1, %v1748_v46 }
 0x63f   : > { %1985 = vmatpush.bf16.xpose.msra.mxu2 %v1976_v50 }
 0x640   : > { %10746 = vmatmul.msk.bf16.vlgmr.msra.gmra.mxu1 %vm573_vm1, %v1747_v51 }
 0x641   : > { %1962 = vmatpush.bf16.xpose.msra.mxu1 %v1953_v3 }
 0x647   : > { %v1720_v36 = vpop.xlane.xlu0 %1719 }
 0x648   : > { %v1723_v37 = vpop.xlane.xlu1 %1722  ;;  %13197 = vrcp.f32 %v1720_v36 }
 0x649   : > { %13199 = vrcp.f32 %v1723_v37 }
 0x64e   : > { %v13198_v14 = vpop.eup %13197 }
 0x64f   : > { %v13200_v55 = vpop.eup %13199  ;;  %v1742_v30 = vmul.f32 %v13198_v14, %v14163_v44  ;;  %v1999_v44 = vsel %vm573_vm1, %v1994_v52, 0 }
 0x650   : > { %v1743_v63 = vmul.f32 %v13200_v55, %v14165_v45 }
 0x651   : > { %v1750_v58 = vpack.c.bf16 %v1742_v30, %v1742_v30 }
 0x652   : > { %v1751_v9 = vpack.c.bf16 %v1743_v63, %v1743_v63 }
 0x653   : > { %10749 = vmatmul.msk.bf16.vlgmr.msrb.gmra.mxu0 %vm573_vm1, %v1750_v58 }
 0x654   : > { %10750 = vmatmul.msk.bf16.vlgmr.msrb.gmra.mxu1 %vm573_vm1, %v1751_v9 }
 0x658   : > { %v1717_v7 = vpop.xlane.xlu0 %1716 }
 0x659   : > { %13201 = vrcp.f32 %v1717_v7 }
 0x65f   : > { %v13202_v57 = vpop.eup %13201 }
 0x660   : > { %v1741_v16 = vmul.f32 %v13202_v57, %v14172_v56  ;;  %v1946_v47 = vpop.permute.xlu1 %1945  ;;  %v1726_v12 = vpop.xlane.xlu2 %1725 }
 0x661   : > { %13203 = vrcp.f32 %v1726_v12 }
 0x662   : > { %v1749_v17 = vpack.c.bf16 %v1741_v16, %v1741_v16 }
 0x663   : > { %10753 = vmatmul.msk.bf16.vlgmr.msra.gmra.mxu0 %vm573_vm1, %v1923_v29 }
 0x664   : > { %10754 = vmatmul.msk.bf16.vlgmr.msra.gmra.mxu1 %vm573_vm1, %v1946_v47  ;;  %10748 = vmatmul.msk.bf16.vlgmr.msra.gmra.mxu3 %vm573_vm1, %v1749_v17 }
 0x665   : > { %2008 = vmatpush.bf16.xpose.msra.mxu3 %v1999_v44 }
 0x667   : > { %v13204_v45 = vpop.eup %13203 }
 0x668   : > { %v1744_v28 = vmul.f32 %v13204_v45, %v14176_v11  ;;  %v2017_v24 = vpop.permute.xlu1 %2016  ;;  %v1992_v22 = vpop.permute.xlu2 %1991 }
 0x669   : > { %v2022_v56 = vsel %vm573_vm1, %v2017_v24, 0  ;;  %v1729_v34 = vpop.xlane.xlu0 %1728 }
 0x66a   : > { %v1752_v31 = vpack.c.bf16 %v1744_v28, %v1744_v28  ;;  %13205 = vrcp.f32 %v1729_v34  ;;  %2031 = vmatpush.bf16.xpose.msrb.mxu0 %v2022_v56 }
 0x66c   : > { %10751 = vmatmul.msk.bf16.vlgmr.msrb.gmra.mxu2 %vm573_vm1, %v1752_v31 }
 0x670   : > { %v13206_v29 = vpop.eup %13205  ;;  %v2063_v52 = vpop.permute.xlu2 %2062 }
 0x671   : > { %v1745_v39 = vmul.f32 %v13206_v29, %v14182_v26  ;;  %v2068_v40 = vsel %vm573_vm1, %v2063_v52, 0  ;;  %v2086_v60 = vpop.permute.xlu1 %2085 }
 0x672   : > { %2077 = vmatpush.bf16.xpose.msrb.mxu2 %v2068_v40  ;;  %v2091_v11 = vsel %vm573_vm1, %v2086_v60, 0 }
 0x673   : > { %v1753_v43 = vpack.c.bf16 %v1745_v39, %v1745_v39 }
 0x675   : > { %10752 = vmatmul.msk.bf16.vlgmr.msrb.gmra.mxu3 %vm573_vm1, %v1753_v43 }
 0x676   : > { %2100 = vmatpush.bf16.xpose.msrb.mxu3 %v2091_v11 }
 0x678   : > { %v2038_v26 = vpop.permute.xlu2 %2037 }
 0x679   : > { %v2061_v51 = vpop.permute.xlu1 %2060 }
 0x67b   : > { %v1969_v2 = vpop.permute.xlu0 %1968 }
 0x67c   : > { %10755 = vmatmul.msk.bf16.vlgmr.msra.gmra.mxu2 %vm573_vm1, %v1969_v2 }
 0x683   : > { %v2040_v46 = vpop.permute.xlu0 %2039 }
 0x684   : > { %v2045_v32 = vsel %vm573_vm1, %v2040_v46, 0 }
 0x685   : > { %10756 = vmatmul.msk.bf16.vlgmr.msra.gmra.mxu3 %vm573_vm1, %v1992_v22  ;;  %2054 = vmatpush.bf16.xpose.msrb.mxu1 %v2045_v32 }
 0x68b   : > { %v2015_v50 = vpop.permute.xlu0 %2014 }
 0x68c   : > { %10757 = vmatmul.msk.bf16.vlgmr.msrb.gmra.mxu0 %vm573_vm1, %v2015_v50  ;;  %10758 = vmatmul.msk.bf16.vlgmr.msrb.gmra.mxu1 %vm573_vm1, %v2038_v26 }
 0x68d   : > { %10759 = vmatmul.msk.bf16.vlgmr.msrb.gmra.mxu2 %vm573_vm1, %v2061_v51 }
 0x693   : > { %v2084_v3 = vpop.permute.xlu0 %2083 }
 0x695   : > { %10760 = vmatmul.msk.bf16.vlgmr.msrb.gmra.mxu3 %vm573_vm1, %v2084_v3 }
 0x6a2   : > { %v14240_v36 = vpop.f32.mrf.mxu0 }
 0x6aa   : > { %v1773_v37 = vpop.f32.mrf.mxu0 }
 0x6bd   : > { %v14242_v14 = vpop.f32.mrf.mxu1 }
 0x6be   : > { %v12979_v55 = vpack.i.bf16 %v14242_v14, %v14240_v36 }
 0x6c1   : > { %v14246_v30 = vpop.f32.mrf.mxu2 }
 0x6c5   : > { %v1794_v63 = vpop.f32.mrf.mxu1 }
 0x6c9   : > { %v1815_v58 = vpop.f32.mrf.mxu2 }
 0x6d0   : > { %v14248_v9 = vpop.f32.mrf.mxu0 }
 0x6d1   : > { %v14250_v7 = vpop.f32.mrf.mxu1 }
 0x6d2   : > { %v13009_v57 = vpack.i.bf16 %v14250_v7, %v14248_v9 }
 0x6d8   : > { %v1857_v16 = vpop.f32.mrf.mxu0 }
 0x6d9   : > { %v1878_v47 = vpop.f32.mrf.mxu1 }
 0x6e0   : > { %v1941_v12 = vpop.f32.mrf.mxu0 }
 0x6e1   : > { %v1964_v17 = vpop.f32.mrf.mxu1  ;;  %v2106_v44 = vsel %vm573_vm1, %v1941_v12, -inf }
 0x6e2   : > { %v2109_v45 = vsel %vm573_vm1, %v1964_v17, -inf  ;;  %2107 = vmax.xlane.f32.xlu2 %v2106_v44 }
 0x6e3   : > { %2110 = vmax.xlane.f32.xlu1 %v2109_v45 }
 0x6e7   : > { %v14256_v28 = vpop.f32.mrf.mxu3 }
 0x6e8   : > { %v12994_v24 = vpack.i.bf16 %v14256_v28, %v14246_v30  ;;  %v1943_v22 = vpop.f32.mrf.mxu0 }
 0x6e9   : > { %v1966_v56 = vpop.f32.mrf.mxu1 }
 0x6ef   : > { %v1836_v34 = vpop.f32.mrf.mxu3  ;;  %v14260_v31 = vpop.f32.mrf.mxu2 }
 0x6f7   : > { %v1899_v29 = vpop.f32.mrf.mxu2 }
 0x6f8   : > { %v14262_v52 = vpop.f32.mrf.mxu3 }
 0x6f9   : > { %v13024_v39 = vpack.i.bf16 %v14262_v52, %v14260_v31 }
 0x6ff   : > { %v1987_v40 = vpop.f32.mrf.mxu2 }
 0x700   : > { %v1920_v60 = vpop.f32.mrf.mxu3  ;;  %v2112_v43 = vsel %vm573_vm1, %v1987_v40, -inf }
 0x701   : > { %2113 = vmax.xlane.f32.xlu0 %v2112_v43 }
 0x707   : > { %v1989_v11 = vpop.f32.mrf.mxu2 }
 0x708   : > { %v2010_v2 = vpop.f32.mrf.mxu3 }
 0x709   : > { %v2115_v46 = vsel %vm573_vm1, %v2010_v2, -inf  ;;  %v2033_v32 = vpop.f32.mrf.mxu0  ;;  %v2056_v26 = vpop.f32.mrf.mxu1 }
 0x70a   : > { %2116 = vmax.xlane.f32.xlu2 %v2115_v46  ;;  %v2121_v50 = vsel %vm573_vm1, %v2056_v26, -inf  ;;  %v2118_v51 = vsel %vm573_vm1, %v2033_v32, -inf }
 0x70b   : > { %2122 = vmax.xlane.f32.xlu0 %v2121_v50  ;;  %2119 = vmax.xlane.f32.xlu1 %v2118_v51 }
 0x710   : > { %v2012_v3 = vpop.f32.mrf.mxu3  ;;  %v14270_v37 = vpop.f32.mrf.mxu2 }
 0x711   : > { %v2124_v63 = vsel %vm573_vm1, %v14270_v37, -inf  ;;  %v2035_v58 = vpop.f32.mrf.mxu0  ;;  %v2058_v16 = vpop.f32.mrf.mxu1 }
 0x712   : > { %2125 = vmax.xlane.f32.xlu2 %v2124_v63 }
 0x718   : > { %v2081_v47 = vpop.f32.mrf.mxu2  ;;  %v2102_v44 = vpop.f32.mrf.mxu3 }
 0x719   : > { %v2127_v45 = vsel %vm573_vm1, %v2102_v44, -inf }
 0x71a   : > { %2128 = vmax.xlane.f32.xlu1 %v2127_v45 }
 0x71f   : > { %2223 = vrot.lane.b32.xlu0 %v13702_v27, %s18461_s21 }
 0x720   : > { %v2104_v22 = vpop.f32.mrf.mxu3 }
 0x727   : > { %2265 = vrot.lane.b32.xlu0 %v13720_v42, %s18461_s21 }
 0x72a   : > { %2244 = vrot.lane.b32.xlu2 %v13712_v35, %s18461_s21 }
 0x732   : > { %2286 = vrot.lane.b32.xlu2 %v13732_v49, %s18461_s21 }
 0x733   : > { %2202 = vrot.lane.b32.xlu1 %v13693_v19, %s18461_s21 }
 0x755   : > { %v2108_v56 = vpop.xlane.xlu2 %2107 }
 0x756   : > { %v2111_v34 = vpop.xlane.xlu1 %2110  ;;  %v2130_v29 = vsub.f32 %v1941_v12, %v2108_v56 }
 0x757   : > { %v2131_v60 = vsub.f32 %v1964_v17, %v2111_v34 }
 0x758   : > { %v2138_v43 = vmul.f32 1.442695, %v2130_v29 }
 0x759   : > { %v2140_v11 = vmul.f32 1.442695, %v2131_v60 }
 0x75a   : > { %13207 = vpow2.f32 %v2138_v43 }
 0x75b   : > { %13209 = vpow2.f32 %v2140_v11 }
 0x760   : > { %v14285_v27 = vpop.eup %13207 }
 0x761   : > { %v14287_v42 = vpop.eup %13209  ;;  %v2154_v35 = vsel %vm573_vm1, %v14285_v27, 0.0 }
 0x762   : > { %v2157_v49 = vsel %vm573_vm1, %v14287_v42, 0.0  ;;  %2155 = vadd.xlane.f32.xlu0 %v2154_v35 }
 0x763   : > { %2158 = vadd.xlane.f32.xlu2 %v2157_v49 }
 0x774   : > { %v2114_v19 = vpop.xlane.xlu0 %2113 }
 0x775   : > { %v2132_v46 = vsub.f32 %v1987_v40, %v2114_v19 }
 0x777   : > { %v2142_v12 = vmul.f32 1.442695, %v2132_v46 }
 0x779   : > { %13211 = vpow2.f32 %v2142_v12 }
 0x77d   : > { %v2117_v17 = vpop.xlane.xlu2 %2116 }
 0x77e   : > { %v2133_v50 = vsub.f32 %v2010_v2, %v2117_v17  ;;  %v2120_v51 = vpop.xlane.xlu1 %2119  ;;  %v2123_v3 = vpop.xlane.xlu0 %2122 }
 0x77f   : > { %v14293_v63 = vpop.eup %13211  ;;  %v2134_v58 = vsub.f32 %v2033_v32, %v2120_v51  ;;  %v2135_v16 = vsub.f32 %v2056_v26, %v2123_v3 }
 0x780   : > { %v2144_v47 = vmul.f32 1.442695, %v2133_v50  ;;  %v2160_v45 = vsel %vm573_vm1, %v14293_v63, 0.0 }
 0x781   : > { %v2146_v22 = vmul.f32 1.442695, %v2134_v58  ;;  %v2148_v56 = vmul.f32 1.442695, %v2135_v16  ;;  %2161 = vadd.xlane.f32.xlu2 %v2160_v45 }
 0x782   : > { %13213 = vpow2.f32 %v2144_v47 }
 0x783   : > { %13215 = vpow2.f32 %v2146_v22 }
 0x784   : > { %13217 = vpow2.f32 %v2148_v56 }
 0x785   : > { %v2126_v40 = vpop.xlane.xlu2 %2125 }
 0x788   : > { %v14297_v34 = vpop.eup %13213 }
 0x789   : > { %v14299_v2 = vpop.eup %13215  ;;  %v2163_v29 = vsel %vm573_vm1, %v14297_v34, 0.0 }
 0x78a   : > { %v14303_v32 = vpop.eup %13217  ;;  %2164 = vadd.xlane.f32.xlu2 %v2163_v29  ;;  %v2166_v26 = vsel %vm573_vm1, %v14299_v2, 0.0 }
 0x78b   : > { %2167 = vadd.xlane.f32.xlu1 %v2166_v26  ;;  %v2169_v60 = vsel %vm573_vm1, %v14303_v32, 0.0 }
 0x78c   : > { %2170 = vadd.xlane.f32.xlu0 %v2169_v60 }
 0x78d   : > { %v2245_v43 = vpop.permute.xlu2 %2244  ;;  %v2129_v11 = vpop.xlane.xlu1 %2128 }
 0x78e   : > { %v2250_v35 = vsel %vm862_vm2, %v2245_v43, 0  ;;  %v2137_v49 = vsub.f32 %v2102_v44, %v2129_v11 }
 0x78f   : > { %2259 = vmatpush.bf16.msra.mxu2 %v2250_v35 }
 0x790   : > { %v2152_v19 = vmul.f32 1.442695, %v2137_v49 }
 0x791   : > { %v2224_v46 = vpop.permute.xlu0 %2223 }
 0x792   : > { %13219 = vpow2.f32 %v2152_v19  ;;  %v2229_v12 = vsel %vm862_vm2, %v2224_v46, 0 }
 0x793   : > { %2238 = vmatpush.bf16.msra.mxu1 %v2229_v12 }
 0x795   : > { %v2287_v44 = vpop.permute.xlu2 %2286 }
 0x796   : > { %v2292_v47 = vsel %vm862_vm2, %v2287_v44, 0 }
 0x798   : > { %v14311_v17 = vpop.eup %13219 }
 0x799   : > { %v2175_v50 = vsel %vm573_vm1, %v14311_v17, 0.0  ;;  %v2266_v51 = vpop.permute.xlu0 %2265 }
 0x79a   : > { %2176 = vadd.xlane.f32.xlu1 %v2175_v50  ;;  %v2271_v3 = vsel %vm862_vm2, %v2266_v51, 0 }
 0x79b   : > { %2280 = vmatpush.bf16.msra.mxu3 %v2271_v3 }
 0x7a0   : > { %2328 = vrot.lane.b32.xlu0 %v13710_v33, %s18461_s21  ;;  %v2136_v33 = vsub.f32 %v14270_v37, %v2126_v40 }
 0x7a2   : > { %2307 = vrot.lane.b32.xlu2 %v13743_v54, %s18461_s21  ;;  %v2150_v54 = vmul.f32 1.442695, %v2136_v33 }
 0x7a4   : > { %13221 = vpow2.f32 %v2150_v54 }
 0x7a5   : > { %v2203_v58 = vpop.permute.xlu1 %2202 }
 0x7a6   : > { %v2208_v16 = vsel %vm862_vm2, %v2203_v58, 0 }
 0x7a7   : > { %2217 = vmatpush.bf16.msra.mxu0 %v2208_v16 }
 0x7a8   : > { %12975 = vrot.lane.b32.xlu0 %v12974_v6, %s18475_s18 }
 0x7aa   : > { %v13222_v59 = vpop.eup %13221 }
 0x7ab   : > { %2301 = vmatpush.bf16.msrb.mxu0 %v2292_v47  ;;  %v2172_v18 = vsel %vm573_vm1, %v13222_v59, 0.0 }
 0x7b0   : > { %12980 = vrot.lane.b32.xlu0 %v12979_v55, %s18473_s22 }
 0x7b3   : > { %2349 = vrot.lane.b32.xlu1 %v13730_v48, %s18461_s21  ;;  %s18471_s21 = smov 24  }
 0x7b8   : > { %12995 = vrot.lane.b32.xlu0 %v12994_v24, %s18473_s22 }
 0x7c0   : > { %13005 = vrot.lane.b32.xlu0 %v13004_v20, %s18475_s18 }
 0x7cb   : > { %2173 = vadd.xlane.f32.xlu2 %v2172_v18 }
 0x7d5   : > { %v2156_v6 = vpop.xlane.xlu0 %2155 }
 0x7d6   : > { %v2159_v48 = vpop.xlane.xlu2 %2158  ;;  %13223 = vrcp.f32 %v2156_v6 }
 0x7d7   : > { %13225 = vrcp.f32 %v2159_v48 }
 0x7dc   : > { %v13224_v36 = vpop.eup %13223 }
 0x7dd   : > { %v13226_v14 = vpop.eup %13225  ;;  %v2186_v55 = vmul.f32 %v13224_v36, %v14285_v27 }
 0x7de   : > { %v2187_v30 = vmul.f32 %v13226_v14, %v14287_v42 }
 0x7df   : > { %v2194_v28 = vpack.c.bf16 %v2186_v55, %v2186_v55  ;;  %v12591_v55 = vld [vmem:[%s18437_s4 + $0x8] sm:$0xff] }
 0x7e0   : > { %v2195_v24 = vpack.c.bf16 %v2187_v30, %v2187_v30 }
 0x7e1   : > { %10761 = vmatmul.msk.bf16.vlgmr.msra.gmra.mxu0 %vm573_vm1, %v2194_v28  ;;  %v12590_v28 = vld [vmem:[%s18437_s4] sm:$0xff] }
 0x7e2   : > { %10762 = vmatmul.msk.bf16.vlgmr.msra.gmra.mxu1 %vm573_vm1, %v2195_v24  ;;  %2534 = vmatpush.bf16.msra.mxu0 %v12591_v55 }
 0x7e3   : > { %12990 = vrot.lane.b32.xlu2 %v12989_v15, %s18475_s18 }
 0x7e6   : > { %2535 = vmatpush.bf16.msra.mxu0 %v12590_v28 }
 0x7eb   : > { %13025 = vrot.lane.b32.xlu2 %v13024_v39, %s18473_s22 }
 0x7f4   : > { %v2162_v8 = vpop.xlane.xlu2 %2161 }
 0x7f5   : > { %13227 = vrcp.f32 %v2162_v8 }
 0x7fb   : > { %v13228_v23 = vpop.eup %13227 }
 0x7fc   : > { %v2188_v20 = vmul.f32 %v13228_v23, %v14293_v63 }
 0x7fd   : > { %v2165_v37 = vpop.xlane.xlu2 %2164 }
 0x7fe   : > { %v2196_v27 = vpack.c.bf16 %v2188_v20, %v2188_v20  ;;  %13229 = vrcp.f32 %v2165_v37  ;;  %v2168_v42 = vpop.xlane.xlu1 %2167 }
 0x7ff   : > { %13231 = vrcp.f32 %v2168_v42  ;;  %v2171_v45 = vpop.xlane.xlu0 %2170 }
 0x800   : > { %13233 = vrcp.f32 %v2171_v45  ;;  %10763 = vmatmul.msk.bf16.vlgmr.msra.gmra.mxu2 %vm573_vm1, %v2196_v27 }
 0x804   : > { %v13230_v53 = vpop.eup %13229 }
 0x805   : > { %v13232_v10 = vpop.eup %13231  ;;  %v2189_v15 = vmul.f32 %v13230_v53, %v14297_v34  ;;  %v2308_v31 = vpop.permute.xlu2 %2307 }
 0x806   : > { %v13234_v52 = vpop.eup %13233  ;;  %v2190_v39 = vmul.f32 %v13232_v10, %v14299_v2  ;;  %v2313_v22 = vsel %vm862_vm2, %v2308_v31, 0 }
 0x807   : > { %v2197_v63 = vpack.c.bf16 %v2189_v15, %v2189_v15  ;;  %v2191_v56 = vmul.f32 %v13234_v52, %v14303_v32  ;;  %2322 = vmatpush.bf16.msrb.mxu1 %v2313_v22 }
 0x808   : > { %v2198_v40 = vpack.c.bf16 %v2190_v39, %v2190_v39 }
 0x809   : > { %v2199_v29 = vpack.c.bf16 %v2191_v56, %v2191_v56  ;;  %10764 = vmatmul.msk.bf16.vlgmr.msra.gmra.mxu3 %vm573_vm1, %v2197_v63 }
 0x80a   : > { %10765 = vmatmul.msk.bf16.vlgmr.msrb.gmra.mxu0 %vm573_vm1, %v2198_v40 }
 0x80b   : > { %10766 = vmatmul.msk.bf16.vlgmr.msrb.gmra.mxu1 %vm573_vm1, %v2199_v29 }
 0x80d   : > { %v2177_v60 = vpop.xlane.xlu1 %2176 }
 0x80e   : > { %13235 = vrcp.f32 %v2177_v60 }
 0x812   : > { %v2329_v26 = vpop.permute.xlu0 %2328 }
 0x813   : > { %v2334_v34 = vsel %vm862_vm2, %v2329_v26, 0 }
 0x814   : > { %2343 = vmatpush.bf16.msrb.mxu2 %v2334_v34  ;;  %v13236_v2 = vpop.eup %13235 }
 0x815   : > { %v2193_v43 = vmul.f32 %v13236_v2, %v14311_v17 }
 0x817   : > { %v2201_v35 = vpack.c.bf16 %v2193_v43, %v2193_v43 }
 0x81a   : > { %v12976_v24 = vpop.permute.xlu0 %12975 }
 0x81b   : > { %v12978_v21 = vunpack.i.h.bf16 %v12976_v24  ;;  %v12977_v38 = vunpack.i.l.bf16 %v12976_v24 }
 0x81d   : > { %v2467_v20 = vsel %vm573_vm1, %v13946_v62, %v12978_v21  ;;  %v2466_v37 = vsel %vm573_vm1, %v13944_v61, %v12977_v38 }
 0x825   : > { %v2350_v11 = vpop.permute.xlu1 %2349 }
 0x826   : > { %v2355_v32 = vsel %vm862_vm2, %v2350_v11, 0 }
 0x827   : > { %2364 = vmatpush.bf16.msrb.mxu3 %v2355_v32 }
 0x82a   : > { %10768 = vmatmul.msk.bf16.vlgmr.msrb.gmra.mxu3 %vm573_vm1, %v2201_v35 }
 0x83e   : > { %v2174_v49 = vpop.xlane.xlu2 %2173 }
 0x83f   : > { %13237 = vrcp.f32 %v2174_v49 }
 0x845   : > { %v13238_v19 = vpop.eup %13237 }
 0x846   : > { %v2192_v46 = vmul.f32 %v13238_v19, %v13222_v59  ;;  %v12991_v39 = vpop.permute.xlu2 %12990 }
 0x847   : > { %v12993_v62 = vunpack.i.h.bf16 %v12991_v39  ;;  %v12992_v63 = vunpack.i.l.bf16 %v12991_v39 }
 0x848   : > { %v2200_v12 = vpack.c.bf16 %v2192_v46, %v2192_v46 }
 0x849   : > { %v2469_v61 = vsel %vm573_vm1, %v13948_v0, %v12993_v62  ;;  %v2468_v56 = vsel %vm573_vm1, %v13950_v1, %v12992_v63  ;;  %v13452_v62 = vld [vmem:[%s13673_s25 + $0x18] sm:$0xff] }
 0x84a   : > { %10767 = vmatmul.msk.bf16.vlgmr.msrb.gmra.mxu2 %vm573_vm1, %v2200_v12 }
 0x85e   : > { %v2219_v50 = vpop.f32.mrf.mxu0 }
 0x85f   : > { %v2240_v51 = vpop.f32.mrf.mxu1 }
 0x860   : > { %v12984_v3 = vpack.i.bf16 %v2240_v51, %v2219_v50 }
 0x862   : > { %12985 = vrot.lane.b32.xlu1 %v12984_v3, %s18471_s21 }
 0x866   : > { %v2221_v17 = vpop.f32.mrf.mxu0 }
 0x867   : > { %v2242_v44 = vpop.f32.mrf.mxu1 }
 0x883   : > { %v2261_v58 = vpop.f32.mrf.mxu2 }
 0x887   : > { %v2303_v16 = vpop.f32.mrf.mxu0 }
 0x888   : > { %v2324_v47 = vpop.f32.mrf.mxu1 }
 0x889   : > { %v13014_v33 = vpack.i.bf16 %v2324_v47, %v2303_v16 }
 0x88b   : > { %13015 = vrot.lane.b32.xlu0 %v13014_v33, %s18471_s21  ;;  %v2263_v54 = vpop.f32.mrf.mxu2 }
 0x88c   : > { %v2282_v18 = vpop.f32.mrf.mxu3 }
 0x88d   : > { %v12999_v59 = vpack.i.bf16 %v2282_v18, %v2261_v58 }
 0x88f   : > { %13000 = vrot.lane.b32.xlu1 %v12999_v59, %s18471_s21  ;;  %v2305_v6 = vpop.f32.mrf.mxu0 }
 0x890   : > { %v2326_v48 = vpop.f32.mrf.mxu1 }
 0x894   : > { %v2284_v36 = vpop.f32.mrf.mxu3 }
 0x897   : > { %13010 = vrot.lane.b32.xlu1 %v13009_v57, %s18473_s22  ;;  %v12981_v57 = vpop.permute.xlu0 %12980  ;;  %s18555_s22 = smov 72  }
 0x898   : > { %v12982_v8 = vunpack.i.l.bf16 %v12981_v57 }
 0x89a   : > { %v2475_v53 = vsel %vm2474_vm3, %v2466_v37, %v12982_v8 }
 0x89f   : > { %13020 = vrot.lane.b32.xlu1 %v13019_v41, %s18475_s18  ;;  %v12983_v41 = vunpack.i.h.bf16 %v12981_v57  ;;  %v12996_v22 = vpop.permute.xlu0 %12995  ;;  %s18554_s18 = smov 48  }
 0x8a0   : > { %v12998_v40 = vunpack.i.h.bf16 %v12996_v22  ;;  %v12997_v29 = vunpack.i.l.bf16 %v12996_v22 }
 0x8a1   : > { %v2476_v10 = vsel %vm2474_vm3, %v2467_v20, %v12983_v41  ;;  %v13449_v41 = vld [vmem:[%s13673_s25] sm:$0xff] }
 0x8a2   : > { %v2477_v2 = vsel %vm2474_vm3, %v2468_v56, %v12997_v29  ;;  %v2478_v43 = vsel %vm2474_vm3, %v2469_v61, %v12998_v40  ;;  %v13453_v29 = vld [vmem:[%s13673_s25 + $0x20] sm:$0xff] }
 0x8a7   : > { %v13006_v35 = vpop.permute.xlu0 %13005 }
 0x8a8   : > { %v13008_v19 = vunpack.i.h.bf16 %v13006_v35  ;;  %v13007_v1 = vunpack.i.l.bf16 %v13006_v35  ;;  %v13535_v35 = vmov 32.0  }
 0x8a9   : > { %13239 = vrcp.f32 %v13535_v35 }
 0x8aa   : > { %v2471_v51 = vsel %vm573_vm1, %v13954_v5, %v13008_v19  ;;  %v2470_v3 = vsel %vm573_vm1, %v13960_v13, %v13007_v1  ;;  %v13026_v5 = vpop.permute.xlu2 %13025 }
 0x8ab   : > { %v13028_v36 = vunpack.i.h.bf16 %v13026_v5 }
 0x8ad   : > { %v2366_v14 = vpop.f32.mrf.mxu3 }
 0x8b5   : > { %v2368_v30 = vpop.f32.mrf.mxu3 }
 0x8cd   : > { %v2345_v9 = vpop.f32.mrf.mxu2 }
 0x8ce   : > { %v13029_v7 = vpack.i.bf16 %v2366_v14, %v2345_v9  ;;  %v13027_v14 = vunpack.i.l.bf16 %v13026_v5 }
 0x8d0   : > { %13030 = vrot.lane.b32.xlu0 %v13029_v7, %s18471_s21  ;;  %s18549_s21 = smov 120  }
 0x8d4   : > { %v12986_v23 = vpop.permute.xlu1 %12985 }
 0x8d5   : > { %v12988_v27 = vunpack.i.h.bf16 %v12986_v23  ;;  %v12987_v42 = vunpack.i.l.bf16 %v12986_v23  ;;  %v2347_v45 = vpop.f32.mrf.mxu2 }
 0x8d7   : > { %v2484_v15 = vsel %vm2483_vm4, %v2475_v53, %v12987_v42  ;;  %v2485_v31 = vsel %vm2483_vm4, %v2476_v10, %v12988_v27  ;;  %v13450_v27 = vld [vmem:[%s13673_s25 + $0x8] sm:$0xff] }
 0x8d8   : > { %v2492_v52 = vpack.c.bf16 %v2485_v31, %v2484_v15  ;;  %v13451_v15 = vld [vmem:[%s13673_s25 + $0x10] sm:$0xff] }
 0x8da   : > { %10777 = vmatmul.msk.bf16.vlgmr.msra.gmra.mxu0 %vm518_vm0, %v2492_v52 }
 0x8fd   : > { %v13016_v50 = vpop.permute.xlu0 %13015 }
 0x8fe   : > { %v13018_v58 = vunpack.i.h.bf16 %v13016_v50  ;;  %v13017_v16 = vunpack.i.l.bf16 %v13016_v50  ;;  %v13455_v50 = vld [vmem:[%s13673_s25 + $0x30] sm:$0xff] }
 0x901   : > { %v13001_v26 = vpop.permute.xlu1 %13000 }
 0x902   : > { %v13003_v34 = vunpack.i.h.bf16 %v13001_v26  ;;  %v13002_v60 = vunpack.i.l.bf16 %v13001_v26 }
 0x904   : > { %v2486_v11 = vsel %vm2483_vm4, %v2477_v2, %v13002_v60  ;;  %v2487_v32 = vsel %vm2483_vm4, %v2478_v43, %v13003_v34  ;;  %v13454_v43 = vld [vmem:[%s13673_s25 + $0x28] sm:$0xff] }
 0x905   : > { %v2493_v49 = vpack.c.bf16 %v2487_v32, %v2486_v11 }
 0x907   : > { %10778 = vmatmul.msk.bf16.gmra.mxu0 %vm518_vm0, %v2493_v49  ;;  %v13240_v49 = vpop.eup %13239 }
 0x908   : > { %vm2596_vm5 = vweird.f32 %v13240_v49 }
 0x909   : > { %v13011_v0 = vpop.permute.xlu1 %13010 }
 0x90a   : > { %v13013_v46 = vunpack.i.h.bf16 %v13011_v0  ;;  %v13012_v12 = vunpack.i.l.bf16 %v13011_v0  ;;  %v2592_v0 = vmul.f32 32.0, %v13240_v49 }
 0x90c   : > { %v2479_v17 = vsel %vm2474_vm3, %v2470_v3, %v13012_v12  ;;  %v2480_v44 = vsel %vm2474_vm3, %v2471_v51, %v13013_v46  ;;  %v2593_v19 = vsub.f32 1.0, %v2592_v0  ;;  %v10783_v0 = vld [vmem:[%s18443_s10] sm:$0xf] }
 0x90d   : > { %v2488_v47 = vsel %vm2483_vm4, %v2479_v17, %v13017_v16  ;;  %v2489_v33 = vsel %vm2483_vm4, %v2480_v44, %v13018_v58 }
 0x90e   : > { %v2494_v54 = vpack.c.bf16 %v2489_v33, %v2488_v47  ;;  %v2594_v12 = vmul.f32 %v13240_v49, %v2593_v19  ;;  %v12594_v19 = vld [vmem:[%s18443_s10 + $0x3c] sm:$0xf0] }
 0x910   : > { %v2595_v17 = vadd.f32 %v13240_v49, %v2594_v12  ;;  %v10784_v12 = vor.u32 %v12594_v19, %v10783_v0 }
 0x911   : > { %v13021_v18 = vpop.permute.xlu1 %13020 }
 0x912   : > { %v13023_v59 = vunpack.i.h.bf16 %v13021_v18  ;;  %v13022_v6 = vunpack.i.l.bf16 %v13021_v18  ;;  %v14439_v44 = vsel %vm2596_vm5, %v13240_v49, %v2595_v17  ;;  %v12595_v17 = vld [vmem:[%s18443_s10 + $0x44] sm:$0xf0] }
 0x913   : > { %18499 = vst [vmem:[#allocation9_spill] sm:$0xff] %v14439_v44 }
 0x914   : > { %v2473_v13 = vsel %vm573_vm1, %v13958_v25, %v13023_v59  ;;  %v2472_v48 = vsel %vm573_vm1, %v13952_v4, %v13022_v6  ;;  %v13098_v4 = vld [vmem:[%s18438_s5] ss:$0 sm:$0xff] }
 0x915   : > { %v2481_v24 = vsel %vm2474_vm3, %v2472_v48, %v13027_v14  ;;  %v2482_v9 = vsel %vm2474_vm3, %v2473_v13, %v13028_v36  ;;  %v13456_v48 = vld [vmem:[%s13673_s25 + $0x38] sm:$0xff]  ;;  %s18557_s25 = smov 40  }
 0x917   : > { %10779 = vmatmul.msk.bf16.gmra.mxu0 %vm518_vm0, %v2494_v54 }
 0x942   : > { %v13031_v55 = vpop.permute.xlu0 %13030 }
 0x943   : > { %v13033_v30 = vunpack.i.h.bf16 %v13031_v55  ;;  %v13032_v28 = vunpack.i.l.bf16 %v13031_v55 }
 0x945   : > { %v2491_v7 = vsel %vm2483_vm4, %v2482_v9, %v13033_v30  ;;  %v2490_v57 = vsel %vm2483_vm4, %v2481_v24, %v13032_v28 }
 0x946   : > { %v2495_v21 = vpack.c.bf16 %v2491_v7, %v2490_v57 }
 0x948   : > { %10780 = vmatmul.msk.bf16.gmra.mxu0 %vm518_vm0, %v2495_v21 }
 0x957   : > { %v2537_v25 = vpop.f32.mrf.mxu0 }
 0x958   : > { %v2538_v38 = vadd.f32 %v13098_v4, %v2537_v25 }
 0x95a   : > { %v2557_v8 = vadd.f32 %v13449_v41, %v2538_v38 }
 0x95c   : > { %v2567_v23 = vsel %vm518_vm0, %v2557_v8, 0.0 }
 0x95d   : > { %2568 = vadd.xlane.f32.xlu1 %v2567_v23 }
 0x95f   : > { %v2539_v20 = vpop.f32.mrf.mxu0 }
 0x960   : > { %v2540_v37 = vadd.f32 %v13098_v4, %v2539_v20 }
 0x962   : > { %v2558_v42 = vadd.f32 %v13450_v27, %v2540_v37 }
 0x964   : > { %v2570_v45 = vsel %vm518_vm0, %v2558_v42, 0.0 }
 0x965   : > { %2571 = vadd.xlane.f32.xlu2 %v2570_v45 }
 0x984   : > { %v2542_v53 = vpop.f32.mrf.mxu0 }
 0x985   : > { %v2543_v10 = vadd.f32 %v13098_v4, %v2542_v53 }
 0x987   : > { %v2559_v31 = vadd.f32 %v13451_v15, %v2543_v10 }
 0x989   : > { %v2573_v52 = vsel %vm518_vm0, %v2559_v31, 0.0 }
 0x98a   : > { %2574 = vadd.xlane.f32.xlu0 %v2573_v52 }
 0x98c   : > { %v2544_v39 = vpop.f32.mrf.mxu0 }
 0x98d   : > { %v2545_v22 = vadd.f32 %v13098_v4, %v2544_v39 }
 0x98f   : > { %v2560_v63 = vadd.f32 %v13452_v62, %v2545_v22 }
 0x991   : > { %v2576_v61 = vsel %vm518_vm0, %v2560_v63, 0.0 }
 0x992   : > { %2577 = vadd.xlane.f32.xlu2 %v2576_v61  ;;  %v12598_v61 = vld [vmem:[%s18443_s10 + $0xbc] sm:$0xf0] }
 0x994   : > { %v2547_v56 = vpop.f32.mrf.mxu0 }
 0x995   : > { %v2548_v40 = vadd.f32 %v13098_v4, %v2547_v56  ;;  %v12596_v56 = vld [vmem:[%s18443_s10 + $0x84] sm:$0xf] }
 0x997   : > { %v2561_v26 = vadd.f32 %v13453_v29, %v2548_v40  ;;  %v10801_v29 = vld [vmem:[%s18443_s10 + $0xc0] sm:$0xf0] }
 0x999   : > { %v2579_v34 = vsel %vm518_vm0, %v2561_v26, 0.0 }
 0x99a   : > { %2580 = vadd.xlane.f32.xlu1 %v2579_v34  ;;  %v12599_v34 = vld [vmem:[%s18443_s10 + $0xc4] sm:$0xf0] }
 0x99c   : > { %v2549_v60 = vpop.f32.mrf.mxu0 }
 0x99d   : > { %v2550_v2 = vadd.f32 %v13098_v4, %v2549_v60 }
 0x99f   : > { %v2562_v11 = vadd.f32 %v13454_v43, %v2550_v2  ;;  %v10804_v2 = vor.u32 %v12596_v56, %v10801_v29 }
 0x9a1   : > { %v2582_v32 = vsel %vm518_vm0, %v2562_v11, 0.0  ;;  %2881 = vmatpush.bf16.msra.mxu2 %v10804_v2 }
 0x9a2   : > { %2583 = vadd.xlane.f32.xlu2 %v2582_v32  ;;  %v10809_v32 = vld [vmem:[%s18443_s10 + $0xc8] sm:$0xf0] }
 0x9c5   : > { %v2552_v1 = vpop.f32.mrf.mxu0 }
 0x9c6   : > { %v2553_v46 = vadd.f32 %v13098_v4, %v2552_v1  ;;  %v12592_v1 = vld [vmem:[%s18443_s10 + $0x4] sm:$0xf] }
 0x9c8   : > { %v2563_v51 = vadd.f32 %v13455_v50, %v2553_v46  ;;  %v10785_v50 = vld [vmem:[%s18443_s10 + $0x40] sm:$0xf0] }
 0x9ca   : > { %v2585_v3 = vsel %vm518_vm0, %v2563_v51, 0.0 }
 0x9cb   : > { %2586 = vadd.xlane.f32.xlu2 %v2585_v3  ;;  %v10788_v3 = vor.u32 %v12592_v1, %v10785_v50 }
 0x9cd   : > { %v2554_v33 = vpop.f32.mrf.mxu0  ;;  %2882 = vmatpush.bf16.msra.mxu2 %v10788_v3 }
 0x9ce   : > { %v2555_v18 = vadd.f32 %v13098_v4, %v2554_v33 }
 0x9d0   : > { %v2569_v58 = vpop.xlane.xlu1 %2568  ;;  %v14451_v36 = vadd.f32 %v13456_v48, %v2555_v18 }
 0x9d1   : > { %v2598_v16 = vmul.f32 %v14439_v44, %v2569_v58  ;;  %v12593_v58 = vld [vmem:[%s18443_s10 + $0xc] sm:$0xf] }
 0x9d2   : > { %v2588_v30 = vsel %vm518_vm0, %v14451_v36, 0.0 }
 0x9d3   : > { %v14442_v47 = vsub.f32 %v2557_v8, %v2598_v16  ;;  %v10793_v16 = vld [vmem:[%s18443_s10 + $0x48] sm:$0xf0] }
 0x9d5   : > { %v2614_v54 = vmul.f32 %v14442_v47, %v14442_v47 }
 0x9d7   : > { %v2622_v59 = vsel %vm518_vm0, %v2614_v54, 0.0  ;;  %v10796_v54 = vor.u32 %v12593_v58, %v10793_v16 }
 0x9d8   : > { %v2572_v6 = vpop.xlane.xlu2 %2571  ;;  %2623 = vadd.xlane.f32.xlu0 %v2622_v59 }
 0x9d9   : > { %v2599_v5 = vmul.f32 %v14439_v44, %v2572_v6 }
 0x9db   : > { %v14448_v13 = vsub.f32 %v2558_v42, %v2599_v5 }
 0x9dd   : > { %v2615_v14 = vmul.f32 %v14448_v13, %v14448_v13 }
 0x9df   : > { %v2625_v55 = vsel %vm518_vm0, %v2615_v14, 0.0 }
 0x9e0   : > { %2626 = vadd.xlane.f32.xlu1 %v2625_v55  ;;  %2589 = vadd.xlane.f32.xlu0 %v2588_v30 }
 0x9fd   : > { %v2575_v28 = vpop.xlane.xlu0 %2574 }
 0x9fe   : > { %v2600_v24 = vmul.f32 %v14439_v44, %v2575_v28 }
 0xa00   : > { %v14459_v9 = vsub.f32 %v2559_v31, %v2600_v24 }
 0xa02   : > { %v2616_v7 = vmul.f32 %v14459_v9, %v14459_v9 }
 0xa04   : > { %v2628_v57 = vsel %vm518_vm0, %v2616_v7, 0.0 }
 0xa05   : > { %v2578_v21 = vpop.xlane.xlu2 %2577  ;;  %2629 = vadd.xlane.f32.xlu1 %v2628_v57 }
 0xa06   : > { %v2601_v4 = vmul.f32 %v14439_v44, %v2578_v21 }
 0xa08   : > { %v14465_v25 = vsub.f32 %v2560_v63, %v2601_v4  ;;  %v10799_v63 = vld [vmem:[%s18443_s10 + $0x80] sm:$0xf] }
 0xa09   : > { %v10800_v40 = vor.u32 %v12598_v61, %v10799_v63 }
 0xa0a   : > { %v2617_v38 = vmul.f32 %v14465_v25, %v14465_v25 }
 0xa0b   : > { %2852 = vmatpush.bf16.msra.mxu1 %v10800_v40 }
 0xa0c   : > { %v2631_v41 = vsel %vm518_vm0, %v2617_v38, 0.0 }
 0xa0d   : > { %2632 = vadd.xlane.f32.xlu2 %v2631_v41  ;;  %v2581_v8 = vpop.xlane.xlu1 %2580 }
 0xa0e   : > { %v2602_v23 = vmul.f32 %v14439_v44, %v2581_v8 }
 0xa0f   : > { %2853 = vmatpush.bf16.msra.mxu1 %v10784_v12 }
 0xa10   : > { %v14471_v20 = vsub.f32 %v2561_v26, %v2602_v23  ;;  %v10807_v26 = vld [vmem:[%s18443_s10 + $0x88] sm:$0xf] }
 0xa11   : > { %v10808_v43 = vor.u32 %v12599_v34, %v10807_v26 }
 0xa12   : > { %v2618_v37 = vmul.f32 %v14471_v20, %v14471_v20 }
 0xa13   : > { %2910 = vmatpush.bf16.msra.mxu3 %v10808_v43 }
 0xa14   : > { %v2634_v27 = vsel %vm518_vm0, %v2618_v37, 0.0 }
 0xa15   : > { %v2584_v42 = vpop.xlane.xlu2 %2583  ;;  %2635 = vadd.xlane.f32.xlu0 %v2634_v27  ;;  %v14548_v27 = vld [vmem:[%s18439_s6] ss:$0 sm:$0xff] }
 0xa16   : > { %v2603_v45 = vmul.f32 %v14439_v44, %v2584_v42 }
 0xa18   : > { %v14477_v53 = vsub.f32 %v2562_v11, %v2603_v45  ;;  %v12597_v11 = vld [vmem:[%s18443_s10 + $0x8c] sm:$0xf] }
 0xa19   : > { %v10812_v49 = vor.u32 %v12597_v11, %v10809_v32 }
 0xa1a   : > { %v2619_v10 = vmul.f32 %v14477_v53, %v14477_v53 }
 0xa1b   : > { %2939 = vmatpush.bf16.msrb.mxu0 %v10812_v49 }
 0xa1c   : > { %v2637_v15 = vsel %vm518_vm0, %v2619_v10, 0.0 }
 0xa1d   : > { %2638 = vadd.xlane.f32.xlu1 %v2637_v15  ;;  %v14554_v15 = vld [vmem:[%s18440_s7] ss:$0 sm:$0xff] }
 0xa1f   : > { %2940 = vmatpush.bf16.msrb.mxu0 %v10796_v54 }
 0xa3e   : > { %v2587_v31 = vpop.xlane.xlu2 %2586 }
 0xa3f   : > { %v2604_v52 = vmul.f32 %v14439_v44, %v2587_v31 }
 0xa41   : > { %v14483_v39 = vsub.f32 %v2563_v51, %v2604_v52  ;;  %v10791_v51 = vld [vmem:[%s18443_s10 + $0x8] sm:$0xf] }
 0xa42   : > { %v10792_v33 = vor.u32 %v12595_v17, %v10791_v51 }
 0xa43   : > { %v2620_v22 = vmul.f32 %v14483_v39, %v14483_v39 }
 0xa44   : > { %2911 = vmatpush.bf16.msra.mxu3 %v10792_v33 }
 0xa45   : > { %v2640_v62 = vsel %vm518_vm0, %v2620_v22, 0.0 }
 0xa46   : > { %2641 = vadd.xlane.f32.xlu2 %v2640_v62 }
 0xa4b   : > { %v2624_v60 = vpop.xlane.xlu0 %2623 }
 0xa4c   : > { %v2646_v35 = vmul.f32 %v2624_v60, %v14439_v44 }
 0xa4e   : > { %v2654_v46 = vadd.f32 1e-05, %v2646_v35 }
 0xa50   : > { %13241 = vrsqrt.f32 %v2654_v46  ;;  %vm2668_vm7 = vweird.f32 %v2654_v46 }
 0xa53   : > { %v2590_v18 = vpop.xlane.xlu0 %2589  ;;  %v2627_v59 = vpop.xlane.xlu1 %2626 }
 0xa54   : > { %v2605_v6 = vmul.f32 %v14439_v44, %v2590_v18  ;;  %v2647_v5 = vmul.f32 %v2627_v59, %v14439_v44 }
 0xa56   : > { %v13242_v48 = vpop.eup %13241  ;;  %v14540_v14 = vsub.f32 %v14451_v36, %v2605_v6  ;;  %v2655_v55 = vadd.f32 1e-05, %v2647_v5 }
 0xa57   : > { %v2663_v30 = vmul.f32 %v13242_v48, %v2654_v46  ;;  %vm2669_vm6 = vweird.f32 %v13242_v48 }
 0xa58   : > { %13243 = vrsqrt.f32 %v2655_v55  ;;  %v2621_v28 = vmul.f32 %v14540_v14, %v14540_v14  ;;  %vm2670_vm8 = vmor %vm2668_vm7, %vm2669_vm6  ;;  %vm2678_vm10 = vweird.f32 %v2655_v55 }
 0xa59   : > { %v2664_v24 = vmul.f32 %v13242_v48, %v2663_v30 }
 0xa5a   : > { %v2643_v7 = vsel %vm518_vm0, %v2621_v28, 0.0 }
 0xa5b   : > { %v2665_v57 = vmul.f32 0.5, %v2664_v24  ;;  %2644 = vadd.xlane.f32.xlu0 %v2643_v7 }
 0xa5d   : > { %v2666_v21 = vsub.f32 1.5, %v2665_v57 }
 0xa5e   : > { %v13244_v4 = vpop.eup %13243 }
 0xa5f   : > { %v2667_v38 = vmul.f32 %v13242_v48, %v2666_v21  ;;  %v2673_v41 = vmul.f32 %v13244_v4, %v2655_v55  ;;  %vm2679_vm9 = vweird.f32 %v13244_v4 }
 0xa60   : > { %vm2680_vm11 = vmor %vm2678_vm10, %vm2679_vm9 }
 0xa61   : > { %v2674_v8 = vmul.f32 %v13244_v4, %v2673_v41  ;;  %v2671_v36 = vsel %vm2670_vm8, %v13242_v48, %v2667_v38 }
 0xa62   : > { %v2742_v42 = vmul.f32 %v2671_v36, %v14442_v47 }
 0xa63   : > { %v2675_v23 = vmul.f32 0.5, %v2674_v8 }
 0xa64   : > { %v2753_v31 = vmul.f32 %v14548_v27, %v2742_v42 }
 0xa65   : > { %v2676_v37 = vsub.f32 1.5, %v2675_v23 }
 0xa66   : > { %v14560_v62 = vadd.f32 %v14554_v15, %v2753_v31 }
 0xa67   : > { %v2677_v45 = vmul.f32 %v13244_v4, %v2676_v37 }
 0xa69   : > { %v2681_v10 = vsel %vm2680_vm11, %v13244_v4, %v2677_v45 }
 0xa6a   : > { %v2743_v52 = vmul.f32 %v2681_v10, %v14448_v13 }
 0xa6c   : > { %v2754_v22 = vmul.f32 %v14548_v27, %v2743_v52 }
 0xa6e   : > { %v14563_v47 = vadd.f32 %v14554_v15, %v2754_v22 }
 0xa70   : > { %v14567_v63 = vpack.c.bf16 %v14563_v47, %v14560_v62 }
 0xa72   : > { %10813 = vmatmul.msk.bf16.vlgmr.msra.gmra.mxu1 %vm518_vm0, %v14567_v63  ;;  %10817 = vmatmul.msk.bf16.vlgmr.msra.gmra.mxu2 %vm518_vm0, %v14567_v63 }
 0xa73   : > { %10821 = vmatmul.msk.bf16.vlgmr.msra.gmra.mxu3 %vm518_vm0, %v14567_v63  ;;  %10825 = vmatmul.msk.bf16.vlgmr.msrb.gmra.mxu0 %vm518_vm0, %v14567_v63 }
 0xa78   : > { %v2630_v13 = vpop.xlane.xlu1 %2629 }
 0xa79   : > { %v2648_v61 = vmul.f32 %v2630_v13, %v14439_v44 }
 0xa7b   : > { %v2656_v56 = vadd.f32 1e-05, %v2648_v61 }
 0xa7d   : > { %13245 = vrsqrt.f32 %v2656_v56  ;;  %vm2688_vm13 = vweird.f32 %v2656_v56 }
 0xa80   : > { %v2633_v40 = vpop.xlane.xlu2 %2632 }
 0xa81   : > { %v2649_v29 = vmul.f32 %v2633_v40, %v14439_v44 }
 0xa83   : > { %v13246_v26 = vpop.eup %13245  ;;  %v2657_v34 = vadd.f32 1e-05, %v2649_v29 }
 0xa84   : > { %v2683_v60 = vmul.f32 %v13246_v26, %v2656_v56  ;;  %vm2689_vm12 = vweird.f32 %v13246_v26 }
 0xa85   : > { %13247 = vrsqrt.f32 %v2657_v34  ;;  %vm2690_vm14 = vmor %vm2688_vm13, %vm2689_vm12  ;;  %vm2698_vm5 = vweird.f32 %v2657_v34 }
 0xa86   : > { %v2684_v2 = vmul.f32 %v13246_v26, %v2683_v60 }
 0xa88   : > { %v2685_v43 = vmul.f32 0.5, %v2684_v2  ;;  %v2636_v11 = vpop.xlane.xlu0 %2635  ;;  %v10847_v2 = vld [vmem:[%s18443_s10 + $0x90] sm:$0xf] }
 0xa89   : > { %v2650_v32 = vmul.f32 %v2636_v11, %v14439_v44 }
 0xa8a   : > { %v2686_v35 = vsub.f32 1.5, %v2685_v43  ;;  %v12638_v43 = vld [vmem:[%s18443_s10 + $0xcc] sm:$0xf0] }
 0xa8b   : > { %v13248_v49 = vpop.eup %13247  ;;  %v2658_v0 = vadd.f32 1e-05, %v2650_v32  ;;  %v10848_v11 = vor.u32 %v12638_v43, %v10847_v2  ;;  %v12636_v32 = vld [vmem:[%s18443_s10 + $0x94] sm:$0xf] }
 0xa8c   : > { %v2687_v19 = vmul.f32 %v13246_v26, %v2686_v35  ;;  %v2693_v1 = vmul.f32 %v13248_v49, %v2657_v34  ;;  %vm2699_vm15 = vweird.f32 %v13248_v49  ;;  %v10849_v35 = vld [vmem:[%s18443_s10 + $0xd0] sm:$0xf0] }
 0xa8d   : > { %13249 = vrsqrt.f32 %v2658_v0  ;;  %vm2700_vm6 = vmor %vm2698_vm5, %vm2699_vm15  ;;  %vm2708_vm8 = vweird.f32 %v2658_v0  ;;  %3138 = vmatpush.bf16.msrb.mxu1 %v10848_v11  ;;  %v12646_v43 = vld [vmem:[%s18445_s12 + $0x130] sm:$0xff] }
 0xa8e   : > { %v2694_v46 = vmul.f32 %v13248_v49, %v2693_v1  ;;  %v2691_v12 = vsel %vm2690_vm14, %v13246_v26, %v2687_v19  ;;  %v12639_v19 = vld [vmem:[%s18443_s10 + $0xd4] sm:$0xf0]  ;;  %v12637_v1 = vld [vmem:[%s18443_s10 + $0x9c] sm:$0xf]  ;;  %v12670_v11 = vld [vmem:[%s18445_s12 + $0x1f0] sm:$0xff] }
 0xa8f   : > { %v2744_v16 = vmul.f32 %v2691_v12, %v14459_v9 }
 0xa90   : > { %v2695_v50 = vmul.f32 0.5, %v2694_v46  ;;  %v2639_v51 = vpop.xlane.xlu1 %2638 }
 0xa91   : > { %v2651_v3 = vmul.f32 %v2639_v51, %v14439_v44  ;;  %v2755_v5 = vmul.f32 %v14548_v27, %v2744_v16 }
 0xa92   : > { %v2696_v17 = vsub.f32 1.5, %v2695_v50  ;;  %v10857_v50 = vld [vmem:[%s18443_s10 + $0xd8] sm:$0xf0] }
 0xa93   : > { %v13250_v58 = vpop.eup %13249  ;;  %v2659_v33 = vadd.f32 1e-05, %v2651_v3  ;;  %v14586_v7 = vadd.f32 %v14554_v15, %v2755_v5  ;;  %v10860_v51 = vor.u32 %v12637_v1, %v10857_v50  ;;  %v10831_v3 = vld [vmem:[%s18443_s10 + $0x10] sm:$0xf]  ;;  %v12669_v1 = vld [vmem:[%s18445_s12 + $0x1e8] sm:$0xff] }
 0xa94   : > { %v2697_v54 = vmul.f32 %v13248_v49, %v2696_v17  ;;  %v2703_v18 = vmul.f32 %v13250_v58, %v2658_v0  ;;  %vm2709_vm7 = vweird.f32 %v13250_v58  ;;  %v10852_v0 = vor.u32 %v12636_v32, %v10849_v35  ;;  %v12634_v17 = vld [vmem:[%s18443_s10 + $0x4c] sm:$0xf0] }
 0xa95   : > { %13251 = vrsqrt.f32 %v2659_v33  ;;  %vm2710_vm9 = vmor %vm2708_vm8, %vm2709_vm7  ;;  %vm2718_vm11 = vweird.f32 %v2659_v33  ;;  %3225 = vmatpush.bf16.msra.mxu0 %v10860_v51 }
 0xa96   : > { %v2701_v59 = vsel %vm2700_vm6, %v13248_v49, %v2697_v54  ;;  %v2704_v6 = vmul.f32 %v13250_v58, %v2703_v18  ;;  %v10855_v49 = vld [vmem:[%s18443_s10 + $0x98] sm:$0xf]  ;;  %3167 = vmatpush.bf16.msrb.mxu2 %v10852_v0  ;;  %v10833_v54 = vld [vmem:[%s18443_s10 + $0x50] sm:$0xf0] }
 0xa97   : > { %v2745_v48 = vmul.f32 %v2701_v59, %v14465_v25  ;;  %v10856_v12 = vor.u32 %v12639_v19, %v10855_v49  ;;  %v10839_v18 = vld [vmem:[%s18443_s10 + $0x18] sm:$0xf]  ;;  %v12645_v19 = vld [vmem:[%s18445_s12 + $0x128] sm:$0xff] }
 0xa98   : > { %v2705_v55 = vmul.f32 0.5, %v2704_v6  ;;  %v12635_v59 = vld [vmem:[%s18443_s10 + $0x54] sm:$0xf0] }
 0xa99   : > { %v2756_v30 = vmul.f32 %v14548_v27, %v2745_v48  ;;  %3196 = vmatpush.bf16.msrb.mxu3 %v10856_v12  ;;  %v12655_v49 = vld [vmem:[%s18445_s12 + $0x178] sm:$0xff]  ;;  %v12662_v12 = vld [vmem:[%s18445_s12 + $0x1b0] sm:$0xff] }
 0xa9a   : > { %v2706_v28 = vsub.f32 1.5, %v2705_v55  ;;  %v10840_v55 = vor.u32 %v12635_v59, %v10839_v18  ;;  %v12663_v0 = vld [vmem:[%s18445_s12 + $0x1b8] sm:$0xff] }
 0xa9b   : > { %v13252_v24 = vpop.eup %13251  ;;  %v14589_v9 = vadd.f32 %v14554_v15, %v2756_v30  ;;  %v12633_v30 = vld [vmem:[%s18443_s10 + $0x1c] sm:$0xf] }
 0xa9c   : > { %v2707_v57 = vmul.f32 %v13250_v58, %v2706_v28  ;;  %v2713_v21 = vmul.f32 %v13252_v24, %v2659_v33  ;;  %vm2719_vm10 = vweird.f32 %v13252_v24  ;;  %v10832_v33 = vor.u32 %v12634_v17, %v10831_v3  ;;  %v10841_v28 = vld [vmem:[%s18443_s10 + $0x58] sm:$0xf0]  ;;  %v12644_v3 = vld [vmem:[%s18445_s12 + $0x120] sm:$0xff] }
 0xa9d   : > { %v14593_v4 = vpack.c.bf16 %v14589_v9, %v14586_v7  ;;  %vm2720_vm12 = vmor %vm2718_vm11, %vm2719_vm10  ;;  %3197 = vmatpush.bf16.msrb.mxu3 %v10840_v55  ;;  %v12668_v17 = vld [vmem:[%s18445_s12 + $0x1e0] sm:$0xff]  ;;  %v12643_v18 = vld [vmem:[%s18445_s12 + $0x118] sm:$0xff] }
 0xa9e   : > { %v2714_v25 = vmul.f32 %v13252_v24, %v2713_v21  ;;  %v2711_v38 = vsel %vm2710_vm9, %v13250_v58, %v2707_v57  ;;  %v12632_v58 = vld [vmem:[%s18443_s10 + $0x14] sm:$0xf]  ;;  %3139 = vmatpush.bf16.msrb.mxu1 %v10832_v33  ;;  %v12667_v59 = vld [vmem:[%s18445_s12 + $0x1d8] sm:$0xff] }
 0xa9f   : > { %10814 = vmatmul.msk.bf16.gmra.mxu1 %vm518_vm0, %v14593_v4  ;;  %10818 = vmatmul.msk.bf16.gmra.mxu2 %vm518_vm0, %v14593_v4  ;;  %v2746_v36 = vmul.f32 %v2711_v38, %v14471_v20  ;;  %v10836_v48 = vor.u32 %v12632_v58, %v10833_v54  ;;  %v12653_v58 = vld [vmem:[%s18445_s12 + $0x168] sm:$0xff]  ;;  %v12666_v55 = vld [vmem:[%s18445_s12 + $0x1d0] sm:$0xff] }
 0xaa0   : > { %v2715_v41 = vmul.f32 0.5, %v2714_v25  ;;  %10822 = vmatmul.msk.bf16.gmra.mxu3 %vm518_vm0, %v14593_v4  ;;  %10826 = vmatmul.msk.bf16.gmra.mxu0 %vm518_vm0, %v14593_v4 }
 0xaa1   : > { %v2757_v42 = vmul.f32 %v14548_v27, %v2746_v36  ;;  %3168 = vmatpush.bf16.msrb.mxu2 %v10836_v48  ;;  %3610 = vmatpush.bf16.msra.mxu3 %v12663_v0  ;;  %v12642_v48 = vld [vmem:[%s18445_s12 + $0x110] sm:$0xff]  ;;  %v12648_v0 = vld [vmem:[%s18445_s12 + $0x140] sm:$0xff] }
 0xaa2   : > { %v2716_v8 = vsub.f32 1.5, %v2715_v41  ;;  %12918 = vmatpush.bf16.msra.mxu1 %v10860_v51 }
 0xaa3   : > { %v14608_v31 = vadd.f32 %v14554_v15, %v2757_v42 }
 0xaa4   : > { %v2717_v23 = vmul.f32 %v13252_v24, %v2716_v8 }
 0xaa5   : > { %18500 = vst [vmem:[#allocation10_spill] sm:$0xff] %v14608_v31  ;;  %3581 = vmatpush.bf16.msra.mxu2 %v12655_v49  ;;  %3611 = vmatpush.bf16.msra.mxu3 %v12662_v12 }
 0xaa6   : > { %v2721_v37 = vsel %vm2720_vm12, %v13252_v24, %v2717_v23  ;;  %v10844_v24 = vor.u32 %v12633_v30, %v10841_v28 }
 0xaa7   : > { %v2747_v45 = vmul.f32 %v2721_v37, %v14477_v53 }
 0xaa8   : > { %3226 = vmatpush.bf16.msra.mxu0 %v10844_v24  ;;  %12919 = vmatpush.bf16.msra.mxu1 %v10844_v24  ;;  %v12651_v24 = vld [vmem:[%s18445_s12 + $0x158] sm:$0xff] }
 0xaa9   : > { %v2758_v10 = vmul.f32 %v14548_v27, %v2747_v45 }
 0xaab   : > { %v14611_v52 = vadd.f32 %v14554_v15, %v2758_v10 }
 0xaad   : > { %18501 = vst [vmem:[#allocation11_spill] sm:$0xff] %v14611_v52  ;;  %v14615_v22 = vpack.c.bf16 %v14611_v52, %v14608_v31 }
 0xaaf   : > { %10815 = vmatmul.msk.bf16.gmra.mxu1 %vm518_vm0, %v14615_v22  ;;  %10819 = vmatmul.msk.bf16.gmra.mxu2 %vm518_vm0, %v14615_v22 }
 0xab0   : > { %10823 = vmatmul.msk.bf16.gmra.mxu3 %vm518_vm0, %v14615_v22  ;;  %10827 = vmatmul.msk.bf16.gmra.mxu0 %vm518_vm0, %v14615_v22 }
 0xab9   : > { %v2642_v20 = vpop.xlane.xlu2 %2641 }
 0xaba   : > { %v2652_v53 = vmul.f32 %v2642_v20, %v14439_v44 }
 0xabc   : > { %v2660_v13 = vadd.f32 1e-05, %v2652_v53 }
 0xabe   : > { %13253 = vrsqrt.f32 %v2660_v13  ;;  %vm2728_vm14 = vweird.f32 %v2660_v13 }
 0xac4   : > { %v13254_v61 = vpop.eup %13253 }
 0xac5   : > { %v2723_v56 = vmul.f32 %v13254_v61, %v2660_v13  ;;  %vm2729_vm13 = vweird.f32 %v13254_v61 }
 0xac6   : > { %vm2730_vm15 = vmor %vm2728_vm14, %vm2729_vm13 }
 0xac7   : > { %v2724_v40 = vmul.f32 %v13254_v61, %v2723_v56 }
 0xac9   : > { %v2725_v60 = vmul.f32 0.5, %v2724_v40 }
 0xacb   : > { %v2726_v46 = vsub.f32 1.5, %v2725_v60 }
 0xacd   : > { %v2727_v6 = vmul.f32 %v13254_v61, %v2726_v46  ;;  %v12654_v46 = vld [vmem:[%s18445_s12 + $0x170] sm:$0xff] }
 0xace   : > { %v2645_v29 = vpop.xlane.xlu0 %2644  ;;  %3582 = vmatpush.bf16.msra.mxu2 %v12654_v46 }
 0xacf   : > { %v2653_v26 = vmul.f32 %v2645_v29, %v14439_v44  ;;  %v2731_v21 = vsel %vm2730_vm15, %v13254_v61, %v2727_v6  ;;  %v12652_v6 = vld [vmem:[%s18445_s12 + $0x160] sm:$0xff] }
 0xad0   : > { %v2748_v41 = vmul.f32 %v2731_v21, %v14483_v39  ;;  %v12641_v21 = vld [vmem:[%s18445_s12 + $0x108] sm:$0xff] }
 0xad1   : > { %v2661_v34 = vadd.f32 1e-05, %v2653_v26  ;;  %v12647_v26 = vld [vmem:[%s18445_s12 + $0x138] sm:$0xff] }
 0xad2   : > { %v2759_v23 = vmul.f32 %v14548_v27, %v2748_v41  ;;  %3583 = vmatpush.bf16.msra.mxu2 %v12653_v58 }
 0xad3   : > { %13255 = vrsqrt.f32 %v2661_v34  ;;  %vm2738_vm6 = vweird.f32 %v2661_v34 }
 0xad4   : > { %v14681_v45 = vadd.f32 %v14554_v15, %v2759_v23  ;;  %v12640_v23 = vld [vmem:[%s18445_s12 + $0x100] sm:$0xff] }
 0xad6   : > { %18502 = vst [vmem:[#allocation12_spill] sm:$0xff] %v14681_v45  ;;  %3584 = vmatpush.bf16.msra.mxu2 %v12652_v6 }
 0xad9   : > { %v13256_v16 = vpop.eup %13255 }
 0xada   : > { %v2733_v5 = vmul.f32 %v13256_v16, %v2661_v34  ;;  %vm2739_vm5 = vweird.f32 %v13256_v16  ;;  %v12671_v34 = vld [vmem:[%s18445_s12 + $0x1f8] sm:$0xff]  ;;  %3585 = vmatpush.bf16.msra.mxu2 %v12651_v24 }
 0xadb   : > { %vm2740_vm7 = vmor %vm2738_vm6, %vm2739_vm5  ;;  %3639 = vmatpush.bf16.msrb.mxu0 %v12671_v34 }
 0xadc   : > { %v2734_v57 = vmul.f32 %v13256_v16, %v2733_v5  ;;  %v12660_v5 = vld [vmem:[%s18445_s12 + $0x1a0] sm:$0xff] }
 0xade   : > { %v2735_v25 = vmul.f32 0.5, %v2734_v57  ;;  %v12659_v57 = vld [vmem:[%s18445_s12 + $0x198] sm:$0xff] }
 0xadf   : > { %3640 = vmatpush.bf16.msrb.mxu0 %v12670_v11 }
 0xae0   : > { %v2736_v38 = vsub.f32 1.5, %v2735_v25  ;;  %v12665_v25 = vld [vmem:[%s18445_s12 + $0x1c8] sm:$0xff] }
 0xae2   : > { %v2737_v8 = vmul.f32 %v13256_v16, %v2736_v38 }
 0xae3   : > { %3641 = vmatpush.bf16.msrb.mxu0 %v12669_v1 }
 0xae4   : > { %v2741_v36 = vsel %vm2740_vm7, %v13256_v16, %v2737_v8  ;;  %v12661_v16 = vld [vmem:[%s18445_s12 + $0x1a8] sm:$0xff]  ;;  %v12650_v8 = vld [vmem:[%s18445_s12 + $0x150] sm:$0xff] }
 0xae5   : > { %v2749_v37 = vmul.f32 %v2741_v36, %v14540_v14  ;;  %3612 = vmatpush.bf16.msra.mxu3 %v12661_v16  ;;  %v12658_v36 = vld [vmem:[%s18445_s12 + $0x190] sm:$0xff]  ;;  %3586 = vmatpush.bf16.msra.mxu2 %v12650_v8  ;;  %v3082_v16 = vld [vmem:[%s18444_s11 + $0x4] sm:$0xf] }
 0xae6   : > { %v14893_v6 = vperm.slane %v3082_v16, 0 }
 0xae7   : > { %v2760_v42 = vmul.f32 %v14548_v27, %v2749_v37  ;;  %3642 = vmatpush.bf16.msrb.mxu0 %v12668_v17  ;;  %v12664_v37 = vld [vmem:[%s18445_s12 + $0x1c0] sm:$0xff] }
 0xae9   : > { %v14684_v10 = vadd.f32 %v14554_v15, %v2760_v42  ;;  %3613 = vmatpush.bf16.msra.mxu3 %v12660_v5  ;;  %v12649_v42 = vld [vmem:[%s18445_s12 + $0x148] sm:$0xff]  ;;  %v14895_v5 = vperm.slane %v3082_v16, 3 }
 0xaea   : > { %3587 = vmatpush.bf16.msra.mxu2 %v12649_v42 }
 0xaeb   : > { %18503 = vst [vmem:[#allocation13_spill] sm:$0xff] %v14684_v10  ;;  %v14688_v39 = vpack.c.bf16 %v14684_v10, %v14681_v45  ;;  %3643 = vmatpush.bf16.msrb.mxu0 %v12667_v59 }
 0xaed   : > { %10816 = vmatmul.msk.bf16.gmra.mxu1 %vm518_vm0, %v14688_v39  ;;  %10820 = vmatmul.msk.bf16.gmra.mxu2 %vm518_vm0, %v14688_v39 }
 0xaee   : > { %10824 = vmatmul.msk.bf16.gmra.mxu3 %vm518_vm0, %v14688_v39  ;;  %10828 = vmatmul.msk.bf16.gmra.mxu0 %vm518_vm0, %v14688_v39 }
 0xaef   : > { %v14726_v14 = vpop.f32.mrf.mxu1  ;;  %3644 = vmatpush.bf16.msrb.mxu0 %v12666_v55  ;;  %3614 = vmatpush.bf16.msra.mxu3 %v12659_v57 }
 0xaf0   : > { %v14728_v27 = vpop.f32.mrf.mxu0  ;;  %3588 = vmatpush.bf16.msra.mxu2 %v12648_v0 }
 0xaf3   : > { %3645 = vmatpush.bf16.msrb.mxu0 %v12665_v25  ;;  %3615 = vmatpush.bf16.msra.mxu3 %v12658_v36  ;;  %v14899_v25 = vperm.slane %v3082_v16, 1 }
 0xaf5   : > { %v14730_v15 = vpop.f32.mrf.mxu2 }
 0xaf6   : > { %v14732_v20 = vpop.f32.mrf.mxu3 }
 0xaf7   : > { %v14734_v53 = vpop.f32.mrf.mxu1  ;;  %3646 = vmatpush.bf16.msrb.mxu0 %v12664_v37 }
 0xaf8   : > { %v14736_v13 = vpop.f32.mrf.mxu0 }
 0xafd   : > { %10861 = vmatmul.msk.bf16.vlgmr.msrb.gmra.mxu1 %vm518_vm0, %v14567_v63  ;;  %10865 = vmatmul.msk.bf16.vlgmr.msrb.gmra.mxu2 %vm518_vm0, %v14567_v63  ;;  %v14740_v61 = vpop.f32.mrf.mxu2 }
 0xafe   : > { %10869 = vmatmul.msk.bf16.vlgmr.msrb.gmra.mxu3 %vm518_vm0, %v14567_v63  ;;  %10873 = vmatmul.msk.bf16.vlgmr.msra.gmra.mxu0 %vm518_vm0, %v14567_v63  ;;  %v14742_v56 = vpop.f32.mrf.mxu3 }
 0xaff   : > { %3552 = vmatpush.bf16.msrb.mxu1 %v12647_v26  ;;  %v12657_v26 = vld [vmem:[%s18445_s12 + $0x188] sm:$0xff] }
 0xb00   : > { %3616 = vmatpush.bf16.msra.mxu3 %v12657_v26 }
 0xb03   : > { %3553 = vmatpush.bf16.msrb.mxu1 %v12646_v43 }
 0xb07   : > { %3554 = vmatpush.bf16.msrb.mxu1 %v12645_v19  ;;  %v12656_v19 = vld [vmem:[%s18445_s12 + $0x180] sm:$0xff] }
 0xb08   : > { %3617 = vmatpush.bf16.msra.mxu3 %v12656_v19 }
 0xb0b   : > { %3555 = vmatpush.bf16.msrb.mxu1 %v12644_v3 }
 0xb0d   : > { %10862 = vmatmul.msk.bf16.gmra.mxu1 %vm518_vm0, %v14593_v4  ;;  %10866 = vmatmul.msk.bf16.gmra.mxu2 %vm518_vm0, %v14593_v4 }
 0xb0e   : > { %10870 = vmatmul.msk.bf16.gmra.mxu3 %vm518_vm0, %v14593_v4  ;;  %10874 = vmatmul.msk.bf16.gmra.mxu0 %vm518_vm0, %v14593_v4 }
 0xb0f   : > { %3556 = vmatpush.bf16.msrb.mxu1 %v12643_v18 }
 0xb13   : > { %3557 = vmatpush.bf16.msrb.mxu1 %v12642_v48 }
 0xb17   : > { %3558 = vmatpush.bf16.msrb.mxu1 %v12641_v21 }
 0xb1b   : > { %3559 = vmatpush.bf16.msrb.mxu1 %v12640_v23  ;;  %v14902_v23 = vperm.slane %v3082_v16, 2  ;;  %v12607_v16 = vld [vmem:[%s18445_s12 + $0x38] sm:$0xff] }
 0xb1c   : > { %v14744_v40 = vpop.f32.mrf.mxu1 }
 0xb1d   : > { %10863 = vmatmul.msk.bf16.gmra.mxu1 %vm518_vm0, %v14615_v22  ;;  %10867 = vmatmul.msk.bf16.gmra.mxu2 %vm518_vm0, %v14615_v22  ;;  %v14746_v29 = vpop.f32.mrf.mxu0 }
 0xb1e   : > { %10871 = vmatmul.msk.bf16.gmra.mxu3 %vm518_vm0, %v14615_v22 }
 0xb22   : > { %v14754_v60 = vpop.f32.mrf.mxu2 }
 0xb23   : > { %v14756_v2 = vpop.f32.mrf.mxu3 }
 0xb24   : > { %v14766_v32 = vpop.f32.mrf.mxu1 }
 0xb25   : > { %v14768_v35 = vpop.f32.mrf.mxu0 }
 0xb2a   : > { %v14788_v50 = vpop.f32.mrf.mxu2 }
 0xb2b   : > { %v14790_v51 = vpop.f32.mrf.mxu3 }
 0xb2c   : > { %v14804_v33 = vpop.f32.mrf.mxu1 }
 0xb2d   : > { %10864 = vmatmul.msk.bf16.gmra.mxu1 %vm518_vm0, %v14688_v39  ;;  %10868 = vmatmul.msk.bf16.gmra.mxu2 %vm518_vm0, %v14688_v39  ;;  %v14806_v54 = vpop.f32.mrf.mxu0 }
 0xb2e   : > { %10872 = vmatmul.msk.bf16.gmra.mxu3 %vm518_vm0, %v14688_v39 }
 0xb32   : > { %v14826_v30 = vpop.f32.mrf.mxu2 }
 0xb33   : > { %v14828_v28 = vpop.f32.mrf.mxu3 }
 0xb34   : > { %v14842_v38 = vpop.f32.mrf.mxu1 }
 0xb35   : > { %v14844_v41 = vpop.f32.mrf.mxu0 }
 0xb3a   : > { %v14864_v34 = vpop.f32.mrf.mxu2 }
 0xb3b   : > { %v14866_v43 = vpop.f32.mrf.mxu3 }
 0xb3d   : > { %10875 = vmatmul.msk.bf16.vlgmr.msra.gmra.mxu1 %vm518_vm0, %v14615_v22 }
 0xb3e   : > { %3860 = vmatpush.bf16.msra.mxu1 %v12607_v16 }
 0xb4d   : > { %10876 = vmatmul.msk.bf16.gmra.mxu1 %vm518_vm0, %v14688_v39 }
 0xb6a   : > { %v14868_v11 = vpop.f32.mrf.mxu1 }
 0xb6b   : > { %v14870_v49 = vpop.f32.mrf.mxu0 }
 0xb70   : > { %v14878_v1 = vpop.f32.mrf.mxu2 }
 0xb71   : > { %v14880_v46 = vpop.f32.mrf.mxu3 }
 0xb72   : > { %v14882_v12 = vpop.f32.mrf.mxu1 }
 0xb73   : > { %v14884_v3 = vpop.f32.mrf.mxu0 }
 0xb78   : > { %v14886_v17 = vpop.f32.mrf.mxu2 }
 0xb79   : > { %v14888_v58 = vpop.f32.mrf.mxu3 }
 0xb7a   : > { %v3141_v18 = vpop.f32.mrf.mxu1 }
 0xb7b   : > { %v3228_v59 = vpop.f32.mrf.mxu0  ;;  %v3142_v55 = vadd.f32 %v3141_v18, %v14893_v6 }
 0xb7c   : > { %v3229_v57 = vadd.f32 %v3228_v59, %v14895_v5 }
 0xb7d   : > { %v3248_v42 = vmax.f32 %v3142_v55, 0.0 }
 0xb7e   : > { %v3251_v0 = vmax.f32 %v3229_v57, 0.0 }
 0xb80   : > { %v3170_v48 = vpop.f32.mrf.mxu2 }
 0xb81   : > { %v3199_v24 = vpop.f32.mrf.mxu3  ;;  %v3171_v10 = vadd.f32 %v3170_v48, %v14899_v25 }
 0xb82   : > { %v3143_v21 = vpop.f32.mrf.mxu1  ;;  %v3200_v44 = vadd.f32 %v3199_v24, %v14902_v23 }
 0xb83   : > { %v3144_v8 = vadd.f32 %v3143_v21, %v14893_v6  ;;  %v3230_v36 = vpop.f32.mrf.mxu0  ;;  %v3249_v21 = vmax.f32 %v3171_v10, 0.0 }
 0xb84   : > { %v3231_v37 = vadd.f32 %v3230_v36, %v14895_v5  ;;  %v3250_v36 = vmax.f32 %v3200_v44, 0.0 }
 0xb85   : > { %v3252_v26 = vmax.f32 %v3144_v8, 0.0 }
 0xb86   : > { %v3255_v19 = vmax.f32 %v3231_v37, 0.0 }
 0xb87   : > { %v3280_v18 = vpack.c.bf16 %v3252_v26, %v3248_v42 }
 0xb88   : > { %v3283_v59 = vpack.c.bf16 %v3255_v19, %v3251_v0  ;;  %v3172_v45 = vpop.f32.mrf.mxu2  ;;  %v12605_v0 = vld [vmem:[%s18445_s12 + $0x28] sm:$0xff] }
 0xb89   : > { %v3173_v52 = vadd.f32 %v3172_v45, %v14899_v25  ;;  %v3201_v31 = vpop.f32.mrf.mxu3  ;;  %3560 = vmatmul.bf16.vlgmr.msrb.gmra.mxu1 %v3280_v18  ;;  %v12606_v45 = vld [vmem:[%s18445_s12 + $0x30] sm:$0xff] }
 0xb8a   : > { %v3202_v55 = vadd.f32 %v3201_v31, %v14902_v23  ;;  %3647 = vmatmul.bf16.vlgmr.msrb.gmra.mxu0 %v3283_v59  ;;  %v3146_v57 = vpop.f32.mrf.mxu1  ;;  %3861 = vmatpush.bf16.msra.mxu1 %v12606_v45  ;;  %v12615_v31 = vld [vmem:[%s18445_s12 + $0x78] sm:$0xff] }
 0xb8b   : > { %v3253_v8 = vmax.f32 %v3173_v52, 0.0  ;;  %v3233_v48 = vpop.f32.mrf.mxu0  ;;  %v12623_v52 = vld [vmem:[%s18445_s12 + $0xb8] sm:$0xff]  ;;  %v3147_v44 = vadd.f32 %v3146_v57, %v14893_v6  ;;  %3889 = vmatpush.bf16.msrb.mxu2 %v12615_v31  ;;  %v12622_v57 = vld [vmem:[%s18445_s12 + $0xb0] sm:$0xff]  ;;  %v12613_v31 = vld [vmem:[%s18445_s12 + $0x68] sm:$0xff] }
 0xb8c   : > { %v3254_v24 = vmax.f32 %v3202_v55, 0.0  ;;  %3918 = vmatpush.bf16.msrb.mxu3 %v12623_v52  ;;  %v3234_v19 = vadd.f32 %v3233_v48, %v14895_v5  ;;  %v12614_v55 = vld [vmem:[%s18445_s12 + $0x70] sm:$0xff]  ;;  %v12604_v48 = vld [vmem:[%s18445_s12 + $0x20] sm:$0xff]  ;;  %v12621_v52 = vld [vmem:[%s18445_s12 + $0xa8] sm:$0xff] }
 0xb8d   : > { %v3281_v37 = vpack.c.bf16 %v3253_v8, %v3249_v21  ;;  %v3256_v8 = vmax.f32 %v3147_v44, 0.0 }
 0xb8e   : > { %v3282_v42 = vpack.c.bf16 %v3254_v24, %v3250_v36  ;;  %3862 = vmatpush.bf16.msra.mxu1 %v12605_v0  ;;  %v3259_v24 = vmax.f32 %v3234_v19, 0.0 }
 0xb8f   : > { %3589 = vmatmul.bf16.vlgmr.msra.gmra.mxu2 %v3281_v37 }
 0xb90   : > { %3618 = vmatmul.bf16.vlgmr.msra.gmra.mxu3 %v3282_v42  ;;  %v3175_v10 = vpop.f32.mrf.mxu2  ;;  %3890 = vmatpush.bf16.msrb.mxu2 %v12614_v55 }
 0xb91   : > { %v3204_v26 = vpop.f32.mrf.mxu3  ;;  %3919 = vmatpush.bf16.msrb.mxu3 %v12622_v57  ;;  %v3176_v45 = vadd.f32 %v3175_v10, %v14899_v25  ;;  %v12603_v10 = vld [vmem:[%s18445_s12 + $0x18] sm:$0xff] }
 0xb92   : > { %v3148_v18 = vpop.f32.mrf.mxu1  ;;  %3863 = vmatpush.bf16.msra.mxu1 %v12604_v48  ;;  %v3205_v44 = vadd.f32 %v3204_v26, %v14902_v23  ;;  %v12612_v26 = vld [vmem:[%s18445_s12 + $0x60] sm:$0xff] }
 0xb93   : > { %v3149_v59 = vadd.f32 %v3148_v18, %v14893_v6  ;;  %v3235_v16 = vpop.f32.mrf.mxu0  ;;  %v3257_v57 = vmax.f32 %v3176_v45, 0.0  ;;  %v12611_v45 = vld [vmem:[%s18445_s12 + $0x58] sm:$0xff] }
 0xb94   : > { %v3236_v21 = vadd.f32 %v3235_v16, %v14895_v5  ;;  %3891 = vmatpush.bf16.msrb.mxu2 %v12613_v31  ;;  %v12619_v31 = vld [vmem:[%s18445_s12 + $0x98] sm:$0xff] }
 0xb95   : > { %v3260_v36 = vmax.f32 %v3149_v59, 0.0  ;;  %3920 = vmatpush.bf16.msrb.mxu3 %v12621_v52 }
 0xb96   : > { %v3263_v37 = vmax.f32 %v3236_v21, 0.0  ;;  %3864 = vmatpush.bf16.msra.mxu1 %v12603_v10  ;;  %v12610_v10 = vld [vmem:[%s18445_s12 + $0x50] sm:$0xff] }
 0xb97   : > { %v3284_v42 = vpack.c.bf16 %v3260_v36, %v3256_v8  ;;  %v12620_v8 = vld [vmem:[%s18445_s12 + $0xa0] sm:$0xff]  ;;  %v3258_v36 = vmax.f32 %v3205_v44, 0.0 }
 0xb98   : > { %v3177_v0 = vpop.f32.mrf.mxu2  ;;  %v3287_v18 = vpack.c.bf16 %v3263_v37, %v3259_v24  ;;  %3892 = vmatpush.bf16.msrb.mxu2 %v12612_v26  ;;  %v12602_v37 = vld [vmem:[%s18445_s12 + $0x10] sm:$0xff]  ;;  %v12609_v26 = vld [vmem:[%s18445_s12 + $0x48] sm:$0xff] }
 0xb99   : > { %v3178_v59 = vadd.f32 %v3177_v0, %v14899_v25  ;;  %v3206_v19 = vpop.f32.mrf.mxu3  ;;  %3565 = vmatmul.bf16.gmra.mxu1 %v3284_v42  ;;  %3921 = vmatpush.bf16.msrb.mxu3 %v12620_v8  ;;  %v12617_v8 = vld [vmem:[%s18445_s12 + $0x88] sm:$0xff] }
 0xb9a   : > { %v3207_v16 = vadd.f32 %v3206_v19, %v14902_v23  ;;  %3652 = vmatmul.bf16.gmra.mxu0 %v3287_v18  ;;  %v3151_v55 = vpop.f32.mrf.mxu1  ;;  %3865 = vmatpush.bf16.msra.mxu1 %v12602_v37  ;;  %v12601_v18 = vld [vmem:[%s18445_s12 + $0x8] sm:$0xff] }
 0xb9b   : > { %v3261_v21 = vmax.f32 %v3178_v59, 0.0  ;;  %v3152_v44 = vadd.f32 %v3151_v55, %v14893_v6 }
 0xb9c   : > { %v3262_v48 = vmax.f32 %v3207_v16, 0.0  ;;  %3893 = vmatpush.bf16.msrb.mxu2 %v12611_v45  ;;  %v12618_v16 = vld [vmem:[%s18445_s12 + $0x90] sm:$0xff] }
 0xb9d   : > { %v3285_v24 = vpack.c.bf16 %v3261_v21, %v3257_v57  ;;  %3922 = vmatpush.bf16.msrb.mxu3 %v12619_v31  ;;  %v3264_v55 = vmax.f32 %v3152_v44, 0.0  ;;  %v12600_v21 = vld [vmem:[%s18445_s12] sm:$0xff]  ;;  %v12631_v31 = vld [vmem:[%s18445_s12 + $0xf8] sm:$0xff] }
 0xb9e   : > { %v3286_v42 = vpack.c.bf16 %v3262_v48, %v3258_v36  ;;  %3866 = vmatpush.bf16.msra.mxu1 %v12601_v18  ;;  %3947 = vmatpush.bf16.msra.mxu0 %v12631_v31  ;;  %v12628_v31 = vld [vmem:[%s18445_s12 + $0xe0] sm:$0xff] }
 0xb9f   : > { %3594 = vmatmul.bf16.gmra.mxu2 %v3285_v24 }
 0xba0   : > { %3623 = vmatmul.bf16.gmra.mxu3 %v3286_v42  ;;  %v3180_v52 = vpop.f32.mrf.mxu2  ;;  %3894 = vmatpush.bf16.msrb.mxu2 %v12610_v10 }
 0xba1   : > { %v3209_v0 = vpop.f32.mrf.mxu3  ;;  %3923 = vmatpush.bf16.msrb.mxu3 %v12618_v16  ;;  %v3181_v36 = vadd.f32 %v3180_v52, %v14899_v25 }
 0xba2   : > { %v3153_v59 = vpop.f32.mrf.mxu1  ;;  %3867 = vmatpush.bf16.msra.mxu1 %v12600_v21  ;;  %v3210_v24 = vadd.f32 %v3209_v0, %v14902_v23  ;;  %v12608_v0 = vld [vmem:[%s18445_s12 + $0x40] sm:$0xff] }
 0xba3   : > { %v3154_v19 = vadd.f32 %v3153_v59, %v14893_v6  ;;  %v3265_v59 = vmax.f32 %v3181_v36, 0.0 }
 0xba4   : > { %3895 = vmatpush.bf16.msrb.mxu2 %v12609_v26  ;;  %v3266_v10 = vmax.f32 %v3210_v24, 0.0 }
 0xba5   : > { %v3268_v57 = vmax.f32 %v3154_v19, 0.0  ;;  %3924 = vmatpush.bf16.msrb.mxu3 %v12617_v8  ;;  %v12616_v19 = vld [vmem:[%s18445_s12 + $0x80] sm:$0xff] }
 0xba7   : > { %v3288_v48 = vpack.c.bf16 %v3268_v57, %v3264_v55  ;;  %v12630_v57 = vld [vmem:[%s18445_s12 + $0xf0] sm:$0xff] }
 0xba8   : > { %v3182_v37 = vpop.f32.mrf.mxu2  ;;  %3896 = vmatpush.bf16.msrb.mxu2 %v12608_v0  ;;  %3948 = vmatpush.bf16.msra.mxu0 %v12630_v57 }
 0xba9   : > { %v3183_v42 = vadd.f32 %v3182_v37, %v14899_v25  ;;  %v3211_v45 = vpop.f32.mrf.mxu3  ;;  %3570 = vmatmul.bf16.gmra.mxu1 %v3288_v48  ;;  %3925 = vmatpush.bf16.msrb.mxu3 %v12616_v19  ;;  %v12629_v48 = vld [vmem:[%s18445_s12 + $0xe8] sm:$0xff] }
 0xbaa   : > { %v3212_v44 = vadd.f32 %v3211_v45, %v14902_v23  ;;  %v3156_v18 = vpop.f32.mrf.mxu1 }
 0xbab   : > { %v3269_v52 = vmax.f32 %v3183_v42, 0.0  ;;  %v3157_v8 = vadd.f32 %v3156_v18, %v14893_v6 }
 0xbac   : > { %v3270_v16 = vmax.f32 %v3212_v44, 0.0  ;;  %3949 = vmatpush.bf16.msra.mxu0 %v12629_v48 }
 0xbad   : > { %v3289_v55 = vpack.c.bf16 %v3269_v52, %v3265_v59  ;;  %v3272_v42 = vmax.f32 %v3157_v8, 0.0 }
 0xbae   : > { %v3290_v21 = vpack.c.bf16 %v3270_v16, %v3266_v10  ;;  %v15018_v10 = vld [vmem:[%s18444_s11] sm:$0xf] }
 0xbaf   : > { %3599 = vmatmul.bf16.gmra.mxu2 %v3289_v55 }
 0xbb0   : > { %3628 = vmatmul.bf16.gmra.mxu3 %v3290_v21  ;;  %v3185_v26 = vpop.f32.mrf.mxu2  ;;  %3950 = vmatpush.bf16.msra.mxu0 %v12628_v31 }
 0xbb1   : > { %v3214_v36 = vpop.f32.mrf.mxu3  ;;  %v3186_v44 = vadd.f32 %v3185_v26, %v14899_v25 }
 0xbb2   : > { %v3158_v24 = vpop.f32.mrf.mxu1  ;;  %v3215_v18 = vadd.f32 %v3214_v36, %v14902_v23  ;;  %v15025_v36 = vperm.slane %v15018_v10, 0 }
 0xbb3   : > { %v3159_v37 = vadd.f32 %v3158_v24, %v14893_v6  ;;  %v12627_v6 = vld [vmem:[%s18445_s12 + $0xd8] sm:$0xff]  ;;  %v3273_v57 = vmax.f32 %v3186_v44, 0.0  ;;  %v15036_v44 = vperm.slane %v15018_v10, 1 }
 0xbb4   : > { %3951 = vmatpush.bf16.msra.mxu0 %v12627_v6  ;;  %v3274_v26 = vmax.f32 %v3215_v18, 0.0 }
 0xbb5   : > { %v3276_v45 = vmax.f32 %v3159_v37, 0.0  ;;  %v2858_v37 = vadd.f32 %v14734_v53, %v15025_v36  ;;  %v12624_v53 = vld [vmem:[%s18445_s12 + $0xc0] sm:$0xff] }
 0xbb7   : > { %v3292_v59 = vpack.c.bf16 %v3276_v45, %v3272_v42  ;;  %v2856_v42 = vadd.f32 %v14726_v14, %v15025_v36  ;;  %v2887_v14 = vadd.f32 %v14740_v61, %v15036_v44 }
 0xbb8   : > { %v3187_v52 = vpop.f32.mrf.mxu2 }
 0xbb9   : > { %v3188_v0 = vadd.f32 %v3187_v52, %v14899_v25  ;;  %v3216_v19 = vpop.f32.mrf.mxu3  ;;  %3575 = vmatmul.bf16.gmra.mxu1 %v3292_v59  ;;  %v12626_v25 = vld [vmem:[%s18445_s12 + $0xd0] sm:$0xff]  ;;  %v2966_v59 = vmax.f32 %v2858_v37, 0.0  ;;  %v15043_v52 = vperm.slane %v15018_v10, 2 }
 0xbba   : > { %v3217_v16 = vadd.f32 %v3216_v19, %v14902_v23  ;;  %v3238_v55 = vpop.f32.mrf.mxu1  ;;  %3952 = vmatpush.bf16.msra.mxu0 %v12626_v25  ;;  %v12625_v23 = vld [vmem:[%s18445_s12 + $0xc8] sm:$0xff] }
 0xbbb   : > { %v3277_v21 = vmax.f32 %v3188_v0, 0.0  ;;  %v3239_v45 = vadd.f32 %v3238_v55, %v14895_v5  ;;  %v2962_v0 = vmax.f32 %v2856_v42, 0.0  ;;  %v2885_v55 = vadd.f32 %v14730_v15, %v15036_v44 }
 0xbbc   : > { %v3278_v8 = vmax.f32 %v3217_v16, 0.0  ;;  %v2916_v16 = vadd.f32 %v14742_v56, %v15043_v52  ;;  %v2914_v25 = vadd.f32 %v14732_v20, %v15043_v52  ;;  %v2863_v56 = vadd.f32 %v14766_v32, %v15025_v36 }
 0xbbd   : > { %v3293_v48 = vpack.c.bf16 %v3277_v21, %v3273_v57  ;;  %v3267_v19 = vmax.f32 %v3239_v45, 0.0  ;;  %v2994_v57 = vpack.c.bf16 %v2966_v59, %v2962_v0  ;;  %v2963_v61 = vmax.f32 %v2885_v55, 0.0 }
 0xbbe   : > { %v3294_v24 = vpack.c.bf16 %v3278_v8, %v3274_v26  ;;  %3953 = vmatpush.bf16.msra.mxu0 %v12625_v23  ;;  %v2967_v26 = vmax.f32 %v2887_v14, 0.0  ;;  %v2968_v8 = vmax.f32 %v2916_v16, 0.0  ;;  %v2861_v15 = vadd.f32 %v14744_v40, %v15025_v36 }
 0xbbf   : > { %3604 = vmatmul.bf16.gmra.mxu2 %v3293_v48  ;;  %v2974_v45 = vmax.f32 %v2863_v56, 0.0  ;;  %v2921_v32 = vadd.f32 %v14790_v51, %v15043_v52  ;;  %v2890_v14 = vadd.f32 %v14754_v60, %v15036_v44  ;;  %v2868_v60 = vadd.f32 %v14842_v38, %v15025_v36 }
 0xbc0   : > { %3633 = vmatmul.bf16.gmra.mxu3 %v3294_v24  ;;  %v2964_v24 = vmax.f32 %v2914_v25, 0.0  ;;  %v2995_v37 = vpack.c.bf16 %v2967_v26, %v2963_v61  ;;  %v2970_v59 = vmax.f32 %v2861_v15, 0.0  ;;  %v12678_v26 = vld [vmem:[%s18443_s10 + $0xdc] sm:$0xf0]  ;;  %v2897_v38 = vadd.f32 %v14864_v34, %v15036_v44  ;;  %v12676_v15 = vld [vmem:[%s18443_s10 + $0xa4] sm:$0xf] }
 0xbc1   : > { %v2971_v55 = vmax.f32 %v2890_v14, 0.0  ;;  %v2982_v61 = vmax.f32 %v2868_v60, 0.0  ;;  %v11153_v34 = vld [vmem:[%s18443_s10 + $0xe0] sm:$0xf0]  ;;  %v11143_v14 = vld [vmem:[%s18443_s10 + $0x28] sm:$0xf]  ;;  %v2871_v60 = vadd.f32 %v14868_v11, %v15025_v36 }
 0xbc2   : > { %v3240_v31 = vpop.f32.mrf.mxu1  ;;  %3954 = vmatpush.bf16.msra.mxu0 %v12624_v53  ;;  %v2996_v23 = vpack.c.bf16 %v2968_v8, %v2964_v24  ;;  %v2998_v40 = vpack.c.bf16 %v2974_v45, %v2970_v59  ;;  %v2866_v8 = vadd.f32 %v14804_v33, %v15025_v36  ;;  %v11135_v24 = vld [vmem:[%s18443_s10 + $0x20] sm:$0xf]  ;;  %v2926_v33 = vadd.f32 %v14866_v43, %v15043_v52  ;;  %v12679_v43 = vld [vmem:[%s18443_s10 + $0xe4] sm:$0xf0] }
 0xbc3   : > { %v3241_v18 = vadd.f32 %v3240_v31, %v14895_v5  ;;  %v2895_v45 = vadd.f32 %v14826_v30, %v15036_v44  ;;  %v11156_v59 = vor.u32 %v12676_v15, %v11153_v34  ;;  %v11137_v30 = vld [vmem:[%s18443_s10 + $0x60] sm:$0xf0] }
 0xbc5   : > { %v3271_v6 = vmax.f32 %v3241_v18, 0.0  ;;  %v2892_v18 = vadd.f32 %v14788_v50, %v15036_v44  ;;  %v15068_v50 = vperm.slane %v15018_v10, 3  ;;  %4069 = vmatpush.bf16.msra.mxu2 %v11156_v59 }
 0xbc7   : > { %v3291_v21 = vpack.c.bf16 %v3271_v6, %v3267_v19  ;;  %v2919_v6 = vadd.f32 %v14756_v2, %v15043_v52  ;;  %v2975_v16 = vmax.f32 %v2892_v18, 0.0  ;;  %v2945_v51 = vadd.f32 %v14736_v13, %v15068_v50  ;;  %v11151_v2 = vld [vmem:[%s18443_s10 + $0xa0] sm:$0xf] }
 0xbc8   : > { %v2943_v10 = vadd.f32 %v14728_v27, %v15068_v50  ;;  %v11152_v13 = vor.u32 %v12678_v26, %v11151_v2  ;;  %v2978_v27 = vmax.f32 %v2866_v8, 0.0  ;;  %v2924_v18 = vadd.f32 %v14828_v28, %v15043_v52 }
 0xbc9   : > { %3657 = vmatmul.bf16.gmra.mxu0 %v3291_v21  ;;  %3868 = vmatmul.bf16.vlgmr.msra.gmra.mxu1 %v2994_v57  ;;  %v2972_v57 = vmax.f32 %v2919_v6, 0.0  ;;  %v2999_v21 = vpack.c.bf16 %v2975_v16, %v2971_v55  ;;  %v2979_v6 = vmax.f32 %v2895_v45, 0.0  ;;  %v2986_v8 = vmax.f32 %v2871_v60, 0.0 }
 0xbca   : > { %v3243_v48 = vpop.f32.mrf.mxu1  ;;  %4040 = vmatpush.bf16.msrb.mxu1 %v11152_v13  ;;  %v2902_v13 = vadd.f32 %v14886_v17, %v15036_v44  ;;  %v2955_v17 = vadd.f32 %v14844_v41, %v15068_v50  ;;  %v12673_v41 = vld [vmem:[%s18443_s10 + $0x2c] sm:$0xf] }
 0xbcb   : > { %v3244_v42 = vadd.f32 %v3243_v48, %v14895_v5  ;;  %v2969_v48 = vmax.f32 %v2945_v51, 0.0  ;;  %v2948_v51 = vadd.f32 %v14746_v29, %v15068_v50  ;;  %v2929_v29 = vadd.f32 %v14880_v46, %v15043_v52  ;;  %v11161_v46 = vld [vmem:[%s18443_s10 + $0xe8] sm:$0xf0] }
 0xbcd   : > { %v3275_v53 = vmax.f32 %v3244_v42, 0.0  ;;  %v11159_v42 = vld [vmem:[%s18443_s10 + $0xa8] sm:$0xf] }
 0xbcf   : > { %3897 = vmatmul.bf16.vlgmr.msrb.gmra.mxu2 %v2995_v37  ;;  %v12674_v37 = vld [vmem:[%s18443_s10 + $0x5c] sm:$0xf0] }
 0xbd0   : > { %3926 = vmatmul.bf16.vlgmr.msrb.gmra.mxu3 %v2996_v23  ;;  %v2965_v23 = vmax.f32 %v2943_v10, 0.0  ;;  %v11136_v56 = vor.u32 %v12674_v37, %v11135_v24  ;;  %v2973_v10 = vmax.f32 %v2948_v51, 0.0  ;;  %v2988_v24 = vmax.f32 %v2929_v29, 0.0 }
 0xbd2   : > { %v3245_v20 = vpop.f32.mrf.mxu1  ;;  %4041 = vmatpush.bf16.msrb.mxu1 %v11136_v56 }
 0xbd3   : > { %v3246_v31 = vadd.f32 %v3245_v20, %v14895_v5  ;;  %v2976_v5 = vmax.f32 %v2921_v32, 0.0  ;;  %v2997_v20 = vpack.c.bf16 %v2969_v48, %v2965_v23  ;;  %v12672_v32 = vld [vmem:[%s18443_s10 + $0x24] sm:$0xf] }
 0xbd4   : > { %v11140_v28 = vor.u32 %v12672_v32, %v11137_v30 }
 0xbd5   : > { %v3279_v0 = vmax.f32 %v3246_v31, 0.0  ;;  %v3000_v25 = vpack.c.bf16 %v2976_v5, %v2972_v57  ;;  %v3002_v31 = vpack.c.bf16 %v2982_v61, %v2978_v27  ;;  %v2980_v5 = vmax.f32 %v2924_v18, 0.0  ;;  %v11145_v27 = vld [vmem:[%s18443_s10 + $0x68] sm:$0xf0] }
 0xbd6   : > { %4070 = vmatpush.bf16.msra.mxu2 %v11140_v28 }
 0xbd7   : > { %v3295_v19 = vpack.c.bf16 %v3279_v0, %v3275_v53  ;;  %v2983_v53 = vmax.f32 %v2897_v38, 0.0  ;;  %v11160_v0 = vor.u32 %v12679_v43, %v11159_v42  ;;  %v2991_v38 = vmax.f32 %v2902_v13, 0.0 }
 0xbd8   : > { %v2960_v42 = vadd.f32 %v14884_v3, %v15068_v50 }
 0xbd9   : > { %3662 = vmatmul.bf16.gmra.mxu0 %v3295_v19  ;;  %3873 = vmatmul.bf16.gmra.mxu1 %v2998_v40  ;;  %v2984_v19 = vmax.f32 %v2926_v33, 0.0  ;;  %v12675_v40 = vld [vmem:[%s18443_s10 + $0x64] sm:$0xf0]  ;;  %v3003_v55 = vpack.c.bf16 %v2983_v53, %v2979_v6  ;;  %v11148_v33 = vor.u32 %v12673_v41, %v11145_v27 }
 0xbda   : > { %4098 = vmatpush.bf16.msra.mxu3 %v11160_v0  ;;  %v11144_v16 = vor.u32 %v12675_v40, %v11143_v14  ;;  %v2993_v59 = vmax.f32 %v2960_v42, 0.0 }
 0xbdb   : > { %v3004_v57 = vpack.c.bf16 %v2984_v19, %v2980_v5 }
 0xbde   : > { %4099 = vmatpush.bf16.msra.mxu3 %v11144_v16 }
 0xbdf   : > { %3902 = vmatmul.bf16.gmra.mxu2 %v2999_v21  ;;  %v2950_v21 = vadd.f32 %v14768_v35, %v15068_v50  ;;  %v2931_v35 = vadd.f32 %v14888_v58, %v15043_v52  ;;  %v2953_v58 = vadd.f32 %v14806_v54, %v15068_v50  ;;  %v2985_v52 = vmax.f32 %v2955_v17, 0.0 }
 0xbe0   : > { %3931 = vmatmul.bf16.gmra.mxu3 %v3000_v25  ;;  %v2873_v25 = vadd.f32 %v14882_v12, %v15025_v36  ;;  %v2900_v12 = vadd.f32 %v14878_v1, %v15036_v44  ;;  %v12677_v1 = vld [vmem:[%s18443_s10 + $0xac] sm:$0xf] }
 0xbe1   : > { %v2977_v2 = vmax.f32 %v2950_v21, 0.0  ;;  %v2992_v11 = vmax.f32 %v2931_v35, 0.0  ;;  %v11164_v44 = vor.u32 %v12677_v1, %v11161_v46  ;;  %v2981_v56 = vmax.f32 %v2953_v58, 0.0 }
 0xbe2   : > { %v2990_v26 = vmax.f32 %v2873_v25, 0.0  ;;  %v2987_v36 = vmax.f32 %v2900_v12, 0.0 }
 0xbe3   : > { %v3001_v61 = vpack.c.bf16 %v2977_v2, %v2973_v10  ;;  %v3008_v23 = vpack.c.bf16 %v2992_v11, %v2988_v24  ;;  %4127 = vmatpush.bf16.msrb.mxu0 %v11164_v44  ;;  %v3005_v34 = vpack.c.bf16 %v2985_v52, %v2981_v56  ;;  %v12687_v56 = vld [vmem:[%s18445_s12 + $0x238] sm:$0xff] }
 0xbe4   : > { %v3006_v48 = vpack.c.bf16 %v2990_v26, %v2986_v8  ;;  %v3007_v37 = vpack.c.bf16 %v2991_v38, %v2987_v36  ;;  %4454 = vmatpush.bf16.msra.mxu1 %v12687_v56 }
 0xbe7   : > { %4128 = vmatpush.bf16.msrb.mxu0 %v11148_v33 }
 0xbe9   : > { %3878 = vmatmul.bf16.gmra.mxu1 %v3002_v31  ;;  %3955 = vmatmul.bf16.vlgmr.msra.gmra.mxu0 %v2997_v20  ;;  %v2958_v20 = vadd.f32 %v14870_v49, %v15068_v50 }
 0xbeb   : > { %v2989_v53 = vmax.f32 %v2958_v20, 0.0  ;;  %v12686_v20 = vld [vmem:[%s18445_s12 + $0x230] sm:$0xff] }
 0xbec   : > { %4455 = vmatpush.bf16.msra.mxu1 %v12686_v20  ;;  %v12711_v20 = vld [vmem:[%s18445_s12 + $0x2f8] sm:$0xff] }
 0xbed   : > { %v3009_v30 = vpack.c.bf16 %v2993_v59, %v2989_v53  ;;  %v12685_v59 = vld [vmem:[%s18445_s12 + $0x228] sm:$0xff]  ;;  %v12684_v53 = vld [vmem:[%s18445_s12 + $0x220] sm:$0xff]  ;;  %4541 = vmatpush.bf16.msra.mxu0 %v12711_v20 }
 0xbee   : > { %v12705_v20 = vld [vmem:[%s18445_s12 + $0x2c8] sm:$0xff] }
 0xbef   : > { %3907 = vmatmul.bf16.gmra.mxu2 %v3003_v55 }
 0xbf0   : > { %3936 = vmatmul.bf16.gmra.mxu3 %v3004_v57  ;;  %4456 = vmatpush.bf16.msra.mxu1 %v12685_v59 }
 0xbf4   : > { %4457 = vmatpush.bf16.msra.mxu1 %v12684_v53 }
 0xbf9   : > { %3883 = vmatmul.bf16.gmra.mxu1 %v3006_v48  ;;  %3960 = vmatmul.bf16.gmra.mxu0 %v3001_v61 }
 0xbff   : > { %3912 = vmatmul.bf16.gmra.mxu2 %v3007_v37 }
 0xc00   : > { %3941 = vmatmul.bf16.gmra.mxu3 %v3008_v23 }
 0xc06   : > { %v3561_v15 = vpop.f32.mrf.mxu1 }
 0xc07   : > { %v3648_v45 = vpop.f32.mrf.mxu0 }
 0xc09   : > { %3965 = vmatmul.bf16.gmra.mxu0 %v3005_v34  ;;  %11165 = vmatmul.msk.bf16.vlgmr.msrb.gmra.mxu1 %vm518_vm0, %v14567_v63 }
 0xc0e   : > { %v15156_v54 = vpop.f32.mrf.mxu1 }
 0xc0f   : > { %11169 = vmatmul.msk.bf16.vlgmr.msra.gmra.mxu2 %vm518_vm0, %v14567_v63  ;;  %v15172_v28 = vpop.f32.mrf.mxu0 }
 0xc10   : > { %11173 = vmatmul.msk.bf16.vlgmr.msra.gmra.mxu3 %vm518_vm0, %v14567_v63 }
 0xc12   : > { %v3590_v31 = vpop.f32.mrf.mxu2 }
 0xc13   : > { %v3591_v43 = vadd.f32 %v3590_v31, %v3561_v15  ;;  %v3619_v18 = vpop.f32.mrf.mxu3 }
 0xc15   : > { %v3620_v0 = vadd.f32 %v3619_v18, %v3591_v43 }
 0xc16   : > { %v3566_v32 = vpop.f32.mrf.mxu1 }
 0xc17   : > { %v3649_v14 = vadd.f32 %v3648_v45, %v3620_v0  ;;  %v3653_v5 = vpop.f32.mrf.mxu0  ;;  %v12695_v0 = vld [vmem:[%s18445_s12 + $0x278] sm:$0xff] }
 0xc18   : > { %4483 = vmatpush.bf16.msrb.mxu2 %v12695_v0 }
 0xc19   : > { %3970 = vmatmul.bf16.gmra.mxu0 %v3009_v30  ;;  %11166 = vmatmul.msk.bf16.gmra.mxu1 %vm518_vm0, %v14593_v4 }
 0xc1a   : > { %v15168_v3 = vpop.f32.mrf.mxu2 }
 0xc1b   : > { %v15170_v19 = vpop.f32.mrf.mxu3 }
 0xc1e   : > { %v15174_v49 = vpop.f32.mrf.mxu1 }
 0xc1f   : > { %11170 = vmatmul.msk.bf16.gmra.mxu2 %vm518_vm0, %v14593_v4  ;;  %v15202_v12 = vpop.f32.mrf.mxu0 }
 0xc20   : > { %11174 = vmatmul.msk.bf16.gmra.mxu3 %vm518_vm0, %v14593_v4 }
 0xc22   : > { %v3595_v50 = vpop.f32.mrf.mxu2 }
 0xc23   : > { %v3596_v40 = vadd.f32 %v3595_v50, %v3566_v32  ;;  %v3624_v6 = vpop.f32.mrf.mxu3  ;;  %v12703_v32 = vld [vmem:[%s18445_s12 + $0x2b8] sm:$0xff] }
 0xc24   : > { %4512 = vmatpush.bf16.msrb.mxu3 %v12703_v32 }
 0xc25   : > { %v3625_v16 = vadd.f32 %v3624_v6, %v3596_v40  ;;  %v12683_v6 = vld [vmem:[%s18445_s12 + $0x218] sm:$0xff] }
 0xc26   : > { %v3571_v55 = vpop.f32.mrf.mxu1  ;;  %4458 = vmatpush.bf16.msra.mxu1 %v12683_v6 }
 0xc27   : > { %v3654_v57 = vadd.f32 %v3653_v5, %v3625_v16  ;;  %v12694_v16 = vld [vmem:[%s18445_s12 + $0x270] sm:$0xff] }
 0xc28   : > { %4484 = vmatpush.bf16.msrb.mxu2 %v12694_v16  ;;  %v12696_v16 = vld [vmem:[%s18445_s12 + $0x280] sm:$0xff] }
 0xc29   : > { %11167 = vmatmul.msk.bf16.gmra.mxu1 %vm518_vm0, %v14615_v22  ;;  %11177 = vmatmul.msk.bf16.vlgmr.msrb.gmra.mxu0 %vm518_vm0, %v14567_v63 }
 0xc2a   : > { %v15184_v21 = vpop.f32.mrf.mxu2 }
 0xc2b   : > { %v15186_v25 = vpop.f32.mrf.mxu3 }
 0xc2e   : > { %v15188_v51 = vpop.f32.mrf.mxu1 }
 0xc2f   : > { %11171 = vmatmul.msk.bf16.gmra.mxu2 %vm518_vm0, %v14615_v22 }
 0xc30   : > { %11175 = vmatmul.msk.bf16.gmra.mxu3 %vm518_vm0, %v14615_v22 }
 0xc32   : > { %v3600_v60 = vpop.f32.mrf.mxu2 }
 0xc33   : > { %v3601_v2 = vadd.f32 %v3600_v60, %v3571_v55  ;;  %v3629_v26 = vpop.f32.mrf.mxu3 }
 0xc35   : > { %v3630_v10 = vadd.f32 %v3629_v26, %v3601_v2  ;;  %v12682_v26 = vld [vmem:[%s18445_s12 + $0x210] sm:$0xff] }
 0xc36   : > { %v3576_v8 = vpop.f32.mrf.mxu1  ;;  %4459 = vmatpush.bf16.msra.mxu1 %v12682_v26 }
 0xc39   : > { %11168 = vmatmul.msk.bf16.gmra.mxu1 %vm518_vm0, %v14688_v39  ;;  %11178 = vmatmul.msk.bf16.gmra.mxu0 %vm518_vm0, %v14593_v4 }
 0xc3a   : > { %v15198_v13 = vpop.f32.mrf.mxu2 }
 0xc3b   : > { %v15200_v35 = vpop.f32.mrf.mxu3 }
 0xc3e   : > { %v15204_v48 = vpop.f32.mrf.mxu1 }
 0xc3f   : > { %18504 = vst [vmem:[#allocation14_spill] sm:$0xff] %v15204_v48  ;;  %11172 = vmatmul.msk.bf16.gmra.mxu2 %vm518_vm0, %v14688_v39 }
 0xc40   : > { %11176 = vmatmul.msk.bf16.gmra.mxu3 %vm518_vm0, %v14688_v39 }
 0xc42   : > { %v3605_v61 = vpop.f32.mrf.mxu2 }
 0xc43   : > { %v3606_v29 = vadd.f32 %v3605_v61, %v3576_v8  ;;  %v3634_v38 = vpop.f32.mrf.mxu3  ;;  %v12701_v8 = vld [vmem:[%s18445_s12 + $0x2a8] sm:$0xff] }
 0xc45   : > { %v3635_v11 = vadd.f32 %v3634_v38, %v3606_v29  ;;  %v12681_v38 = vld [vmem:[%s18445_s12 + $0x208] sm:$0xff] }
 0xc46   : > { %v3658_v36 = vpop.f32.mrf.mxu0  ;;  %v3869_v24 = vpop.f32.mrf.mxu1  ;;  %4460 = vmatpush.bf16.msra.mxu1 %v12681_v38 }
 0xc47   : > { %v3659_v37 = vadd.f32 %v3658_v36, %v3630_v10  ;;  %v3870_v23 = vadd.f32 %v3869_v24, %v3649_v14  ;;  %v12693_v10 = vld [vmem:[%s18445_s12 + $0x268] sm:$0xff]  ;;  %v12700_v36 = vld [vmem:[%s18445_s12 + $0x2a0] sm:$0xff] }
 0xc48   : > { %4485 = vmatpush.bf16.msrb.mxu2 %v12693_v10 }
 0xc49   : > { %11179 = vmatmul.msk.bf16.gmra.mxu0 %vm518_vm0, %v14615_v22 }
 0xc4a   : > { %v15212_v17 = vpop.f32.mrf.mxu2 }
 0xc4b   : > { %18505 = vst [vmem:[#allocation15_spill] sm:$0xff] %v15212_v17  ;;  %v15214_v1 = vpop.f32.mrf.mxu3 }
 0xc4c   : > { %18506 = vst [vmem:[#allocation16_spill] sm:$0xff] %v15214_v1 }
 0xc4e   : > { %v15216_v46 = vpop.f32.mrf.mxu0  ;;  %v15218_v58 = vpop.f32.mrf.mxu1 }
 0xc52   : > { %v3898_v44 = vpop.f32.mrf.mxu2 }
 0xc53   : > { %v3899_v52 = vadd.f32 %v3898_v44, %v3870_v23  ;;  %v3927_v41 = vpop.f32.mrf.mxu3  ;;  %v12680_v23 = vld [vmem:[%s18445_s12 + $0x200] sm:$0xff]  ;;  %v12691_v44 = vld [vmem:[%s18445_s12 + $0x258] sm:$0xff] }
 0xc54   : > { %4461 = vmatpush.bf16.msra.mxu1 %v12680_v23  ;;  %v3984_v23 = vld [vmem:[%s18444_s11 + $0x8] sm:$0xf] }
 0xc55   : > { %v3928_v27 = vadd.f32 %v3927_v41, %v3899_v52  ;;  %v12699_v52 = vld [vmem:[%s18445_s12 + $0x298] sm:$0xff] }
 0xc56   : > { %v3663_v33 = vpop.f32.mrf.mxu0  ;;  %v3874_v15 = vpop.f32.mrf.mxu1 }
 0xc57   : > { %v15223_v34 = vadd.f32 %v3663_v33, %v3635_v11  ;;  %v3875_v42 = vadd.f32 %v3874_v15, %v3654_v57  ;;  %v12702_v57 = vld [vmem:[%s18445_s12 + $0x2b0] sm:$0xff]  ;;  %v12692_v11 = vld [vmem:[%s18445_s12 + $0x260] sm:$0xff] }
 0xc58   : > { %4513 = vmatpush.bf16.msrb.mxu3 %v12702_v57  ;;  %4486 = vmatpush.bf16.msrb.mxu2 %v12692_v11  ;;  %v12690_v15 = vld [vmem:[%s18445_s12 + $0x250] sm:$0xff]  ;;  %v12707_v11 = vld [vmem:[%s18445_s12 + $0x2d8] sm:$0xff] }
 0xc59   : > { %11180 = vmatmul.msk.bf16.gmra.mxu0 %vm518_vm0, %v14688_v39 }
 0xc5a   : > { %v15230_v45 = vpop.f32.mrf.mxu2 }
 0xc5b   : > { %v15232_v31 = vpop.f32.mrf.mxu3 }
 0xc5c   : > { %4514 = vmatpush.bf16.msrb.mxu3 %v12701_v8  ;;  %4487 = vmatpush.bf16.msrb.mxu2 %v12691_v44 }
 0xc5e   : > { %v15237_v43 = vpop.f32.mrf.mxu0  ;;  %v15239_v18 = vpop.f32.mrf.mxu1 }
 0xc5f   : > { %18507 = vst [vmem:[#allocation17_spill] sm:$0xff] %v15237_v43 }
 0xc60   : > { %4515 = vmatpush.bf16.msrb.mxu3 %v12700_v36  ;;  %4488 = vmatpush.bf16.msrb.mxu2 %v12690_v15 }
 0xc62   : > { %v3903_v30 = vpop.f32.mrf.mxu2 }
 0xc63   : > { %v3904_v14 = vadd.f32 %v3903_v30, %v3875_v42  ;;  %v3932_v50 = vpop.f32.mrf.mxu3  ;;  %v12698_v42 = vld [vmem:[%s18445_s12 + $0x290] sm:$0xff]  ;;  %v12689_v30 = vld [vmem:[%s18445_s12 + $0x248] sm:$0xff] }
 0xc64   : > { %4516 = vmatpush.bf16.msrb.mxu3 %v12699_v52  ;;  %4489 = vmatpush.bf16.msrb.mxu2 %v12689_v30 }
 0xc65   : > { %v3933_v40 = vadd.f32 %v3932_v50, %v3904_v14  ;;  %v12697_v14 = vld [vmem:[%s18445_s12 + $0x288] sm:$0xff]  ;;  %v12710_v50 = vld [vmem:[%s18445_s12 + $0x2f0] sm:$0xff] }
 0xc66   : > { %v3879_v5 = vpop.f32.mrf.mxu1  ;;  %v3956_v55 = vpop.f32.mrf.mxu0  ;;  %4542 = vmatpush.bf16.msra.mxu0 %v12710_v50 }
 0xc67   : > { %v3880_v60 = vadd.f32 %v3879_v5, %v3659_v37  ;;  %v15259_v2 = vadd.f32 %v3956_v55, %v3928_v27  ;;  %v12709_v5 = vld [vmem:[%s18445_s12 + $0x2e8] sm:$0xff] }
 0xc68   : > { %4517 = vmatpush.bf16.msrb.mxu3 %v12698_v42 }
 0xc6a   : > { %v15270_v61 = vpop.f32.mrf.mxu2  ;;  %4543 = vmatpush.bf16.msra.mxu0 %v12709_v5  ;;  %v15364_v5 = vperm.slane %v3984_v23, 1 }
 0xc6b   : > { %v15272_v29 = vpop.f32.mrf.mxu3 }
 0xc6c   : > { %4518 = vmatpush.bf16.msrb.mxu3 %v12697_v14  ;;  %v12704_v14 = vld [vmem:[%s18445_s12 + $0x2c0] sm:$0xff] }
 0xc6e   : > { %v15283_v24 = vpop.f32.mrf.mxu1  ;;  %v15285_v37 = vpop.f32.mrf.mxu0 }
 0xc70   : > { %4519 = vmatpush.bf16.msrb.mxu3 %v12696_v16 }
 0xc72   : > { %v3908_v41 = vpop.f32.mrf.mxu2 }
 0xc73   : > { %v3909_v27 = vadd.f32 %v3908_v41, %v3880_v60  ;;  %v3937_v56 = vpop.f32.mrf.mxu3  ;;  %v12708_v60 = vld [vmem:[%s18445_s12 + $0x2e0] sm:$0xff]  ;;  %v15345_v41 = vperm.slane %v3984_v23, 0 }
 0xc74   : > { %4544 = vmatpush.bf16.msra.mxu0 %v12708_v60  ;;  %v15366_v60 = vperm.slane %v3984_v23, 2 }
 0xc75   : > { %v3938_v33 = vadd.f32 %v3937_v56, %v3909_v27  ;;  %v12706_v27 = vld [vmem:[%s18445_s12 + $0x2d0] sm:$0xff] }
 0xc76   : > { %v3884_v59 = vpop.f32.mrf.mxu1  ;;  %v3961_v53 = vpop.f32.mrf.mxu0 }
 0xc77   : > { %v3885_v0 = vadd.f32 %v3884_v59, %v15223_v34  ;;  %v15306_v32 = vadd.f32 %v3961_v53, %v3933_v40  ;;  %v12688_v40 = vld [vmem:[%s18445_s12 + $0x240] sm:$0xff] }
 0xc78   : > { %4490 = vmatpush.bf16.msrb.mxu2 %v12688_v40  ;;  %4545 = vmatpush.bf16.msra.mxu0 %v12707_v11 }
 0xc7a   : > { %v15317_v6 = vpop.f32.mrf.mxu2 }
 0xc7b   : > { %18508 = vst [vmem:[#allocation18_spill] sm:$0xff] %v15317_v6  ;;  %v15319_v34 = vpop.f32.mrf.mxu3 }
 0xc7c   : > { %18509 = vst [vmem:[#allocation19_spill] sm:$0xff] %v15319_v34  ;;  %4546 = vmatpush.bf16.msra.mxu0 %v12706_v27 }
 0xc7e   : > { %v15330_v55 = vpop.f32.mrf.mxu1  ;;  %v15332_v57 = vpop.f32.mrf.mxu0 }
 0xc7f   : > { %18510 = vst [vmem:[#allocation20_spill] sm:$0xff] %v15330_v55 }
 0xc80   : > { %4547 = vmatpush.bf16.msra.mxu0 %v12705_v20 }
 0xc82   : > { %v3913_v26 = vpop.f32.mrf.mxu2 }
 0xc83   : > { %v3914_v10 = vadd.f32 %v3913_v26, %v3885_v0  ;;  %v3942_v8 = vpop.f32.mrf.mxu3 }
 0xc84   : > { %4548 = vmatpush.bf16.msra.mxu0 %v12704_v14 }
 0xc85   : > { %v3943_v38 = vadd.f32 %v3942_v8, %v3914_v10 }
 0xc86   : > { %v3966_v36 = vpop.f32.mrf.mxu0  ;;  %v4043_v44 = vpop.f32.mrf.mxu1 }
 0xc87   : > { %v15343_v52 = vadd.f32 %v3966_v36, %v3938_v33  ;;  %v4044_v42 = vadd.f32 %v4043_v44, %v15345_v41 }
 0xc89   : > { %v4150_v0 = vmax.f32 %v4044_v42, 0.0 }
 0xc8a   : > { %v15350_v56 = vpop.f32.mrf.mxu2 }
 0xc8b   : > { %18511 = vst [vmem:[#allocation21_spill] sm:$0xff] %v15350_v56  ;;  %v15352_v15 = vpop.f32.mrf.mxu3 }
 0xc8c   : > { %18512 = vst [vmem:[#allocation22_spill] sm:$0xff] %v15352_v15 }
 0xc8e   : > { %v15358_v33 = vpop.f32.mrf.mxu0  ;;  %v4045_v59 = vpop.f32.mrf.mxu1 }
 0xc8f   : > { %18513 = vst [vmem:[#allocation23_spill] sm:$0xff] %v15358_v33  ;;  %v4046_v53 = vadd.f32 %v4045_v59, %v15345_v41 }
 0xc91   : > { %v4154_v30 = vmax.f32 %v4046_v53, 0.0 }
 0xc92   : > { %v4072_v50 = vpop.f32.mrf.mxu2 }
 0xc93   : > { %v4182_v40 = vpack.c.bf16 %v4154_v30, %v4150_v0  ;;  %v4101_v16 = vpop.f32.mrf.mxu3  ;;  %v4073_v11 = vadd.f32 %v4072_v50, %v15364_v5 }
 0xc94   : > { %v4102_v36 = vadd.f32 %v4101_v16, %v15366_v60 }
 0xc95   : > { %4462 = vmatmul.bf16.vlgmr.msra.gmra.mxu1 %v4182_v40  ;;  %v4151_v59 = vmax.f32 %v4073_v11, 0.0 }
 0xc96   : > { %v3971_v26 = vpop.f32.mrf.mxu0  ;;  %v4048_v10 = vpop.f32.mrf.mxu1  ;;  %v4152_v30 = vmax.f32 %v4102_v36, 0.0 }
 0xc97   : > { %v15368_v8 = vadd.f32 %v3971_v26, %v3943_v38  ;;  %v4049_v53 = vadd.f32 %v4048_v10, %v15345_v41 }
 0xc99   : > { %v4158_v16 = vmax.f32 %v4049_v53, 0.0 }
 0xc9a   : > { %v4074_v44 = vpop.f32.mrf.mxu2 }
 0xc9b   : > { %v4075_v27 = vadd.f32 %v4074_v44, %v15364_v5  ;;  %v4103_v42 = vpop.f32.mrf.mxu3 }
 0xc9c   : > { %v4104_v20 = vadd.f32 %v4103_v42, %v15366_v60 }
 0xc9d   : > { %v4155_v0 = vmax.f32 %v4075_v27, 0.0  ;;  %v15379_v27 = vperm.slane %v3984_v23, 3 }
 0xc9e   : > { %v4156_v14 = vmax.f32 %v4104_v20, 0.0  ;;  %v15375_v40 = vpop.f32.mrf.mxu0  ;;  %v4050_v38 = vpop.f32.mrf.mxu1 }
 0xc9f   : > { %18514 = vst [vmem:[#allocation24_spill] sm:$0xff] %v15375_v40  ;;  %v4183_v26 = vpack.c.bf16 %v4155_v0, %v4151_v59  ;;  %v4051_v50 = vadd.f32 %v4050_v38, %v15345_v41 }
 0xca0   : > { %v4184_v15 = vpack.c.bf16 %v4156_v14, %v4152_v30  ;;  %v12718_v14 = vld [vmem:[%s18443_s10 + $0xec] sm:$0xf0] }
 0xca1   : > { %v4162_v56 = vmax.f32 %v4051_v50, 0.0  ;;  %4491 = vmatmul.bf16.vlgmr.msrb.gmra.mxu2 %v4183_v26 }
 0xca2   : > { %4520 = vmatmul.bf16.vlgmr.msrb.gmra.mxu3 %v4184_v15  ;;  %v4077_v44 = vpop.f32.mrf.mxu2 }
 0xca3   : > { %v4106_v55 = vpop.f32.mrf.mxu3  ;;  %v4186_v42 = vpack.c.bf16 %v4162_v56, %v4158_v16  ;;  %v4078_v36 = vadd.f32 %v4077_v44, %v15364_v5  ;;  %v11327_v56 = vld [vmem:[%s18443_s10 + $0xb0] sm:$0xf] }
 0xca4   : > { %v4107_v20 = vadd.f32 %v4106_v55, %v15366_v60  ;;  %v11328_v26 = vor.u32 %v12718_v14, %v11327_v56 }
 0xca5   : > { %4467 = vmatmul.bf16.gmra.mxu1 %v4186_v42  ;;  %v4159_v23 = vmax.f32 %v4078_v36, 0.0  ;;  %v11311_v36 = vld [vmem:[%s18443_s10 + $0x30] sm:$0xf] }
 0xca6   : > { %v4053_v11 = vpop.f32.mrf.mxu1  ;;  %v4130_v10 = vpop.f32.mrf.mxu0  ;;  %v4160_v50 = vmax.f32 %v4107_v20, 0.0  ;;  %4642 = vmatpush.bf16.msrb.mxu1 %v11328_v26 }
 0xca7   : > { %v4054_v53 = vadd.f32 %v4053_v11, %v15345_v41  ;;  %v4131_v38 = vadd.f32 %v4130_v10, %v15379_v27  ;;  %v12714_v10 = vld [vmem:[%s18443_s10 + $0x6c] sm:$0xf0] }
 0xca8   : > { %v11312_v56 = vor.u32 %v12714_v10, %v11311_v36 }
 0xca9   : > { %v4166_v40 = vmax.f32 %v4054_v53, 0.0  ;;  %v4153_v20 = vmax.f32 %v4131_v38, 0.0  ;;  %v12716_v38 = vld [vmem:[%s18443_s10 + $0xb4] sm:$0xf] }
 0xcaa   : > { %v4079_v59 = vpop.f32.mrf.mxu2  ;;  %4643 = vmatpush.bf16.msrb.mxu1 %v11312_v56  ;;  %v11313_v56 = vld [vmem:[%s18443_s10 + $0x70] sm:$0xf0] }
 0xcab   : > { %v4080_v0 = vadd.f32 %v4079_v59, %v15364_v5  ;;  %v4108_v30 = vpop.f32.mrf.mxu3 }
 0xcac   : > { %v4109_v15 = vadd.f32 %v4108_v30, %v15366_v60 }
 0xcad   : > { %v4163_v55 = vmax.f32 %v4080_v0, 0.0 }
 0xcae   : > { %v4164_v16 = vmax.f32 %v4109_v15, 0.0  ;;  %v4055_v44 = vpop.f32.mrf.mxu1  ;;  %v4132_v42 = vpop.f32.mrf.mxu0 }
 0xcaf   : > { %v4056_v11 = vadd.f32 %v4055_v44, %v15345_v41  ;;  %v4133_v59 = vadd.f32 %v4132_v42, %v15379_v27  ;;  %v4187_v30 = vpack.c.bf16 %v4163_v55, %v4159_v23  ;;  %v12719_v42 = vld [vmem:[%s18443_s10 + $0xf4] sm:$0xf0] }
 0xcb0   : > { %v4188_v43 = vpack.c.bf16 %v4164_v16, %v4160_v50  ;;  %v11329_v16 = vld [vmem:[%s18443_s10 + $0xf0] sm:$0xf0] }
 0xcb1   : > { %v4170_v0 = vmax.f32 %v4056_v11, 0.0  ;;  %v4157_v15 = vmax.f32 %v4133_v59, 0.0  ;;  %4496 = vmatmul.bf16.gmra.mxu2 %v4187_v30 }
 0xcb2   : > { %4525 = vmatmul.bf16.gmra.mxu3 %v4188_v43  ;;  %v4082_v14 = vpop.f32.mrf.mxu2  ;;  %v11335_v43 = vld [vmem:[%s18443_s10 + $0xb8] sm:$0xf] }
 0xcb3   : > { %v4185_v44 = vpack.c.bf16 %v4157_v15, %v4153_v20  ;;  %v4111_v23 = vpop.f32.mrf.mxu3  ;;  %v4190_v55 = vpack.c.bf16 %v4170_v0, %v4166_v40  ;;  %v4083_v50 = vadd.f32 %v4082_v14, %v15364_v5  ;;  %v11332_v40 = vor.u32 %v12716_v38, %v11329_v16  ;;  %v12712_v15 = vld [vmem:[%s18443_s10 + $0x34] sm:$0xf]  ;;  %v11319_v14 = vld [vmem:[%s18443_s10 + $0x38] sm:$0xf] }
 0xcb4   : > { %v4112_v11 = vadd.f32 %v4111_v23, %v15366_v60  ;;  %v11336_v30 = vor.u32 %v12719_v42, %v11335_v43  ;;  %v12715_v38 = vld [vmem:[%s18443_s10 + $0x74] sm:$0xf0] }
 0xcb5   : > { %4472 = vmatmul.bf16.gmra.mxu1 %v4190_v55  ;;  %4549 = vmatmul.bf16.vlgmr.msra.gmra.mxu0 %v4185_v44  ;;  %v4167_v36 = vmax.f32 %v4083_v50, 0.0  ;;  %v11316_v50 = vor.u32 %v12712_v15, %v11313_v56 }
 0xcb6   : > { %v4058_v53 = vpop.f32.mrf.mxu1  ;;  %v4135_v26 = vpop.f32.mrf.mxu0  ;;  %4671 = vmatpush.bf16.msra.mxu2 %v11332_v40  ;;  %4700 = vmatpush.bf16.msra.mxu3 %v11336_v30  ;;  %v4168_v16 = vmax.f32 %v4112_v11, 0.0 }
 0xcb7   : > { %v4059_v44 = vadd.f32 %v4058_v53, %v15345_v41  ;;  %v4136_v23 = vadd.f32 %v4135_v26, %v15379_v27 }
 0xcb9   : > { %v4174_v26 = vmax.f32 %v4059_v44, 0.0 }
 0xcba   : > { %v4084_v59 = vpop.f32.mrf.mxu2  ;;  %4672 = vmatpush.bf16.msra.mxu2 %v11316_v50 }
 0xcbb   : > { %v4085_v10 = vadd.f32 %v4084_v59, %v15364_v5  ;;  %v4113_v20 = vpop.f32.mrf.mxu3  ;;  %v11320_v59 = vor.u32 %v12715_v38, %v11319_v14 }
 0xcbc   : > { %v4114_v0 = vadd.f32 %v4113_v20, %v15366_v60 }
 0xcbd   : > { %v4171_v55 = vmax.f32 %v4085_v10, 0.0  ;;  %4701 = vmatpush.bf16.msra.mxu3 %v11320_v59  ;;  %v4161_v10 = vmax.f32 %v4136_v23, 0.0 }
 0xcbe   : > { %v4172_v43 = vmax.f32 %v4114_v0, 0.0  ;;  %v4060_v40 = vpop.f32.mrf.mxu1  ;;  %v4137_v42 = vpop.f32.mrf.mxu0 }
 0xcbf   : > { %v4061_v30 = vadd.f32 %v4060_v40, %v15345_v41  ;;  %v4138_v20 = vadd.f32 %v4137_v42, %v15379_v27  ;;  %v4191_v1 = vpack.c.bf16 %v4171_v55, %v4167_v36  ;;  %v12717_v41 = vld [vmem:[%s18443_s10 + $0xbc] sm:$0xf] }
 0xcc0   : > { %v4192_v53 = vpack.c.bf16 %v4172_v43, %v4168_v16  ;;  %v11337_v36 = vld [vmem:[%s18443_s10 + $0xf8] sm:$0xf0] }
 0xcc1   : > { %v4178_v15 = vmax.f32 %v4061_v30, 0.0  ;;  %v4165_v56 = vmax.f32 %v4138_v20, 0.0  ;;  %4501 = vmatmul.bf16.gmra.mxu2 %v4191_v1  ;;  %v11340_v44 = vor.u32 %v12717_v41, %v11337_v36 }
 0xcc2   : > { %4530 = vmatmul.bf16.gmra.mxu3 %v4192_v53  ;;  %v4087_v17 = vpop.f32.mrf.mxu2 }
 0xcc3   : > { %v4116_v11 = vpop.f32.mrf.mxu3  ;;  %v4194_v0 = vpack.c.bf16 %v4178_v15, %v4174_v26  ;;  %v4189_v48 = vpack.c.bf16 %v4165_v56, %v4161_v10  ;;  %4729 = vmatpush.bf16.msrb.mxu0 %v11340_v44  ;;  %v4088_v1 = vadd.f32 %v4087_v17, %v15364_v5  ;;  %v12713_v17 = vld [vmem:[%s18443_s10 + $0x3c] sm:$0xf] }
 0xcc4   : > { %v4117_v23 = vadd.f32 %v4116_v11, %v15366_v60 }
 0xcc5   : > { %4477 = vmatmul.bf16.gmra.mxu1 %v4194_v0  ;;  %4554 = vmatmul.bf16.gmra.mxu0 %v4189_v48  ;;  %v4175_v16 = vmax.f32 %v4088_v1, 0.0 }
 0xcc6   : > { %v4140_v14 = vpop.f32.mrf.mxu0  ;;  %v4176_v42 = vmax.f32 %v4117_v23, 0.0  ;;  %v12727_v23 = vld [vmem:[%s18445_s12 + $0x338] sm:$0xff] }
 0xcc7   : > { %v4141_v43 = vadd.f32 %v4140_v14, %v15379_v27  ;;  %5056 = vmatpush.bf16.msra.mxu1 %v12727_v23 }
 0xcca   : > { %v4089_v55 = vpop.f32.mrf.mxu2 }
 0xccb   : > { %v4090_v50 = vadd.f32 %v4089_v55, %v15364_v5  ;;  %v4118_v38 = vpop.f32.mrf.mxu3  ;;  %v11321_v5 = vld [vmem:[%s18443_s10 + $0x78] sm:$0xf0] }
 0xccc   : > { %v4119_v48 = vadd.f32 %v4118_v38, %v15366_v60  ;;  %v4169_v60 = vmax.f32 %v4141_v43, 0.0  ;;  %v11324_v15 = vor.u32 %v12713_v17, %v11321_v5  ;;  %v12743_v17 = vld [vmem:[%s18445_s12 + $0x3b8] sm:$0xff] }
 0xccd   : > { %v4179_v40 = vmax.f32 %v4090_v50, 0.0  ;;  %5114 = vmatpush.bf16.msrb.mxu3 %v12743_v17 }
 0xcce   : > { %v4180_v59 = vmax.f32 %v4119_v48, 0.0  ;;  %v4142_v30 = vpop.f32.mrf.mxu0  ;;  %4730 = vmatpush.bf16.msrb.mxu0 %v11324_v15  ;;  %v12726_v48 = vld [vmem:[%s18445_s12 + $0x330] sm:$0xff] }
 0xccf   : > { %v4143_v20 = vadd.f32 %v4142_v30, %v15379_v27  ;;  %v4195_v53 = vpack.c.bf16 %v4179_v40, %v4175_v16  ;;  %5057 = vmatpush.bf16.msra.mxu1 %v12726_v48 }
 0xcd0   : > { %v4196_v26 = vpack.c.bf16 %v4180_v59, %v4176_v42  ;;  %v12723_v59 = vld [vmem:[%s18445_s12 + $0x318] sm:$0xff] }
 0xcd1   : > { %v4173_v10 = vmax.f32 %v4143_v20, 0.0  ;;  %4506 = vmatmul.bf16.gmra.mxu2 %v4195_v53 }
 0xcd2   : > { %4535 = vmatmul.bf16.gmra.mxu3 %v4196_v26  ;;  %v12735_v26 = vld [vmem:[%s18445_s12 + $0x378] sm:$0xff] }
 0xcd3   : > { %v4193_v56 = vpack.c.bf16 %v4173_v10, %v4169_v60  ;;  %5085 = vmatpush.bf16.msrb.mxu2 %v12735_v26 }
 0xcd5   : > { %4559 = vmatmul.bf16.gmra.mxu0 %v4193_v56  ;;  %11341 = vmatmul.msk.bf16.vlgmr.msrb.gmra.mxu1 %vm518_vm0, %v14567_v63  ;;  %v12722_v56 = vld [vmem:[%s18445_s12 + $0x310] sm:$0xff] }
 0xcd6   : > { %v4145_v11 = vpop.f32.mrf.mxu0 }
 0xcd7   : > { %v4146_v0 = vadd.f32 %v4145_v11, %v15379_v27 }
 0xcd9   : > { %v4177_v14 = vmax.f32 %v4146_v0, 0.0  ;;  %v12734_v0 = vld [vmem:[%s18445_s12 + $0x370] sm:$0xff] }
 0xcda   : > { %5086 = vmatpush.bf16.msrb.mxu2 %v12734_v0  ;;  %v12729_v0 = vld [vmem:[%s18445_s12 + $0x348] sm:$0xff] }
 0xcde   : > { %v4147_v41 = vpop.f32.mrf.mxu0 }
 0xcdf   : > { %v4148_v36 = vadd.f32 %v4147_v41, %v15379_v27  ;;  %v12742_v41 = vld [vmem:[%s18445_s12 + $0x3b0] sm:$0xff] }
 0xce0   : > { %5115 = vmatpush.bf16.msrb.mxu3 %v12742_v41  ;;  %v12737_v41 = vld [vmem:[%s18445_s12 + $0x388] sm:$0xff] }
 0xce1   : > { %v4181_v44 = vmax.f32 %v4148_v36, 0.0  ;;  %11345 = vmatmul.msk.bf16.vlgmr.msra.gmra.mxu2 %vm518_vm0, %v14567_v63 }
 0xce2   : > { %11349 = vmatmul.msk.bf16.vlgmr.msra.gmra.mxu3 %vm518_vm0, %v14567_v63 }
 0xce3   : > { %v4197_v1 = vpack.c.bf16 %v4181_v44, %v4177_v14  ;;  %v12733_v44 = vld [vmem:[%s18445_s12 + $0x368] sm:$0xff] }
 0xce4   : > { %5087 = vmatpush.bf16.msrb.mxu2 %v12733_v44 }
 0xce5   : > { %4564 = vmatmul.bf16.gmra.mxu0 %v4197_v1  ;;  %11342 = vmatmul.msk.bf16.gmra.mxu1 %vm518_vm0, %v14593_v4  ;;  %v12741_v1 = vld [vmem:[%s18445_s12 + $0x3a8] sm:$0xff] }
 0xce6   : > { %5116 = vmatpush.bf16.msrb.mxu3 %v12741_v1  ;;  %v12748_v1 = vld [vmem:[%s18445_s12 + $0x3e0] sm:$0xff] }
 0xcf1   : > { %11346 = vmatmul.msk.bf16.gmra.mxu2 %vm518_vm0, %v14593_v4 }
 0xcf2   : > { %11350 = vmatmul.msk.bf16.gmra.mxu3 %vm518_vm0, %v14593_v4 }
 0xcf5   : > { %11343 = vmatmul.msk.bf16.gmra.mxu1 %vm518_vm0, %v14615_v22  ;;  %11353 = vmatmul.msk.bf16.vlgmr.msrb.gmra.mxu0 %vm518_vm0, %v14567_v63 }
 0xd01   : > { %11347 = vmatmul.msk.bf16.gmra.mxu2 %vm518_vm0, %v14615_v22 }
 0xd02   : > { %11351 = vmatmul.msk.bf16.gmra.mxu3 %vm518_vm0, %v14615_v22 }
 0xd05   : > { %11344 = vmatmul.msk.bf16.gmra.mxu1 %vm518_vm0, %v14688_v39  ;;  %11354 = vmatmul.msk.bf16.gmra.mxu0 %vm518_vm0, %v14593_v4 }
 0xd11   : > { %11348 = vmatmul.msk.bf16.gmra.mxu2 %vm518_vm0, %v14688_v39 }
 0xd12   : > { %11352 = vmatmul.msk.bf16.gmra.mxu3 %vm518_vm0, %v14688_v39  ;;  %v4463_v27 = vpop.f32.mrf.mxu1 }
 0xd15   : > { %11355 = vmatmul.msk.bf16.gmra.mxu0 %vm518_vm0, %v14615_v22  ;;  %v12725_v22 = vld [vmem:[%s18445_s12 + $0x328] sm:$0xff] }
 0xd16   : > { %5058 = vmatpush.bf16.msra.mxu1 %v12725_v22 }
 0xd1a   : > { %v15482_v63 = vpop.f32.mrf.mxu1 }
 0xd22   : > { %v4468_v55 = vpop.f32.mrf.mxu1 }
 0xd24   : > { %v4492_v50 = vpop.f32.mrf.mxu2 }
 0xd25   : > { %v4493_v4 = vadd.f32 %v4492_v50, %v4463_v27  ;;  %v4521_v38 = vpop.f32.mrf.mxu3  ;;  %11356 = vmatmul.msk.bf16.gmra.mxu0 %vm518_vm0, %v14688_v39  ;;  %v12724_v39 = vld [vmem:[%s18445_s12 + $0x320] sm:$0xff] }
 0xd26   : > { %5059 = vmatpush.bf16.msra.mxu1 %v12724_v39  ;;  %v12732_v50 = vld [vmem:[%s18445_s12 + $0x360] sm:$0xff]  ;;  %v12731_v39 = vld [vmem:[%s18445_s12 + $0x358] sm:$0xff] }
 0xd27   : > { %v4522_v16 = vadd.f32 %v4521_v38, %v4493_v4  ;;  %v12740_v4 = vld [vmem:[%s18445_s12 + $0x3a0] sm:$0xff]  ;;  %5088 = vmatpush.bf16.msrb.mxu2 %v12732_v50  ;;  %v12751_v38 = vld [vmem:[%s18445_s12 + $0x3f8] sm:$0xff] }
 0xd28   : > { %5117 = vmatpush.bf16.msrb.mxu3 %v12740_v4  ;;  %5143 = vmatpush.bf16.msra.mxu0 %v12751_v38  ;;  %v12736_v50 = vld [vmem:[%s18445_s12 + $0x380] sm:$0xff]  ;;  %v12747_v4 = vld [vmem:[%s18445_s12 + $0x3d8] sm:$0xff] }
 0xd2a   : > { %v15495_v43 = vpop.f32.mrf.mxu1  ;;  %5060 = vmatpush.bf16.msra.mxu1 %v12723_v59  ;;  %v12739_v59 = vld [vmem:[%s18445_s12 + $0x398] sm:$0xff] }
 0xd2b   : > { %5089 = vmatpush.bf16.msrb.mxu2 %v12731_v39 }
 0xd2c   : > { %v15497_v40 = vpop.f32.mrf.mxu2  ;;  %5118 = vmatpush.bf16.msrb.mxu3 %v12739_v59 }
 0xd2d   : > { %v15499_v42 = vpop.f32.mrf.mxu3 }
 0xd2e   : > { %5061 = vmatpush.bf16.msra.mxu1 %v12722_v56  ;;  %v12738_v56 = vld [vmem:[%s18445_s12 + $0x390] sm:$0xff] }
 0xd30   : > { %5119 = vmatpush.bf16.msrb.mxu3 %v12738_v56 }
 0xd32   : > { %v4473_v30 = vpop.f32.mrf.mxu1  ;;  %v4550_v20 = vpop.f32.mrf.mxu0 }
 0xd33   : > { %v4551_v53 = vadd.f32 %v4550_v20, %v4522_v16 }
 0xd34   : > { %v4497_v5 = vpop.f32.mrf.mxu2  ;;  %5120 = vmatpush.bf16.msrb.mxu3 %v12737_v41 }
 0xd35   : > { %v15514_v60 = vadd.f32 %v4551_v53, %v15259_v2  ;;  %v4498_v10 = vadd.f32 %v4497_v5, %v4468_v55  ;;  %v4526_v15 = vpop.f32.mrf.mxu3  ;;  %v12721_v2 = vld [vmem:[%s18445_s12 + $0x308] sm:$0xff]  ;;  %v12720_v55 = vld [vmem:[%s18445_s12 + $0x300] sm:$0xff]  ;;  %v12750_v5 = vld [vmem:[%s18445_s12 + $0x3f0] sm:$0xff] }
 0xd36   : > { %5062 = vmatpush.bf16.msra.mxu1 %v12721_v2  ;;  %5144 = vmatpush.bf16.msra.mxu0 %v12750_v5 }
 0xd37   : > { %v4527_v11 = vadd.f32 %v4526_v15, %v4498_v10  ;;  %v12730_v15 = vld [vmem:[%s18445_s12 + $0x350] sm:$0xff] }
 0xd38   : > { %5090 = vmatpush.bf16.msrb.mxu2 %v12730_v15  ;;  %5121 = vmatpush.bf16.msrb.mxu3 %v12736_v50  ;;  %v12746_v15 = vld [vmem:[%s18445_s12 + $0x3d0] sm:$0xff] }
 0xd3a   : > { %v15528_v36 = vpop.f32.mrf.mxu1  ;;  %v15530_v14 = vpop.f32.mrf.mxu0  ;;  %5063 = vmatpush.bf16.msra.mxu1 %v12720_v55  ;;  %v12728_v55 = vld [vmem:[%s18445_s12 + $0x340] sm:$0xff] }
 0xd3c   : > { %v15538_v27 = vpop.f32.mrf.mxu2  ;;  %5091 = vmatpush.bf16.msrb.mxu2 %v12729_v0 }
 0xd3d   : > { %v15540_v23 = vpop.f32.mrf.mxu3 }
 0xd40   : > { %5092 = vmatpush.bf16.msrb.mxu2 %v12728_v55 }
 0xd42   : > { %v4478_v48 = vpop.f32.mrf.mxu1  ;;  %v4555_v16 = vpop.f32.mrf.mxu0 }
 0xd43   : > { %v4556_v22 = vadd.f32 %v4555_v16, %v4527_v11  ;;  %v4586_v16 = vld [vmem:[%s18444_s11 + $0xc] sm:$0xf] }
 0xd44   : > { %v4502_v20 = vpop.f32.mrf.mxu2 }
 0xd45   : > { %v15561_v53 = vadd.f32 %v4556_v22, %v15306_v32  ;;  %v4503_v26 = vadd.f32 %v4502_v20, %v4473_v30  ;;  %v4531_v17 = vpop.f32.mrf.mxu3  ;;  %v12749_v32 = vld [vmem:[%s18445_s12 + $0x3e8] sm:$0xff] }
 0xd46   : > { %5145 = vmatpush.bf16.msra.mxu0 %v12749_v32 }
 0xd47   : > { %v4532_v10 = vadd.f32 %v4531_v17, %v4503_v26  ;;  %v15607_v26 = vperm.slane %v4586_v16, 0 }
 0xd4a   : > { %v15575_v30 = vpop.f32.mrf.mxu1  ;;  %v15577_v11 = vpop.f32.mrf.mxu0  ;;  %5146 = vmatpush.bf16.msra.mxu0 %v12748_v1 }
 0xd4b   : > { %18515 = vst [vmem:[#allocation25_spill] sm:$0xff] %v15575_v30 }
 0xd4c   : > { %v15585_v2 = vpop.f32.mrf.mxu2 }
 0xd4d   : > { %v15587_v44 = vpop.f32.mrf.mxu3 }
 0xd4e   : > { %18516 = vst [vmem:[#allocation26_spill] sm:$0xff] %v15587_v44  ;;  %5147 = vmatpush.bf16.msra.mxu0 %v12747_v4  ;;  %v12744_v4 = vld [vmem:[%s18445_s12 + $0x3c0] sm:$0xff] }
 0xd52   : > { %v4560_v38 = vpop.f32.mrf.mxu0  ;;  %v4645_v22 = vpop.f32.mrf.mxu1  ;;  %5148 = vmatpush.bf16.msra.mxu0 %v12746_v15 }
 0xd53   : > { %v4561_v39 = vadd.f32 %v4560_v38, %v4532_v10  ;;  %v4646_v32 = vadd.f32 %v4645_v22, %v15607_v26  ;;  %v12745_v10 = vld [vmem:[%s18445_s12 + $0x3c8] sm:$0xff] }
 0xd54   : > { %v4507_v59 = vpop.f32.mrf.mxu2 }
 0xd55   : > { %v15605_v20 = vadd.f32 %v4561_v39, %v15343_v52  ;;  %v4508_v17 = vadd.f32 %v4507_v59, %v4478_v48  ;;  %v4536_v5 = vpop.f32.mrf.mxu3  ;;  %v4752_v1 = vmax.f32 %v4646_v32, 0.0  ;;  %v15631_v32 = vperm.slane %v4586_v16, 2 }
 0xd56   : > { %5149 = vmatpush.bf16.msra.mxu0 %v12745_v10  ;;  %v15629_v10 = vperm.slane %v4586_v16, 1 }
 0xd57   : > { %18517 = vst [vmem:[#allocation27_spill] sm:$0xff] %v15605_v20  ;;  %v4537_v56 = vadd.f32 %v4536_v5, %v4508_v17 }
 0xd5a   : > { %v15616_v0 = vpop.f32.mrf.mxu0  ;;  %v4647_v52 = vpop.f32.mrf.mxu1  ;;  %5150 = vmatpush.bf16.msra.mxu0 %v12744_v4 }
 0xd5b   : > { %18518 = vst [vmem:[#allocation28_spill] sm:$0xff] %v15616_v0  ;;  %v4648_v41 = vadd.f32 %v4647_v52, %v15607_v26 }
 0xd5c   : > { %v15619_v48 = vpop.f32.mrf.mxu2 }
 0xd5d   : > { %18519 = vst [vmem:[#allocation29_spill] sm:$0xff] %v15619_v48  ;;  %v4756_v55 = vmax.f32 %v4648_v41, 0.0  ;;  %v15621_v50 = vpop.f32.mrf.mxu3 }
 0xd5e   : > { %18520 = vst [vmem:[#allocation30_spill] sm:$0xff] %v15621_v50 }
 0xd5f   : > { %v4784_v38 = vpack.c.bf16 %v4756_v55, %v4752_v1 }
 0xd61   : > { %5064 = vmatmul.bf16.vlgmr.msra.gmra.mxu1 %v4784_v38 }
 0xd62   : > { %v4565_v22 = vpop.f32.mrf.mxu0  ;;  %v4650_v39 = vpop.f32.mrf.mxu1 }
 0xd63   : > { %v4566_v59 = vadd.f32 %v4565_v22, %v4537_v56  ;;  %v4651_v52 = vadd.f32 %v4650_v39, %v15607_v26 }
 0xd64   : > { %v4674_v17 = vpop.f32.mrf.mxu2 }
 0xd65   : > { %v15627_v5 = vadd.f32 %v4566_v59, %v15368_v8  ;;  %v4703_v15 = vpop.f32.mrf.mxu3  ;;  %v4675_v1 = vadd.f32 %v4674_v17, %v15629_v10  ;;  %v4760_v38 = vmax.f32 %v4651_v52, 0.0  ;;  %v15641_v52 = vperm.slane %v4586_v16, 3 }
 0xd66   : > { %v4704_v56 = vadd.f32 %v4703_v15, %v15631_v32 }
 0xd67   : > { %18521 = vst [vmem:[#allocation31_spill] sm:$0xff] %v15627_v5  ;;  %v4753_v30 = vmax.f32 %v4675_v1, 0.0 }
 0xd68   : > { %v4754_v33 = vmax.f32 %v4704_v56, 0.0 }
 0xd6a   : > { %v15634_v41 = vpop.f32.mrf.mxu0  ;;  %v4652_v50 = vpop.f32.mrf.mxu1 }
 0xd6b   : > { %18522 = vst [vmem:[#allocation32_spill] sm:$0xff] %v15634_v41  ;;  %v4653_v55 = vadd.f32 %v4652_v50, %v15607_v26 }
 0xd6c   : > { %v4676_v4 = vpop.f32.mrf.mxu2 }
 0xd6d   : > { %v4764_v8 = vmax.f32 %v4653_v55, 0.0  ;;  %v4677_v22 = vadd.f32 %v4676_v4, %v15629_v10  ;;  %v4705_v59 = vpop.f32.mrf.mxu3 }
 0xd6e   : > { %v4706_v48 = vadd.f32 %v4705_v59, %v15631_v32 }
 0xd6f   : > { %v4757_v5 = vmax.f32 %v4677_v22, 0.0  ;;  %v4788_v39 = vpack.c.bf16 %v4764_v8, %v4760_v38 }
 0xd70   : > { %v4758_v41 = vmax.f32 %v4706_v48, 0.0 }
 0xd71   : > { %v4785_v0 = vpack.c.bf16 %v4757_v5, %v4753_v30  ;;  %5069 = vmatmul.bf16.gmra.mxu1 %v4788_v39 }
 0xd72   : > { %v4786_v17 = vpack.c.bf16 %v4758_v41, %v4754_v33  ;;  %v4655_v34 = vpop.f32.mrf.mxu1  ;;  %v4732_v50 = vpop.f32.mrf.mxu0 }
 0xd73   : > { %5093 = vmatmul.bf16.vlgmr.msrb.gmra.mxu2 %v4785_v0  ;;  %v4656_v4 = vadd.f32 %v4655_v34, %v15607_v26  ;;  %v4733_v59 = vadd.f32 %v4732_v50, %v15641_v52 }
 0xd74   : > { %5122 = vmatmul.bf16.vlgmr.msrb.gmra.mxu3 %v4786_v17  ;;  %v4679_v15 = vpop.f32.mrf.mxu2 }
 0xd75   : > { %v4708_v55 = vpop.f32.mrf.mxu3  ;;  %v4680_v56 = vadd.f32 %v4679_v15, %v15629_v10  ;;  %v4768_v48 = vmax.f32 %v4656_v4, 0.0  ;;  %v4755_v41 = vmax.f32 %v4733_v59, 0.0 }
 0xd76   : > { %v4709_v0 = vadd.f32 %v4708_v55, %v15631_v32 }
 0xd77   : > { %v4761_v17 = vmax.f32 %v4680_v56, 0.0 }
 0xd78   : > { %v4762_v44 = vmax.f32 %v4709_v0, 0.0 }
 0xd7a   : > { %v4657_v1 = vpop.f32.mrf.mxu1  ;;  %v4734_v22 = vpop.f32.mrf.mxu0 }
 0xd7b   : > { %v4658_v30 = vadd.f32 %v4657_v1, %v15607_v26  ;;  %v4735_v33 = vadd.f32 %v4734_v22, %v15641_v52 }
 0xd7c   : > { %v4681_v5 = vpop.f32.mrf.mxu2 }
 0xd7d   : > { %v4772_v16 = vmax.f32 %v4658_v30, 0.0  ;;  %v4759_v38 = vmax.f32 %v4735_v33, 0.0  ;;  %v4682_v8 = vadd.f32 %v4681_v5, %v15629_v10  ;;  %v4710_v34 = vpop.f32.mrf.mxu3 }
 0xd7e   : > { %v4711_v39 = vadd.f32 %v4710_v34, %v15631_v32 }
 0xd7f   : > { %v4787_v50 = vpack.c.bf16 %v4759_v38, %v4755_v41  ;;  %v4765_v20 = vmax.f32 %v4682_v8, 0.0  ;;  %v4792_v15 = vpack.c.bf16 %v4772_v16, %v4768_v48 }
 0xd80   : > { %v4766_v1 = vmax.f32 %v4711_v39, 0.0 }
 0xd81   : > { %5074 = vmatmul.bf16.gmra.mxu1 %v4792_v15  ;;  %5151 = vmatmul.bf16.vlgmr.msra.gmra.mxu0 %v4787_v50  ;;  %v4789_v4 = vpack.c.bf16 %v4765_v20, %v4761_v17 }
 0xd82   : > { %v4660_v22 = vpop.f32.mrf.mxu1  ;;  %v4737_v55 = vpop.f32.mrf.mxu0  ;;  %v4790_v6 = vpack.c.bf16 %v4766_v1, %v4762_v44 }
 0xd83   : > { %5098 = vmatmul.bf16.gmra.mxu2 %v4789_v4  ;;  %v4661_v33 = vadd.f32 %v4660_v22, %v15607_v26  ;;  %v4738_v5 = vadd.f32 %v4737_v55, %v15641_v52 }
 0xd84   : > { %5127 = vmatmul.bf16.gmra.mxu3 %v4790_v6  ;;  %v4684_v59 = vpop.f32.mrf.mxu2 }
 0xd85   : > { %v4713_v30 = vpop.f32.mrf.mxu3  ;;  %v4685_v48 = vadd.f32 %v4684_v59, %v15629_v10  ;;  %v4776_v20 = vmax.f32 %v4661_v33, 0.0  ;;  %v4763_v8 = vmax.f32 %v4738_v5, 0.0 }
 0xd86   : > { %v4714_v38 = vadd.f32 %v4713_v30, %v15631_v32 }
 0xd87   : > { %v4769_v15 = vmax.f32 %v4685_v48, 0.0 }
 0xd88   : > { %v4770_v55 = vmax.f32 %v4714_v38, 0.0 }
 0xd8a   : > { %v4662_v56 = vpop.f32.mrf.mxu1  ;;  %v4739_v41 = vpop.f32.mrf.mxu0 }
 0xd8b   : > { %v4663_v0 = vadd.f32 %v4662_v56, %v15607_v26  ;;  %v4740_v16 = vadd.f32 %v4739_v41, %v15641_v52 }
 0xd8c   : > { %v4686_v44 = vpop.f32.mrf.mxu2 }
 0xd8d   : > { %v4780_v6 = vmax.f32 %v4663_v0, 0.0  ;;  %v4767_v34 = vmax.f32 %v4740_v16, 0.0  ;;  %v4687_v39 = vadd.f32 %v4686_v44, %v15629_v10  ;;  %v4715_v17 = vpop.f32.mrf.mxu3 }
 0xd8e   : > { %v4716_v50 = vadd.f32 %v4715_v17, %v15631_v32 }
 0xd8f   : > { %v4773_v1 = vmax.f32 %v4687_v39, 0.0  ;;  %v4796_v4 = vpack.c.bf16 %v4780_v6, %v4776_v20  ;;  %v4791_v22 = vpack.c.bf16 %v4767_v34, %v4763_v8 }
 0xd90   : > { %v4774_v26 = vmax.f32 %v4716_v50, 0.0 }
 0xd91   : > { %5079 = vmatmul.bf16.gmra.mxu1 %v4796_v4  ;;  %5156 = vmatmul.bf16.gmra.mxu0 %v4791_v22  ;;  %v4793_v59 = vpack.c.bf16 %v4773_v1, %v4769_v15 }
 0xd92   : > { %v4742_v33 = vpop.f32.mrf.mxu0  ;;  %v4794_v30 = vpack.c.bf16 %v4774_v26, %v4770_v55 }
 0xd93   : > { %5103 = vmatmul.bf16.gmra.mxu2 %v4793_v59  ;;  %v4743_v41 = vadd.f32 %v4742_v33, %v15641_v52 }
 0xd94   : > { %5132 = vmatmul.bf16.gmra.mxu3 %v4794_v30  ;;  %v4689_v5 = vpop.f32.mrf.mxu2 }
 0xd95   : > { %v4718_v56 = vpop.f32.mrf.mxu3  ;;  %v4690_v16 = vadd.f32 %v4689_v5, %v15629_v10  ;;  %v4771_v44 = vmax.f32 %v4743_v41, 0.0  ;;  %v3593_v41 = vadd.f32 %v15168_v3, %v15156_v54  ;;  %v15678_v3 = vld [vmem:[%s18446_s13] ss:$0 sm:$0xff] }
 0xd96   : > { %v4719_v20 = vadd.f32 %v4718_v56, %v15631_v32 }
 0xd97   : > { %v4777_v17 = vmax.f32 %v4690_v16, 0.0 }
 0xd98   : > { %v4778_v1 = vmax.f32 %v4719_v20, 0.0  ;;  %v3622_v20 = vadd.f32 %v15170_v19, %v3593_v41 }
 0xd9a   : > { %v4744_v0 = vpop.f32.mrf.mxu0 }
 0xd9b   : > { %v4745_v48 = vadd.f32 %v4744_v0, %v15641_v52 }
 0xd9c   : > { %v4691_v38 = vpop.f32.mrf.mxu2 }
 0xd9d   : > { %v4775_v8 = vmax.f32 %v4745_v48, 0.0  ;;  %v4692_v6 = vadd.f32 %v4691_v38, %v15629_v10  ;;  %v4720_v34 = vpop.f32.mrf.mxu3 }
 0xd9e   : > { %v4721_v39 = vadd.f32 %v4720_v34, %v15631_v32 }
 0xd9f   : > { %v4781_v50 = vmax.f32 %v4692_v6, 0.0  ;;  %v4795_v15 = vpack.c.bf16 %v4775_v8, %v4771_v44  ;;  %v3651_v44 = vadd.f32 %v15172_v28, %v3622_v20 }
 0xda0   : > { %v4782_v4 = vmax.f32 %v4721_v39, 0.0 }
 0xda1   : > { %5161 = vmatmul.bf16.gmra.mxu0 %v4795_v15  ;;  %v4797_v22 = vpack.c.bf16 %v4781_v50, %v4777_v17  ;;  %v3872_v8 = vadd.f32 %v15218_v58, %v3651_v44 }
 0xda2   : > { %v4747_v55 = vpop.f32.mrf.mxu0  ;;  %v4798_v26 = vpack.c.bf16 %v4782_v4, %v4778_v1 }
 0xda3   : > { %5108 = vmatmul.bf16.gmra.mxu2 %v4797_v22  ;;  %v4748_v59 = vadd.f32 %v4747_v55, %v15641_v52  ;;  %v3901_v50 = vadd.f32 %v15230_v45, %v3872_v8 }
 0xda4   : > { %5137 = vmatmul.bf16.gmra.mxu3 %v4798_v26 }
 0xda5   : > { %v4779_v10 = vmax.f32 %v4748_v59, 0.0 }
 0xdaa   : > { %v4749_v33 = vpop.f32.mrf.mxu0 }
 0xdab   : > { %v4750_v30 = vadd.f32 %v4749_v33, %v15641_v52  ;;  %v4495_v52 = vadd.f32 %v15497_v40, %v15482_v63  ;;  %v3598_v63 = vadd.f32 %v15184_v21, %v15174_v49  ;;  %v3930_v40 = vadd.f32 %v15232_v31, %v3901_v50 }
 0xdad   : > { %v4783_v5 = vmax.f32 %v4750_v30, 0.0  ;;  %v4524_v28 = vadd.f32 %v15499_v42, %v4495_v52  ;;  %v3959_v4 = vadd.f32 %v15285_v37, %v3930_v40  ;;  %v18523_v40 = vld [vmem:[#allocation18_spill] sm:$0xff] }
 0xdaf   : > { %v4799_v56 = vpack.c.bf16 %v4783_v5, %v4779_v10  ;;  %v4553_v1 = vadd.f32 %v15530_v14, %v4524_v28  ;;  %v4500_v5 = vadd.f32 %v15538_v27, %v15495_v43 }
 0xdb1   : > { %5166 = vmatmul.bf16.gmra.mxu0 %v4799_v56  ;;  %v4571_v33 = vadd.f32 %v4553_v1, %v3959_v4  ;;  %v4529_v20 = vadd.f32 %v15540_v23, %v4500_v5 }
 0xdb3   : > { %v4558_v27 = vadd.f32 %v15577_v11, %v4529_v20 }
 0xdde   : > { %v5065_v32 = vpop.f32.mrf.mxu1 }
 0xde6   : > { %v5067_v16 = vpop.f32.mrf.mxu1 }
 0xdee   : > { %v5070_v19 = vpop.f32.mrf.mxu1 }
 0xdf6   : > { %v5094_v0 = vpop.f32.mrf.mxu2  ;;  %v5072_v14 = vpop.f32.mrf.mxu1 }
 0xdf7   : > { %v5123_v48 = vpop.f32.mrf.mxu3  ;;  %v5095_v38 = vadd.f32 %v5094_v0, %v5065_v32 }
 0xdf9   : > { %v5124_v6 = vadd.f32 %v5123_v48, %v5095_v38 }
 0xdfe   : > { %v5096_v34 = vpop.f32.mrf.mxu2  ;;  %v5152_v17 = vpop.f32.mrf.mxu0 }
 0xdff   : > { %v5125_v39 = vpop.f32.mrf.mxu3  ;;  %v5153_v54 = vadd.f32 %v5152_v17, %v5124_v6  ;;  %v5097_v15 = vadd.f32 %v5096_v34, %v5067_v16  ;;  %v5075_v44 = vpop.f32.mrf.mxu1 }
 0xe01   : > { %v5172_v58 = vadd.f32 %v5153_v54, %v15514_v60  ;;  %v5126_v22 = vadd.f32 %v5125_v39, %v5097_v15  ;;  %v3627_v60 = vadd.f32 %v15186_v25, %v3598_v63 }
 0xe03   : > { %v5184_v45 = vadd.f32 %v15678_v3, %v5172_v58  ;;  %v3656_v37 = vadd.f32 %v15202_v12, %v3627_v60 }
 0xe05   : > { %v15689_v26 = vadd.f32 %v5184_v45, %v14560_v62  ;;  %v3877_v62 = vadd.f32 %v15239_v18, %v3656_v37  ;;  %v18524_v45 = vld [vmem:[#allocation26_spill] sm:$0xff] }
 0xe06   : > { %v5099_v55 = vpop.f32.mrf.mxu2  ;;  %v5154_v59 = vpop.f32.mrf.mxu0 }
 0xe07   : > { %v5128_v42 = vpop.f32.mrf.mxu3  ;;  %v5155_v30 = vadd.f32 %v5154_v59, %v5126_v22  ;;  %v5202_v49 = vsel %vm518_vm0, %v15689_v26, 0.0  ;;  %v5100_v21 = vadd.f32 %v5099_v55, %v5070_v19  ;;  %v3906_v16 = vadd.f32 %v15270_v61, %v3877_v62  ;;  %v5077_v58 = vpop.f32.mrf.mxu1  ;;  %v18525_v22 = vld [vmem:[#allocation27_spill] sm:$0xff]  ;;  %v18527_v59 = vld [vmem:[#allocation28_spill] sm:$0xff] }
 0xe08   : > { %5203 = vadd.xlane.f32.xlu1 %v5202_v49  ;;  %v3603_v61 = vadd.f32 %v15198_v13, %v15188_v51 }
 0xe09   : > { %v5173_v31 = vadd.f32 %v5155_v30, %v4571_v33  ;;  %v5129_v56 = vadd.f32 %v5128_v42, %v5100_v21  ;;  %v3935_v43 = vadd.f32 %v15272_v29, %v3906_v16  ;;  %v18528_v33 = vld [vmem:[#allocation23_spill] sm:$0xff]  ;;  %v18529_v21 = vld [vmem:[#allocation10_spill] sm:$0xff] }
 0xe0a   : > { %v3632_v17 = vadd.f32 %v15200_v35, %v3603_v61  ;;  %v18532_v61 = vld [vmem:[#allocation12_spill] sm:$0xff] }
 0xe0b   : > { %v5185_v10 = vadd.f32 %v15678_v3, %v5173_v31  ;;  %v3964_v8 = vadd.f32 %v15332_v57, %v3935_v43 }
 0xe0c   : > { %v3661_v51 = vadd.f32 %v15216_v46, %v3632_v17 }
 0xe0d   : > { %v15700_v32 = vadd.f32 %v5185_v10, %v14563_v47  ;;  %v4573_v39 = vadd.f32 %v4558_v27, %v3964_v8  ;;  %v18531_v27 = vld [vmem:[#allocation31_spill] sm:$0xff] }
 0xe0e   : > { %v5101_v25 = vpop.f32.mrf.mxu2  ;;  %v5157_v0 = vpop.f32.mrf.mxu0  ;;  %v3882_v57 = vadd.f32 %v15283_v24, %v3661_v51 }
 0xe0f   : > { %v5130_v41 = vpop.f32.mrf.mxu3  ;;  %v5158_v48 = vadd.f32 %v5157_v0, %v5129_v56  ;;  %v5205_v12 = vsel %vm518_vm0, %v15700_v32, 0.0  ;;  %v5102_v18 = vadd.f32 %v5101_v25, %v5072_v14  ;;  %v5080_v56 = vpop.f32.mrf.mxu1 }
 0xe10   : > { %5206 = vadd.xlane.f32.xlu2 %v5205_v12  ;;  %v3911_v35 = vadd.f32 %v18523_v40, %v3882_v57  ;;  %v18530_v12 = vld [vmem:[#allocation11_spill] sm:$0xff]  ;;  %v18539_v57 = vld [vmem:[#allocation29_spill] sm:$0xff]  ;;  %v18541_v40 = vld [vmem:[#allocation30_spill] sm:$0xff] }
 0xe11   : > { %v5174_v38 = vadd.f32 %v5158_v48, %v15561_v53  ;;  %v5131_v52 = vadd.f32 %v5130_v41, %v5102_v18 }
 0xe13   : > { %v5186_v47 = vadd.f32 %v15678_v3, %v5174_v38 }
 0xe15   : > { %v15714_v34 = vadd.f32 %v5186_v47, %v14586_v7  ;;  %v4505_v7 = vadd.f32 %v15585_v2, %v15528_v36  ;;  %v18526_v2 = vld [vmem:[#allocation19_spill] sm:$0xff] }
 0xe16   : > { %v5104_v6 = vpop.f32.mrf.mxu2  ;;  %v5159_v23 = vpop.f32.mrf.mxu0  ;;  %v3940_v42 = vadd.f32 %v18526_v2, %v3911_v35 }
 0xe17   : > { %v5160_v53 = vadd.f32 %v5159_v23, %v5131_v52  ;;  %v5208_v29 = vsel %vm518_vm0, %v15714_v34, 0.0  ;;  %v5133_v11 = vpop.f32.mrf.mxu3  ;;  %v5105_v50 = vadd.f32 %v5104_v6, %v5075_v44  ;;  %v4534_v4 = vadd.f32 %v18524_v45, %v4505_v7  ;;  %v18533_v6 = vld [vmem:[#allocation14_spill] sm:$0xff]  ;;  %v18534_v23 = vld [vmem:[#allocation15_spill] sm:$0xff] }
 0xe18   : > { %5209 = vadd.xlane.f32.xlu0 %v5208_v29  ;;  %v3969_v30 = vadd.f32 %v18528_v33, %v3940_v42  ;;  %v18542_v45 = vld [vmem:[#allocation22_spill] sm:$0xff] }
 0xe19   : > { %v5175_v54 = vadd.f32 %v5160_v53, %v4573_v39  ;;  %v5134_v19 = vadd.f32 %v5133_v11, %v5105_v50  ;;  %v3608_v39 = vadd.f32 %v18534_v23, %v18533_v6  ;;  %v18535_v53 = vld [vmem:[#allocation16_spill] sm:$0xff]  ;;  %v18536_v11 = vld [vmem:[#allocation17_spill] sm:$0xff] }
 0xe1b   : > { %v5187_v13 = vadd.f32 %v15678_v3, %v5175_v54  ;;  %v3637_v29 = vadd.f32 %v18535_v53, %v3608_v39  ;;  %v18537_v54 = vld [vmem:[#allocation20_spill] sm:$0xff] }
 0xe1d   : > { %v15725_v15 = vadd.f32 %v5187_v13, %v14589_v9  ;;  %v4563_v9 = vadd.f32 %v18527_v59, %v4534_v4  ;;  %v3666_v17 = vadd.f32 %v18536_v11, %v3637_v29  ;;  %v18538_v13 = vld [vmem:[#allocation25_spill] sm:$0xff] }
 0xe1e   : > { %v5106_v28 = vpop.f32.mrf.mxu2  ;;  %v5162_v63 = vpop.f32.mrf.mxu0  ;;  %v4510_v7 = vadd.f32 %v18539_v57, %v18538_v13  ;;  %v12752_v57 = vld [vmem:[%s18435_s2 + $0x10] sm:$0xff] }
 0xe1f   : > { %v5163_v1 = vadd.f32 %v5162_v63, %v5134_v19  ;;  %v5211_v46 = vsel %vm518_vm0, %v15725_v15, 0.0  ;;  %v5107_v24 = vadd.f32 %v5106_v28, %v5077_v58  ;;  %v5135_v36 = vpop.f32.mrf.mxu3  ;;  %v4575_v10 = vadd.f32 %v4563_v9, %v3969_v30  ;;  %v5082_v19 = vpop.f32.mrf.mxu1  ;;  %v18540_v28 = vld [vmem:[#allocation21_spill] sm:$0xff] }
 0xe20   : > { %5212 = vadd.xlane.f32.xlu1 %v5211_v46  ;;  %v3887_v51 = vadd.f32 %v18537_v54, %v3666_v17  ;;  %v4539_v35 = vadd.f32 %v18541_v40, %v4510_v7 }
 0xe21   : > { %v5176_v55 = vadd.f32 %v5163_v1, %v18525_v22  ;;  %v5136_v49 = vadd.f32 %v5135_v36, %v5107_v24  ;;  %v18543_v24 = vld [vmem:[#allocation32_spill] sm:$0xff] }
 0xe22   : > { %v3916_v58 = vadd.f32 %v18540_v28, %v3887_v51  ;;  %v4568_v22 = vadd.f32 %v18543_v24, %v4539_v35  ;;  %v18544_v36 = vld [vmem:[#allocation24_spill] sm:$0xff] }
 0xe23   : > { %v5188_v60 = vadd.f32 %v15678_v3, %v5176_v55 }
 0xe24   : > { %v3945_v4 = vadd.f32 %v18542_v45, %v3916_v58 }
 0xe25   : > { %v15737_v31 = vadd.f32 %v5188_v60, %v18529_v21  ;;  %v18545_v60 = vld [vmem:[#allocation9_spill] sm:$0xff] }
 0xe26   : > { %v5109_v14 = vpop.f32.mrf.mxu2  ;;  %v5164_v37 = vpop.f32.mrf.mxu0  ;;  %v3974_v2 = vadd.f32 %v18544_v36, %v3945_v4 }
 0xe27   : > { %v5165_v62 = vadd.f32 %v5164_v37, %v5136_v49  ;;  %v5214_v5 = vsel %vm518_vm0, %v15737_v31, 0.0  ;;  %v5110_v25 = vadd.f32 %v5109_v14, %v5080_v56  ;;  %v5138_v16 = vpop.f32.mrf.mxu3  ;;  %v18546_v56 = vld [vmem:[#allocation13_spill] sm:$0xff] }
 0xe28   : > { %5215 = vadd.xlane.f32.xlu2 %v5214_v5  ;;  %v4577_v9 = vadd.f32 %v4568_v22, %v3974_v2 }
 0xe29   : > { %v5177_v41 = vadd.f32 %v5165_v62, %v4575_v10  ;;  %v5139_v48 = vadd.f32 %v5138_v16, %v5110_v25 }
 0xe2b   : > { %v5189_v0 = vadd.f32 %v15678_v3, %v5177_v41 }
 0xe2d   : > { %v15743_v20 = vadd.f32 %v5189_v0, %v18530_v12 }
 0xe2e   : > { %v5167_v18 = vpop.f32.mrf.mxu0  ;;  %v5111_v50 = vpop.f32.mrf.mxu2 }
 0xe2f   : > { %v5168_v38 = vadd.f32 %v5167_v18, %v5139_v48  ;;  %v5217_v43 = vsel %vm518_vm0, %v15743_v20, 0.0  ;;  %v5112_v63 = vadd.f32 %v5111_v50, %v5082_v19  ;;  %v5140_v1 = vpop.f32.mrf.mxu3 }
 0xe30   : > { %5218 = vadd.xlane.f32.xlu0 %v5217_v43 }
 0xe31   : > { %v5178_v47 = vadd.f32 %v5168_v38, %v18531_v27  ;;  %v5141_v55 = vadd.f32 %v5140_v1, %v5112_v63 }
 0xe33   : > { %v5190_v44 = vadd.f32 %v15678_v3, %v5178_v47 }
 0xe35   : > { %v15750_v8 = vadd.f32 %v5190_v44, %v18532_v61 }
 0xe36   : > { %v5169_v46 = vpop.f32.mrf.mxu0 }
 0xe37   : > { %v5220_v52 = vsel %vm518_vm0, %v15750_v8, 0.0  ;;  %v5170_v42 = vadd.f32 %v5169_v46, %v5141_v55 }
 0xe38   : > { %5221 = vadd.xlane.f32.xlu0 %v5220_v52 }
 0xe39   : > { %v5179_v30 = vadd.f32 %v5170_v42, %v4577_v9 }
 0xe3b   : > { %v5191_v37 = vadd.f32 %v15678_v3, %v5179_v30 }
 0xe3d   : > { %v5199_v25 = vadd.f32 %v5191_v37, %v18546_v56  ;;  %v15837_v56 = vld [vmem:[%s18441_s8] ss:$0 sm:$0xff] }
 0xe3f   : > { %v5223_v41 = vsel %vm518_vm0, %v5199_v25, 0.0 }
 0xe7b   : > { %v5204_v59 = vpop.xlane.xlu1 %5203 }
 0xe7c   : > { %v5226_v33 = vmul.f32 %v5204_v59, %v18545_v60 }
 0xe7e   : > { %v15768_v49 = vsub.f32 %v15689_v26, %v5226_v33 }
 0xe80   : > { %v5242_v21 = vmul.f32 %v15768_v49, %v15768_v49 }
 0xe82   : > { %v5250_v14 = vsel %vm518_vm0, %v5242_v21, 0.0 }
 0xe83   : > { %v5207_v10 = vpop.xlane.xlu2 %5206  ;;  %5251 = vadd.xlane.f32.xlu1 %v5250_v14 }
 0xe84   : > { %v5227_v62 = vmul.f32 %v5207_v10, %v18545_v60 }
 0xe86   : > { %v15776_v5 = vsub.f32 %v15700_v32, %v5227_v62 }
 0xe88   : > { %v5243_v26 = vmul.f32 %v15776_v5, %v15776_v5 }
 0xe8a   : > { %v5253_v0 = vsel %vm518_vm0, %v5243_v26, 0.0 }
 0xe8b   : > { %v5210_v16 = vpop.xlane.xlu0 %5209  ;;  %5224 = vadd.xlane.f32.xlu1 %v5223_v41  ;;  %5254 = vadd.xlane.f32.xlu2 %v5253_v0 }
 0xe8c   : > { %v5228_v3 = vmul.f32 %v5210_v16, %v18545_v60 }
 0xe8e   : > { %v15785_v48 = vsub.f32 %v15714_v34, %v5228_v3 }
 0xe90   : > { %v5244_v32 = vmul.f32 %v15785_v48, %v15785_v48 }
 0xe92   : > { %v5256_v12 = vsel %vm518_vm0, %v5244_v32, 0.0  ;;  %v15843_v32 = vld [vmem:[%s18442_s9] ss:$0 sm:$0xff] }
 0xe93   : > { %v5213_v18 = vpop.xlane.xlu1 %5212  ;;  %5257 = vadd.xlane.f32.xlu2 %v5256_v12 }
 0xe94   : > { %v5229_v38 = vmul.f32 %v5213_v18, %v18545_v60 }
 0xe96   : > { %v15792_v43 = vsub.f32 %v15725_v15, %v5229_v38 }
 0xe98   : > { %v5245_v27 = vmul.f32 %v15792_v43, %v15792_v43 }
 0xe9a   : > { %v5259_v47 = vsel %vm518_vm0, %v5245_v27, 0.0 }
 0xe9b   : > { %5260 = vadd.xlane.f32.xlu0 %v5259_v47  ;;  %v5216_v34 = vpop.xlane.xlu2 %5215 }
 0xe9c   : > { %v5230_v44 = vmul.f32 %v5216_v34, %v18545_v60 }
 0xe9e   : > { %v15799_v61 = vsub.f32 %v15737_v31, %v5230_v44 }
 0xea0   : > { %v5246_v52 = vmul.f32 %v15799_v61, %v15799_v61 }
 0xea2   : > { %v5262_v6 = vsel %vm518_vm0, %v5246_v52, 0.0 }
 0xea3   : > { %v5219_v23 = vpop.xlane.xlu0 %5218  ;;  %5263 = vadd.xlane.f32.xlu1 %v5262_v6 }
 0xea4   : > { %v5231_v15 = vmul.f32 %v5219_v23, %v18545_v60 }
 0xea6   : > { %v15806_v39 = vsub.f32 %v15743_v20, %v5231_v15  ;;  %v12753_v20 = vld [vmem:[%s18435_s2 + $0x18] sm:$0xff] }
 0xea7   : > { %5444 = vmatpush.bf16.msrb.mxu1 %v12753_v20 }
 0xea8   : > { %v5247_v53 = vmul.f32 %v15806_v39, %v15806_v39 }
 0xeaa   : > { %v5265_v29 = vsel %vm518_vm0, %v5247_v53, 0.0 }
 0xeab   : > { %v5222_v11 = vpop.xlane.xlu0 %5221  ;;  %5266 = vadd.xlane.f32.xlu2 %v5265_v29  ;;  %5445 = vmatpush.bf16.msrb.mxu1 %v12752_v57 }
 0xeac   : > { %v5232_v31 = vmul.f32 %v5222_v11, %v18545_v60 }
 0xeae   : > { %v15813_v17 = vsub.f32 %v15750_v8, %v5232_v31 }
 0xeb0   : > { %v5248_v50 = vmul.f32 %v15813_v17, %v15813_v17 }
 0xeb2   : > { %v5268_v54 = vsel %vm518_vm0, %v5248_v50, 0.0 }
 0xeb3   : > { %5269 = vadd.xlane.f32.xlu0 %v5268_v54 }
 0xef6   : > { %v5252_v51 = vpop.xlane.xlu1 %5251 }
 0xef7   : > { %v5274_v13 = vmul.f32 %v5252_v51, %v18545_v60 }
 0xef9   : > { %v5282_v8 = vadd.f32 1e-05, %v5274_v13 }
 0xefb   : > { %13257 = vrsqrt.f32 %v5282_v8  ;;  %vm5296_vm9 = vweird.f32 %v5282_v8 }
 0xefe   : > { %v5225_v7 = vpop.xlane.xlu1 %5224  ;;  %v5255_v19 = vpop.xlane.xlu2 %5254 }
 0xeff   : > { %v5233_v28 = vmul.f32 %v5225_v7, %v18545_v60  ;;  %v5275_v58 = vmul.f32 %v5255_v19, %v18545_v60 }
 0xf01   : > { %v13258_v63 = vpop.eup %13257  ;;  %v15827_v40 = vsub.f32 %v5199_v25, %v5233_v28  ;;  %v5283_v35 = vadd.f32 1e-05, %v5275_v58 }
 0xf02   : > { %v5291_v1 = vmul.f32 %v13258_v63, %v5282_v8  ;;  %vm5297_vm8 = vweird.f32 %v13258_v63 }
 0xf03   : > { %13259 = vrsqrt.f32 %v5283_v35  ;;  %v5249_v46 = vmul.f32 %v15827_v40, %v15827_v40  ;;  %vm5298_vm10 = vmor %vm5296_vm9, %vm5297_vm8  ;;  %vm5306_vm12 = vweird.f32 %v5283_v35 }
 0xf04   : > { %v5292_v45 = vmul.f32 %v13258_v63, %v5291_v1 }
 0xf05   : > { %v5271_v4 = vsel %vm518_vm0, %v5249_v46, 0.0 }
 0xf06   : > { %v5293_v24 = vmul.f32 0.5, %v5292_v45  ;;  %5272 = vadd.xlane.f32.xlu1 %v5271_v4  ;;  %v5258_v22 = vpop.xlane.xlu2 %5257 }
 0xf07   : > { %v5276_v55 = vmul.f32 %v5258_v22, %v18545_v60 }
 0xf08   : > { %v5294_v36 = vsub.f32 1.5, %v5293_v24 }
 0xf09   : > { %v13260_v2 = vpop.eup %13259  ;;  %v5284_v42 = vadd.f32 1e-05, %v5276_v55 }
 0xf0a   : > { %v5295_v59 = vmul.f32 %v13258_v63, %v5294_v36  ;;  %v5301_v9 = vmul.f32 %v13260_v2, %v5283_v35  ;;  %vm5307_vm11 = vweird.f32 %v13260_v2 }
 0xf0b   : > { %13261 = vrsqrt.f32 %v5284_v42  ;;  %vm5308_vm13 = vmor %vm5306_vm12, %vm5307_vm11  ;;  %vm5316_vm15 = vweird.f32 %v5284_v42 }
 0xf0c   : > { %v5302_v33 = vmul.f32 %v13260_v2, %v5301_v9  ;;  %v5299_v30 = vsel %vm5298_vm10, %v13258_v63, %v5295_v59 }
 0xf0d   : > { %v5370_v25 = vmul.f32 %v5299_v30, %v15768_v49 }
 0xf0e   : > { %v5303_v21 = vmul.f32 0.5, %v5302_v33  ;;  %v5261_v14 = vpop.xlane.xlu0 %5260 }
 0xf0f   : > { %v5277_v37 = vmul.f32 %v5261_v14, %v18545_v60  ;;  %v5381_v12 = vmul.f32 %v15837_v56, %v5370_v25 }
 0xf10   : > { %v5304_v10 = vsub.f32 1.5, %v5303_v21 }
 0xf11   : > { %v13262_v62 = vpop.eup %13261  ;;  %v5285_v26 = vadd.f32 1e-05, %v5277_v37  ;;  %v15850_v52 = vadd.f32 %v15843_v32, %v5381_v12 }
 0xf12   : > { %v5305_v41 = vmul.f32 %v13260_v2, %v5304_v10  ;;  %v5311_v0 = vmul.f32 %v13262_v62, %v5284_v42  ;;  %vm5317_vm14 = vweird.f32 %v13262_v62 }
 0xf13   : > { %13263 = vrsqrt.f32 %v5285_v26  ;;  %vm5318_vm5 = vmor %vm5316_vm15, %vm5317_vm14  ;;  %vm5326_vm7 = vweird.f32 %v5285_v26 }
 0xf14   : > { %v5309_v16 = vsel %vm5308_vm13, %v13260_v2, %v5305_v41  ;;  %v5312_v3 = vmul.f32 %v13262_v62, %v5311_v0 }
 0xf15   : > { %v5371_v18 = vmul.f32 %v5309_v16, %v15776_v5 }
 0xf16   : > { %v5313_v38 = vmul.f32 0.5, %v5312_v3  ;;  %v5264_v27 = vpop.xlane.xlu1 %5263 }
 0xf17   : > { %v5382_v49 = vmul.f32 %v15837_v56, %v5371_v18  ;;  %v5278_v47 = vmul.f32 %v5264_v27, %v18545_v60 }
 0xf18   : > { %v5314_v34 = vsub.f32 1.5, %v5313_v38 }
 0xf19   : > { %v13264_v44 = vpop.eup %13263  ;;  %v15853_v6 = vadd.f32 %v15843_v32, %v5382_v49  ;;  %v5286_v23 = vadd.f32 1e-05, %v5278_v47 }
 0xf1a   : > { %v5315_v15 = vmul.f32 %v13262_v62, %v5314_v34  ;;  %v5321_v53 = vmul.f32 %v13264_v44, %v5285_v26  ;;  %vm5327_vm6 = vweird.f32 %v13264_v44 }
 0xf1b   : > { %v5400_v5 = vpack.c.bf16 %v15853_v6, %v15850_v52  ;;  %13265 = vrsqrt.f32 %v5286_v23  ;;  %vm5328_vm8 = vmor %vm5326_vm7, %vm5327_vm6  ;;  %vm5336_vm10 = vweird.f32 %v5286_v23 }
 0xf1c   : > { %v5322_v29 = vmul.f32 %v13264_v44, %v5321_v53  ;;  %v5319_v11 = vsel %vm5318_vm5, %v13262_v62, %v5315_v15 }
 0xf1d   : > { %11498 = vmatmul.msk.bf16.vlgmr.msrb.gmra.mxu1 %vm518_vm0, %v5400_v5  ;;  %v5372_v13 = vmul.f32 %v5319_v11, %v15785_v48 }
 0xf1e   : > { %v5323_v31 = vmul.f32 0.5, %v5322_v29  ;;  %v5267_v50 = vpop.xlane.xlu2 %5266 }
 0xf1f   : > { %v5279_v54 = vmul.f32 %v5267_v50, %v18545_v60  ;;  %v5383_v63 = vmul.f32 %v15837_v56, %v5372_v13 }
 0xf20   : > { %v5324_v20 = vsub.f32 1.5, %v5323_v31 }
 0xf21   : > { %v13266_v51 = vpop.eup %13265  ;;  %v5287_v57 = vadd.f32 1e-05, %v5279_v54  ;;  %v15864_v4 = vadd.f32 %v15843_v32, %v5383_v63 }
 0xf22   : > { %v5325_v8 = vmul.f32 %v13264_v44, %v5324_v20  ;;  %v5331_v7 = vmul.f32 %v13266_v51, %v5286_v23  ;;  %vm5337_vm9 = vweird.f32 %v13266_v51 }
 0xf23   : > { %13267 = vrsqrt.f32 %v5287_v57  ;;  %vm5338_vm11 = vmor %vm5336_vm10, %vm5337_vm9  ;;  %vm5346_vm13 = vweird.f32 %v5287_v57 }
 0xf24   : > { %v5329_v19 = vsel %vm5328_vm8, %v13264_v44, %v5325_v8  ;;  %v5332_v28 = vmul.f32 %v13266_v51, %v5331_v7 }
 0xf25   : > { %v5373_v58 = vmul.f32 %v5329_v19, %v15792_v43 }
 0xf26   : > { %v5333_v35 = vmul.f32 0.5, %v5332_v28 }
 0xf27   : > { %v5384_v1 = vmul.f32 %v15837_v56, %v5373_v58 }
 0xf28   : > { %v5334_v46 = vsub.f32 1.5, %v5333_v35 }
 0xf29   : > { %v13268_v45 = vpop.eup %13267  ;;  %v15867_v48 = vadd.f32 %v15843_v32, %v5384_v1 }
 0xf2a   : > { %v5335_v24 = vmul.f32 %v13266_v51, %v5334_v46  ;;  %v5341_v22 = vmul.f32 %v13268_v45, %v5287_v57  ;;  %vm5347_vm12 = vweird.f32 %v13268_v45 }
 0xf2b   : > { %v5401_v55 = vpack.c.bf16 %v15867_v48, %v15864_v4  ;;  %vm5348_vm14 = vmor %vm5346_vm13, %vm5347_vm12 }
 0xf2c   : > { %v5342_v43 = vmul.f32 %v13268_v45, %v5341_v22  ;;  %v5339_v36 = vsel %vm5338_vm11, %v13266_v51, %v5335_v24 }
 0xf2d   : > { %11499 = vmatmul.msk.bf16.gmra.mxu1 %vm518_vm0, %v5401_v55  ;;  %v5374_v59 = vmul.f32 %v5339_v36, %v15799_v61  ;;  %v5270_v61 = vpop.xlane.xlu0 %5269 }
 0xf2e   : > { %v5343_v2 = vmul.f32 0.5, %v5342_v43  ;;  %v5280_v25 = vmul.f32 %v5270_v61, %v18545_v60 }
 0xf2f   : > { %v5385_v21 = vmul.f32 %v15837_v56, %v5374_v59 }
 0xf30   : > { %v5344_v42 = vsub.f32 1.5, %v5343_v2  ;;  %v5288_v26 = vadd.f32 1e-05, %v5280_v25 }
 0xf31   : > { %v15877_v37 = vadd.f32 %v15843_v32, %v5385_v21 }
 0xf32   : > { %v5345_v9 = vmul.f32 %v13268_v45, %v5344_v42  ;;  %13269 = vrsqrt.f32 %v5288_v26  ;;  %vm5356_vm5 = vweird.f32 %v5288_v26 }
 0xf34   : > { %v5349_v33 = vsel %vm5348_vm14, %v13268_v45, %v5345_v9 }
 0xf35   : > { %v5375_v30 = vmul.f32 %v5349_v33, %v15806_v39 }
 0xf37   : > { %v5386_v14 = vmul.f32 %v15837_v56, %v5375_v30 }
 0xf38   : > { %v13270_v39 = vpop.eup %13269 }
 0xf39   : > { %v15880_v10 = vadd.f32 %v15843_v32, %v5386_v14  ;;  %v5351_v41 = vmul.f32 %v13270_v39, %v5288_v26  ;;  %vm5357_vm15 = vweird.f32 %v13270_v39 }
 0xf3a   : > { %vm5358_vm6 = vmor %vm5356_vm5, %vm5357_vm15 }
 0xf3b   : > { %v5402_v62 = vpack.c.bf16 %v15880_v10, %v15877_v37  ;;  %v5352_v0 = vmul.f32 %v13270_v39, %v5351_v41 }
 0xf3d   : > { %11500 = vmatmul.msk.bf16.gmra.mxu1 %vm518_vm0, %v5402_v62  ;;  %v5353_v18 = vmul.f32 0.5, %v5352_v0 }
 0xf3f   : > { %v5354_v38 = vsub.f32 1.5, %v5353_v18 }
 0xf41   : > { %v5355_v49 = vmul.f32 %v13270_v39, %v5354_v38 }
 0xf43   : > { %v5359_v44 = vsel %vm5358_vm6, %v13270_v39, %v5355_v49 }
 0xf44   : > { %v5376_v53 = vmul.f32 %v5359_v44, %v15813_v17  ;;  %v13104_v17 = vld [vmem:[%s18436_s3 + $0x1] ss:$0 sm:$0xff] }
 0xf46   : > { %v5387_v31 = vmul.f32 %v15837_v56, %v5376_v53 }
 0xf48   : > { %v15892_v54 = vadd.f32 %v15843_v32, %v5387_v31 }
 0xf79   : > { %v5273_v16 = vpop.xlane.xlu1 %5272 }
 0xf7a   : > { %v5281_v3 = vmul.f32 %v5273_v16, %v18545_v60 }
 0xf7c   : > { %v5289_v12 = vadd.f32 1e-05, %v5281_v3 }
 0xf7e   : > { %13271 = vrsqrt.f32 %v5289_v12  ;;  %vm5366_vm8 = vweird.f32 %v5289_v12 }
 0xf84   : > { %v13272_v27 = vpop.eup %13271 }
 0xf85   : > { %v5361_v47 = vmul.f32 %v13272_v27, %v5289_v12  ;;  %vm5367_vm7 = vweird.f32 %v13272_v27 }
 0xf86   : > { %vm5368_vm9 = vmor %vm5366_vm8, %vm5367_vm7 }
 0xf87   : > { %v5362_v34 = vmul.f32 %v13272_v27, %v5361_v47 }
 0xf89   : > { %v5363_v23 = vmul.f32 0.5, %v5362_v34 }
 0xf8b   : > { %v5364_v15 = vsub.f32 1.5, %v5363_v23 }
 0xf8d   : > { %v5365_v5 = vmul.f32 %v13272_v27, %v5364_v15 }
 0xf8f   : > { %v5369_v29 = vsel %vm5368_vm9, %v13272_v27, %v5365_v5 }
 0xf90   : > { %v5377_v11 = vmul.f32 %v5369_v29, %v15827_v40 }
 0xf92   : > { %v5388_v50 = vmul.f32 %v15837_v56, %v5377_v11 }
 0xf94   : > { %v15895_v20 = vadd.f32 %v15843_v32, %v5388_v50 }
 0xf96   : > { %v5403_v51 = vpack.c.bf16 %v15895_v20, %v15892_v54 }
 0xf98   : > { %11501 = vmatmul.msk.bf16.gmra.mxu1 %vm518_vm0, %v5403_v51 }
 0xf9a   : > { %v5447_v40 = vpop.f32.mrf.mxu1 }
 0xf9b   : > { %v5448_v13 = vadd.f32 %v13104_v17, %v5447_v40 }
 0xf9d   : > { %v5467_v57 = vpack.c.bf16 %v5448_v13, %v5448_v13 }
 0xf9f   : > { %v5476_v8 = vunpack.c.l.b16 %v5467_v57 }
 0xfa1   : > { %v15903_v56 = vpack.c.b16 %v5476_v8, %v5476_v8 }
 0xfa2   : > { %v5449_v7 = vpop.f32.mrf.mxu1 }
 0xfa3   : > { %v5450_v19 = vadd.f32 %v13104_v17, %v5449_v7  ;;  %5478 = vrot.lane.b32.xlu2 %v15903_v56, %s18547_s20 }
 0xfa5   : > { %v5468_v32 = vpack.c.bf16 %v5450_v19, %v5450_v19 }
 0xfa7   : > { %v5500_v28 = vunpack.c.l.b16 %v5468_v32 }
 0xfa9   : > { %v15907_v58 = vpack.c.b16 %v5500_v28, %v5500_v28 }
 0xfaa   : > { %v5452_v63 = vpop.f32.mrf.mxu1 }
 0xfab   : > { %v5453_v35 = vadd.f32 %v13104_v17, %v5452_v63  ;;  %5502 = vrot.lane.b32.xlu0 %v15907_v58, %s18547_s20 }
 0xfad   : > { %v5469_v1 = vpack.c.bf16 %v5453_v35, %v5453_v35 }
 0xfaf   : > { %v5524_v46 = vunpack.c.l.b16 %v5469_v1 }
 0xfb1   : > { %v15911_v45 = vpack.c.b16 %v5524_v46, %v5524_v46 }
 0xfb2   : > { %v5454_v24 = vpop.f32.mrf.mxu1 }
 0xfb3   : > { %v5455_v22 = vadd.f32 %v13104_v17, %v5454_v24  ;;  %5526 = vrot.lane.b32.xlu1 %v15911_v45, %s18547_s20 }
 0xfb5   : > { %v5470_v55 = vpack.c.bf16 %v5455_v22, %v5455_v22 }
 0xfb7   : > { %v5548_v43 = vunpack.c.l.b16 %v5470_v55 }
 0xfb9   : > { %v15915_v36 = vpack.c.b16 %v5548_v43, %v5548_v43 }
 0xfba   : > { %v5457_v2 = vpop.f32.mrf.mxu1 }
 0xfbb   : > { %v5458_v42 = vadd.f32 %v13104_v17, %v5457_v2  ;;  %5550 = vrot.lane.b32.xlu0 %v15915_v36, %s18547_s20 }
 0xfbd   : > { %v5471_v59 = vpack.c.bf16 %v5458_v42, %v5458_v42 }
 0xfbf   : > { %v5572_v9 = vunpack.c.l.b16 %v5471_v59 }
 0xfc1   : > { %v15919_v33 = vpack.c.b16 %v5572_v9, %v5572_v9 }
 0xfc2   : > { %v5459_v30 = vpop.f32.mrf.mxu1 }
 0xfc3   : > { %v5460_v21 = vadd.f32 %v13104_v17, %v5459_v30  ;;  %5574 = vrot.lane.b32.xlu2 %v15919_v33, %s18547_s20 }
 0xfc5   : > { %v5472_v14 = vpack.c.bf16 %v5460_v21, %v5460_v21 }
 0xfc7   : > { %v5596_v62 = vunpack.c.l.b16 %v5472_v14 }
 0xfc9   : > { %v15923_v61 = vpack.c.b16 %v5596_v62, %v5596_v62 }
 0xfcb   : > { %5598 = vrot.lane.b32.xlu1 %v15923_v61, %s18547_s20 }
 0xfd3   : > { %5805 = vrot.lane.b32.xlu1 %v15911_v45, %s18548_s15 }
 0xfdb   : > { %5868 = vrot.lane.b32.xlu1 %v15923_v61, %s18548_s15 }
 0xfe3   : > { %5977 = vrot.lane.b32.xlu1 %v15911_v45, %s18549_s21 }
 0xffd   : > { %v5479_v25 = vpop.permute.xlu2 %5478 }
 0xffe   : > { %v5484_v26 = vsel %vm573_vm1, %v5479_v25, 0 }
 0xfff   : > { %5493 = vmatpush.bf16.xpose.msra.mxu2 %v5484_v26 }
0x1006   : > { %11502 = vmatmul.msk.bf16.vlgmr.msra.gmra.mxu2 %vm573_vm1, %v5467_v57 }
0x1015   : > { %v5462_v39 = vpop.f32.mrf.mxu1 }
0x1016   : > { %v5463_v41 = vadd.f32 %v13104_v17, %v5462_v39 }
0x1018   : > { %v15935_v0 = vpack.c.bf16 %v5463_v41, %v5463_v41 }
0x101a   : > { %v5620_v16 = vunpack.c.l.b16 %v15935_v0 }
0x101c   : > { %v15938_v3 = vpack.c.b16 %v5620_v16, %v5620_v16 }
0x101d   : > { %v5503_v12 = vpop.permute.xlu0 %5502  ;;  %v5464_v18 = vpop.f32.mrf.mxu1 }
0x101e   : > { %v5508_v38 = vsel %vm573_vm1, %v5503_v12, 0  ;;  %v5465_v27 = vadd.f32 %v13104_v17, %v5464_v18  ;;  %5622 = vrot.lane.b32.xlu0 %v15938_v3, %s18547_s20  ;;  %v5575_v44 = vpop.permute.xlu2 %5574 }
0x101f   : > { %5517 = vmatpush.bf16.xpose.msra.mxu3 %v5508_v38  ;;  %v5580_v53 = vsel %vm573_vm1, %v5575_v44, 0 }
0x1020   : > { %v5474_v49 = vpack.c.bf16 %v5465_v27, %v5465_v27 }
0x1022   : > { %v5644_v47 = vunpack.c.l.b16 %v5474_v49 }
0x1024   : > { %v15943_v34 = vpack.c.b16 %v5644_v47, %v5644_v47 }
0x1025   : > { %v5527_v23 = vpop.permute.xlu1 %5526 }
0x1026   : > { %v5532_v15 = vsel %vm573_vm1, %v5527_v23, 0  ;;  %11503 = vmatmul.msk.bf16.vlgmr.msra.gmra.mxu3 %vm573_vm1, %v5468_v32  ;;  %5826 = vrot.lane.b32.xlu0 %v15915_v36, %s18548_s15 }
0x1027   : > { %5646 = vrot.lane.b32.xlu2 %v15943_v34, %s18547_s20  ;;  %5541 = vmatpush.bf16.xpose.msrb.mxu2 %v5532_v15  ;;  %s18558_s20 = smov 8  }
0x102d   : > { %v5551_v5 = vpop.permute.xlu0 %5550 }
0x102e   : > { %v5556_v29 = vsel %vm573_vm1, %v5551_v5, 0  ;;  %5784 = vrot.lane.b32.xlu0 %v15907_v58, %s18548_s15  ;;  %11504 = vmatmul.msk.bf16.vlgmr.msrb.gmra.mxu2 %vm573_vm1, %v5469_v1 }
0x102f   : > { %5589 = vmatpush.bf16.xpose.msra.mxu2 %v5580_v53  ;;  %5763 = vrot.lane.b32.xlu2 %v15903_v56, %s18548_s15 }
0x1030   : > { %5565 = vmatpush.bf16.xpose.msrb.mxu3 %v5556_v29 }
0x1036   : > { %6002 = vrot.lane.b32.xlu0 %v15915_v36, %s18550_s26 }
0x1037   : > { %11505 = vmatmul.msk.bf16.vlgmr.msrb.gmra.mxu3 %vm573_vm1, %v5470_v55  ;;  %5889 = vrot.lane.b32.xlu2 %v15938_v3, %s18548_s15 }
0x103d   : > { %v5599_v11 = vpop.permute.xlu1 %5598 }
0x103e   : > { %v5604_v31 = vsel %vm573_vm1, %v5599_v11, 0  ;;  %6000 = vrot.lane.b32.xlu0 %v15915_v36, %s18549_s21  ;;  %11506 = vmatmul.msk.bf16.vlgmr.msra.gmra.mxu2 %vm573_vm1, %v5471_v59 }
0x103f   : > { %5847 = vrot.lane.b32.xlu2 %v15919_v33, %s18548_s15  ;;  %5613 = vmatpush.bf16.xpose.msra.mxu3 %v5604_v31 }
0x1045   : > { %v5806_v8 = vpop.permute.xlu1 %5805 }
0x1046   : > { %v5811_v63 = vsel %vm862_vm2, %v5806_v8, 0 }
0x1047   : > { %11507 = vmatmul.msk.bf16.vlgmr.msra.gmra.mxu3 %vm573_vm1, %v5472_v14  ;;  %5979 = vrot.lane.b32.xlu2 %v15911_v45, %s18550_s26 }
0x104d   : > { %v5869_v55 = vpop.permute.xlu1 %5868 }
0x104e   : > { %v5874_v59 = vsel %vm862_vm2, %v5869_v55, 0 }
0x104f   : > { %5933 = vrot.lane.b32.xlu2 %v15903_v56, %s18550_s26 }
0x1057   : > { %5956 = vrot.lane.b32.xlu2 %v15907_v58, %s18550_s26 }
0x105f   : > { %5910 = vrot.lane.b32.xlu2 %v15943_v34, %s18548_s15  ;;  %s18559_s15 = smov 16  }
0x1081   : > { %v5647_v50 = vpop.permute.xlu2 %5646 }
0x1082   : > { %v5652_v51 = vsel %vm573_vm1, %v5647_v50, 0 }
0x1083   : > { %5661 = vmatpush.bf16.xpose.msrb.mxu3 %v5652_v51 }
0x1089   : > { %v5764_v17 = vpop.permute.xlu2 %5763  ;;  %v5495_v40 = vpop.f32.mrf.mxu2 }
0x108a   : > { %v5769_v13 = vsel %vm862_vm2, %v5764_v17, 0  ;;  %11509 = vmatmul.msk.bf16.vlgmr.msrb.gmra.mxu3 %vm573_vm1, %v5474_v49  ;;  %v5667_v57 = vsel %vm573_vm1, %v5495_v40, -inf }
0x108b   : > { %5778 = vmatpush.bf16.msrb.mxu0 %v5769_v13  ;;  %5668 = vmax.xlane.f32.xlu2 %v5667_v57 }
0x1090   : > { %v5623_v7 = vpop.permute.xlu0 %5622 }
0x1091   : > { %v5628_v19 = vsel %vm573_vm1, %v5623_v7, 0  ;;  %v5890_v32 = vpop.permute.xlu2 %5889  ;;  %v5497_v28 = vpop.f32.mrf.mxu2 }
0x1092   : > { %5637 = vmatpush.bf16.xpose.msrb.mxu2 %v5628_v19  ;;  %v5895_v1 = vsel %vm862_vm2, %v5890_v32, 0  ;;  %v16018_v32 = vpop.permute.xlu1 %5977 }
0x1098   : > { %v5827_v35 = vpop.permute.xlu0 %5826 }
0x1099   : > { %v5832_v46 = vsel %vm862_vm2, %v5827_v35, 0  ;;  %v5848_v24 = vpop.permute.xlu2 %5847  ;;  %11508 = vmatmul.msk.bf16.vlgmr.msrb.gmra.mxu2 %vm573_vm1, %v15935_v0 }
0x109a   : > { %5820 = vmatpush.bf16.msra.mxu2 %v5811_v63  ;;  %v5853_v22 = vsel %vm862_vm2, %v5848_v24, 0  ;;  %5841 = vmatpush.bf16.msra.mxu3 %v5832_v46 }
0x109b   : > { %5862 = vmatpush.bf16.msra.mxu0 %v5853_v22 }
0x109e   : > { %5904 = vmatpush.bf16.msrb.mxu2 %v5895_v1 }
0x10a0   : > { %v5785_v43 = vpop.permute.xlu0 %5784 }
0x10a1   : > { %v5790_v2 = vsel %vm862_vm2, %v5785_v43, 0  ;;  %v15990_v42 = vpop.permute.xlu2 %5979 }
0x10a2   : > { %5799 = vmatpush.bf16.msra.mxu1 %v5790_v2 }
0x10a6   : > { %5883 = vmatpush.bf16.msrb.mxu1 %v5874_v59 }
0x10a8   : > { %v16007_v50 = vpop.permute.xlu0 %6002 }
0x10a9   : > { %v15993_v9 = vpop.permute.xlu2 %5933  ;;  %v5519_v30 = vpop.f32.mrf.mxu3 }
0x10aa   : > { %v5670_v21 = vsel %vm573_vm1, %v5519_v30, -inf }
0x10ab   : > { %5671 = vmax.xlane.f32.xlu1 %v5670_v21 }
0x10b0   : > { %v16014_v7 = vpop.permute.xlu0 %6000 }
0x10b1   : > { %v15996_v14 = vpop.permute.xlu2 %5956  ;;  %v5521_v62 = vpop.f32.mrf.mxu3 }
0x10b2   : > { %v5543_v25 = vpop.f32.mrf.mxu2 }
0x10b3   : > { %v5673_v26 = vsel %vm573_vm1, %v5543_v25, -inf }
0x10b4   : > { %5674 = vmax.xlane.f32.xlu1 %v5673_v26 }
0x10b9   : > { %v5911_v39 = vpop.permute.xlu2 %5910 }
0x10ba   : > { %v5567_v41 = vpop.f32.mrf.mxu3  ;;  %v5916_v0 = vsel %vm862_vm2, %v5911_v39, 0  ;;  %v5545_v16 = vpop.f32.mrf.mxu2 }
0x10bb   : > { %v5676_v12 = vsel %vm573_vm1, %v5567_v41, -inf  ;;  %5925 = vmatpush.bf16.msrb.mxu3 %v5916_v0 }
0x10bc   : > { %5677 = vmax.xlane.f32.xlu0 %v5676_v12 }
0x10c2   : > { %v5569_v18 = vpop.f32.mrf.mxu3  ;;  %v5591_v38 = vpop.f32.mrf.mxu2 }
0x10c3   : > { %v5679_v27 = vsel %vm573_vm1, %v5591_v38, -inf }
0x10c4   : > { %5680 = vmax.xlane.f32.xlu1 %v5679_v27 }
0x10ca   : > { %v5615_v49 = vpop.f32.mrf.mxu3  ;;  %v5593_v47 = vpop.f32.mrf.mxu2 }
0x10cb   : > { %v5682_v44 = vsel %vm573_vm1, %v5615_v49, -inf }
0x10cc   : > { %5683 = vmax.xlane.f32.xlu0 %v5682_v44 }
0x10d2   : > { %v5617_v23 = vpop.f32.mrf.mxu3 }
0x10fe   : > { %v5669_v5 = vpop.xlane.xlu2 %5668 }
0x10ff   : > { %v5691_v29 = vsub.f32 %v5495_v40, %v5669_v5 }
0x1101   : > { %v5699_v31 = vmul.f32 1.442695, %v5691_v29 }
0x1103   : > { %13273 = vpow2.f32 %v5699_v31 }
0x1109   : > { %v16010_v13 = vpop.eup %13273 }
0x110a   : > { %v5715_v8 = vsel %vm573_vm1, %v16010_v13, 0.0 }
0x110d   : > { %v16003_v15 = vpop.f32.mrf.mxu3 }
0x110e   : > { %v5688_v53 = vsel %vm573_vm1, %v16003_v15, -inf }
0x110f   : > { %5689 = vmax.xlane.f32.xlu2 %v5688_v53 }
0x1115   : > { %v5665_v11 = vpop.f32.mrf.mxu3 }
0x111c   : > { %v5639_v51 = vpop.f32.mrf.mxu2 }
0x111d   : > { %v5685_v17 = vsel %vm573_vm1, %v5639_v51, -inf }
0x111e   : > { %5686 = vmax.xlane.f32.xlu0 %v5685_v17  ;;  %v5672_v35 = vpop.xlane.xlu1 %5671 }
0x111f   : > { %v5692_v46 = vsub.f32 %v5519_v30, %v5672_v35 }
0x1121   : > { %v5701_v24 = vmul.f32 1.442695, %v5692_v46 }
0x1124   : > { %v5641_v57 = vpop.f32.mrf.mxu2 }
0x1125   : > { %v5939_v57 = vsel %vm573_vm1, %v15993_v9, 0 }
0x1126   : > { %5716 = vadd.xlane.f32.xlu0 %v5715_v8 }
0x1127   : > { %5931 = vrot.lane.b32.xlu2 %v15903_v56, %s18549_s21  ;;  %v5675_v22 = vpop.xlane.xlu1 %5674 }
0x1128   : > { %v5693_v55 = vsub.f32 %v5543_v25, %v5675_v22 }
0x112a   : > { %v5703_v43 = vmul.f32 1.442695, %v5693_v55 }
0x112f   : > { %v5678_v40 = vpop.xlane.xlu0 %5677 }
0x1130   : > { %v5694_v19 = vsub.f32 %v5567_v41, %v5678_v40 }
0x1132   : > { %v5705_v28 = vmul.f32 1.442695, %v5694_v19 }
0x1134   : > { %13275 = vpow2.f32 %v5705_v28  ;;  %v6008_v28 = vsel %vm573_vm1, %v16007_v50, 0  ;;  %v5962_v50 = vsel %vm573_vm1, %v15996_v14, 0 }
0x1135   : > { %13277 = vpow2.f32 %v5701_v24 }
0x1136   : > { %13279 = vpow2.f32 %v5703_v43 }
0x1137   : > { %v5681_v0 = vpop.xlane.xlu1 %5680 }
0x1138   : > { %v5695_v16 = vsub.f32 %v5591_v38, %v5681_v0 }
0x113a   : > { %v16020_v63 = vpop.eup %13275  ;;  %6071 = vrot.lane.b32.xlu0 %v15938_v3, %s18550_s26  ;;  %v5707_v12 = vmul.f32 1.442695, %v5695_v16 }
0x113b   : > { %v5724_v1 = vsel %vm573_vm1, %v16020_v63, 0.0  ;;  %v16026_v2 = vpop.eup %13277 }
0x113c   : > { %5725 = vadd.xlane.f32.xlu1 %v5724_v1  ;;  %v5718_v21 = vsel %vm573_vm1, %v16026_v2, 0.0  ;;  %v16030_v26 = vpop.eup %13279 }
0x113d   : > { %v5721_v39 = vsel %vm573_vm1, %v16030_v26, 0.0 }
0x113f   : > { %v5684_v59 = vpop.xlane.xlu0 %5683 }
0x1140   : > { %v5696_v62 = vsub.f32 %v5615_v49, %v5684_v59 }
0x1142   : > { %v5709_v30 = vmul.f32 1.442695, %v5696_v62 }
0x1144   : > { %13281 = vpow2.f32 %v5709_v30 }
0x1145   : > { %13283 = vpow2.f32 %v5707_v12 }
0x114a   : > { %v16036_v25 = vpop.eup %13281 }
0x114b   : > { %v5730_v41 = vsel %vm573_vm1, %v16036_v25, 0.0  ;;  %v16042_v18 = vpop.eup %13283 }
0x114c   : > { %v5727_v27 = vsel %vm573_vm1, %v16042_v18, 0.0 }
0x1150   : > { %5719 = vadd.xlane.f32.xlu2 %v5718_v21 }
0x1155   : > { %5954 = vrot.lane.b32.xlu1 %v15907_v58, %s18549_s21 }
0x1158   : > { %5722 = vadd.xlane.f32.xlu2 %v5721_v39 }
0x1164   : > { %5731 = vadd.xlane.f32.xlu0 %v5730_v41 }
0x1178   : > { %6048 = vrot.lane.b32.xlu0 %v15923_v61, %s18550_s26 }
0x117f   : > { %5728 = vadd.xlane.f32.xlu1 %v5727_v27 }
0x1180   : > { %6023 = vrot.lane.b32.xlu0 %v15919_v33, %s18549_s21 }
0x1182   : > { %v5690_v38 = vpop.xlane.xlu2 %5689 }
0x1183   : > { %v5698_v44 = vsub.f32 %v16003_v15, %v5690_v38 }
0x1185   : > { %v5713_v53 = vmul.f32 1.442695, %v5698_v44 }
0x1188   : > { %6211 = vrot.lane.b32.xlu0 %v15903_v56, %s18551_s0 }
0x118a   : > { %v5932_v35 = vpop.permute.xlu2 %5931 }
0x1190   : > { %6232 = vrot.lane.b32.xlu0 %v15907_v58, %s18551_s0 }
0x1191   : > { %v5687_v49 = vpop.xlane.xlu0 %5686 }
0x1192   : > { %v5697_v47 = vsub.f32 %v5639_v51, %v5687_v49 }
0x1194   : > { %v5711_v23 = vmul.f32 1.442695, %v5697_v47 }
0x1196   : > { %13285 = vpow2.f32 %v5711_v23 }
0x1198   : > { %6025 = vrot.lane.b32.xlu1 %v15919_v33, %s18550_s26  ;;  %6358 = vrot.lane.b32.xlu0 %v15943_v34, %s18551_s0 }
0x1199   : > { %v5717_v5 = vpop.xlane.xlu0 %5716 }
0x119a   : > { %13287 = vrcp.f32 %v5717_v5 }
0x119b   : > { %13289 = vpow2.f32 %v5713_v53 }
0x119c   : > { %v16057_v29 = vpop.eup %13285 }
0x119d   : > { %v5733_v11 = vsel %vm573_vm1, %v16057_v29, 0.0 }
0x119e   : > { %5734 = vadd.xlane.f32.xlu2 %v5733_v11 }
0x11a0   : > { %6092 = vrot.lane.b32.xlu1 %v15943_v34, %s18549_s21  ;;  %v13288_v15 = vpop.eup %13287  ;;  %6316 = vrot.lane.b32.xlu0 %v15923_v61, %s18551_s0 }
0x11a1   : > { %v5747_v31 = vmul.f32 %v13288_v15, %v16010_v13  ;;  %v16066_v51 = vpop.eup %13289 }
0x11a2   : > { %v5736_v8 = vsel %vm573_vm1, %v16066_v51, 0.0 }
0x11a3   : > { %v5755_v17 = vpack.c.bf16 %v5747_v31, %v5747_v31 }
0x11a5   : > { %11510 = vmatmul.msk.bf16.vlgmr.msrb.gmra.mxu0 %vm573_vm1, %v5755_v17 }
0x11a6   : > { %5948 = vmatpush.bf16.xpose.msrb.mxu0 %v5939_v57  ;;  %5737 = vadd.xlane.f32.xlu2 %v5736_v8 }
0x11a8   : > { %6253 = vrot.lane.b32.xlu1 %v15911_v45, %s18551_s0 }
0x11ac   : > { %v6072_v55 = vpop.permute.xlu0 %6071 }
0x11ad   : > { %v6077_v17 = vsel %vm573_vm1, %v6072_v55, 0 }
0x11af   : > { %v5726_v40 = vpop.xlane.xlu1 %5725 }
0x11b0   : > { %13291 = vrcp.f32 %v5726_v40  ;;  %6337 = vrot.lane.b32.xlu1 %v15938_v3, %s18551_s0 }
0x11b6   : > { %v13292_v13 = vpop.eup %13291 }
0x11b7   : > { %v5750_v19 = vmul.f32 %v13292_v13, %v16020_v63 }
0x11b8   : > { %6427 = vrot.lane.b32.xlu1 %v15911_v45, %s18552_s19 }
0x11b9   : > { %v5758_v9 = vpack.c.bf16 %v5750_v19, %v5750_v19 }
0x11bb   : > { %11513 = vmatmul.msk.bf16.vlgmr.msra.gmra.mxu3 %vm573_vm1, %v5758_v9 }
0x11bc   : > { %6017 = vmatpush.bf16.xpose.msra.mxu3 %v6008_v28 }
0x11be   : > { %6094 = vrot.lane.b32.xlu2 %v15943_v34, %s18550_s26 }
0x11c3   : > { %v5720_v1 = vpop.xlane.xlu2 %5719 }
0x11c4   : > { %13293 = vrcp.f32 %v5720_v1 }
0x11c6   : > { %6069 = vrot.lane.b32.xlu2 %v15938_v3, %s18549_s21 }
0x11ca   : > { %v13294_v63 = vpop.eup %13293 }
0x11cb   : > { %v5748_v46 = vmul.f32 %v13294_v63, %v16026_v2  ;;  %v5723_v24 = vpop.xlane.xlu2 %5722  ;;  %v5985_v2 = vsel %vm573_vm1, %v15990_v42, 0 }
0x11cc   : > { %13295 = vrcp.f32 %v5723_v24 }
0x11cd   : > { %v5756_v22 = vpack.c.bf16 %v5748_v46, %v5748_v46 }
0x11ce   : > { %6046 = vrot.lane.b32.xlu2 %v15923_v61, %s18549_s21  ;;  %s18560_s21 = smov 24  }
0x11cf   : > { %11511 = vmatmul.msk.bf16.vlgmr.msra.gmra.mxu1 %vm573_vm1, %v5756_v22 }
0x11d0   : > { %5971 = vmatpush.bf16.xpose.msra.mxu1 %v5962_v50 }
0x11d2   : > { %v13296_v43 = vpop.eup %13295 }
0x11d3   : > { %v5749_v59 = vmul.f32 %v13296_v43, %v16030_v26  ;;  %v5955_v26 = vpop.permute.xlu1 %5954 }
0x11d5   : > { %v5757_v21 = vpack.c.bf16 %v5749_v59, %v5749_v59 }
0x11d6   : > { %6274 = vrot.lane.b32.xlu2 %v15915_v36, %s18551_s0 }
0x11d7   : > { %11512 = vmatmul.msk.bf16.vlgmr.msra.gmra.mxu2 %vm573_vm1, %v5757_v21  ;;  %v5732_v62 = vpop.xlane.xlu0 %5731 }
0x11d8   : > { %5994 = vmatpush.bf16.xpose.msra.mxu2 %v5985_v2  ;;  %13297 = vrcp.f32 %v5732_v62 }
0x11de   : > { %v13298_v14 = vpop.eup %13297  ;;  %6295 = vrot.lane.b32.xlu2 %v15919_v33, %s18551_s0 }
0x11df   : > { %v5752_v30 = vmul.f32 %v13298_v14, %v16036_v25 }
0x11e1   : > { %v5760_v39 = vpack.c.bf16 %v5752_v30, %v5752_v30 }
0x11e3   : > { %11515 = vmatmul.msk.bf16.vlgmr.msrb.gmra.mxu1 %vm573_vm1, %v5760_v39 }
0x11e6   : > { %6450 = vrot.lane.b32.xlu2 %v15915_v36, %s18552_s19 }
0x11ea   : > { %v6049_v41 = vpop.permute.xlu0 %6048 }
0x11eb   : > { %v6054_v42 = vsel %vm573_vm1, %v6049_v41, 0 }
0x11ec   : > { %6063 = vmatpush.bf16.xpose.msrb.mxu1 %v6054_v42 }
0x11f2   : > { %v5729_v0 = vpop.xlane.xlu1 %5728  ;;  %v6024_v16 = vpop.permute.xlu0 %6023 }
0x11f3   : > { %13299 = vrcp.f32 %v5729_v0  ;;  %11519 = vmatmul.msk.bf16.vlgmr.msra.gmra.mxu1 %vm573_vm1, %v5955_v26 }
0x11f9   : > { %v13300_v12 = vpop.eup %13299 }
0x11fa   : > { %v5751_v27 = vmul.f32 %v13300_v12, %v16042_v18  ;;  %v6212_v25 = vpop.permute.xlu0 %6211 }
0x11fb   : > { %v6217_v53 = vsel %vm862_vm2, %v6212_v25, 0 }
0x11fc   : > { %v5759_v38 = vpack.c.bf16 %v5751_v27, %v5751_v27 }
0x11fe   : > { %11514 = vmatmul.msk.bf16.vlgmr.msra.gmra.mxu0 %vm573_vm1, %v5759_v38 }
0x1202   : > { %v6233_v49 = vpop.permute.xlu0 %6232 }
0x1203   : > { %v6238_v47 = vsel %vm862_vm2, %v6233_v49, 0 }
0x1204   : > { %6247 = vmatpush.bf16.msra.mxu1 %v6238_v47 }
0x120a   : > { %v6026_v44 = vpop.permute.xlu1 %6025  ;;  %v6359_v28 = vpop.permute.xlu0 %6358 }
0x120b   : > { %v6031_v23 = vsel %vm573_vm1, %v6026_v44, 0  ;;  %v6364_v62 = vsel %vm862_vm2, %v6359_v28, 0 }
0x120c   : > { %6040 = vmatpush.bf16.xpose.msra.mxu0 %v6031_v23 }
0x120e   : > { %11518 = vmatmul.msk.bf16.vlgmr.msrb.gmra.mxu0 %vm573_vm1, %v5932_v35 }
0x1211   : > { %v5735_v5 = vpop.xlane.xlu2 %5734 }
0x1212   : > { %13301 = vrcp.f32 %v5735_v5  ;;  %v6093_v8 = vpop.permute.xlu1 %6092 }
0x1214   : > { %6226 = vmatpush.bf16.msrb.mxu0 %v6217_v53 }
0x1218   : > { %v13302_v18 = vpop.eup %13301 }
0x1219   : > { %v5753_v11 = vmul.f32 %v13302_v18, %v16057_v29  ;;  %v5738_v15 = vpop.xlane.xlu2 %5737 }
0x121a   : > { %13303 = vrcp.f32 %v5738_v15  ;;  %v6254_v1 = vpop.permute.xlu1 %6253 }
0x121b   : > { %v5761_v31 = vpack.c.bf16 %v5753_v11, %v5753_v11  ;;  %v6259_v46 = vsel %vm862_vm2, %v6254_v1, 0 }
0x121d   : > { %11516 = vmatmul.msk.bf16.vlgmr.msrb.gmra.mxu2 %vm573_vm1, %v5761_v31 }
0x121e   : > { %11522 = vmatmul.msk.bf16.vlgmr.msra.gmra.mxu0 %vm573_vm1, %v6024_v16  ;;  %6086 = vmatpush.bf16.xpose.msrb.mxu2 %v6077_v17 }
0x1220   : > { %v13304_v57 = vpop.eup %13303 }
0x1221   : > { %v5754_v40 = vmul.f32 %v13304_v57, %v16066_v51  ;;  %v6095_v13 = vpop.permute.xlu2 %6094  ;;  %v6317_v51 = vpop.permute.xlu0 %6316 }
0x1222   : > { %v16118_v19 = vpop.f32.mrf.mxu0  ;;  %v6100_v29 = vsel %vm573_vm1, %v6095_v13, 0  ;;  %v6322_v22 = vsel %vm862_vm2, %v6317_v51, 0  ;;  %v6338_v55 = vpop.permute.xlu1 %6337 }
0x1223   : > { %v5762_v9 = vpack.c.bf16 %v5754_v40, %v5754_v40  ;;  %v6343_v59 = vsel %vm862_vm2, %v6338_v55, 0 }
0x1225   : > { %11517 = vmatmul.msk.bf16.vlgmr.msrb.gmra.mxu3 %vm573_vm1, %v5762_v9 }
0x1226   : > { %6109 = vmatpush.bf16.xpose.msrb.mxu3 %v6100_v29 }
0x1229   : > { %v6070_v35 = vpop.permute.xlu2 %6069 }
0x122a   : > { %v5782_v63 = vpop.f32.mrf.mxu0 }
0x122d   : > { %11520 = vmatmul.msk.bf16.vlgmr.msra.gmra.mxu2 %vm573_vm1, %v16018_v32 }
0x122e   : > { %6268 = vmatpush.bf16.msra.mxu2 %v6259_v46 }
0x1231   : > { %v6047_v24 = vpop.permute.xlu2 %6046 }
0x1232   : > { %11523 = vmatmul.msk.bf16.vlgmr.msrb.gmra.mxu1 %vm573_vm1, %v6047_v24 }
0x1233   : > { %6331 = vmatpush.bf16.msrb.mxu1 %v6322_v22  ;;  %v16171_v22 = vpop.permute.xlu1 %6427 }
0x1235   : > { %11521 = vmatmul.msk.bf16.vlgmr.msra.gmra.mxu3 %vm573_vm1, %v16014_v7 }
0x1239   : > { %v6275_v50 = vpop.permute.xlu2 %6274 }
0x123a   : > { %v6280_v43 = vsel %vm862_vm2, %v6275_v50, 0 }
0x123b   : > { %6289 = vmatpush.bf16.msra.mxu3 %v6280_v43 }
0x123d   : > { %11524 = vmatmul.msk.bf16.vlgmr.msrb.gmra.mxu2 %vm573_vm1, %v6070_v35 }
0x123e   : > { %v16131_v21 = vpop.f32.mrf.mxu3  ;;  %6352 = vmatpush.bf16.msrb.mxu2 %v6343_v59 }
0x1241   : > { %v6296_v32 = vpop.permute.xlu2 %6295 }
0x1242   : > { %v6301_v2 = vsel %vm862_vm2, %v6296_v32, 0 }
0x1243   : > { %6310 = vmatpush.bf16.msra.mxu0 %v6301_v2 }
0x1245   : > { %11525 = vmatmul.msk.bf16.vlgmr.msrb.gmra.mxu3 %vm573_vm1, %v6093_v8 }
0x1246   : > { %v5845_v14 = vpop.f32.mrf.mxu3  ;;  %6373 = vmatpush.bf16.msrb.mxu3 %v6364_v62 }
0x1249   : > { %v16173_v43 = vpop.permute.xlu2 %6450 }
0x124c   : > { %v16137_v7 = vpop.f32.mrf.mxu1 }
0x1254   : > { %v5803_v30 = vpop.f32.mrf.mxu1 }
0x125a   : > { %v16139_v39 = vpop.f32.mrf.mxu2 }
0x1260   : > { %v16141_v26 = vpop.f32.mrf.mxu1 }
0x1262   : > { %v5824_v41 = vpop.f32.mrf.mxu2 }
0x1268   : > { %v5887_v42 = vpop.f32.mrf.mxu1 }
0x1270   : > { %v5973_v0 = vpop.f32.mrf.mxu1 }
0x1271   : > { %v6118_v16 = vsel %vm573_vm1, %v5973_v0, -inf }
0x1272   : > { %6119 = vmax.xlane.f32.xlu1 %v6118_v16 }
0x1278   : > { %v5975_v12 = vpop.f32.mrf.mxu1 }
0x127b   : > { %v16144_v27 = vpop.f32.mrf.mxu0 }
0x1283   : > { %v5866_v25 = vpop.f32.mrf.mxu0 }
0x128b   : > { %v5950_v38 = vpop.f32.mrf.mxu0 }
0x128c   : > { %v6115_v49 = vsel %vm573_vm1, %v5950_v38, -inf }
0x128d   : > { %6116 = vmax.xlane.f32.xlu2 %v6115_v49 }
0x1293   : > { %v5952_v47 = vpop.f32.mrf.mxu0 }
0x129b   : > { %v6042_v44 = vpop.f32.mrf.mxu0 }
0x129c   : > { %v6127_v23 = vsel %vm573_vm1, %v6042_v44, -inf }
0x129d   : > { %6128 = vmax.xlane.f32.xlu1 %v6127_v23 }
0x12a0   : > { %v16148_v53 = vpop.f32.mrf.mxu2 }
0x12a3   : > { %v6044_v5 = vpop.f32.mrf.mxu0 }
0x12a8   : > { %v5908_v18 = vpop.f32.mrf.mxu2  ;;  %v16150_v11 = vpop.f32.mrf.mxu3 }
0x12af   : > { %v16152_v15 = vpop.f32.mrf.mxu1 }
0x12b0   : > { %v5929_v31 = vpop.f32.mrf.mxu3  ;;  %v5996_v17 = vpop.f32.mrf.mxu2  ;;  %v6130_v57 = vsel %vm573_vm1, %v16152_v15, -inf }
0x12b1   : > { %6131 = vmax.xlane.f32.xlu2 %v6130_v57  ;;  %v6121_v8 = vsel %vm573_vm1, %v5996_v17, -inf }
0x12b2   : > { %6122 = vmax.xlane.f32.xlu1 %v6121_v8 }
0x12b7   : > { %v6067_v40 = vpop.f32.mrf.mxu1 }
0x12b8   : > { %v5998_v13 = vpop.f32.mrf.mxu2  ;;  %v6019_v9 = vpop.f32.mrf.mxu3 }
0x12b9   : > { %v6124_v28 = vsel %vm573_vm1, %v6019_v9, -inf }
0x12ba   : > { %6125 = vmax.xlane.f32.xlu0 %v6124_v28 }
0x12c0   : > { %v6021_v29 = vpop.f32.mrf.mxu3  ;;  %v6088_v35 = vpop.f32.mrf.mxu2 }
0x12c1   : > { %v6133_v1 = vsel %vm573_vm1, %v6088_v35, -inf }
0x12c2   : > { %6134 = vmax.xlane.f32.xlu2 %v6133_v1 }
0x12c8   : > { %v6090_v63 = vpop.f32.mrf.mxu2  ;;  %v16159_v46 = vpop.f32.mrf.mxu3 }
0x12c9   : > { %v6136_v51 = vsel %vm573_vm1, %v16159_v46, -inf }
0x12ca   : > { %6137 = vmax.xlane.f32.xlu0 %v6136_v51 }
0x12cb   : > { %6404 = vrot.lane.b32.xlu1 %v15907_v58, %s18552_s19 }
0x12d0   : > { %v6113_v24 = vpop.f32.mrf.mxu3 }
0x12d3   : > { %6379 = vrot.lane.b32.xlu1 %v15903_v56, %s18553_s24 }
0x12da   : > { %6425 = vrot.lane.b32.xlu2 %v15911_v45, %s18553_s24 }
0x12de   : > { %6381 = vrot.lane.b32.xlu0 %v15903_v56, %s18552_s19 }
0x12e5   : > { %v6120_v50 = vpop.xlane.xlu1 %6119 }
0x12e6   : > { %v6140_v55 = vsub.f32 %v5973_v0, %v6120_v50 }
0x12e8   : > { %v6149_v59 = vmul.f32 1.442695, %v6140_v55 }
0x12ea   : > { %13305 = vpow2.f32 %v6149_v59 }
0x12f0   : > { %v16175_v14 = vpop.eup %13305 }
0x12f1   : > { %v6166_v30 = vsel %vm573_vm1, %v16175_v14, 0.0 }
0x1300   : > { %v6117_v32 = vpop.xlane.xlu2 %6116 }
0x1301   : > { %v6139_v2 = vsub.f32 %v5950_v38, %v6117_v32 }
0x1303   : > { %v6147_v62 = vmul.f32 1.442695, %v6139_v2 }
0x1305   : > { %13307 = vpow2.f32 %v6147_v62 }
0x1308   : > { %6167 = vadd.xlane.f32.xlu0 %v6166_v30 }
0x130b   : > { %v16179_v41 = vpop.eup %13307 }
0x130c   : > { %v6163_v42 = vsel %vm573_vm1, %v16179_v41, 0.0 }
0x130d   : > { %6164 = vadd.xlane.f32.xlu2 %v6163_v42 }
0x1310   : > { %v6129_v0 = vpop.xlane.xlu1 %6128 }
0x1311   : > { %v6143_v16 = vsub.f32 %v6042_v44, %v6129_v0 }
0x1313   : > { %v6155_v12 = vmul.f32 1.442695, %v6143_v16 }
0x1315   : > { %13309 = vpow2.f32 %v6155_v12 }
0x131b   : > { %v16183_v25 = vpop.eup %13309 }
0x131c   : > { %v6175_v38 = vsel %vm573_vm1, %v16183_v25, 0.0 }
0x131d   : > { %6176 = vadd.xlane.f32.xlu0 %v6175_v38 }
0x1324   : > { %v6132_v40 = vpop.xlane.xlu2 %6131 }
0x1325   : > { %6402 = vrot.lane.b32.xlu2 %v15907_v58, %s18553_s24  ;;  %v6123_v49 = vpop.xlane.xlu1 %6122 }
0x1326   : > { %v6141_v47 = vsub.f32 %v5996_v17, %v6123_v49  ;;  %v6144_v17 = vsub.f32 %v16152_v15, %v6132_v40 }
0x1328   : > { %v6151_v23 = vmul.f32 1.442695, %v6141_v47  ;;  %v6157_v28 = vmul.f32 1.442695, %v6144_v17 }
0x132a   : > { %13311 = vpow2.f32 %v6151_v23 }
0x132d   : > { %v6126_v5 = vpop.xlane.xlu0 %6125 }
0x132e   : > { %v6142_v18 = vsub.f32 %v6019_v9, %v6126_v5 }
0x1330   : > { %v16189_v31 = vpop.eup %13311  ;;  %v6153_v44 = vmul.f32 1.442695, %v6142_v18 }
0x1331   : > { %v6169_v57 = vsel %vm573_vm1, %v16189_v31, 0.0 }
0x1332   : > { %13313 = vpow2.f32 %v6153_v44  ;;  %6170 = vadd.xlane.f32.xlu0 %v6169_v57 }
0x1333   : > { %13315 = vpow2.f32 %v6157_v28 }
0x1335   : > { %v6135_v29 = vpop.xlane.xlu2 %6134 }
0x1336   : > { %v6145_v9 = vsub.f32 %v6088_v35, %v6135_v29  ;;  %v6433_v29 = vsel %vm573_vm1, %v16171_v22, 0 }
0x1338   : > { %v16193_v8 = vpop.eup %13313  ;;  %v6159_v1 = vmul.f32 1.442695, %v6145_v9 }
0x1339   : > { %v6172_v13 = vsel %vm573_vm1, %v16193_v8, 0.0  ;;  %v16200_v63 = vpop.eup %13315 }
0x133a   : > { %6173 = vadd.xlane.f32.xlu1 %v6172_v13  ;;  %13317 = vpow2.f32 %v6159_v1  ;;  %v6178_v51 = vsel %vm573_vm1, %v16200_v63, 0.0 }
0x133d   : > { %v6138_v35 = vpop.xlane.xlu0 %6137  ;;  %v16227_v32 = vpop.permute.xlu2 %6425 }
0x133e   : > { %v6146_v50 = vsub.f32 %v16159_v46, %v6138_v35  ;;  %v6405_v16 = vpop.permute.xlu1 %6404 }
0x133f   : > { %v6410_v49 = vsel %vm573_vm1, %v6405_v16, 0 }
0x1340   : > { %v16206_v24 = vpop.eup %13317  ;;  %v6161_v55 = vmul.f32 1.442695, %v6146_v50 }
0x1341   : > { %v6181_v15 = vsel %vm573_vm1, %v16206_v24, 0.0 }
0x1342   : > { %13319 = vpow2.f32 %v6161_v55 }
0x1346   : > { %6448 = vrot.lane.b32.xlu0 %v15915_v36, %s18553_s24 }
0x1348   : > { %v16229_v2 = vpop.eup %13319 }
0x1349   : > { %v6184_v62 = vsel %vm573_vm1, %v16229_v2, 0.0 }
0x134e   : > { %6179 = vadd.xlane.f32.xlu2 %v6178_v51  ;;  %6519 = vrot.lane.b32.xlu0 %v15938_v3, %s18552_s19 }
0x1350   : > { %v6382_v59 = vpop.permute.xlu0 %6381 }
0x1351   : > { %v6387_v5 = vsel %vm573_vm1, %v6382_v59, 0 }
0x1353   : > { %6542 = vrot.lane.b32.xlu1 %v15943_v34, %s18552_s19 }
0x1356   : > { %6182 = vadd.xlane.f32.xlu2 %v6181_v15  ;;  %6496 = vrot.lane.b32.xlu0 %v15923_v61, %s18552_s19 }
0x135e   : > { %6471 = vrot.lane.b32.xlu0 %v15919_v33, %s18553_s24 }
0x1366   : > { %6680 = vrot.lane.b32.xlu0 %v15907_v58, %s18554_s18 }
0x136e   : > { %6473 = vrot.lane.b32.xlu2 %v15919_v33, %s18552_s19  ;;  %6722 = vrot.lane.b32.xlu0 %v15915_v36, %s18554_s18 }
0x1376   : > { %6540 = vrot.lane.b32.xlu2 %v15943_v34, %s18553_s24  ;;  %6764 = vrot.lane.b32.xlu0 %v15923_v61, %s18554_s18 }
0x137b   : > { %v6168_v46 = vpop.xlane.xlu0 %6167 }
0x137c   : > { %13321 = vrcp.f32 %v6168_v46 }
0x137d   : > { %6185 = vadd.xlane.f32.xlu1 %v6184_v62 }
0x137e   : > { %6659 = vrot.lane.b32.xlu2 %v15903_v56, %s18554_s18  ;;  %6806 = vrot.lane.b32.xlu0 %v15943_v34, %s18554_s18 }
0x1380   : > { %v6165_v30 = vpop.xlane.xlu2 %6164 }
0x1381   : > { %13323 = vrcp.f32 %v6165_v30 }
0x1382   : > { %v13322_v42 = vpop.eup %13321 }
0x1383   : > { %v6196_v0 = vmul.f32 %v13322_v42, %v16175_v14 }
0x1385   : > { %v6204_v12 = vpack.c.bf16 %v6196_v0, %v6196_v0 }
0x1386   : > { %6785 = vrot.lane.b32.xlu2 %v15938_v3, %s18554_s18 }
0x1387   : > { %v13324_v38 = vpop.eup %13323  ;;  %11527 = vmatmul.msk.bf16.vlgmr.msra.gmra.mxu1 %vm573_vm1, %v6204_v12 }
0x1388   : > { %v6195_v47 = vmul.f32 %v13324_v38, %v16179_v41  ;;  %6419 = vmatpush.bf16.xpose.msra.mxu1 %v6410_v49  ;;  %v6380_v41 = vpop.permute.xlu1 %6379  ;;  %v6403_v15 = vpop.permute.xlu2 %6402 }
0x138a   : > { %v6203_v23 = vpack.c.bf16 %v6195_v47, %v6195_v47 }
0x138c   : > { %11526 = vmatmul.msk.bf16.vlgmr.msrb.gmra.mxu0 %vm573_vm1, %v6203_v23 }
0x138d   : > { %6396 = vmatpush.bf16.xpose.msrb.mxu0 %v6387_v5 }
0x1390   : > { %v6177_v14 = vpop.xlane.xlu0 %6176 }
0x1391   : > { %13325 = vrcp.f32 %v6177_v14 }
0x1396   : > { %6517 = vrot.lane.b32.xlu1 %v15938_v3, %s18553_s24 }
0x1397   : > { %v13326_v18 = vpop.eup %13325 }
0x1398   : > { %v6199_v44 = vmul.f32 %v13326_v18, %v16183_v25 }
0x139a   : > { %v6207_v57 = vpack.c.bf16 %v6199_v44, %v6199_v44 }
0x139c   : > { %11530 = vmatmul.msk.bf16.vlgmr.msra.gmra.mxu0 %vm573_vm1, %v6207_v57 }
0x139e   : > { %6494 = vrot.lane.b32.xlu1 %v15923_v61, %s18553_s24 }
0x13a5   : > { %v6171_v40 = vpop.xlane.xlu0 %6170 }
0x13a6   : > { %13327 = vrcp.f32 %v6171_v40  ;;  %6701 = vrot.lane.b32.xlu1 %v15911_v45, %s18554_s18 }
0x13ac   : > { %11534 = vmatmul.msk.bf16.vlgmr.msrb.gmra.mxu0 %vm573_vm1, %v6380_v41  ;;  %v13328_v13 = vpop.eup %13327 }
0x13ad   : > { %v6197_v17 = vmul.f32 %v13328_v13, %v16189_v31  ;;  %v6174_v28 = vpop.xlane.xlu1 %6173  ;;  %v6456_v31 = vsel %vm573_vm1, %v16173_v43, 0 }
0x13ae   : > { %13329 = vrcp.f32 %v6174_v28  ;;  %6743 = vrot.lane.b32.xlu1 %v15919_v33, %s18554_s18  ;;  %s472_s18 = sand.u32 1, %s13511_s30  }
0x13af   : > { %v6205_v25 = vpack.c.bf16 %v6197_v17, %v6197_v17 }
0x13b1   : > { %11528 = vmatmul.msk.bf16.vlgmr.msra.gmra.mxu2 %vm573_vm1, %v6205_v25 }
0x13b2   : > { %6442 = vmatpush.bf16.xpose.msra.mxu2 %v6433_v29 }
0x13b4   : > { %v13330_v9 = vpop.eup %13329 }
0x13b5   : > { %v6198_v1 = vmul.f32 %v13330_v9, %v16193_v8 }
0x13b7   : > { %v6206_v51 = vpack.c.bf16 %v6198_v1, %v6198_v1 }
0x13b8   : > { %v6449_v35 = vpop.permute.xlu0 %6448 }
0x13b9   : > { %11529 = vmatmul.msk.bf16.vlgmr.msra.gmra.mxu3 %vm573_vm1, %v6206_v51 }
0x13ba   : > { %6465 = vmatpush.bf16.xpose.msra.mxu3 %v6456_v31 }
0x13c0   : > { %v6520_v50 = vpop.permute.xlu0 %6519 }
0x13c1   : > { %v6180_v55 = vpop.xlane.xlu2 %6179 }
0x13c2   : > { %13331 = vrcp.f32 %v6180_v55 }
0x13c5   : > { %v6543_v14 = vpop.permute.xlu1 %6542 }
0x13c6   : > { %v6548_v40 = vsel %vm573_vm1, %v6543_v14, 0 }
0x13c8   : > { %v13332_v59 = vpop.eup %13331  ;;  %v6497_v46 = vpop.permute.xlu0 %6496 }
0x13c9   : > { %v6200_v22 = vmul.f32 %v13332_v59, %v16200_v63  ;;  %v6183_v62 = vpop.xlane.xlu2 %6182  ;;  %v6502_v8 = vsel %vm573_vm1, %v6497_v46, 0  ;;  %v6525_v63 = vsel %vm573_vm1, %v6520_v50, 0 }
0x13ca   : > { %13333 = vrcp.f32 %v6183_v62 }
0x13cb   : > { %v6208_v30 = vpack.c.bf16 %v6200_v22, %v6200_v22 }
0x13cd   : > { %11531 = vmatmul.msk.bf16.vlgmr.msrb.gmra.mxu1 %vm573_vm1, %v6208_v30 }
0x13ce   : > { %6511 = vmatpush.bf16.xpose.msrb.mxu1 %v6502_v8 }
0x13d0   : > { %v13334_v42 = vpop.eup %13333  ;;  %v6472_v0 = vpop.permute.xlu0 %6471 }
0x13d1   : > { %v6201_v43 = vmul.f32 %v13334_v42, %v16206_v24  ;;  %v6474_v16 = vpop.permute.xlu2 %6473 }
0x13d2   : > { %v6479_v12 = vsel %vm573_vm1, %v6474_v16, 0 }
0x13d3   : > { %v6209_v38 = vpack.c.bf16 %v6201_v43, %v6201_v43  ;;  %6488 = vmatpush.bf16.xpose.msra.mxu0 %v6479_v12 }
0x13d5   : > { %11532 = vmatmul.msk.bf16.vlgmr.msrb.gmra.mxu2 %vm573_vm1, %v6209_v38 }
0x13d6   : > { %6534 = vmatpush.bf16.xpose.msrb.mxu2 %v6525_v63 }
0x13d8   : > { %v6681_v47 = vpop.permute.xlu0 %6680 }
0x13d9   : > { %v6541_v49 = vpop.permute.xlu2 %6540  ;;  %v6686_v23 = vsel %vm862_vm2, %v6681_v47, 0 }
0x13da   : > { %11538 = vmatmul.msk.bf16.vlgmr.msra.gmra.mxu0 %vm573_vm1, %v6472_v0 }
0x13dd   : > { %11535 = vmatmul.msk.bf16.vlgmr.msra.gmra.mxu1 %vm573_vm1, %v6403_v15 }
0x13de   : > { %6695 = vmatpush.bf16.msra.mxu1 %v6686_v23 }
0x13e0   : > { %v6723_v13 = vpop.permute.xlu0 %6722 }
0x13e1   : > { %v6660_v24 = vpop.permute.xlu2 %6659  ;;  %v6728_v29 = vsel %vm862_vm2, %v6723_v13, 0 }
0x13e2   : > { %v6665_v5 = vsel %vm862_vm2, %v6660_v24, 0 }
0x13e3   : > { %6674 = vmatpush.bf16.msrb.mxu0 %v6665_v5 }
0x13e5   : > { %11536 = vmatmul.msk.bf16.vlgmr.msra.gmra.mxu2 %vm573_vm1, %v16227_v32 }
0x13e8   : > { %v6765_v9 = vpop.permute.xlu0 %6764 }
0x13e9   : > { %v6770_v15 = vsel %vm862_vm2, %v6765_v9, 0  ;;  %v6786_v31 = vpop.permute.xlu2 %6785 }
0x13ea   : > { %v6791_v46 = vsel %vm862_vm2, %v6786_v31, 0 }
0x13f0   : > { %v6186_v18 = vpop.xlane.xlu1 %6185  ;;  %v6807_v59 = vpop.permute.xlu0 %6806 }
0x13f1   : > { %13335 = vrcp.f32 %v6186_v18 }
0x13f7   : > { %v13336_v44 = vpop.eup %13335 }
0x13f8   : > { %v6202_v57 = vmul.f32 %v13336_v44, %v16229_v2 }
0x13fa   : > { %v6210_v41 = vpack.c.bf16 %v6202_v57, %v6202_v57 }
0x13fc   : > { %11533 = vmatmul.msk.bf16.vlgmr.msrb.gmra.mxu3 %vm573_vm1, %v6210_v41 }
0x13fd   : > { %6557 = vmatpush.bf16.xpose.msrb.mxu3 %v6548_v40 }
0x1404   : > { %v16280_v17 = vpop.f32.mrf.mxu1 }
0x1408   : > { %v6518_v28 = vpop.permute.xlu1 %6517 }
0x1409   : > { %v16282_v25 = vpop.f32.mrf.mxu0  ;;  %11540 = vmatmul.msk.bf16.vlgmr.msrb.gmra.mxu2 %vm573_vm1, %v6518_v28 }
0x140a   : > { %v13034_v32 = vpack.i.bf16 %v16280_v17, %v16282_v25 }
0x140c   : > { %v6251_v2 = vpop.f32.mrf.mxu1  ;;  %11537 = vmatmul.msk.bf16.vlgmr.msra.gmra.mxu3 %vm573_vm1, %v6449_v35  ;;  %v6812_v35 = vsel %vm862_vm2, %v6807_v59, 0 }
0x140d   : > { %6737 = vmatpush.bf16.msra.mxu3 %v6728_v29 }
0x1410   : > { %v6495_v1 = vpop.permute.xlu1 %6494 }
0x1411   : > { %v6230_v51 = vpop.f32.mrf.mxu0  ;;  %11539 = vmatmul.msk.bf16.vlgmr.msrb.gmra.mxu1 %vm573_vm1, %v6495_v1 }
0x1412   : > { %6779 = vmatpush.bf16.msrb.mxu1 %v6770_v15 }
0x1418   : > { %v6702_v50 = vpop.permute.xlu1 %6701 }
0x1419   : > { %v16291_v55 = vpop.f32.mrf.mxu0  ;;  %v6707_v22 = vsel %vm862_vm2, %v6702_v50, 0 }
0x141a   : > { %6716 = vmatpush.bf16.msra.mxu2 %v6707_v22 }
0x141c   : > { %11541 = vmatmul.msk.bf16.vlgmr.msrb.gmra.mxu3 %vm573_vm1, %v6541_v49 }
0x141d   : > { %6821 = vmatpush.bf16.msrb.mxu3 %v6812_v35 }
0x141e   : > { %6800 = vmatpush.bf16.msrb.mxu2 %v6791_v46 }
0x1420   : > { %v6744_v62 = vpop.permute.xlu1 %6743 }
0x1421   : > { %v6314_v30 = vpop.f32.mrf.mxu0  ;;  %v6749_v8 = vsel %vm862_vm2, %v6744_v62, 0 }
0x1422   : > { %6758 = vmatpush.bf16.msra.mxu0 %v6749_v8 }
0x1429   : > { %v6398_v42 = vpop.f32.mrf.mxu0 }
0x142a   : > { %v6563_v43 = vsel %vm573_vm1, %v6398_v42, -inf }
0x142b   : > { %6564 = vmax.xlane.f32.xlu2 %v6563_v43 }
0x1431   : > { %v6400_v0 = vpop.f32.mrf.mxu0 }
0x1434   : > { %v16299_v16 = vpop.f32.mrf.mxu2 }
0x143c   : > { %v6272_v12 = vpop.f32.mrf.mxu2  ;;  %v16301_v38 = vpop.f32.mrf.mxu3 }
0x143d   : > { %v13049_v63 = vpack.i.bf16 %v16301_v38, %v16299_v16 }
0x1443   : > { %6852 = vrot.lane.b32.xlu2 %v15907_v58, %s18555_s22 }
0x1444   : > { %v6293_v49 = vpop.f32.mrf.mxu3 }
0x144a   : > { %v16307_v47 = vpop.f32.mrf.mxu1 }
0x144b   : > { %v13064_v23 = vpack.i.bf16 %v16307_v47, %v16291_v55 }
0x1452   : > { %v6335_v24 = vpop.f32.mrf.mxu1 }
0x1457   : > { %v6490_v5 = vpop.f32.mrf.mxu0 }
0x1458   : > { %v16311_v14 = vpop.f32.mrf.mxu2  ;;  %v6575_v13 = vsel %vm573_vm1, %v6490_v5, -inf }
0x145a   : > { %v6421_v18 = vpop.f32.mrf.mxu1 }
0x145b   : > { %v6566_v44 = vsel %vm573_vm1, %v6421_v18, -inf }
0x145c   : > { %6567 = vmax.xlane.f32.xlu0 %v6566_v44 }
0x145f   : > { %v6492_v57 = vpop.f32.mrf.mxu0 }
0x1460   : > { %v6356_v41 = vpop.f32.mrf.mxu2 }
0x1462   : > { %v6423_v40 = vpop.f32.mrf.mxu1 }
0x1464   : > { %6576 = vmax.xlane.f32.xlu0 %v6575_v13 }
0x1468   : > { %v6444_v28 = vpop.f32.mrf.mxu2 }
0x1469   : > { %v6569_v62 = vsel %vm573_vm1, %v6444_v28, -inf }
0x1470   : > { %v6446_v29 = vpop.f32.mrf.mxu2 }
0x147f   : > { %v16315_v2 = vpop.f32.mrf.mxu3 }
0x1480   : > { %v13079_v9 = vpack.i.bf16 %v16315_v2, %v16311_v14 }
0x1487   : > { %v6377_v1 = vpop.f32.mrf.mxu3 }
0x148c   : > { %v6536_v51 = vpop.f32.mrf.mxu2 }
0x148d   : > { %v6581_v30 = vsel %vm573_vm1, %v6536_v51, -inf }
0x148e   : > { %v6513_v15 = vpop.f32.mrf.mxu1 }
0x148f   : > { %v6467_v31 = vpop.f32.mrf.mxu3  ;;  %v6578_v50 = vsel %vm573_vm1, %v6513_v15, -inf }
0x1490   : > { %6579 = vmax.xlane.f32.xlu1 %v6578_v50  ;;  %v6572_v59 = vsel %vm573_vm1, %v6467_v31, -inf }
0x1491   : > { %6573 = vmax.xlane.f32.xlu2 %v6572_v59 }
0x1494   : > { %v6538_v22 = vpop.f32.mrf.mxu2 }
0x1496   : > { %v6515_v46 = vpop.f32.mrf.mxu1 }
0x1497   : > { %v6469_v35 = vpop.f32.mrf.mxu3 }
0x1498   : > { %6570 = vmax.xlane.f32.xlu1 %v6569_v62 }
0x1499   : > { %6582 = vmax.xlane.f32.xlu2 %v6581_v30 }
0x149e   : > { %v6565_v12 = vpop.xlane.xlu2 %6564 }
0x149f   : > { %v6559_v8 = vpop.f32.mrf.mxu3  ;;  %v6587_v49 = vsub.f32 %v6398_v42, %v6565_v12 }
0x14a0   : > { %v6584_v43 = vsel %vm573_vm1, %v6559_v8, -inf }
0x14a1   : > { %6585 = vmax.xlane.f32.xlu0 %v6584_v43  ;;  %v6595_v24 = vmul.f32 1.442695, %v6587_v49 }
0x14a3   : > { %13337 = vpow2.f32 %v6595_v24 }
0x14a7   : > { %v6561_v0 = vpop.f32.mrf.mxu3 }
0x14a9   : > { %v16328_v13 = vpop.eup %13337 }
0x14aa   : > { %v6611_v22 = vsel %vm573_vm1, %v16328_v13, 0.0 }
0x14b1   : > { %6829 = vrot.lane.b32.xlu1 %v15903_v56, %s18555_s22 }
0x14b5   : > { %6875 = vrot.lane.b32.xlu0 %v15911_v45, %s18555_s22 }
0x14cf   : > { %v6568_v44 = vpop.xlane.xlu0 %6567 }
0x14d0   : > { %v6588_v57 = vsub.f32 %v6421_v18, %v6568_v44 }
0x14d2   : > { %v6597_v41 = vmul.f32 1.442695, %v6588_v57 }
0x14d4   : > { %13339 = vpow2.f32 %v6597_v41 }
0x14d7   : > { %v6577_v40 = vpop.xlane.xlu0 %6576 }
0x14d8   : > { %v6591_v29 = vsub.f32 %v6490_v5, %v6577_v40  ;;  %v16342_v5 = vpop.permute.xlu2 %6852 }
0x14da   : > { %v16330_v1 = vpop.eup %13339  ;;  %v6603_v50 = vmul.f32 1.442695, %v6591_v29 }
0x14db   : > { %v6614_v59 = vsel %vm573_vm1, %v16330_v1, 0.0  ;;  %6612 = vadd.xlane.f32.xlu1 %v6611_v22 }
0x14dc   : > { %13341 = vpow2.f32 %v6603_v50  ;;  %6615 = vadd.xlane.f32.xlu2 %v6614_v59 }
0x14e2   : > { %v16336_v42 = vpop.eup %13341 }
0x14e3   : > { %v6623_v18 = vsel %vm573_vm1, %v16336_v42, 0.0 }
0x14e4   : > { %6624 = vadd.xlane.f32.xlu2 %v6623_v18 }
0x14fc   : > { %6827 = vrot.lane.b32.xlu2 %v15903_v56, %s18556_s28 }
0x1503   : > { %v6580_v46 = vpop.xlane.xlu1 %6579 }
0x1504   : > { %6896 = vrot.lane.b32.xlu2 %v15915_v36, %s18556_s28  ;;  %v6592_v35 = vsub.f32 %v6513_v15, %v6580_v46  ;;  %v6574_v62 = vpop.xlane.xlu2 %6573 }
0x1505   : > { %v6590_v43 = vsub.f32 %v6467_v31, %v6574_v62 }
0x1506   : > { %v6605_v30 = vmul.f32 1.442695, %v6592_v35 }
0x1507   : > { %v6601_v0 = vmul.f32 1.442695, %v6590_v43 }
0x1508   : > { %13343 = vpow2.f32 %v6605_v30 }
0x1509   : > { %13345 = vpow2.f32 %v6601_v0 }
0x150b   : > { %v6571_v12 = vpop.xlane.xlu1 %6570 }
0x150c   : > { %6967 = vrot.lane.b32.xlu2 %v15938_v3, %s18555_s22  ;;  %v6589_v49 = vsub.f32 %v6444_v28, %v6571_v12  ;;  %v6583_v24 = vpop.xlane.xlu2 %6582 }
0x150d   : > { %v6593_v41 = vsub.f32 %v6536_v51, %v6583_v24 }
0x150e   : > { %v16348_v44 = vpop.eup %13343  ;;  %v6599_v57 = vmul.f32 1.442695, %v6589_v49 }
0x150f   : > { %v6626_v40 = vsel %vm573_vm1, %v16348_v44, 0.0  ;;  %v6607_v15 = vmul.f32 1.442695, %v6593_v41  ;;  %v16352_v31 = vpop.eup %13345 }
0x1510   : > { %13347 = vpow2.f32 %v6599_v57  ;;  %6627 = vadd.xlane.f32.xlu1 %v6626_v40  ;;  %v6620_v50 = vsel %vm573_vm1, %v16352_v31, 0.0 }
0x1511   : > { %13349 = vpow2.f32 %v6607_v15 }
0x1514   : > { %v6586_v59 = vpop.xlane.xlu0 %6585 }
0x1515   : > { %v6594_v18 = vsub.f32 %v6559_v8, %v6586_v59 }
0x1516   : > { %v16354_v29 = vpop.eup %13347 }
0x1517   : > { %v6617_v28 = vsel %vm573_vm1, %v16354_v29, 0.0  ;;  %v16360_v51 = vpop.eup %13349  ;;  %v6609_v46 = vmul.f32 1.442695, %v6594_v18 }
0x1518   : > { %6618 = vadd.xlane.f32.xlu0 %v6617_v28  ;;  %6621 = vadd.xlane.f32.xlu1 %v6620_v50  ;;  %v6629_v22 = vsel %vm573_vm1, %v16360_v51, 0.0  ;;  %v6858_v28 = vsel %vm573_vm1, %v16342_v5, 0 }
0x1519   : > { %13351 = vpow2.f32 %v6609_v46 }
0x151f   : > { %v16364_v35 = vpop.eup %13351 }
0x1520   : > { %6630 = vadd.xlane.f32.xlu0 %v6629_v22  ;;  %v6632_v62 = vsel %vm573_vm1, %v16364_v35, 0.0 }
0x1523   : > { %v6830_v8 = vpop.permute.xlu1 %6829 }
0x1524   : > { %v6835_v15 = vsel %vm573_vm1, %v6830_v8, 0 }
0x1527   : > { %v6876_v59 = vpop.permute.xlu0 %6875 }
0x1531   : > { %6898 = vrot.lane.b32.xlu1 %v15915_v36, %s18555_s22 }
0x1534   : > { %6850 = vrot.lane.b32.xlu0 %v15907_v58, %s18556_s28 }
0x1535   : > { %6633 = vadd.xlane.f32.xlu2 %v6632_v62 }
0x1539   : > { %6873 = vrot.lane.b32.xlu1 %v15911_v45, %s18556_s28 }
0x153c   : > { %6921 = vrot.lane.b32.xlu0 %v15919_v33, %s18555_s22 }
0x1541   : > { %6944 = vrot.lane.b32.xlu1 %v15923_v61, %s18555_s22 }
0x1544   : > { %6990 = vrot.lane.b32.xlu0 %v15943_v34, %s18555_s22  ;;  %s18391_s22 = sshll.u32 %s472_s18, 3 }
0x1549   : > { %6919 = vrot.lane.b32.xlu1 %v15919_v33, %s18556_s28 }
0x154c   : > { %6965 = vrot.lane.b32.xlu0 %v15938_v3, %s18556_s28 }
0x154d   : > { %6942 = vrot.lane.b32.xlu2 %v15923_v61, %s18556_s28 }
0x154e   : > { %v6613_v30 = vpop.xlane.xlu1 %6612 }
0x154f   : > { %v6616_v43 = vpop.xlane.xlu2 %6615  ;;  %13353 = vrcp.f32 %v6613_v30 }
0x1550   : > { %13355 = vrcp.f32 %v6616_v43 }
0x1551   : > { %6988 = vrot.lane.b32.xlu1 %v15943_v34, %s18556_s28 }
0x1554   : > { %7107 = vrot.lane.b32.xlu0 %v15903_v56, %s18557_s25 }
0x1555   : > { %v13354_v0 = vpop.eup %13353 }
0x1556   : > { %v13356_v12 = vpop.eup %13355  ;;  %v6643_v49 = vmul.f32 %v13354_v0, %v16328_v13 }
0x1557   : > { %v6644_v24 = vmul.f32 %v13356_v12, %v16330_v1  ;;  %v6625_v41 = vpop.xlane.xlu2 %6624 }
0x1558   : > { %v6651_v57 = vpack.c.bf16 %v6643_v49, %v6643_v49  ;;  %13357 = vrcp.f32 %v6625_v41  ;;  %v6881_v41 = vsel %vm573_vm1, %v6876_v59, 0 }
0x1559   : > { %v6652_v40 = vpack.c.bf16 %v6644_v24, %v6644_v24 }
0x155a   : > { %11542 = vmatmul.msk.bf16.vlgmr.msrb.gmra.mxu0 %vm573_vm1, %v6651_v57 }
0x155b   : > { %11543 = vmatmul.msk.bf16.vlgmr.msra.gmra.mxu1 %vm573_vm1, %v6652_v40  ;;  %6844 = vmatpush.bf16.xpose.msrb.mxu0 %v6835_v15 }
0x155c   : > { %6867 = vmatpush.bf16.xpose.msra.mxu1 %v6858_v28 }
0x155e   : > { %v13358_v56 = vpop.eup %13357 }
0x155f   : > { %v6647_v13 = vmul.f32 %v13358_v56, %v16336_v42  ;;  %v6828_v1 = vpop.permute.xlu2 %6827 }
0x1561   : > { %v6655_v50 = vpack.c.bf16 %v6647_v13, %v6647_v13 }
0x1567   : > { %v6897_v12 = vpop.permute.xlu2 %6896 }
0x156a   : > { %11546 = vmatmul.msk.bf16.vlgmr.msra.gmra.mxu0 %vm573_vm1, %v6655_v50 }
0x156f   : > { %v6968_v40 = vpop.permute.xlu2 %6967 }
0x1570   : > { %v6973_v13 = vsel %vm573_vm1, %v6968_v40, 0 }
0x157a   : > { %11550 = vmatmul.msk.bf16.vlgmr.msrb.gmra.mxu0 %vm573_vm1, %v6828_v1 }
0x1583   : > { %v6628_v22 = vpop.xlane.xlu1 %6627 }
0x1584   : > { %13359 = vrcp.f32 %v6628_v22 }
0x158a   : > { %v13360_v18 = vpop.eup %13359 }
0x158b   : > { %v6648_v5 = vmul.f32 %v13360_v18, %v16348_v44  ;;  %v6619_v46 = vpop.xlane.xlu0 %6618  ;;  %v6622_v62 = vpop.xlane.xlu1 %6621 }
0x158c   : > { %13361 = vrcp.f32 %v6619_v46 }
0x158d   : > { %v6656_v8 = vpack.c.bf16 %v6648_v5, %v6648_v5  ;;  %13363 = vrcp.f32 %v6622_v62 }
0x158f   : > { %11547 = vmatmul.msk.bf16.vlgmr.msrb.gmra.mxu1 %vm573_vm1, %v6656_v8 }
0x1592   : > { %v13362_v42 = vpop.eup %13361 }
0x1593   : > { %v13364_v30 = vpop.eup %13363  ;;  %v6645_v43 = vmul.f32 %v13362_v42, %v16354_v29  ;;  %v6631_v24 = vpop.xlane.xlu0 %6630 }
0x1594   : > { %v6646_v0 = vmul.f32 %v13364_v30, %v16352_v31  ;;  %13365 = vrcp.f32 %v6631_v24 }
0x1595   : > { %v6653_v49 = vpack.c.bf16 %v6645_v43, %v6645_v43 }
0x1596   : > { %v6654_v57 = vpack.c.bf16 %v6646_v0, %v6646_v0 }
0x1597   : > { %11544 = vmatmul.msk.bf16.vlgmr.msra.gmra.mxu2 %vm573_vm1, %v6653_v49 }
0x1598   : > { %11545 = vmatmul.msk.bf16.vlgmr.msra.gmra.mxu3 %vm573_vm1, %v6654_v57  ;;  %6890 = vmatpush.bf16.xpose.msra.mxu2 %v6881_v41 }
0x159a   : > { %v13366_v44 = vpop.eup %13365 }
0x159b   : > { %v6649_v15 = vmul.f32 %v13366_v44, %v16360_v51 }
0x159d   : > { %v6657_v31 = vpack.c.bf16 %v6649_v15, %v6649_v15 }
0x15a3   : > { %v6899_v28 = vpop.permute.xlu1 %6898 }
0x15a4   : > { %v6904_v29 = vsel %vm573_vm1, %v6899_v28, 0 }
0x15a5   : > { %6913 = vmatpush.bf16.xpose.msra.mxu3 %v6904_v29 }
0x15a6   : > { %v6851_v56 = vpop.permute.xlu0 %6850 }
0x15a7   : > { %11548 = vmatmul.msk.bf16.vlgmr.msrb.gmra.mxu2 %vm573_vm1, %v6657_v31  ;;  %11551 = vmatmul.msk.bf16.vlgmr.msra.gmra.mxu1 %vm573_vm1, %v6851_v56 }
0x15a8   : > { %v6634_v50 = vpop.xlane.xlu2 %6633  ;;  %6982 = vmatpush.bf16.xpose.msrb.mxu2 %v6973_v13 }
0x15a9   : > { %13367 = vrcp.f32 %v6634_v50 }
0x15ab   : > { %v6874_v1 = vpop.permute.xlu1 %6873 }
0x15ae   : > { %v6922_v22 = vpop.permute.xlu0 %6921 }
0x15af   : > { %v13368_v59 = vpop.eup %13367  ;;  %v6927_v18 = vsel %vm573_vm1, %v6922_v22, 0 }
0x15b0   : > { %v6650_v51 = vmul.f32 %v13368_v59, %v16364_v35  ;;  %6936 = vmatpush.bf16.xpose.msra.mxu0 %v6927_v18  ;;  %v6943_v30 = vpop.permute.xlu2 %6942 }
0x15b2   : > { %v6658_v5 = vpack.c.bf16 %v6650_v51, %v6650_v51 }
0x15b3   : > { %v6945_v46 = vpop.permute.xlu1 %6944 }
0x15b4   : > { %11549 = vmatmul.msk.bf16.vlgmr.msrb.gmra.mxu3 %vm573_vm1, %v6658_v5  ;;  %v6950_v62 = vsel %vm573_vm1, %v6945_v46, 0 }
0x15b5   : > { %6959 = vmatpush.bf16.xpose.msrb.mxu1 %v6950_v62 }
0x15b6   : > { %v6991_v8 = vpop.permute.xlu0 %6990 }
0x15b7   : > { %v6996_v42 = vsel %vm573_vm1, %v6991_v8, 0  ;;  %11552 = vmatmul.msk.bf16.vlgmr.msra.gmra.mxu2 %vm573_vm1, %v6874_v1 }
0x15b8   : > { %7005 = vmatpush.bf16.xpose.msrb.mxu3 %v6996_v42 }
0x15bb   : > { %v6920_v43 = vpop.permute.xlu1 %6919 }
0x15bc   : > { %11554 = vmatmul.msk.bf16.vlgmr.msra.gmra.mxu0 %vm573_vm1, %v6920_v43  ;;  %11555 = vmatmul.msk.bf16.vlgmr.msrb.gmra.mxu1 %vm573_vm1, %v6943_v30 }
0x15be   : > { %v6966_v35 = vpop.permute.xlu0 %6965 }
0x15c3   : > { %v6989_v24 = vpop.permute.xlu1 %6988 }
0x15c4   : > { %11553 = vmatmul.msk.bf16.vlgmr.msra.gmra.mxu3 %vm573_vm1, %v6897_v12 }
0x15c6   : > { %v7108_v0 = vpop.permute.xlu0 %7107 }
0x15c7   : > { %v7113_v49 = vsel %vm862_vm2, %v7108_v0, 0  ;;  %11556 = vmatmul.msk.bf16.vlgmr.msrb.gmra.mxu2 %vm573_vm1, %v6966_v35 }
0x15c8   : > { %7122 = vmatpush.bf16.msrb.mxu0 %v7113_v49 }
0x15d4   : > { %11557 = vmatmul.msk.bf16.vlgmr.msrb.gmra.mxu3 %vm573_vm1, %v6989_v24 }
0x15d7   : > { %v16424_v57 = vpop.f32.mrf.mxu0 }
0x15d8   : > { %v16426_v41 = vpop.f32.mrf.mxu1 }
0x15d9   : > { %v13039_v44 = vpack.i.bf16 %v16426_v41, %v16424_v57 }
0x15df   : > { %v6678_v40 = vpop.f32.mrf.mxu0 }
0x15e0   : > { %v6699_v15 = vpop.f32.mrf.mxu1 }
0x15e7   : > { %v16430_v28 = vpop.f32.mrf.mxu0 }
0x15ef   : > { %v6762_v12 = vpop.f32.mrf.mxu0 }
0x15f7   : > { %v6846_v29 = vpop.f32.mrf.mxu0 }
0x15f8   : > { %v7011_v31 = vsel %vm573_vm1, %v6846_v29, -inf }
0x15f9   : > { %7012 = vmax.xlane.f32.xlu2 %v7011_v31 }
0x15ff   : > { %v6848_v56 = vpop.f32.mrf.mxu0 }
0x160c   : > { %v16433_v13 = vpop.f32.mrf.mxu1 }
0x160d   : > { %v18561_v2 = vpack.i.bf16 %v16433_v13, %v16430_v28 }
0x1611   : > { %7149 = vrot.lane.b32.xlu2 %v15911_v45, %s18557_s25 }
0x1614   : > { %v6783_v1 = vpop.f32.mrf.mxu1 }
0x161a   : > { %v16439_v59 = vpop.f32.mrf.mxu2 }
0x161b   : > { %v16441_v22 = vpop.f32.mrf.mxu3 }
0x161c   : > { %v13054_v51 = vpack.i.bf16 %v16441_v22, %v16439_v59 }
0x1622   : > { %v6720_v18 = vpop.f32.mrf.mxu2 }
0x1623   : > { %v6741_v5 = vpop.f32.mrf.mxu3 }
0x1624   : > { %v6869_v46 = vpop.f32.mrf.mxu1 }
0x1625   : > { %v7014_v62 = vsel %vm573_vm1, %v6869_v46, -inf }
0x1626   : > { %7015 = vmax.xlane.f32.xlu0 %v7014_v62 }
0x162a   : > { %v16446_v8 = vpop.f32.mrf.mxu2 }
0x162c   : > { %v6871_v42 = vpop.f32.mrf.mxu1 }
0x1632   : > { %v6804_v30 = vpop.f32.mrf.mxu2 }
0x1637   : > { %v16448_v43 = vpop.f32.mrf.mxu3 }
0x1639   : > { %v6938_v35 = vpop.f32.mrf.mxu0  ;;  %v6961_v0 = vpop.f32.mrf.mxu1 }
0x163a   : > { %v6892_v49 = vpop.f32.mrf.mxu2  ;;  %v7023_v24 = vsel %vm573_vm1, %v6938_v35, -inf  ;;  %v7026_v40 = vsel %vm573_vm1, %v6961_v0, -inf }
0x163b   : > { %7024 = vmax.xlane.f32.xlu0 %v7023_v24  ;;  %7027 = vmax.xlane.f32.xlu1 %v7026_v40  ;;  %v7017_v1 = vsel %vm573_vm1, %v6892_v49, -inf }
0x163f   : > { %v6825_v15 = vpop.f32.mrf.mxu3 }
0x1641   : > { %v6940_v12 = vpop.f32.mrf.mxu0  ;;  %v6963_v31 = vpop.f32.mrf.mxu1 }
0x1642   : > { %v6894_v56 = vpop.f32.mrf.mxu2 }
0x1643   : > { %7018 = vmax.xlane.f32.xlu1 %v7017_v1 }
0x1647   : > { %v6915_v18 = vpop.f32.mrf.mxu3 }
0x1648   : > { %v7020_v5 = vsel %vm573_vm1, %v6915_v18, -inf }
0x1649   : > { %7021 = vmax.xlane.f32.xlu2 %v7020_v5 }
0x164a   : > { %v16456_v62 = vpop.f32.mrf.mxu2 }
0x164b   : > { %v7029_v30 = vsel %vm573_vm1, %v16456_v62, -inf }
0x164f   : > { %v6917_v42 = vpop.f32.mrf.mxu3 }
0x1651   : > { %7030 = vmax.xlane.f32.xlu2 %v7029_v30 }
0x1652   : > { %v6986_v24 = vpop.f32.mrf.mxu2 }
0x1657   : > { %v7007_v40 = vpop.f32.mrf.mxu3 }
0x1658   : > { %v7032_v15 = vsel %vm573_vm1, %v7007_v40, -inf }
0x1659   : > { %7033 = vmax.xlane.f32.xlu0 %v7032_v15 }
0x165c   : > { %7128 = vrot.lane.b32.xlu1 %v15907_v58, %s18557_s25 }
0x165f   : > { %v7009_v12 = vpop.f32.mrf.mxu3 }
0x1669   : > { %7191 = vrot.lane.b32.xlu2 %v15919_v33, %s18557_s25 }
0x166c   : > { %v7013_v31 = vpop.xlane.xlu2 %7012 }
0x166d   : > { %7170 = vrot.lane.b32.xlu0 %v15915_v36, %s18557_s25  ;;  %v7035_v56 = vsub.f32 %v6846_v29, %v7013_v31 }
0x166f   : > { %v7043_v42 = vmul.f32 1.442695, %v7035_v56 }
0x1671   : > { %13369 = vpow2.f32 %v7043_v42 }
0x1674   : > { %v7150_v1 = vpop.permute.xlu2 %7149 }
0x1675   : > { %v7155_v5 = vsel %vm862_vm2, %v7150_v1, 0 }
0x1676   : > { %7164 = vmatpush.bf16.msra.mxu2 %v7155_v5 }
0x1677   : > { %v16468_v30 = vpop.eup %13369 }
0x1678   : > { %v7059_v58 = vsel %vm573_vm1, %v16468_v30, 0.0 }
0x1686   : > { %7060 = vadd.xlane.f32.xlu1 %v7059_v58 }
0x1699   : > { %v7016_v24 = vpop.xlane.xlu0 %7015 }
0x169a   : > { %v7036_v15 = vsub.f32 %v6869_v46, %v7016_v24 }
0x169c   : > { %v7045_v33 = vmul.f32 1.442695, %v7036_v15 }
0x169e   : > { %13371 = vpow2.f32 %v7045_v33 }
0x16a4   : > { %v16472_v12 = vpop.eup %13371 }
0x16a5   : > { %v7062_v36 = vsel %vm573_vm1, %v16472_v12, 0.0 }
0x16a6   : > { %7063 = vadd.xlane.f32.xlu2 %v7062_v36 }
0x16ae   : > { %v7025_v29 = vpop.xlane.xlu0 %7024  ;;  %v7028_v31 = vpop.xlane.xlu1 %7027 }
0x16af   : > { %v7039_v56 = vsub.f32 %v6938_v35, %v7025_v29  ;;  %v7040_v1 = vsub.f32 %v6961_v0, %v7028_v31 }
0x16b1   : > { %v7051_v5 = vmul.f32 1.442695, %v7039_v56  ;;  %v7053_v42 = vmul.f32 1.442695, %v7040_v1 }
0x16b3   : > { %13373 = vpow2.f32 %v7051_v5 }
0x16b4   : > { %13375 = vpow2.f32 %v7053_v42 }
0x16b6   : > { %v7019_v45 = vpop.xlane.xlu1 %7018 }
0x16b7   : > { %v7037_v58 = vsub.f32 %v6892_v49, %v7019_v45 }
0x16b9   : > { %v16476_v50 = vpop.eup %13373  ;;  %v7047_v46 = vmul.f32 1.442695, %v7037_v58 }
0x16ba   : > { %v16478_v24 = vpop.eup %13375  ;;  %v7071_v15 = vsel %vm573_vm1, %v16476_v50, 0.0 }
0x16bb   : > { %13377 = vpow2.f32 %v7047_v46  ;;  %7072 = vadd.xlane.f32.xlu0 %v7071_v15  ;;  %v7074_v35 = vsel %vm573_vm1, %v16478_v24, 0.0 }
0x16bc   : > { %v7022_v0 = vpop.xlane.xlu2 %7021  ;;  %7075 = vadd.xlane.f32.xlu1 %v7074_v35 }
0x16bd   : > { %v7038_v33 = vsub.f32 %v6915_v18, %v7022_v0 }
0x16bf   : > { %v7049_v36 = vmul.f32 1.442695, %v7038_v33 }
0x16c1   : > { %v13378_v29 = vpop.eup %13377  ;;  %13379 = vpow2.f32 %v7049_v36 }
0x16c2   : > { %v7065_v45 = vsel %vm573_vm1, %v13378_v29, 0.0 }
0x16c3   : > { %7066 = vadd.xlane.f32.xlu2 %v7065_v45 }
0x16c4   : > { %v7031_v49 = vpop.xlane.xlu2 %7030 }
0x16c5   : > { %v7041_v17 = vsub.f32 %v16456_v62, %v7031_v49 }
0x16c7   : > { %v16485_v31 = vpop.eup %13379 }
0x16c8   : > { %v7068_v56 = vsel %vm573_vm1, %v16485_v31, 0.0 }
0x16cb   : > { %7069 = vadd.xlane.f32.xlu2 %v7068_v56 }
0x16cc   : > { %v7034_v1 = vpop.xlane.xlu0 %7033  ;;  %v7192_v5 = vpop.permute.xlu2 %7191 }
0x16cd   : > { %v7042_v42 = vsub.f32 %v7007_v40, %v7034_v1  ;;  %v7197_v58 = vsel %vm862_vm2, %v7192_v5, 0 }
0x16ce   : > { %7206 = vmatpush.bf16.msra.mxu0 %v7197_v58  ;;  %v7129_v46 = vpop.permute.xlu1 %7128 }
0x16cf   : > { %v7057_v18 = vmul.f32 1.442695, %v7042_v42  ;;  %v7134_v15 = vsel %vm862_vm2, %v7129_v46, 0 }
0x16d0   : > { %7143 = vmatpush.bf16.msra.mxu1 %v7134_v15 }
0x16d1   : > { %13381 = vpow2.f32 %v7057_v18 }
0x16d5   : > { %7233 = vrot.lane.b32.xlu1 %v15938_v3, %s18557_s25 }
0x16d7   : > { %v16493_v35 = vpop.eup %13381 }
0x16d8   : > { %v7080_v0 = vsel %vm573_vm1, %v16493_v35, 0.0 }
0x16d9   : > { %7081 = vadd.xlane.f32.xlu0 %v7080_v0 }
0x16dd   : > { %13035 = vrot.lane.b32.xlu1 %v13034_v32, %s18558_s20 }
0x16df   : > { %v7171_v40 = vpop.permute.xlu0 %7170 }
0x16e0   : > { %v7176_v33 = vsel %vm862_vm2, %v7171_v40, 0 }
0x16e1   : > { %7185 = vmatpush.bf16.msra.mxu3 %v7176_v33 }
0x16e3   : > { %7212 = vrot.lane.b32.xlu2 %v15923_v61, %s18557_s25  ;;  %v7055_v61 = vmul.f32 1.442695, %v7041_v17 }
0x16e5   : > { %13050 = vrot.lane.b32.xlu1 %v13049_v63, %s18558_s20 }
0x16ed   : > { %7254 = vrot.lane.b32.xlu0 %v15943_v34, %s18557_s25 }
0x16f5   : > { %13040 = vrot.lane.b32.xlu0 %v13039_v44, %s18559_s15 }
0x16f9   : > { %v7061_v3 = vpop.xlane.xlu1 %7060 }
0x16fa   : > { %13383 = vrcp.f32 %v7061_v3 }
0x16fb   : > { %13385 = vpow2.f32 %v7055_v61 }
0x16fd   : > { %13055 = vrot.lane.b32.xlu0 %v13054_v51, %s18559_s15 }
0x1700   : > { %v13384_v25 = vpop.eup %13383 }
0x1701   : > { %v7091_v32 = vmul.f32 %v13384_v25, %v16468_v30  ;;  %v13386_v16 = vpop.eup %13385 }
0x1702   : > { %v7077_v38 = vsel %vm573_vm1, %v13386_v16, 0.0 }
0x1703   : > { %v7099_v34 = vpack.c.bf16 %v7091_v32, %v7091_v32 }
0x1705   : > { %13065 = vrot.lane.b32.xlu0 %v13064_v23, %s18558_s20  ;;  %11558 = vmatmul.msk.bf16.vlgmr.msrb.gmra.mxu0 %vm573_vm1, %v7099_v34 }
0x170c   : > { %7078 = vadd.xlane.f32.xlu2 %v7077_v38 }
0x1719   : > { %v7064_v63 = vpop.xlane.xlu2 %7063 }
0x171a   : > { %13387 = vrcp.f32 %v7064_v63 }
0x1720   : > { %v13388_v57 = vpop.eup %13387 }
0x1721   : > { %v7092_v41 = vmul.f32 %v13388_v57, %v16472_v12 }
0x1723   : > { %v7100_v44 = vpack.c.bf16 %v7092_v41, %v7092_v41 }
0x1725   : > { %11559 = vmatmul.msk.bf16.vlgmr.msra.gmra.mxu1 %vm573_vm1, %v7100_v44 }
0x172e   : > { %v7073_v59 = vpop.xlane.xlu0 %7072 }
0x172f   : > { %13389 = vrcp.f32 %v7073_v59  ;;  %v7076_v51 = vpop.xlane.xlu1 %7075 }
0x1735   : > { %v13390_v22 = vpop.eup %13389 }
0x1736   : > { %v7095_v55 = vmul.f32 %v13390_v22, %v16476_v50  ;;  %v7067_v47 = vpop.xlane.xlu2 %7066 }
0x1737   : > { %13391 = vrcp.f32 %v7067_v47  ;;  %v12755_v47 = vld [vmem:[%s18437_s4 + $0x18] sm:$0xff] }
0x1738   : > { %v7103_v23 = vpack.c.bf16 %v7095_v55, %v7095_v55  ;;  %13393 = vrcp.f32 %v7076_v51  ;;  %7439 = vmatpush.bf16.msrb.mxu0 %v12755_v47  ;;  %v12754_v51 = vld [vmem:[%s18437_s4 + $0x10] sm:$0xff] }
0x173a   : > { %11562 = vmatmul.msk.bf16.vlgmr.msra.gmra.mxu0 %vm573_vm1, %v7103_v23 }
0x173c   : > { %7440 = vmatpush.bf16.msrb.mxu0 %v12754_v51 }
0x173d   : > { %v13392_v62 = vpop.eup %13391 }
0x173e   : > { %v7093_v30 = vmul.f32 %v13392_v62, %v13378_v29  ;;  %v7070_v36 = vpop.xlane.xlu2 %7069  ;;  %v13394_v45 = vpop.eup %13393 }
0x173f   : > { %13395 = vrcp.f32 %v7070_v36  ;;  %v7096_v56 = vmul.f32 %v13394_v45, %v16478_v24 }
0x1740   : > { %v7101_v12 = vpack.c.bf16 %v7093_v30, %v7093_v30 }
0x1741   : > { %v7104_v29 = vpack.c.bf16 %v7096_v56, %v7096_v56 }
0x1742   : > { %11560 = vmatmul.msk.bf16.vlgmr.msra.gmra.mxu2 %vm573_vm1, %v7101_v12 }
0x1745   : > { %v13396_v49 = vpop.eup %13395 }
0x1746   : > { %v7094_v50 = vmul.f32 %v13396_v49, %v16485_v31  ;;  %v7213_v1 = vpop.permute.xlu2 %7212 }
0x1747   : > { %v7234_v5 = vpop.permute.xlu1 %7233  ;;  %v7218_v42 = vsel %vm862_vm2, %v7213_v1, 0 }
0x1748   : > { %v7102_v58 = vpack.c.bf16 %v7094_v50, %v7094_v50  ;;  %v7239_v18 = vsel %vm862_vm2, %v7234_v5, 0  ;;  %7227 = vmatpush.bf16.msrb.mxu1 %v7218_v42 }
0x1749   : > { %7248 = vmatpush.bf16.msrb.mxu2 %v7239_v18 }
0x174a   : > { %11561 = vmatmul.msk.bf16.vlgmr.msra.gmra.mxu3 %vm573_vm1, %v7102_v58 }
0x174b   : > { %11563 = vmatmul.msk.bf16.vlgmr.msrb.gmra.mxu1 %vm573_vm1, %v7104_v29 }
0x174c   : > { %v7082_v46 = vpop.xlane.xlu0 %7081 }
0x174d   : > { %13397 = vrcp.f32 %v7082_v46 }
0x174f   : > { %v13036_v36 = vpop.permute.xlu1 %13035 }
0x1750   : > { %v13038_v45 = vunpack.i.h.bf16 %v13036_v36  ;;  %v13037_v49 = vunpack.i.l.bf16 %v13036_v36 }
0x1752   : > { %v7372_v13 = vsel %vm573_vm1, %v16137_v7, %v13038_v45 }
0x1753   : > { %v13398_v15 = vpop.eup %13397 }
0x1754   : > { %v7098_v24 = vmul.f32 %v13398_v15, %v16493_v35 }
0x1756   : > { %v7106_v40 = vpack.c.bf16 %v7098_v24, %v7098_v24 }
0x1757   : > { %v13051_v24 = vpop.permute.xlu1 %13050 }
0x175f   : > { %v7255_v31 = vpop.permute.xlu0 %7254 }
0x1760   : > { %v7260_v0 = vsel %vm862_vm2, %v7255_v31, 0  ;;  %v13053_v31 = vunpack.i.h.bf16 %v13051_v24 }
0x1761   : > { %7269 = vmatpush.bf16.msrb.mxu3 %v7260_v0  ;;  %v13052_v0 = vunpack.i.l.bf16 %v13051_v24 }
0x1764   : > { %11565 = vmatmul.msk.bf16.vlgmr.msrb.gmra.mxu3 %vm573_vm1, %v7106_v40 }
0x1767   : > { %v13041_v12 = vpop.permute.xlu0 %13040 }
0x1768   : > { %v13043_v56 = vunpack.i.h.bf16 %v13041_v12  ;;  %v13042_v50 = vunpack.i.l.bf16 %v13041_v12 }
0x176a   : > { %v7380_v42 = vsel %vm2474_vm3, %v7372_v13, %v13043_v56 }
0x177f   : > { %v7079_v33 = vpop.xlane.xlu2 %7078 }
0x1780   : > { %13399 = vrcp.f32 %v7079_v33 }
0x1782   : > { %v7124_v3 = vpop.f32.mrf.mxu0 }
0x1786   : > { %v13400_v17 = vpop.eup %13399 }
0x1787   : > { %v7097_v61 = vmul.f32 %v13400_v17, %v13386_v16  ;;  %v7374_v17 = vsel %vm573_vm1, %v16131_v21, %v13053_v31 }
0x1789   : > { %v7105_v25 = vpack.c.bf16 %v7097_v61, %v7097_v61  ;;  %v7373_v61 = vsel %vm573_vm1, %v16139_v39, %v13052_v0 }
0x178a   : > { %v7126_v32 = vpop.f32.mrf.mxu0 }
0x178b   : > { %11564 = vmatmul.msk.bf16.vlgmr.msrb.gmra.mxu2 %vm573_vm1, %v7105_v25 }
0x17a2   : > { %v7145_v34 = vpop.f32.mrf.mxu1 }
0x17a3   : > { %v13044_v38 = vpack.i.bf16 %v7145_v34, %v7124_v3 }
0x17a5   : > { %13045 = vrot.lane.b32.xlu2 %v13044_v38, %s18560_s21 }
0x17aa   : > { %v7147_v35 = vpop.f32.mrf.mxu1 }
0x17ad   : > { %13080 = vrot.lane.b32.xlu2 %v13079_v9, %s18558_s20  ;;  %v18562_v9 = vpack.i.bf16 %v16448_v43, %v16446_v8  ;;  %v7371_v8 = vsel %vm573_vm1, %v16118_v19, %v13037_v49  ;;  %v13056_v19 = vpop.permute.xlu0 %13055  ;;  %s10692_s20 = sshll.u32 %s18629_s17, 3 }
0x17ae   : > { %v7379_v5 = vsel %vm2474_vm3, %v7371_v8, %v13042_v50  ;;  %v13058_v40 = vunpack.i.h.bf16 %v13056_v19  ;;  %v13057_v33 = vunpack.i.l.bf16 %v13056_v19  ;;  %s484_s26 = scalar_lea.vmem %s18434_s1, %s10692_s20  ;;  %s10609_s20 = scalar_lea.hbm %s18447_s14, %s13663_s27 }
0x17af   : > { %s10599_s27 = scalar_lea.sflag [#allocation3], %s472_s18 }
0x17b0   : > { %v7381_v34 = vsel %vm2474_vm3, %v7373_v61, %v13057_v33  ;;  %v7382_v38 = vsel %vm2474_vm3, %v7374_v17, %v13058_v40 }
0x17b7   : > { %v7208_v63 = vpop.f32.mrf.mxu0 }
0x17bf   : > { %v7210_v57 = vpop.f32.mrf.mxu0 }
0x17c0   : > { %v13066_v57 = vpop.permute.xlu0 %13065 }
0x17c1   : > { %v13067_v21 = vunpack.i.l.bf16 %v13066_v57 }
0x17c3   : > { %v7375_v47 = vsel %vm573_vm1, %v16144_v27, %v13067_v21 }
0x17c5   : > { %v7166_v41 = vpop.f32.mrf.mxu2 }
0x17c8   : > { %v7229_v44 = vpop.f32.mrf.mxu1 }
0x17c9   : > { %v13074_v59 = vpack.i.bf16 %v7229_v44, %v7208_v63 }
0x17cb   : > { %13075 = vrot.lane.b32.xlu0 %v13074_v59, %s18560_s21  ;;  %v13068_v59 = vunpack.i.h.bf16 %v13066_v57 }
0x17cd   : > { %v7168_v16 = vpop.f32.mrf.mxu2  ;;  %v7187_v22 = vpop.f32.mrf.mxu3 }
0x17ce   : > { %v13059_v55 = vpack.i.bf16 %v7187_v22, %v7166_v41 }
0x17d0   : > { %13060 = vrot.lane.b32.xlu1 %v13059_v55, %s18560_s21  ;;  %v7231_v23 = vpop.f32.mrf.mxu1  ;;  %v7376_v55 = vsel %vm573_vm1, %v16141_v26, %v13068_v59  ;;  %v16593_v26 = vld [vmem:[%s18438_s5 + $0x1] ss:$0 sm:$0xff] }
0x17d5   : > { %v7189_v14 = vpop.f32.mrf.mxu3 }
0x17d8   : > { %13070 = vrot.lane.b32.xlu1 %v18561_v2, %s18559_s15 }
0x17e0   : > { %13085 = vrot.lane.b32.xlu1 %v18562_v9, %s18559_s15  ;;  %s474_s15 = scalar_lea.vmem [#allocation2], %s18391_s22  ;;  %s13477_s22 = scalar_lea.hbm %s18447_s14, 16 }
0x17e7   : > { %v7271_v62 = vpop.f32.mrf.mxu3 }
0x17ef   : > { %v7273_v30 = vpop.f32.mrf.mxu3 }
0x17ff   : > { %v13046_v28 = vpop.permute.xlu2 %13045 }
0x1800   : > { %v13048_v43 = vunpack.i.h.bf16 %v13046_v28  ;;  %v13047_v1 = vunpack.i.l.bf16 %v13046_v28 }
0x1802   : > { %v7388_v58 = vsel %vm2483_vm4, %v7380_v42, %v13048_v43  ;;  %v7387_v18 = vsel %vm2483_vm4, %v7379_v5, %v13047_v1 }
0x1803   : > { %v7395_v29 = vpack.c.bf16 %v7388_v58, %v7387_v18 }
0x1805   : > { %11579 = vmatmul.msk.bf16.vlgmr.msrb.gmra.mxu0 %vm518_vm0, %v7395_v29 }
0x1807   : > { %v13081_v36 = vpop.permute.xlu2 %13080 }
0x1808   : > { %v13083_v27 = vunpack.i.h.bf16 %v13081_v36  ;;  %v13082_v45 = vunpack.i.l.bf16 %v13081_v36 }
0x180a   : > { %v7378_v8 = vsel %vm573_vm1, %v16150_v11, %v13083_v27  ;;  %v7377_v43 = vsel %vm573_vm1, %v16148_v53, %v13082_v45 }
0x180e   : > { %v7250_v46 = vpop.f32.mrf.mxu2 }
0x180f   : > { %v13089_v15 = vpack.i.bf16 %v7271_v62, %v7250_v46 }
0x1811   : > { %13090 = vrot.lane.b32.xlu0 %v13089_v15, %s18560_s21  ;;  %s10611_s21 = sshll.u32 %s474_s15, 4  ;;  %s10612_s21 = int_to_ptr.vmem [resolvable:$true] %s10611_s21 }
0x1816   : > { %v7252_v7 = vpop.f32.mrf.mxu2 }
0x183d   : > { %v13076_v39 = vpop.permute.xlu0 %13075 }
0x183e   : > { %v13078_v2 = vunpack.i.h.bf16 %v13076_v39  ;;  %v13077_v9 = vunpack.i.l.bf16 %v13076_v39 }
0x1842   : > { %v13061_v3 = vpop.permute.xlu1 %13060 }
0x1843   : > { %v13063_v25 = vunpack.i.h.bf16 %v13061_v3  ;;  %v13062_v32 = vunpack.i.l.bf16 %v13061_v3 }
0x1845   : > { %v7390_v35 = vsel %vm2483_vm4, %v7382_v38, %v13063_v25  ;;  %v7389_v63 = vsel %vm2483_vm4, %v7381_v34, %v13062_v32 }
0x1846   : > { %v7396_v41 = vpack.c.bf16 %v7390_v35, %v7389_v63 }
0x1848   : > { %11580 = vmatmul.msk.bf16.gmra.mxu0 %vm518_vm0, %v7396_v41 }
0x184a   : > { %v13071_v44 = vpop.permute.xlu1 %13070 }
0x184b   : > { %v13073_v16 = vunpack.i.h.bf16 %v13071_v44  ;;  %v13072_v22 = vunpack.i.l.bf16 %v13071_v44 }
0x184d   : > { %v7384_v23 = vsel %vm2474_vm3, %v7376_v55, %v13073_v16  ;;  %v7383_v14 = vsel %vm2474_vm3, %v7375_v47, %v13072_v22 }
0x184e   : > { %v7391_v51 = vsel %vm2483_vm4, %v7383_v14, %v13077_v9  ;;  %v7392_v62 = vsel %vm2483_vm4, %v7384_v23, %v13078_v2 }
0x184f   : > { %v7397_v30 = vpack.c.bf16 %v7392_v62, %v7391_v51 }
0x1852   : > { %v13086_v12 = vpop.permute.xlu1 %13085 }
0x1853   : > { %v13088_v49 = vunpack.i.h.bf16 %v13086_v12  ;;  %v13087_v56 = vunpack.i.l.bf16 %v13086_v12 }
0x1855   : > { %v7385_v42 = vsel %vm2474_vm3, %v7377_v43, %v13087_v56  ;;  %v7386_v58 = vsel %vm2474_vm3, %v7378_v8, %v13088_v49 }
0x1858   : > { %11581 = vmatmul.msk.bf16.gmra.mxu0 %vm518_vm0, %v7397_v30 }
0x1882   : > { %v7442_v50 = vpop.f32.mrf.mxu0 }
0x1883   : > { %v7443_v28 = vadd.f32 %v16593_v26, %v7442_v50  ;;  %v13091_v13 = vpop.permute.xlu0 %13090 }
0x1884   : > { %v13093_v1 = vunpack.i.h.bf16 %v13091_v13  ;;  %v13092_v5 = vunpack.i.l.bf16 %v13091_v13 }
0x1885   : > { %v7462_v18 = vadd.f32 %v7443_v28, %v15850_v52 }
0x1886   : > { %v7393_v29 = vsel %vm2483_vm4, %v7385_v42, %v13092_v5  ;;  %v7394_v46 = vsel %vm2483_vm4, %v7386_v58, %v13093_v1 }
0x1887   : > { %v7398_v15 = vpack.c.bf16 %v7394_v46, %v7393_v29  ;;  %v7474_v7 = vsel %vm518_vm0, %v7462_v18, 0.0  ;;  %v12762_v29 = vld [vmem:[%s18443_s10 + $0x1bc] sm:$0xf0]  ;;  %v12760_v46 = vld [vmem:[%s18443_s10 + $0x184] sm:$0xf] }
0x1888   : > { %7475 = vadd.xlane.f32.xlu2 %v7474_v7 }
0x1889   : > { %11582 = vmatmul.msk.bf16.gmra.mxu0 %vm518_vm0, %v7398_v15 }
0x188a   : > { %v7444_v11 = vpop.f32.mrf.mxu0 }
0x188b   : > { %v7445_v53 = vadd.f32 %v16593_v26, %v7444_v11  ;;  %v11614_v11 = vld [vmem:[%s18443_s10 + $0x1c0] sm:$0xf0] }
0x188d   : > { %v7463_v24 = vadd.f32 %v7445_v53, %v15853_v6  ;;  %v11620_v53 = vld [vmem:[%s18443_s10 + $0x188] sm:$0xf] }
0x188f   : > { %v7477_v19 = vsel %vm518_vm0, %v7463_v24, 0.0 }
0x1890   : > { %7478 = vadd.xlane.f32.xlu1 %v7477_v19 }
0x18c5   : > { %v7447_v31 = vpop.f32.mrf.mxu0 }
0x18c6   : > { %v7448_v52 = vadd.f32 %v16593_v26, %v7447_v31  ;;  %v11617_v31 = vor.u32 %v12760_v46, %v11614_v11 }
0x18c8   : > { %v7464_v0 = vadd.f32 %v7448_v52, %v15864_v4  ;;  %7783 = vmatpush.bf16.msra.mxu2 %v11617_v31 }
0x18ca   : > { %v7480_v40 = vsel %vm518_vm0, %v7464_v0, 0.0 }
0x18cb   : > { %7481 = vadd.xlane.f32.xlu0 %v7480_v40  ;;  %v11622_v40 = vld [vmem:[%s18443_s10 + $0x1c8] sm:$0xf0] }
0x18cd   : > { %v7449_v33 = vpop.f32.mrf.mxu0 }
0x18ce   : > { %v7450_v3 = vadd.f32 %v16593_v26, %v7449_v33 }
0x18d0   : > { %v7465_v17 = vadd.f32 %v7450_v3, %v15867_v48 }
0x18d2   : > { %v7483_v61 = vsel %vm518_vm0, %v7465_v17, 0.0 }
0x18d3   : > { %7484 = vadd.xlane.f32.xlu2 %v7483_v61  ;;  %v12758_v61 = vld [vmem:[%s18443_s10 + $0x13c] sm:$0xf0] }
0x18d5   : > { %v7452_v6 = vpop.f32.mrf.mxu0 }
0x18d6   : > { %v7453_v25 = vadd.f32 %v16593_v26, %v7452_v6 }
0x18d8   : > { %v7466_v32 = vadd.f32 %v7453_v25, %v15877_v37  ;;  %v12756_v25 = vld [vmem:[%s18443_s10 + $0x104] sm:$0xf] }
0x18da   : > { %v7486_v34 = vsel %vm518_vm0, %v7466_v32, 0.0 }
0x18db   : > { %7487 = vadd.xlane.f32.xlu1 %v7486_v34  ;;  %v11604_v34 = vld [vmem:[%s18443_s10 + $0x108] sm:$0xf] }
0x18dd   : > { %v7454_v4 = vpop.f32.mrf.mxu0 }
0x18de   : > { %v7455_v38 = vadd.f32 %v16593_v26, %v7454_v4 }
0x18e0   : > { %v7467_v35 = vadd.f32 %v7455_v38, %v15880_v10  ;;  %v12759_v38 = vld [vmem:[%s18443_s10 + $0x144] sm:$0xf0] }
0x18e2   : > { %v7489_v63 = vsel %vm518_vm0, %v7467_v35, 0.0 }
0x18e3   : > { %7490 = vadd.xlane.f32.xlu0 %v7489_v63  ;;  %v11606_v63 = vld [vmem:[%s18443_s10 + $0x148] sm:$0xf0] }
0x18fb   : > { %v7476_v48 = vpop.xlane.xlu2 %7475 }
0x18fc   : > { %v7498_v57 = vmul.f32 %v7476_v48, %v18545_v60  ;;  %v11605_v48 = vor.u32 %v12759_v38, %v11604_v34 }
0x18fe   : > { %v16623_v41 = vsub.f32 %v7462_v18, %v7498_v57  ;;  %v11612_v18 = vld [vmem:[%s18443_s10 + $0x180] sm:$0xf] }
0x18ff   : > { %v11613_v7 = vor.u32 %v12762_v29, %v11612_v18 }
0x1900   : > { %v7514_v44 = vmul.f32 %v16623_v41, %v16623_v41 }
0x1901   : > { %7754 = vmatpush.bf16.msra.mxu1 %v11613_v7 }
0x1902   : > { %v7522_v37 = vsel %vm518_vm0, %v7514_v44, 0.0 }
0x1903   : > { %v7479_v59 = vpop.xlane.xlu1 %7478  ;;  %7523 = vadd.xlane.f32.xlu2 %v7522_v37 }
0x1904   : > { %v7499_v21 = vmul.f32 %v7479_v59, %v18545_v60 }
0x1906   : > { %v16629_v16 = vsub.f32 %v7463_v24, %v7499_v21  ;;  %v7457_v10 = vpop.f32.mrf.mxu0  ;;  %v12763_v24 = vld [vmem:[%s18443_s10 + $0x1c4] sm:$0xf0] }
0x1907   : > { %v7458_v22 = vadd.f32 %v16593_v26, %v7457_v10  ;;  %v11621_v52 = vor.u32 %v12763_v24, %v11620_v53 }
0x1908   : > { %v7515_v39 = vmul.f32 %v16629_v16, %v16629_v16 }
0x1909   : > { %v16635_v55 = vadd.f32 %v7458_v22, %v15892_v54  ;;  %7812 = vmatpush.bf16.msra.mxu3 %v11621_v52 }
0x190a   : > { %v7525_v47 = vsel %vm518_vm0, %v7515_v39, 0.0 }
0x190b   : > { %7526 = vadd.xlane.f32.xlu1 %v7525_v47  ;;  %v7492_v23 = vsel %vm518_vm0, %v16635_v55, 0.0 }
0x190c   : > { %7493 = vadd.xlane.f32.xlu0 %v7492_v23 }
0x190d   : > { %7813 = vmatpush.bf16.msra.mxu3 %v11605_v48 }
0x190e   : > { %v7459_v14 = vpop.f32.mrf.mxu0 }
0x190f   : > { %v7460_v2 = vadd.f32 %v16593_v26, %v7459_v14 }
0x1911   : > { %v16642_v9 = vadd.f32 %v7460_v2, %v15895_v20 }
0x1913   : > { %v7495_v51 = vsel %vm518_vm0, %v16642_v9, 0.0 }
0x1914   : > { %7496 = vadd.xlane.f32.xlu2 %v7495_v51 }
0x193e   : > { %v7482_v62 = vpop.xlane.xlu0 %7481 }
0x193f   : > { %v7500_v54 = vmul.f32 %v7482_v62, %v18545_v60 }
0x1941   : > { %v16647_v30 = vsub.f32 %v7464_v0, %v7500_v54  ;;  %v12761_v0 = vld [vmem:[%s18443_s10 + $0x18c] sm:$0xf] }
0x1942   : > { %v11625_v33 = vor.u32 %v12761_v0, %v11622_v40 }
0x1943   : > { %v7516_v36 = vmul.f32 %v16647_v30, %v16647_v30 }
0x1944   : > { %7841 = vmatpush.bf16.msra.mxu0 %v11625_v33 }
0x1945   : > { %v7528_v12 = vsel %vm518_vm0, %v7516_v36, 0.0 }
0x1946   : > { %7529 = vadd.xlane.f32.xlu1 %v7528_v12  ;;  %v7485_v27 = vpop.xlane.xlu2 %7484 }
0x1947   : > { %v7501_v26 = vmul.f32 %v7485_v27, %v18545_v60 }
0x1949   : > { %v16653_v20 = vsub.f32 %v7465_v17, %v7501_v26  ;;  %v11596_v17 = vld [vmem:[%s18443_s10 + $0x100] sm:$0xf] }
0x194a   : > { %v11597_v6 = vor.u32 %v12758_v61, %v11596_v17 }
0x194b   : > { %v7517_v45 = vmul.f32 %v16653_v20, %v16653_v20 }
0x194c   : > { %7755 = vmatpush.bf16.msra.mxu1 %v11597_v6 }
0x194d   : > { %v7531_v49 = vsel %vm518_vm0, %v7517_v45, 0.0 }
0x194e   : > { %v7488_v56 = vpop.xlane.xlu1 %7487  ;;  %7532 = vadd.xlane.f32.xlu0 %v7531_v49 }
0x194f   : > { %v7502_v50 = vmul.f32 %v7488_v56, %v18545_v60 }
0x1951   : > { %v16659_v28 = vsub.f32 %v7466_v32, %v7502_v50  ;;  %v11598_v32 = vld [vmem:[%s18443_s10 + $0x140] sm:$0xf0] }
0x1952   : > { %v11601_v4 = vor.u32 %v12756_v25, %v11598_v32 }
0x1953   : > { %v7518_v13 = vmul.f32 %v16659_v28, %v16659_v28 }
0x1954   : > { %7784 = vmatpush.bf16.msra.mxu2 %v11601_v4 }
0x1955   : > { %v7534_v8 = vsel %vm518_vm0, %v7518_v13, 0.0 }
0x1956   : > { %v7491_v43 = vpop.xlane.xlu0 %7490  ;;  %7535 = vadd.xlane.f32.xlu2 %v7534_v8 }
0x1957   : > { %v7503_v1 = vmul.f32 %v7491_v43, %v18545_v60  ;;  %v16737_v43 = vld [vmem:[%s18439_s6 + $0x1] ss:$0 sm:$0xff] }
0x1959   : > { %v16665_v5 = vsub.f32 %v7467_v35, %v7503_v1  ;;  %v12757_v35 = vld [vmem:[%s18443_s10 + $0x10c] sm:$0xf] }
0x195a   : > { %v11609_v57 = vor.u32 %v12757_v35, %v11606_v63 }
0x195b   : > { %v7519_v42 = vmul.f32 %v16665_v5, %v16665_v5 }
0x195c   : > { %7842 = vmatpush.bf16.msra.mxu0 %v11609_v57 }
0x195d   : > { %v7537_v58 = vsel %vm518_vm0, %v7519_v42, 0.0 }
0x195e   : > { %7538 = vadd.xlane.f32.xlu1 %v7537_v58  ;;  %v16743_v58 = vld [vmem:[%s18440_s7 + $0x1] ss:$0 sm:$0xff] }
0x1976   : > { %v7524_v15 = vpop.xlane.xlu2 %7523 }
0x1977   : > { %v7546_v19 = vmul.f32 %v7524_v15, %v18545_v60 }
0x1979   : > { %v7554_v3 = vadd.f32 1e-05, %v7546_v19 }
0x197b   : > { %13401 = vrsqrt.f32 %v7554_v3  ;;  %vm7568_vm3 = vweird.f32 %v7554_v3 }
0x197e   : > { %v7527_v44 = vpop.xlane.xlu1 %7526 }
0x197f   : > { %v7547_v37 = vmul.f32 %v7527_v44, %v18545_v60  ;;  %v7494_v59 = vpop.xlane.xlu0 %7493 }
0x1980   : > { %v7504_v21 = vmul.f32 %v7494_v59, %v18545_v60 }
0x1981   : > { %v13402_v10 = vpop.eup %13401  ;;  %v7555_v22 = vadd.f32 1e-05, %v7547_v37 }
0x1982   : > { %v7563_v39 = vmul.f32 %v13402_v10, %v7554_v3  ;;  %v16722_v47 = vsub.f32 %v16635_v55, %v7504_v21  ;;  %vm7569_vm2 = vweird.f32 %v13402_v10 }
0x1983   : > { %13403 = vrsqrt.f32 %v7555_v22  ;;  %vm7570_vm4 = vmor %vm7568_vm3, %vm7569_vm2  ;;  %vm7578_vm11 = vweird.f32 %v7555_v22 }
0x1984   : > { %v7564_v23 = vmul.f32 %v13402_v10, %v7563_v39  ;;  %v7520_v14 = vmul.f32 %v16722_v47, %v16722_v47 }
0x1986   : > { %v7565_v2 = vmul.f32 0.5, %v7564_v23  ;;  %v7540_v51 = vsel %vm518_vm0, %v7520_v14, 0.0 }
0x1987   : > { %7541 = vadd.xlane.f32.xlu0 %v7540_v51  ;;  %v7497_v62 = vpop.xlane.xlu2 %7496 }
0x1988   : > { %v7566_v54 = vsub.f32 1.5, %v7565_v2  ;;  %v7505_v36 = vmul.f32 %v7497_v62, %v18545_v60 }
0x1989   : > { %v13404_v12 = vpop.eup %13403 }
0x198a   : > { %v7567_v27 = vmul.f32 %v13402_v10, %v7566_v54  ;;  %v7573_v26 = vmul.f32 %v13404_v12, %v7555_v22  ;;  %v16729_v55 = vsub.f32 %v16642_v9, %v7505_v36  ;;  %vm7579_vm10 = vweird.f32 %v13404_v12 }
0x198b   : > { %vm7580_vm12 = vmor %vm7578_vm11, %vm7579_vm10 }
0x198c   : > { %v7574_v45 = vmul.f32 %v13404_v12, %v7573_v26  ;;  %v7521_v49 = vmul.f32 %v16729_v55, %v16729_v55  ;;  %v7571_v56 = vsel %vm7570_vm4, %v13402_v10, %v7567_v27 }
0x198d   : > { %v7642_v9 = vmul.f32 %v7571_v56, %v16623_v41 }
0x198e   : > { %v7575_v50 = vmul.f32 0.5, %v7574_v45  ;;  %v7543_v13 = vsel %vm518_vm0, %v7521_v49, 0.0 }
0x198f   : > { %7544 = vadd.xlane.f32.xlu2 %v7543_v13  ;;  %v7653_v18 = vmul.f32 %v16737_v43, %v7642_v9 }
0x1990   : > { %v7576_v8 = vsub.f32 1.5, %v7575_v50 }
0x1991   : > { %v16749_v15 = vadd.f32 %v16743_v58, %v7653_v18 }
0x1992   : > { %v7577_v1 = vmul.f32 %v13404_v12, %v7576_v8 }
0x1994   : > { %v7581_v42 = vsel %vm7580_vm12, %v13404_v12, %v7577_v1 }
0x1995   : > { %v7643_v29 = vmul.f32 %v7581_v42, %v16629_v16 }
0x1997   : > { %v7654_v46 = vmul.f32 %v16737_v43, %v7643_v29 }
0x1999   : > { %v16752_v41 = vadd.f32 %v16743_v58, %v7654_v46 }
0x199b   : > { %v16756_v7 = vpack.c.bf16 %v16752_v41, %v16749_v15 }
0x199d   : > { %11626 = vmatmul.msk.bf16.vlgmr.msra.gmra.mxu1 %vm518_vm0, %v16756_v7  ;;  %11630 = vmatmul.msk.bf16.vlgmr.msra.gmra.mxu2 %vm518_vm0, %v16756_v7 }
0x199e   : > { %11634 = vmatmul.msk.bf16.vlgmr.msra.gmra.mxu3 %vm518_vm0, %v16756_v7  ;;  %11638 = vmatmul.msk.bf16.vlgmr.msra.gmra.mxu0 %vm518_vm0, %v16756_v7 }
0x19b9   : > { %v7530_v16 = vpop.xlane.xlu1 %7529 }
0x19ba   : > { %v7548_v11 = vmul.f32 %v7530_v16, %v18545_v60 }
0x19bc   : > { %v7556_v53 = vadd.f32 1e-05, %v7548_v11 }
0x19be   : > { %13405 = vrsqrt.f32 %v7556_v53  ;;  %vm7588_vm14 = vweird.f32 %v7556_v53 }
0x19c1   : > { %v7533_v24 = vpop.xlane.xlu0 %7532 }
0x19c2   : > { %v7549_v19 = vmul.f32 %v7533_v24, %v18545_v60 }
0x19c4   : > { %v13406_v31 = vpop.eup %13405  ;;  %v7557_v52 = vadd.f32 1e-05, %v7549_v19 }
0x19c5   : > { %v7583_v0 = vmul.f32 %v13406_v31, %v7556_v53  ;;  %vm7589_vm13 = vweird.f32 %v13406_v31 }
0x19c6   : > { %13407 = vrsqrt.f32 %v7557_v52  ;;  %vm7590_vm15 = vmor %vm7588_vm14, %vm7589_vm13  ;;  %vm7598_vm6 = vweird.f32 %v7557_v52 }
0x19c7   : > { %v7584_v40 = vmul.f32 %v13406_v31, %v7583_v0  ;;  %v12800_v0 = vld [vmem:[%s18443_s10 + $0x194] sm:$0xf] }
0x19c9   : > { %v7585_v33 = vmul.f32 0.5, %v7584_v40  ;;  %v7536_v3 = vpop.xlane.xlu2 %7535  ;;  %v11735_v40 = vld [vmem:[%s18443_s10 + $0x1d0] sm:$0xf0] }
0x19ca   : > { %v7550_v17 = vmul.f32 %v7536_v3, %v18545_v60  ;;  %v11741_v3 = vld [vmem:[%s18443_s10 + $0x198] sm:$0xf] }
0x19cb   : > { %v7586_v61 = vsub.f32 1.5, %v7585_v33  ;;  %v11738_v33 = vor.u32 %v12800_v0, %v11735_v40  ;;  %v12835_v0 = vld [vmem:[%s18445_s12 + $0x5f8] sm:$0xff] }
0x19cc   : > { %v13408_v6 = vpop.eup %13407  ;;  %v7558_v25 = vadd.f32 1e-05, %v7550_v17  ;;  %v12803_v17 = vld [vmem:[%s18443_s10 + $0x1d4] sm:$0xf0] }
0x19cd   : > { %v7587_v32 = vmul.f32 %v13406_v31, %v7586_v61  ;;  %v7593_v34 = vmul.f32 %v13408_v6, %v7557_v52  ;;  %vm7599_vm5 = vweird.f32 %v13408_v6  ;;  %v11733_v61 = vld [vmem:[%s18443_s10 + $0x190] sm:$0xf]  ;;  %8070 = vmatpush.bf16.msrb.mxu2 %v11738_v33 }
0x19ce   : > { %13409 = vrsqrt.f32 %v7558_v25  ;;  %vm7600_vm7 = vmor %vm7598_vm6, %vm7599_vm5  ;;  %vm7608_vm9 = vweird.f32 %v7558_v25 }
0x19cf   : > { %v7594_v4 = vmul.f32 %v13408_v6, %v7593_v34  ;;  %v7591_v38 = vsel %vm7590_vm15, %v13406_v31, %v7587_v32  ;;  %v12802_v32 = vld [vmem:[%s18443_s10 + $0x1cc] sm:$0xf0]  ;;  %v12801_v34 = vld [vmem:[%s18443_s10 + $0x19c] sm:$0xf] }
0x19d0   : > { %v7644_v37 = vmul.f32 %v7591_v38, %v16647_v30  ;;  %v11743_v38 = vld [vmem:[%s18443_s10 + $0x1d8] sm:$0xf0] }
0x19d1   : > { %v7595_v35 = vmul.f32 0.5, %v7594_v4  ;;  %v7539_v63 = vpop.xlane.xlu1 %7538  ;;  %v11734_v4 = vor.u32 %v12802_v32, %v11733_v61  ;;  %v12809_v32 = vld [vmem:[%s18445_s12 + $0x528] sm:$0xff] }
0x19d2   : > { %v7551_v48 = vmul.f32 %v7539_v63, %v18545_v60  ;;  %v7655_v23 = vmul.f32 %v16737_v43, %v7644_v37  ;;  %v11746_v63 = vor.u32 %v12801_v34, %v11743_v38  ;;  %v12796_v37 = vld [vmem:[%s18443_s10 + $0x114] sm:$0xf]  ;;  %v12833_v34 = vld [vmem:[%s18445_s12 + $0x5e8] sm:$0xff] }
0x19d3   : > { %v7596_v57 = vsub.f32 1.5, %v7595_v35  ;;  %8041 = vmatpush.bf16.msrb.mxu1 %v11734_v4  ;;  %v12818_v38 = vld [vmem:[%s18445_s12 + $0x570] sm:$0xff] }
0x19d4   : > { %v13410_v44 = vpop.eup %13409  ;;  %v7559_v59 = vadd.f32 1e-05, %v7551_v48  ;;  %v16775_v36 = vadd.f32 %v16743_v58, %v7655_v23  ;;  %8128 = vmatpush.bf16.msrb.mxu0 %v11746_v63  ;;  %v12799_v23 = vld [vmem:[%s18443_s10 + $0x154] sm:$0xf0] }
0x19d5   : > { %v7597_v21 = vmul.f32 %v13408_v6, %v7596_v57  ;;  %v7603_v10 = vmul.f32 %v13410_v44, %v7558_v25  ;;  %vm7609_vm8 = vweird.f32 %v13410_v44  ;;  %v11742_v25 = vor.u32 %v12803_v17, %v11741_v3  ;;  %v11717_v57 = vld [vmem:[%s18443_s10 + $0x110] sm:$0xf] }
0x19d6   : > { %13411 = vrsqrt.f32 %v7559_v59  ;;  %vm7610_vm2 = vmor %vm7608_vm9, %vm7609_vm8  ;;  %vm7618_vm4 = vweird.f32 %v7559_v59  ;;  %v12810_v3 = vld [vmem:[%s18445_s12 + $0x530] sm:$0xff] }
0x19d7   : > { %v7601_v22 = vsel %vm7600_vm7, %v13408_v6, %v7597_v21  ;;  %v7604_v39 = vmul.f32 %v13410_v44, %v7603_v10  ;;  %8099 = vmatpush.bf16.msrb.mxu3 %v11742_v25  ;;  %v12834_v17 = vld [vmem:[%s18445_s12 + $0x5f0] sm:$0xff]  ;;  %v12827_v25 = vld [vmem:[%s18445_s12 + $0x5b8] sm:$0xff] }
0x19d8   : > { %v7645_v14 = vmul.f32 %v7601_v22, %v16653_v20  ;;  %v11719_v22 = vld [vmem:[%s18443_s10 + $0x150] sm:$0xf0] }
0x19d9   : > { %v7605_v2 = vmul.f32 0.5, %v7604_v39  ;;  %v11725_v39 = vld [vmem:[%s18443_s10 + $0x118] sm:$0xf] }
0x19da   : > { %v7656_v51 = vmul.f32 %v16737_v43, %v7645_v14  ;;  %v11722_v14 = vor.u32 %v12796_v37, %v11719_v22  ;;  %v12817_v37 = vld [vmem:[%s18445_s12 + $0x568] sm:$0xff]  ;;  %v12831_v22 = vld [vmem:[%s18445_s12 + $0x5d8] sm:$0xff] }
0x19db   : > { %v7606_v62 = vsub.f32 1.5, %v7605_v2  ;;  %v11726_v2 = vor.u32 %v12799_v23, %v11725_v39  ;;  %v12816_v39 = vld [vmem:[%s18445_s12 + $0x560] sm:$0xff] }
0x19dc   : > { %v13412_v54 = vpop.eup %13411  ;;  %v16778_v30 = vadd.f32 %v16743_v58, %v7656_v51  ;;  %v12797_v51 = vld [vmem:[%s18443_s10 + $0x11c] sm:$0xf]  ;;  %8071 = vmatpush.bf16.msrb.mxu2 %v11722_v14  ;;  %v12824_v23 = vld [vmem:[%s18445_s12 + $0x5a0] sm:$0xff] }
0x19dd   : > { %v7607_v12 = vmul.f32 %v13410_v44, %v7606_v62  ;;  %v7613_v27 = vmul.f32 %v13412_v54, %v7559_v59  ;;  %vm7619_vm3 = vweird.f32 %v13412_v54  ;;  %v11727_v62 = vld [vmem:[%s18443_s10 + $0x158] sm:$0xf0]  ;;  %8100 = vmatpush.bf16.msrb.mxu3 %v11726_v2  ;;  %v12806_v2 = vld [vmem:[%s18445_s12 + $0x510] sm:$0xff] }
0x19de   : > { %v16782_v26 = vpack.c.bf16 %v16778_v30, %v16775_v36  ;;  %vm7620_vm10 = vmor %vm7618_vm4, %vm7619_vm3 }
0x19df   : > { %v7614_v20 = vmul.f32 %v13412_v54, %v7613_v27  ;;  %v7611_v45 = vsel %vm7610_vm2, %v13410_v44, %v7607_v12  ;;  %v12798_v44 = vld [vmem:[%s18443_s10 + $0x14c] sm:$0xf0]  ;;  %v11730_v12 = vor.u32 %v12797_v51, %v11727_v62 }
0x19e0   : > { %11627 = vmatmul.msk.bf16.gmra.mxu1 %vm518_vm0, %v16782_v26  ;;  %11631 = vmatmul.msk.bf16.gmra.mxu2 %vm518_vm0, %v16782_v26  ;;  %v7646_v50 = vmul.f32 %v7611_v45, %v16659_v28  ;;  %v11718_v10 = vor.u32 %v12798_v44, %v11717_v57  ;;  %v12832_v57 = vld [vmem:[%s18445_s12 + $0x5e0] sm:$0xff]  ;;  %v12830_v51 = vld [vmem:[%s18445_s12 + $0x5d0] sm:$0xff] }
0x19e1   : > { %v7615_v49 = vmul.f32 0.5, %v7614_v20  ;;  %11635 = vmatmul.msk.bf16.gmra.mxu3 %vm518_vm0, %v16782_v26  ;;  %11639 = vmatmul.msk.bf16.gmra.mxu0 %vm518_vm0, %v16782_v26 }
0x19e2   : > { %v7657_v9 = vmul.f32 %v16737_v43, %v7646_v50  ;;  %8042 = vmatpush.bf16.msrb.mxu1 %v11718_v10  ;;  %8129 = vmatpush.bf16.msrb.mxu0 %v11730_v12  ;;  %v12807_v10 = vld [vmem:[%s18445_s12 + $0x518] sm:$0xff] }
0x19e3   : > { %v7616_v56 = vsub.f32 1.5, %v7615_v49  ;;  %8513 = vmatpush.bf16.msra.mxu3 %v12827_v25  ;;  %v12823_v12 = vld [vmem:[%s18445_s12 + $0x598] sm:$0xff]  ;;  %v12812_v25 = vld [vmem:[%s18445_s12 + $0x540] sm:$0xff] }
0x19e4   : > { %v16797_v18 = vadd.f32 %v16743_v58, %v7657_v9 }
0x19e5   : > { %v7617_v13 = vmul.f32 %v13412_v54, %v7616_v56 }
0x19e6   : > { %18563 = vst [vmem:[#allocation18_spill] sm:$0xff] %v16797_v18  ;;  %8542 = vmatpush.bf16.msra.mxu0 %v12835_v0  ;;  %v12821_v0 = vld [vmem:[%s18445_s12 + $0x588] sm:$0xff] }
0x19e7   : > { %v7621_v8 = vsel %vm7620_vm10, %v13412_v54, %v7617_v13 }
0x19e8   : > { %v7647_v1 = vmul.f32 %v7621_v8, %v16665_v5 }
0x19ea   : > { %v7658_v42 = vmul.f32 %v16737_v43, %v7647_v1  ;;  %8543 = vmatpush.bf16.msra.mxu0 %v12834_v17 }
0x19ec   : > { %v16800_v29 = vadd.f32 %v16743_v58, %v7658_v42 }
0x19ee   : > { %18564 = vst [vmem:[#allocation26_spill] sm:$0xff] %v16800_v29  ;;  %v16804_v46 = vpack.c.bf16 %v16800_v29, %v16797_v18  ;;  %8544 = vmatpush.bf16.msra.mxu0 %v12833_v34 }
0x19f0   : > { %11628 = vmatmul.msk.bf16.gmra.mxu1 %vm518_vm0, %v16804_v46  ;;  %11632 = vmatmul.msk.bf16.gmra.mxu2 %vm518_vm0, %v16804_v46 }
0x19f1   : > { %11636 = vmatmul.msk.bf16.gmra.mxu3 %vm518_vm0, %v16804_v46  ;;  %11640 = vmatmul.msk.bf16.gmra.mxu0 %vm518_vm0, %v16804_v46 }
0x19f2   : > { %8545 = vmatpush.bf16.msra.mxu0 %v12832_v57 }
0x19f6   : > { %8546 = vmatpush.bf16.msra.mxu0 %v12831_v22 }
0x19fa   : > { %v7542_v28 = vpop.xlane.xlu0 %7541  ;;  %8547 = vmatpush.bf16.msra.mxu0 %v12830_v51 }
0x19fb   : > { %v7552_v5 = vmul.f32 %v7542_v28, %v18545_v60 }
0x19fd   : > { %v7560_v16 = vadd.f32 1e-05, %v7552_v5 }
0x19ff   : > { %13413 = vrsqrt.f32 %v7560_v16  ;;  %vm7628_vm12 = vweird.f32 %v7560_v16 }
0x1a02   : > { %v7545_v11 = vpop.xlane.xlu2 %7544 }
0x1a03   : > { %v7553_v53 = vmul.f32 %v7545_v11, %v18545_v60 }
0x1a05   : > { %v13414_v24 = vpop.eup %13413  ;;  %v7561_v19 = vadd.f32 1e-05, %v7553_v53 }
0x1a06   : > { %v7623_v31 = vmul.f32 %v13414_v24, %v7560_v16  ;;  %vm7629_vm11 = vweird.f32 %v13414_v24 }
0x1a07   : > { %13415 = vrsqrt.f32 %v7561_v19  ;;  %vm7630_vm13 = vmor %vm7628_vm12, %vm7629_vm11  ;;  %vm7638_vm15 = vweird.f32 %v7561_v19 }
0x1a08   : > { %v7624_v52 = vmul.f32 %v13414_v24, %v7623_v31 }
0x1a0a   : > { %v7625_v6 = vmul.f32 0.5, %v7624_v52  ;;  %v12811_v52 = vld [vmem:[%s18445_s12 + $0x538] sm:$0xff] }
0x1a0b   : > { %8455 = vmatpush.bf16.msra.mxu1 %v12811_v52  ;;  %v12813_v52 = vld [vmem:[%s18445_s12 + $0x548] sm:$0xff] }
0x1a0c   : > { %v7626_v35 = vsub.f32 1.5, %v7625_v6  ;;  %v12819_v6 = vld [vmem:[%s18445_s12 + $0x578] sm:$0xff] }
0x1a0d   : > { %v13416_v48 = vpop.eup %13415  ;;  %8484 = vmatpush.bf16.msra.mxu2 %v12819_v6 }
0x1a0e   : > { %v7627_v59 = vmul.f32 %v13414_v24, %v7626_v35  ;;  %v7633_v21 = vmul.f32 %v13416_v48, %v7561_v19  ;;  %vm7639_vm14 = vweird.f32 %v13416_v48  ;;  %v12826_v35 = vld [vmem:[%s18445_s12 + $0x5b0] sm:$0xff] }
0x1a0f   : > { %vm7640_vm5 = vmor %vm7638_vm15, %vm7639_vm14  ;;  %8456 = vmatpush.bf16.msra.mxu1 %v12810_v3  ;;  %8514 = vmatpush.bf16.msra.mxu3 %v12826_v35 }
0x1a10   : > { %v7634_v54 = vmul.f32 %v13416_v48, %v7633_v21  ;;  %v7631_v27 = vsel %vm7630_vm13, %v13414_v24, %v7627_v59  ;;  %v12825_v59 = vld [vmem:[%s18445_s12 + $0x5a8] sm:$0xff] }
0x1a11   : > { %v7648_v49 = vmul.f32 %v7631_v27, %v16722_v47  ;;  %8485 = vmatpush.bf16.msra.mxu2 %v12818_v38 }
0x1a12   : > { %v7635_v20 = vmul.f32 0.5, %v7634_v54  ;;  %v12815_v54 = vld [vmem:[%s18445_s12 + $0x558] sm:$0xff] }
0x1a13   : > { %v7659_v13 = vmul.f32 %v16737_v43, %v7648_v49  ;;  %8457 = vmatpush.bf16.msra.mxu1 %v12809_v32  ;;  %8515 = vmatpush.bf16.msra.mxu3 %v12825_v59  ;;  %v12820_v32 = vld [vmem:[%s18445_s12 + $0x580] sm:$0xff]  ;;  %v11714_v59 = vld [vmem:[%s18444_s11 + $0x14] sm:$0xf] }
0x1a14   : > { %v7636_v45 = vsub.f32 1.5, %v7635_v20  ;;  %v12805_v20 = vld [vmem:[%s18445_s12 + $0x508] sm:$0xff] }
0x1a15   : > { %v16869_v1 = vadd.f32 %v16743_v58, %v7659_v13  ;;  %8486 = vmatpush.bf16.msra.mxu2 %v12817_v37  ;;  %v12804_v13 = vld [vmem:[%s18445_s12 + $0x500] sm:$0xff] }
0x1a16   : > { %v7637_v56 = vmul.f32 %v13416_v48, %v7636_v45  ;;  %v12829_v45 = vld [vmem:[%s18445_s12 + $0x5c8] sm:$0xff] }
0x1a17   : > { %18565 = vst [vmem:[#allocation27_spill] sm:$0xff] %v16869_v1  ;;  %8516 = vmatpush.bf16.msra.mxu3 %v12824_v23  ;;  %8548 = vmatpush.bf16.msra.mxu0 %v12829_v45  ;;  %v17083_v23 = vperm.slane %v11714_v59, 3  ;;  %v17087_v45 = vperm.slane %v11714_v59, 1 }
0x1a18   : > { %v7641_v50 = vsel %vm7640_vm5, %v13416_v48, %v7637_v56  ;;  %v12808_v48 = vld [vmem:[%s18445_s12 + $0x520] sm:$0xff]  ;;  %v12814_v56 = vld [vmem:[%s18445_s12 + $0x550] sm:$0xff] }
0x1a19   : > { %v7649_v8 = vmul.f32 %v7641_v50, %v16729_v55  ;;  %8458 = vmatpush.bf16.msra.mxu1 %v12808_v48  ;;  %8487 = vmatpush.bf16.msra.mxu2 %v12816_v39  ;;  %v12822_v50 = vld [vmem:[%s18445_s12 + $0x590] sm:$0xff]  ;;  %v17081_v39 = vperm.slane %v11714_v59, 0 }
0x1a1a   : > { %v16918_v47 = vpop.f32.mrf.mxu1 }
0x1a1b   : > { %v7660_v9 = vmul.f32 %v16737_v43, %v7649_v8  ;;  %v16920_v55 = vpop.f32.mrf.mxu0  ;;  %8517 = vmatpush.bf16.msra.mxu3 %v12823_v12  ;;  %v12828_v8 = vld [vmem:[%s18445_s12 + $0x5c0] sm:$0xff] }
0x1a1c   : > { %8549 = vmatpush.bf16.msra.mxu0 %v12828_v8 }
0x1a1d   : > { %v16872_v42 = vadd.f32 %v16743_v58, %v7660_v9  ;;  %8459 = vmatpush.bf16.msra.mxu1 %v12807_v10  ;;  %8488 = vmatpush.bf16.msra.mxu2 %v12815_v54 }
0x1a1f   : > { %18566 = vst [vmem:[#allocation19_spill] sm:$0xff] %v16872_v42  ;;  %v16876_v28 = vpack.c.bf16 %v16872_v42, %v16869_v1  ;;  %8518 = vmatpush.bf16.msra.mxu3 %v12822_v50 }
0x1a20   : > { %v16922_v43 = vpop.f32.mrf.mxu2 }
0x1a21   : > { %11629 = vmatmul.msk.bf16.gmra.mxu1 %vm518_vm0, %v16876_v28  ;;  %11633 = vmatmul.msk.bf16.gmra.mxu2 %vm518_vm0, %v16876_v28  ;;  %v16924_v58 = vpop.f32.mrf.mxu3 }
0x1a22   : > { %11637 = vmatmul.msk.bf16.gmra.mxu3 %vm518_vm0, %v16876_v28  ;;  %11641 = vmatmul.msk.bf16.gmra.mxu0 %vm518_vm0, %v16876_v28  ;;  %v16926_v5 = vpop.f32.mrf.mxu1 }
0x1a23   : > { %v16928_v16 = vpop.f32.mrf.mxu0  ;;  %8460 = vmatpush.bf16.msra.mxu1 %v12806_v2  ;;  %8489 = vmatpush.bf16.msra.mxu2 %v12814_v56 }
0x1a24   : > { %8519 = vmatpush.bf16.msra.mxu3 %v12821_v0 }
0x1a27   : > { %8461 = vmatpush.bf16.msra.mxu1 %v12805_v20  ;;  %8490 = vmatpush.bf16.msra.mxu2 %v12813_v52 }
0x1a28   : > { %v16930_v11 = vpop.f32.mrf.mxu2  ;;  %8520 = vmatpush.bf16.msra.mxu3 %v12820_v32 }
0x1a29   : > { %v16932_v53 = vpop.f32.mrf.mxu3 }
0x1a2b   : > { %8462 = vmatpush.bf16.msra.mxu1 %v12804_v13  ;;  %8491 = vmatpush.bf16.msra.mxu2 %v12812_v25  ;;  %v17090_v13 = vperm.slane %v11714_v59, 2 }
0x1a31   : > { %11747 = vmatmul.msk.bf16.vlgmr.msrb.gmra.mxu1 %vm518_vm0, %v16756_v7  ;;  %11751 = vmatmul.msk.bf16.vlgmr.msrb.gmra.mxu2 %vm518_vm0, %v16756_v7 }
0x1a32   : > { %11755 = vmatmul.msk.bf16.vlgmr.msrb.gmra.mxu3 %vm518_vm0, %v16756_v7  ;;  %11759 = vmatmul.msk.bf16.vlgmr.msrb.gmra.mxu0 %vm518_vm0, %v16756_v7 }
0x1a41   : > { %11748 = vmatmul.msk.bf16.gmra.mxu1 %vm518_vm0, %v16782_v26  ;;  %11752 = vmatmul.msk.bf16.gmra.mxu2 %vm518_vm0, %v16782_v26 }
0x1a42   : > { %11756 = vmatmul.msk.bf16.gmra.mxu3 %vm518_vm0, %v16782_v26  ;;  %11760 = vmatmul.msk.bf16.gmra.mxu0 %vm518_vm0, %v16782_v26 }
0x1a51   : > { %11749 = vmatmul.msk.bf16.gmra.mxu1 %vm518_vm0, %v16804_v46  ;;  %11753 = vmatmul.msk.bf16.gmra.mxu2 %vm518_vm0, %v16804_v46 }
0x1a52   : > { %11757 = vmatmul.msk.bf16.gmra.mxu3 %vm518_vm0, %v16804_v46  ;;  %11761 = vmatmul.msk.bf16.gmra.mxu0 %vm518_vm0, %v16804_v46 }
0x1a5d   : > { %v16934_v24 = vpop.f32.mrf.mxu1 }
0x1a5e   : > { %v16936_v19 = vpop.f32.mrf.mxu0 }
0x1a61   : > { %11750 = vmatmul.msk.bf16.gmra.mxu1 %vm518_vm0, %v16876_v28  ;;  %11754 = vmatmul.msk.bf16.gmra.mxu2 %vm518_vm0, %v16876_v28 }
0x1a62   : > { %11758 = vmatmul.msk.bf16.gmra.mxu3 %vm518_vm0, %v16876_v28  ;;  %11762 = vmatmul.msk.bf16.gmra.mxu0 %vm518_vm0, %v16876_v28 }
0x1a63   : > { %v16938_v31 = vpop.f32.mrf.mxu2 }
0x1a64   : > { %v16946_v40 = vpop.f32.mrf.mxu3 }
0x1a65   : > { %v16948_v33 = vpop.f32.mrf.mxu1 }
0x1a66   : > { %v16956_v61 = vpop.f32.mrf.mxu0 }
0x1a6b   : > { %v16970_v4 = vpop.f32.mrf.mxu2 }
0x1a6c   : > { %v16978_v63 = vpop.f32.mrf.mxu3 }
0x1a6d   : > { %v16986_v44 = vpop.f32.mrf.mxu1 }
0x1a6e   : > { %v16994_v21 = vpop.f32.mrf.mxu0 }
0x1a73   : > { %v17008_v14 = vpop.f32.mrf.mxu2 }
0x1a74   : > { %v17016_v62 = vpop.f32.mrf.mxu3 }
0x1a75   : > { %v17024_v27 = vpop.f32.mrf.mxu1 }
0x1a76   : > { %v17032_v49 = vpop.f32.mrf.mxu0 }
0x1a7b   : > { %v17046_v9 = vpop.f32.mrf.mxu2 }
0x1a7c   : > { %v17054_v3 = vpop.f32.mrf.mxu3 }
0x1a9e   : > { %v17056_v17 = vpop.f32.mrf.mxu1 }
0x1a9f   : > { %v17058_v6 = vpop.f32.mrf.mxu0 }
0x1aa4   : > { %v17066_v34 = vpop.f32.mrf.mxu2 }
0x1aa5   : > { %v17068_v38 = vpop.f32.mrf.mxu3 }
0x1aa6   : > { %v17070_v35 = vpop.f32.mrf.mxu1 }
0x1aa7   : > { %v17072_v48 = vpop.f32.mrf.mxu0 }
0x1aac   : > { %v17074_v57 = vpop.f32.mrf.mxu2 }
0x1aad   : > { %v17076_v37 = vpop.f32.mrf.mxu3 }
0x1aae   : > { %v8044_v10 = vpop.f32.mrf.mxu1 }
0x1aaf   : > { %v8131_v22 = vpop.f32.mrf.mxu0  ;;  %v8045_v51 = vadd.f32 %v8044_v10, %v17081_v39 }
0x1ab0   : > { %v8132_v12 = vadd.f32 %v8131_v22, %v17083_v23 }
0x1ab1   : > { %v8151_v52 = vmax.f32 %v8045_v51, 0.0  ;;  %v12771_v51 = vld [vmem:[%s18445_s12 + $0x438] sm:$0xff] }
0x1ab2   : > { %v8154_v25 = vmax.f32 %v8132_v12, 0.0  ;;  %8763 = vmatpush.bf16.msrb.mxu1 %v12771_v51  ;;  %v12793_v51 = vld [vmem:[%s18445_s12 + $0x4e8] sm:$0xff] }
0x1ab4   : > { %v8073_v2 = vpop.f32.mrf.mxu2 }
0x1ab5   : > { %v8102_v54 = vpop.f32.mrf.mxu3  ;;  %v8074_v60 = vadd.f32 %v8073_v2, %v17087_v45  ;;  %v12795_v2 = vld [vmem:[%s18445_s12 + $0x4f8] sm:$0xff] }
0x1ab6   : > { %v8046_v20 = vpop.f32.mrf.mxu1  ;;  %v8103_v42 = vadd.f32 %v8102_v54, %v17090_v13  ;;  %8850 = vmatpush.bf16.msrb.mxu0 %v12795_v2 }
0x1ab7   : > { %v8047_v56 = vadd.f32 %v8046_v20, %v17081_v39  ;;  %v8133_v50 = vpop.f32.mrf.mxu0  ;;  %v8152_v12 = vmax.f32 %v8074_v60, 0.0  ;;  %v12779_v60 = vld [vmem:[%s18445_s12 + $0x478] sm:$0xff] }
0x1ab8   : > { %v8134_v8 = vadd.f32 %v8133_v50, %v17083_v23  ;;  %v8153_v50 = vmax.f32 %v8103_v42, 0.0  ;;  %8792 = vmatpush.bf16.msrb.mxu2 %v12779_v60 }
0x1ab9   : > { %v8155_v0 = vmax.f32 %v8047_v56, 0.0 }
0x1aba   : > { %v8158_v32 = vmax.f32 %v8134_v8, 0.0 }
0x1abb   : > { %v8183_v10 = vpack.c.bf16 %v8155_v0, %v8151_v52  ;;  %v12794_v0 = vld [vmem:[%s18445_s12 + $0x4f0] sm:$0xff] }
0x1abc   : > { %v8186_v22 = vpack.c.bf16 %v8158_v32, %v8154_v25  ;;  %v8075_v1 = vpop.f32.mrf.mxu2  ;;  %8851 = vmatpush.bf16.msrb.mxu0 %v12794_v0  ;;  %v12792_v0 = vld [vmem:[%s18445_s12 + $0x4e0] sm:$0xff] }
0x1abd   : > { %v8076_v29 = vadd.f32 %v8075_v1, %v17087_v45  ;;  %v8104_v18 = vpop.f32.mrf.mxu3  ;;  %8463 = vmatmul.bf16.vlgmr.msra.gmra.mxu1 %v8183_v10 }
0x1abe   : > { %v8105_v59 = vadd.f32 %v8104_v18, %v17090_v13  ;;  %8550 = vmatmul.bf16.vlgmr.msra.gmra.mxu0 %v8186_v22  ;;  %v8049_v20 = vpop.f32.mrf.mxu1  ;;  %v12770_v18 = vld [vmem:[%s18445_s12 + $0x430] sm:$0xff] }
0x1abf   : > { %v8156_v54 = vmax.f32 %v8076_v29, 0.0  ;;  %v8136_v56 = vpop.f32.mrf.mxu0  ;;  %8764 = vmatpush.bf16.msrb.mxu1 %v12770_v18  ;;  %v12787_v29 = vld [vmem:[%s18445_s12 + $0x4b8] sm:$0xff]  ;;  %v8050_v42 = vadd.f32 %v8049_v20, %v17081_v39  ;;  %v12768_v18 = vld [vmem:[%s18445_s12 + $0x420] sm:$0xff] }
0x1ac0   : > { %v8157_v8 = vmax.f32 %v8105_v59, 0.0  ;;  %v8137_v10 = vadd.f32 %v8136_v56, %v17083_v23  ;;  %8821 = vmatpush.bf16.msrb.mxu3 %v12787_v29  ;;  %v12769_v59 = vld [vmem:[%s18445_s12 + $0x428] sm:$0xff]  ;;  %v12786_v56 = vld [vmem:[%s18445_s12 + $0x4b0] sm:$0xff]  ;;  %8852 = vmatpush.bf16.msrb.mxu0 %v12793_v51 }
0x1ac1   : > { %v8184_v1 = vpack.c.bf16 %v8156_v54, %v8152_v12  ;;  %v12778_v54 = vld [vmem:[%s18445_s12 + $0x470] sm:$0xff]  ;;  %v12785_v51 = vld [vmem:[%s18445_s12 + $0x4a8] sm:$0xff] }
0x1ac2   : > { %v8185_v52 = vpack.c.bf16 %v8157_v8, %v8153_v50  ;;  %v8159_v50 = vmax.f32 %v8050_v42, 0.0  ;;  %8793 = vmatpush.bf16.msrb.mxu2 %v12778_v54  ;;  %v12791_v54 = vld [vmem:[%s18445_s12 + $0x4d8] sm:$0xff] }
0x1ac3   : > { %8492 = vmatmul.bf16.vlgmr.msra.gmra.mxu2 %v8184_v1  ;;  %8765 = vmatpush.bf16.msrb.mxu1 %v12769_v59  ;;  %v8162_v1 = vmax.f32 %v8137_v10, 0.0  ;;  %v12777_v10 = vld [vmem:[%s18445_s12 + $0x468] sm:$0xff] }
0x1ac4   : > { %8521 = vmatmul.bf16.vlgmr.msra.gmra.mxu3 %v8185_v52  ;;  %v8078_v25 = vpop.f32.mrf.mxu2  ;;  %8853 = vmatpush.bf16.msrb.mxu0 %v12792_v0  ;;  %v12784_v0 = vld [vmem:[%s18445_s12 + $0x4a0] sm:$0xff] }
0x1ac5   : > { %v8107_v32 = vpop.f32.mrf.mxu3  ;;  %8822 = vmatpush.bf16.msrb.mxu3 %v12786_v56  ;;  %v8079_v60 = vadd.f32 %v8078_v25, %v17087_v45 }
0x1ac6   : > { %v8051_v22 = vpop.f32.mrf.mxu1  ;;  %8794 = vmatpush.bf16.msrb.mxu2 %v12777_v10  ;;  %v12775_v10 = vld [vmem:[%s18445_s12 + $0x458] sm:$0xff] }
0x1ac7   : > { %v8052_v2 = vadd.f32 %v8051_v22, %v17081_v39  ;;  %v8138_v12 = vpop.f32.mrf.mxu0  ;;  %v8108_v22 = vadd.f32 %v8107_v32, %v17090_v13  ;;  %8766 = vmatpush.bf16.msrb.mxu1 %v12768_v18  ;;  %v8160_v56 = vmax.f32 %v8079_v60, 0.0  ;;  %v12776_v18 = vld [vmem:[%s18445_s12 + $0x460] sm:$0xff]  ;;  %v12790_v60 = vld [vmem:[%s18445_s12 + $0x4d0] sm:$0xff] }
0x1ac8   : > { %v8139_v20 = vadd.f32 %v8138_v12, %v17083_v23  ;;  %8854 = vmatpush.bf16.msrb.mxu0 %v12791_v54 }
0x1ac9   : > { %v8163_v8 = vmax.f32 %v8052_v2, 0.0  ;;  %8823 = vmatpush.bf16.msrb.mxu3 %v12785_v51  ;;  %v12783_v51 = vld [vmem:[%s18445_s12 + $0x498] sm:$0xff] }
0x1aca   : > { %v8166_v52 = vmax.f32 %v8139_v20, 0.0  ;;  %v12767_v20 = vld [vmem:[%s18445_s12 + $0x418] sm:$0xff]  ;;  %8795 = vmatpush.bf16.msrb.mxu2 %v12776_v18 }
0x1acb   : > { %v8187_v29 = vpack.c.bf16 %v8163_v8, %v8159_v50  ;;  %8767 = vmatpush.bf16.msrb.mxu1 %v12767_v20  ;;  %v12789_v20 = vld [vmem:[%s18445_s12 + $0x4c8] sm:$0xff] }
0x1acc   : > { %v8080_v42 = vpop.f32.mrf.mxu2  ;;  %v8190_v59 = vpack.c.bf16 %v8166_v52, %v8162_v1  ;;  %v8161_v1 = vmax.f32 %v8108_v22, 0.0  ;;  %8855 = vmatpush.bf16.msrb.mxu0 %v12790_v60 }
0x1acd   : > { %v8081_v2 = vadd.f32 %v8080_v42, %v17087_v45  ;;  %v8109_v12 = vpop.f32.mrf.mxu3  ;;  %8468 = vmatmul.bf16.gmra.mxu1 %v8187_v29  ;;  %v12766_v29 = vld [vmem:[%s18445_s12 + $0x410] sm:$0xff]  ;;  %8824 = vmatpush.bf16.msrb.mxu3 %v12784_v0 }
0x1ace   : > { %v8110_v25 = vadd.f32 %v8109_v12, %v17090_v13  ;;  %8555 = vmatmul.bf16.gmra.mxu0 %v8190_v59  ;;  %v8054_v32 = vpop.f32.mrf.mxu1  ;;  %8796 = vmatpush.bf16.msrb.mxu2 %v12775_v10  ;;  %v12773_v10 = vld [vmem:[%s18445_s12 + $0x448] sm:$0xff] }
0x1acf   : > { %v8164_v50 = vmax.f32 %v8081_v2, 0.0  ;;  %v8141_v8 = vpop.f32.mrf.mxu0  ;;  %8768 = vmatpush.bf16.msrb.mxu1 %v12766_v29  ;;  %v12765_v2 = vld [vmem:[%s18445_s12 + $0x408] sm:$0xff]  ;;  %v8055_v12 = vadd.f32 %v8054_v32, %v17081_v39  ;;  %v12782_v32 = vld [vmem:[%s18445_s12 + $0x490] sm:$0xff] }
0x1ad0   : > { %v8165_v52 = vmax.f32 %v8110_v25, 0.0  ;;  %v8142_v54 = vadd.f32 %v8141_v8, %v17083_v23  ;;  %v12764_v8 = vld [vmem:[%s18445_s12 + $0x400] sm:$0xff]  ;;  %8856 = vmatpush.bf16.msrb.mxu0 %v12789_v20 }
0x1ad1   : > { %v8188_v42 = vpack.c.bf16 %v8164_v50, %v8160_v56  ;;  %v12774_v50 = vld [vmem:[%s18445_s12 + $0x450] sm:$0xff]  ;;  %8825 = vmatpush.bf16.msrb.mxu3 %v12783_v51  ;;  %v8167_v0 = vmax.f32 %v8055_v12, 0.0  ;;  %v12781_v12 = vld [vmem:[%s18445_s12 + $0x488] sm:$0xff] }
0x1ad2   : > { %v8189_v22 = vpack.c.bf16 %v8165_v52, %v8161_v1  ;;  %v8170_v60 = vmax.f32 %v8142_v54, 0.0  ;;  %8797 = vmatpush.bf16.msrb.mxu2 %v12774_v50 }
0x1ad3   : > { %8497 = vmatmul.bf16.gmra.mxu2 %v8188_v42  ;;  %8769 = vmatpush.bf16.msrb.mxu1 %v12765_v2  ;;  %v12788_v42 = vld [vmem:[%s18445_s12 + $0x4c0] sm:$0xff] }
0x1ad4   : > { %8526 = vmatmul.bf16.gmra.mxu3 %v8189_v22  ;;  %v8083_v59 = vpop.f32.mrf.mxu2  ;;  %8857 = vmatpush.bf16.msrb.mxu0 %v12788_v42 }
0x1ad5   : > { %v8112_v25 = vpop.f32.mrf.mxu3  ;;  %v8084_v51 = vadd.f32 %v8083_v59, %v17087_v45  ;;  %8826 = vmatpush.bf16.msrb.mxu3 %v12782_v32  ;;  %v12772_v32 = vld [vmem:[%s18445_s12 + $0x440] sm:$0xff] }
0x1ad6   : > { %v8056_v56 = vpop.f32.mrf.mxu1  ;;  %v8113_v20 = vadd.f32 %v8112_v25, %v17090_v13  ;;  %8798 = vmatpush.bf16.msrb.mxu2 %v12773_v10 }
0x1ad7   : > { %v8057_v1 = vadd.f32 %v8056_v56, %v17081_v39  ;;  %v8143_v52 = vpop.f32.mrf.mxu0  ;;  %8770 = vmatpush.bf16.msrb.mxu1 %v12764_v8  ;;  %v12780_v8 = vld [vmem:[%s18445_s12 + $0x480] sm:$0xff] }
0x1ad8   : > { %v8144_v18 = vadd.f32 %v8143_v52, %v17083_v23 }
0x1ad9   : > { %v8171_v29 = vmax.f32 %v8057_v1, 0.0  ;;  %8827 = vmatpush.bf16.msrb.mxu3 %v12781_v12 }
0x1ada   : > { %v8174_v22 = vmax.f32 %v8144_v18, 0.0  ;;  %v8168_v18 = vmax.f32 %v8084_v51, 0.0  ;;  %8799 = vmatpush.bf16.msrb.mxu2 %v12772_v32 }
0x1adb   : > { %v8191_v2 = vpack.c.bf16 %v8171_v29, %v8167_v0  ;;  %v8169_v29 = vmax.f32 %v8113_v20, 0.0 }
0x1adc   : > { %v8085_v56 = vpop.f32.mrf.mxu2  ;;  %v8194_v1 = vpack.c.bf16 %v8174_v22, %v8170_v60 }
0x1add   : > { %v8086_v54 = vadd.f32 %v8085_v56, %v17087_v45  ;;  %v8114_v50 = vpop.f32.mrf.mxu3  ;;  %8473 = vmatmul.bf16.gmra.mxu1 %v8191_v2  ;;  %8828 = vmatpush.bf16.msrb.mxu3 %v12780_v8 }
0x1ade   : > { %v8115_v52 = vadd.f32 %v8114_v50, %v17090_v13  ;;  %8560 = vmatmul.bf16.gmra.mxu0 %v8194_v1  ;;  %v8059_v59 = vpop.f32.mrf.mxu1 }
0x1adf   : > { %v8172_v0 = vmax.f32 %v8086_v54, 0.0  ;;  %v8146_v25 = vpop.f32.mrf.mxu0  ;;  %v8060_v2 = vadd.f32 %v8059_v59, %v17081_v39 }
0x1ae0   : > { %v8173_v60 = vmax.f32 %v8115_v52, 0.0  ;;  %v8147_v51 = vadd.f32 %v8146_v25, %v17083_v23 }
0x1ae1   : > { %v8192_v42 = vpack.c.bf16 %v8172_v0, %v8168_v18  ;;  %v8175_v20 = vmax.f32 %v8060_v2, 0.0 }
0x1ae2   : > { %v8193_v22 = vpack.c.bf16 %v8173_v60, %v8169_v29  ;;  %v8178_v18 = vmax.f32 %v8147_v51, 0.0 }
0x1ae3   : > { %8502 = vmatmul.bf16.gmra.mxu2 %v8192_v42 }
0x1ae4   : > { %8531 = vmatmul.bf16.gmra.mxu3 %v8193_v22  ;;  %v8088_v10 = vpop.f32.mrf.mxu2 }
0x1ae5   : > { %v8117_v56 = vpop.f32.mrf.mxu3  ;;  %v8089_v32 = vadd.f32 %v8088_v10, %v17087_v45 }
0x1ae6   : > { %v8061_v1 = vpop.f32.mrf.mxu1  ;;  %v8118_v29 = vadd.f32 %v8117_v56, %v17090_v13 }
0x1ae7   : > { %v8062_v12 = vadd.f32 %v8061_v1, %v17081_v39  ;;  %v8148_v54 = vpop.f32.mrf.mxu0  ;;  %v11593_v39 = vld [vmem:[%s18444_s11 + $0x10] sm:$0xf]  ;;  %v8176_v22 = vmax.f32 %v8089_v32, 0.0 }
0x1ae8   : > { %v8149_v50 = vadd.f32 %v8148_v54, %v17083_v23  ;;  %v8177_v51 = vmax.f32 %v8118_v29, 0.0  ;;  %v17220_v1 = vperm.slane %v11593_v39, 0 }
0x1ae9   : > { %v8179_v52 = vmax.f32 %v8062_v12, 0.0  ;;  %v17222_v12 = vperm.slane %v11593_v39, 3 }
0x1aea   : > { %v8182_v0 = vmax.f32 %v8149_v50, 0.0 }
0x1aeb   : > { %v8195_v8 = vpack.c.bf16 %v8179_v52, %v8175_v20  ;;  %v7847_v50 = vadd.f32 %v16928_v16, %v17222_v12  ;;  %v7845_v20 = vadd.f32 %v16920_v55, %v17222_v12  ;;  %v17232_v52 = vperm.slane %v11593_v39, 1 }
0x1aec   : > { %v8090_v60 = vpop.f32.mrf.mxu2  ;;  %v8198_v59 = vpack.c.bf16 %v8182_v0, %v8178_v18  ;;  %v17234_v0 = vperm.slane %v11593_v39, 2 }
0x1aed   : > { %v8091_v42 = vadd.f32 %v8090_v60, %v17087_v45  ;;  %v8119_v25 = vpop.f32.mrf.mxu3  ;;  %8478 = vmatmul.bf16.gmra.mxu1 %v8195_v8  ;;  %v7760_v45 = vadd.f32 %v16926_v5, %v17220_v1  ;;  %v7871_v32 = vmax.f32 %v7847_v50, 0.0  ;;  %v7789_v5 = vadd.f32 %v16930_v11, %v17232_v52 }
0x1aee   : > { %v8120_v23 = vadd.f32 %v8119_v25, %v17090_v13  ;;  %8565 = vmatmul.bf16.gmra.mxu0 %v8198_v59  ;;  %v7758_v13 = vadd.f32 %v16918_v47, %v17220_v1  ;;  %v7867_v29 = vmax.f32 %v7845_v20, 0.0  ;;  %v7818_v16 = vadd.f32 %v16932_v53, %v17234_v0 }
0x1aef   : > { %v8180_v2 = vmax.f32 %v8091_v42, 0.0  ;;  %v7868_v18 = vmax.f32 %v7760_v45, 0.0  ;;  %v7787_v47 = vadd.f32 %v16922_v43, %v17232_v52  ;;  %v7816_v55 = vadd.f32 %v16924_v58, %v17234_v0 }
0x1af0   : > { %v8181_v10 = vmax.f32 %v8120_v23, 0.0  ;;  %v7864_v8 = vmax.f32 %v7758_v13, 0.0  ;;  %v7899_v59 = vpack.c.bf16 %v7871_v32, %v7867_v29  ;;  %v7869_v42 = vmax.f32 %v7789_v5, 0.0  ;;  %v12842_v29 = vld [vmem:[%s18443_s10 + $0x1dc] sm:$0xf0] }
0x1af1   : > { %v8196_v56 = vpack.c.bf16 %v8180_v2, %v8176_v22  ;;  %v7870_v25 = vmax.f32 %v7818_v16, 0.0  ;;  %v7865_v39 = vmax.f32 %v7787_v47, 0.0  ;;  %v7866_v23 = vmax.f32 %v7816_v55, 0.0  ;;  %v12112_v47 = vld [vmem:[%s18443_s10 + $0x1e0] sm:$0xf0] }
0x1af2   : > { %v8197_v54 = vpack.c.bf16 %v8181_v10, %v8177_v51  ;;  %v7896_v60 = vpack.c.bf16 %v7868_v18, %v7864_v8  ;;  %v7765_v2 = vadd.f32 %v16948_v33, %v17220_v1  ;;  %v7852_v43 = vadd.f32 %v16956_v61, %v17222_v12 }
0x1af3   : > { %8507 = vmatmul.bf16.gmra.mxu2 %v8196_v56  ;;  %v7897_v22 = vpack.c.bf16 %v7869_v42, %v7865_v39  ;;  %v7898_v11 = vpack.c.bf16 %v7870_v25, %v7866_v23  ;;  %v7763_v58 = vadd.f32 %v16934_v24, %v17220_v1  ;;  %v7850_v53 = vadd.f32 %v16936_v19, %v17222_v12 }
0x1af4   : > { %8536 = vmatmul.bf16.gmra.mxu3 %v8197_v54  ;;  %v7876_v51 = vmax.f32 %v7765_v2, 0.0  ;;  %v7879_v10 = vmax.f32 %v7852_v43, 0.0  ;;  %v7794_v54 = vadd.f32 %v16970_v4, %v17232_v52  ;;  %v7823_v33 = vadd.f32 %v16978_v63, %v17234_v0  ;;  %v12837_v2 = vld [vmem:[%s18443_s10 + $0x12c] sm:$0xf] }
0x1af5   : > { %v7872_v56 = vmax.f32 %v7763_v58, 0.0  ;;  %v7875_v45 = vmax.f32 %v7850_v53, 0.0  ;;  %v7792_v61 = vadd.f32 %v16938_v31, %v17232_v52  ;;  %v7821_v24 = vadd.f32 %v16946_v40, %v17234_v0  ;;  %v12110_v40 = vld [vmem:[%s18443_s10 + $0x1a0] sm:$0xf] }
0x1af6   : > { %v7877_v20 = vmax.f32 %v7794_v54, 0.0  ;;  %v7878_v19 = vmax.f32 %v7823_v33, 0.0  ;;  %v7770_v5 = vadd.f32 %v17024_v27, %v17220_v1  ;;  %v7768_v31 = vadd.f32 %v16986_v44, %v17220_v1  ;;  %v12841_v27 = vld [vmem:[%s18443_s10 + $0x1ac] sm:$0xf] }
0x1af7   : > { %v7900_v50 = vpack.c.bf16 %v7876_v51, %v7872_v56  ;;  %v7903_v13 = vpack.c.bf16 %v7879_v10, %v7875_v45  ;;  %v7873_v18 = vmax.f32 %v7792_v61, 0.0  ;;  %v7874_v32 = vmax.f32 %v7821_v24, 0.0  ;;  %v12120_v44 = vld [vmem:[%s18443_s10 + $0x1e8] sm:$0xf0]  ;;  %v12118_v10 = vld [vmem:[%s18443_s10 + $0x1a8] sm:$0xf] }
0x1af8   : > { %v7857_v63 = vadd.f32 %v17032_v49, %v17222_v12  ;;  %v12111_v16 = vor.u32 %v12842_v29, %v12110_v40  ;;  %v12840_v49 = vld [vmem:[%s18443_s10 + $0x1a4] sm:$0xf]  ;;  %v12123_v55 = vor.u32 %v12841_v27, %v12120_v44  ;;  %v7884_v42 = vmax.f32 %v7770_v5, 0.0  ;;  %v12843_v56 = vld [vmem:[%s18443_s10 + $0x1e4] sm:$0xf0] }
0x1af9   : > { %v7901_v8 = vpack.c.bf16 %v7877_v20, %v7873_v18  ;;  %v7902_v4 = vpack.c.bf16 %v7878_v19, %v7874_v32  ;;  %v7880_v25 = vmax.f32 %v7768_v31, 0.0  ;;  %v7799_v23 = vadd.f32 %v17046_v9, %v17232_v52  ;;  %v12104_v9 = vld [vmem:[%s18443_s10 + $0x168] sm:$0xf0]  ;;  %v12096_v24 = vld [vmem:[%s18443_s10 + $0x160] sm:$0xf0] }
0x1afa   : > { %8943 = vmatpush.bf16.msra.mxu1 %v12111_v16  ;;  %v7887_v39 = vmax.f32 %v7857_v63, 0.0  ;;  %9030 = vmatpush.bf16.msra.mxu0 %v12123_v55  ;;  %v12107_v51 = vor.u32 %v12837_v2, %v12104_v9  ;;  %v7826_v54 = vadd.f32 %v17016_v62, %v17234_v0  ;;  %v12119_v33 = vor.u32 %v12843_v56, %v12118_v10  ;;  %v12102_v62 = vld [vmem:[%s18443_s10 + $0x128] sm:$0xf] }
0x1afb   : > { %v7904_v53 = vpack.c.bf16 %v7884_v42, %v7880_v25  ;;  %v7885_v61 = vmax.f32 %v7799_v23, 0.0  ;;  %v12839_v19 = vld [vmem:[%s18443_s10 + $0x164] sm:$0xf0]  ;;  %v7775_v5 = vadd.f32 %v17070_v35, %v17220_v1  ;;  %v7862_v31 = vadd.f32 %v17072_v48, %v17222_v12 }
0x1afc   : > { %9001 = vmatpush.bf16.msra.mxu3 %v12119_v33  ;;  %v7882_v18 = vmax.f32 %v7826_v54, 0.0  ;;  %v12103_v32 = vor.u32 %v12839_v19, %v12102_v62  ;;  %v7773_v63 = vadd.f32 %v17056_v17, %v17220_v1  ;;  %v7860_v40 = vadd.f32 %v17058_v6, %v17222_v12 }
0x1afd   : > { %8771 = vmatmul.bf16.vlgmr.msrb.gmra.mxu1 %v7896_v60  ;;  %v7855_v60 = vadd.f32 %v16994_v21, %v17222_v12  ;;  %v12838_v21 = vld [vmem:[%s18443_s10 + $0x15c] sm:$0xf0]  ;;  %v7892_v29 = vmax.f32 %v7775_v5, 0.0  ;;  %v7895_v27 = vmax.f32 %v7862_v31, 0.0  ;;  %v7804_v44 = vadd.f32 %v17074_v57, %v17232_v52 }
0x1afe   : > { %8858 = vmatmul.bf16.vlgmr.msrb.gmra.mxu0 %v7899_v59  ;;  %v12115_v59 = vor.u32 %v12840_v49, %v12112_v47  ;;  %v7888_v16 = vmax.f32 %v7773_v63, 0.0  ;;  %v7891_v49 = vmax.f32 %v7860_v40, 0.0  ;;  %v7833_v35 = vadd.f32 %v17076_v37, %v17234_v0 }
0x1aff   : > { %v7883_v43 = vmax.f32 %v7855_v60, 0.0  ;;  %9031 = vmatpush.bf16.msra.mxu0 %v12107_v51  ;;  %v7802_v48 = vadd.f32 %v17066_v34, %v17232_v52  ;;  %v7831_v17 = vadd.f32 %v17068_v38, %v17234_v0  ;;  %v7893_v60 = vmax.f32 %v7804_v44, 0.0 }
0x1b00   : > { %8972 = vmatpush.bf16.msra.mxu2 %v12115_v59  ;;  %9002 = vmatpush.bf16.msra.mxu3 %v12103_v32  ;;  %v7908_v47 = vpack.c.bf16 %v7892_v29, %v7888_v16  ;;  %v7911_v1 = vpack.c.bf16 %v7895_v27, %v7891_v49  ;;  %v7894_v6 = vmax.f32 %v7833_v35, 0.0 }
0x1b01   : > { %v7907_v45 = vpack.c.bf16 %v7887_v39, %v7883_v43  ;;  %v7889_v12 = vmax.f32 %v7802_v48, 0.0  ;;  %v7890_v55 = vmax.f32 %v7831_v17, 0.0 }
0x1b03   : > { %8800 = vmatmul.bf16.vlgmr.msrb.gmra.mxu2 %v7897_v22  ;;  %v7828_v22 = vadd.f32 %v17054_v3, %v17234_v0  ;;  %v7797_v3 = vadd.f32 %v17008_v14, %v17232_v52  ;;  %v12836_v14 = vld [vmem:[%s18443_s10 + $0x124] sm:$0xf]  ;;  %v7909_v59 = vpack.c.bf16 %v7893_v60, %v7889_v12  ;;  %v7910_v57 = vpack.c.bf16 %v7894_v6, %v7890_v55 }
0x1b04   : > { %8829 = vmatmul.bf16.vlgmr.msrb.gmra.mxu3 %v7898_v11  ;;  %v12094_v11 = vld [vmem:[%s18443_s10 + $0x120] sm:$0xf]  ;;  %v12099_v20 = vor.u32 %v12836_v14, %v12096_v24 }
0x1b05   : > { %v12095_v58 = vor.u32 %v12838_v21, %v12094_v11 }
0x1b06   : > { %8973 = vmatpush.bf16.msra.mxu2 %v12099_v20 }
0x1b07   : > { %8944 = vmatpush.bf16.msra.mxu1 %v12095_v58 }
0x1b0d   : > { %8776 = vmatmul.bf16.gmra.mxu1 %v7900_v50  ;;  %v7886_v50 = vmax.f32 %v7828_v22, 0.0 }
0x1b0e   : > { %8863 = vmatmul.bf16.gmra.mxu0 %v7903_v13  ;;  %v7881_v13 = vmax.f32 %v7797_v3, 0.0 }
0x1b13   : > { %8805 = vmatmul.bf16.gmra.mxu2 %v7901_v8  ;;  %v7905_v8 = vpack.c.bf16 %v7885_v61, %v7881_v13 }
0x1b14   : > { %8834 = vmatmul.bf16.gmra.mxu3 %v7902_v4  ;;  %v7906_v4 = vpack.c.bf16 %v7886_v50, %v7882_v18 }
0x1b1d   : > { %8781 = vmatmul.bf16.gmra.mxu1 %v7904_v53 }
0x1b1e   : > { %8868 = vmatmul.bf16.gmra.mxu0 %v7907_v45 }
0x1b23   : > { %8810 = vmatmul.bf16.gmra.mxu2 %v7905_v8 }
0x1b24   : > { %8839 = vmatmul.bf16.gmra.mxu3 %v7906_v4 }
0x1b2d   : > { %8786 = vmatmul.bf16.gmra.mxu1 %v7908_v47 }
0x1b2e   : > { %8873 = vmatmul.bf16.gmra.mxu0 %v7911_v1 }
0x1b33   : > { %8815 = vmatmul.bf16.gmra.mxu2 %v7909_v59  ;;  %v12851_v59 = vld [vmem:[%s18445_s12 + $0x638] sm:$0xff] }
0x1b34   : > { %8844 = vmatmul.bf16.gmra.mxu3 %v7910_v57  ;;  %v12875_v57 = vld [vmem:[%s18445_s12 + $0x6f8] sm:$0xff]  ;;  %9357 = vmatpush.bf16.msrb.mxu1 %v12851_v59  ;;  %v12856_v59 = vld [vmem:[%s18445_s12 + $0x660] sm:$0xff] }
0x1b35   : > { %9444 = vmatpush.bf16.msrb.mxu0 %v12875_v57  ;;  %v12864_v57 = vld [vmem:[%s18445_s12 + $0x6a0] sm:$0xff] }
0x1b3a   : > { %v8464_v42 = vpop.f32.mrf.mxu1 }
0x1b3b   : > { %v8551_v37 = vpop.f32.mrf.mxu0 }
0x1b3d   : > { %12124 = vmatmul.msk.bf16.vlgmr.msra.gmra.mxu1 %vm518_vm0, %v16756_v7 }
0x1b3e   : > { %12136 = vmatmul.msk.bf16.vlgmr.msra.gmra.mxu0 %vm518_vm0, %v16756_v7 }
0x1b42   : > { %v17344_v34 = vpop.f32.mrf.mxu1 }
0x1b43   : > { %v17346_v38 = vpop.f32.mrf.mxu0  ;;  %12128 = vmatmul.msk.bf16.vlgmr.msra.gmra.mxu2 %vm518_vm0, %v16756_v7 }
0x1b44   : > { %12132 = vmatmul.msk.bf16.vlgmr.msra.gmra.mxu3 %vm518_vm0, %v16756_v7 }
0x1b46   : > { %v8493_v52 = vpop.f32.mrf.mxu2 }
0x1b47   : > { %v8494_v0 = vadd.f32 %v8493_v52, %v8464_v42  ;;  %v8522_v25 = vpop.f32.mrf.mxu3 }
0x1b49   : > { %v8523_v39 = vadd.f32 %v8522_v25, %v8494_v0  ;;  %v12850_v25 = vld [vmem:[%s18445_s12 + $0x630] sm:$0xff] }
0x1b4a   : > { %v8469_v23 = vpop.f32.mrf.mxu1  ;;  %9358 = vmatpush.bf16.msrb.mxu1 %v12850_v25 }
0x1b4b   : > { %v8556_v22 = vpop.f32.mrf.mxu0  ;;  %v8552_v11 = vadd.f32 %v8551_v37, %v8523_v39  ;;  %v12874_v39 = vld [vmem:[%s18445_s12 + $0x6f0] sm:$0xff] }
0x1b4c   : > { %9445 = vmatpush.bf16.msrb.mxu0 %v12874_v39  ;;  %v12844_v39 = vld [vmem:[%s18445_s12 + $0x600] sm:$0xff] }
0x1b4d   : > { %12125 = vmatmul.msk.bf16.gmra.mxu1 %vm518_vm0, %v16782_v26 }
0x1b4e   : > { %12137 = vmatmul.msk.bf16.gmra.mxu0 %vm518_vm0, %v16782_v26  ;;  %v17356_v21 = vpop.f32.mrf.mxu2 }
0x1b4f   : > { %v17358_v2 = vpop.f32.mrf.mxu3 }
0x1b52   : > { %v17360_v43 = vpop.f32.mrf.mxu1 }
0x1b53   : > { %v17362_v58 = vpop.f32.mrf.mxu0  ;;  %12129 = vmatmul.msk.bf16.gmra.mxu2 %vm518_vm0, %v16782_v26 }
0x1b54   : > { %12133 = vmatmul.msk.bf16.gmra.mxu3 %vm518_vm0, %v16782_v26 }
0x1b56   : > { %v8498_v9 = vpop.f32.mrf.mxu2 }
0x1b57   : > { %v8499_v3 = vadd.f32 %v8498_v9, %v8469_v23  ;;  %v8527_v53 = vpop.f32.mrf.mxu3  ;;  %v12873_v9 = vld [vmem:[%s18445_s12 + $0x6e8] sm:$0xff] }
0x1b58   : > { %9446 = vmatpush.bf16.msrb.mxu0 %v12873_v9  ;;  %v12863_v9 = vld [vmem:[%s18445_s12 + $0x698] sm:$0xff] }
0x1b59   : > { %v8528_v51 = vadd.f32 %v8527_v53, %v8499_v3 }
0x1b5a   : > { %v8474_v10 = vpop.f32.mrf.mxu1 }
0x1b5b   : > { %v8561_v56 = vpop.f32.mrf.mxu0  ;;  %v8557_v54 = vadd.f32 %v8556_v22, %v8528_v51  ;;  %v12848_v51 = vld [vmem:[%s18445_s12 + $0x620] sm:$0xff] }
0x1b5d   : > { %12126 = vmatmul.msk.bf16.gmra.mxu1 %vm518_vm0, %v16804_v46 }
0x1b5e   : > { %12138 = vmatmul.msk.bf16.gmra.mxu0 %vm518_vm0, %v16804_v46  ;;  %v17372_v45 = vpop.f32.mrf.mxu2 }
0x1b5f   : > { %v17374_v33 = vpop.f32.mrf.mxu3 }
0x1b62   : > { %v17376_v61 = vpop.f32.mrf.mxu1 }
0x1b63   : > { %v17378_v50 = vpop.f32.mrf.mxu0  ;;  %12130 = vmatmul.msk.bf16.gmra.mxu2 %vm518_vm0, %v16804_v46 }
0x1b64   : > { %12134 = vmatmul.msk.bf16.gmra.mxu3 %vm518_vm0, %v16804_v46 }
0x1b66   : > { %v8503_v14 = vpop.f32.mrf.mxu2 }
0x1b67   : > { %v8504_v24 = vadd.f32 %v8503_v14, %v8474_v10  ;;  %v8532_v62 = vpop.f32.mrf.mxu3  ;;  %v12859_v10 = vld [vmem:[%s18445_s12 + $0x678] sm:$0xff] }
0x1b68   : > { %9386 = vmatpush.bf16.msrb.mxu2 %v12859_v10  ;;  %v12868_v10 = vld [vmem:[%s18445_s12 + $0x6c0] sm:$0xff] }
0x1b69   : > { %v8533_v13 = vadd.f32 %v8532_v62, %v8504_v24  ;;  %v12872_v24 = vld [vmem:[%s18445_s12 + $0x6e0] sm:$0xff] }
0x1b6a   : > { %v8479_v20 = vpop.f32.mrf.mxu1  ;;  %9447 = vmatpush.bf16.msrb.mxu0 %v12872_v24  ;;  %v12862_v24 = vld [vmem:[%s18445_s12 + $0x690] sm:$0xff] }
0x1b6b   : > { %v8566_v19 = vpop.f32.mrf.mxu0  ;;  %v8562_v18 = vadd.f32 %v8561_v56, %v8533_v13  ;;  %v12867_v56 = vld [vmem:[%s18445_s12 + $0x6b8] sm:$0xff] }
0x1b6c   : > { %9415 = vmatpush.bf16.msrb.mxu3 %v12867_v56 }
0x1b6d   : > { %12127 = vmatmul.msk.bf16.gmra.mxu1 %vm518_vm0, %v16876_v28 }
0x1b6e   : > { %12139 = vmatmul.msk.bf16.gmra.mxu0 %vm518_vm0, %v16876_v28  ;;  %v17388_v32 = vpop.f32.mrf.mxu2 }
0x1b6f   : > { %v17390_v8 = vpop.f32.mrf.mxu3 }
0x1b72   : > { %v17392_v4 = vpop.f32.mrf.mxu1 }
0x1b73   : > { %v17394_v5 = vpop.f32.mrf.mxu0  ;;  %12131 = vmatmul.msk.bf16.gmra.mxu2 %vm518_vm0, %v16876_v28 }
0x1b74   : > { %18567 = vst [vmem:[#allocation28_spill] sm:$0xff] %v17394_v5  ;;  %12135 = vmatmul.msk.bf16.gmra.mxu3 %vm518_vm0, %v16876_v28 }
0x1b76   : > { %v8508_v31 = vpop.f32.mrf.mxu2 }
0x1b77   : > { %v8509_v63 = vadd.f32 %v8508_v31, %v8479_v20  ;;  %v8537_v40 = vpop.f32.mrf.mxu3  ;;  %v12847_v20 = vld [vmem:[%s18445_s12 + $0x618] sm:$0xff] }
0x1b79   : > { %v8538_v29 = vadd.f32 %v8537_v40, %v8509_v63 }
0x1b7a   : > { %v8772_v27 = vpop.f32.mrf.mxu1 }
0x1b7b   : > { %v8773_v16 = vadd.f32 %v8772_v27, %v8552_v11  ;;  %v8859_v44 = vpop.f32.mrf.mxu0  ;;  %v17400_v49 = vadd.f32 %v8566_v19, %v8538_v29  ;;  %v12849_v11 = vld [vmem:[%s18445_s12 + $0x628] sm:$0xff]  ;;  %v12858_v19 = vld [vmem:[%s18445_s12 + $0x670] sm:$0xff]  ;;  %v12871_v27 = vld [vmem:[%s18445_s12 + $0x6d8] sm:$0xff] }
0x1b7c   : > { %9359 = vmatpush.bf16.msrb.mxu1 %v12849_v11  ;;  %v12866_v29 = vld [vmem:[%s18445_s12 + $0x6b0] sm:$0xff]  ;;  %9387 = vmatpush.bf16.msrb.mxu2 %v12858_v19  ;;  %v12855_v11 = vld [vmem:[%s18445_s12 + $0x658] sm:$0xff] }
0x1b7d   : > { %9416 = vmatpush.bf16.msrb.mxu3 %v12866_v29  ;;  %9448 = vmatpush.bf16.msrb.mxu0 %v12871_v27  ;;  %v12861_v29 = vld [vmem:[%s18445_s12 + $0x688] sm:$0xff] }
0x1b7e   : > { %v17402_v35 = vpop.f32.mrf.mxu2 }
0x1b7f   : > { %v17404_v48 = vpop.f32.mrf.mxu3 }
0x1b80   : > { %9360 = vmatpush.bf16.msrb.mxu1 %v12848_v51 }
0x1b82   : > { %v17406_v47 = vpop.f32.mrf.mxu1 }
0x1b83   : > { %v17408_v17 = vpop.f32.mrf.mxu0 }
0x1b84   : > { %9361 = vmatpush.bf16.msrb.mxu1 %v12847_v20 }
0x1b86   : > { %v8801_v1 = vpop.f32.mrf.mxu2 }
0x1b87   : > { %v8802_v60 = vadd.f32 %v8801_v1, %v8773_v16  ;;  %v8830_v6 = vpop.f32.mrf.mxu3  ;;  %v12865_v1 = vld [vmem:[%s18445_s12 + $0x6a8] sm:$0xff] }
0x1b88   : > { %9417 = vmatpush.bf16.msrb.mxu3 %v12865_v1 }
0x1b89   : > { %v8831_v12 = vadd.f32 %v8830_v6, %v8802_v60  ;;  %v12870_v6 = vld [vmem:[%s18445_s12 + $0x6d0] sm:$0xff] }
0x1b8a   : > { %v8777_v55 = vpop.f32.mrf.mxu1  ;;  %9449 = vmatpush.bf16.msrb.mxu0 %v12870_v6 }
0x1b8b   : > { %v17416_v42 = vadd.f32 %v8859_v44, %v8831_v12  ;;  %v8778_v37 = vadd.f32 %v8777_v55, %v8557_v54  ;;  %v8864_v52 = vpop.f32.mrf.mxu0  ;;  %v12846_v44 = vld [vmem:[%s18445_s12 + $0x610] sm:$0xff]  ;;  %v12845_v55 = vld [vmem:[%s18445_s12 + $0x608] sm:$0xff] }
0x1b8c   : > { %9362 = vmatpush.bf16.msrb.mxu1 %v12846_v44  ;;  %9418 = vmatpush.bf16.msrb.mxu3 %v12864_v57  ;;  %v12860_v44 = vld [vmem:[%s18445_s12 + $0x680] sm:$0xff]  ;;  %v12091_v57 = vld [vmem:[%s18444_s11 + $0x18] sm:$0xf] }
0x1b8e   : > { %v17418_v0 = vpop.f32.mrf.mxu2 }
0x1b8f   : > { %v17426_v23 = vpop.f32.mrf.mxu3 }
0x1b90   : > { %9363 = vmatpush.bf16.msrb.mxu1 %v12845_v55  ;;  %9419 = vmatpush.bf16.msrb.mxu3 %v12863_v9  ;;  %v17544_v9 = vperm.slane %v12091_v57, 3 }
0x1b92   : > { %v17428_v22 = vpop.f32.mrf.mxu1 }
0x1b93   : > { %v17436_v3 = vpop.f32.mrf.mxu0 }
0x1b94   : > { %9364 = vmatpush.bf16.msrb.mxu1 %v12844_v39  ;;  %9420 = vmatpush.bf16.msrb.mxu3 %v12862_v24 }
0x1b96   : > { %v8806_v53 = vpop.f32.mrf.mxu2 }
0x1b97   : > { %v8807_v54 = vadd.f32 %v8806_v53, %v8778_v37  ;;  %v8835_v14 = vpop.f32.mrf.mxu3 }
0x1b98   : > { %9421 = vmatpush.bf16.msrb.mxu3 %v12861_v29 }
0x1b99   : > { %v8836_v62 = vadd.f32 %v8835_v14, %v8807_v54  ;;  %v12854_v14 = vld [vmem:[%s18445_s12 + $0x650] sm:$0xff] }
0x1b9a   : > { %v8782_v13 = vpop.f32.mrf.mxu1 }
0x1b9b   : > { %v17456_v31 = vadd.f32 %v8864_v52, %v8836_v62  ;;  %v8783_v63 = vadd.f32 %v8782_v13, %v8562_v18  ;;  %v8869_v40 = vpop.f32.mrf.mxu0  ;;  %v12857_v18 = vld [vmem:[%s18445_s12 + $0x668] sm:$0xff] }
0x1b9c   : > { %9388 = vmatpush.bf16.msrb.mxu2 %v12857_v18  ;;  %v12869_v52 = vld [vmem:[%s18445_s12 + $0x6c8] sm:$0xff]  ;;  %9422 = vmatpush.bf16.msrb.mxu3 %v12860_v44 }
0x1b9d   : > { %9450 = vmatpush.bf16.msrb.mxu0 %v12869_v52 }
0x1b9e   : > { %v17464_v16 = vpop.f32.mrf.mxu2 }
0x1b9f   : > { %v17475_v60 = vpop.f32.mrf.mxu3 }
0x1ba0   : > { %9389 = vmatpush.bf16.msrb.mxu2 %v12856_v59 }
0x1ba1   : > { %9451 = vmatpush.bf16.msrb.mxu0 %v12868_v10 }
0x1ba2   : > { %v17480_v12 = vpop.f32.mrf.mxu1 }
0x1ba3   : > { %v17491_v37 = vpop.f32.mrf.mxu0 }
0x1ba4   : > { %18568 = vst [vmem:[#allocation23_spill] sm:$0xff] %v17491_v37  ;;  %9390 = vmatpush.bf16.msrb.mxu2 %v12855_v11  ;;  %v17542_v11 = vperm.slane %v12091_v57, 0 }
0x1ba6   : > { %v8811_v25 = vpop.f32.mrf.mxu2 }
0x1ba7   : > { %v8812_v53 = vadd.f32 %v8811_v25, %v8783_v63  ;;  %v8840_v51 = vpop.f32.mrf.mxu3  ;;  %v12853_v63 = vld [vmem:[%s18445_s12 + $0x648] sm:$0xff] }
0x1ba8   : > { %9391 = vmatpush.bf16.msrb.mxu2 %v12854_v14 }
0x1ba9   : > { %v8841_v56 = vadd.f32 %v8840_v51, %v8812_v53 }
0x1baa   : > { %v8787_v54 = vpop.f32.mrf.mxu1 }
0x1bab   : > { %v17514_v62 = vadd.f32 %v8869_v40, %v8841_v56  ;;  %v8788_v13 = vadd.f32 %v8787_v54, %v17400_v49  ;;  %v8874_v20 = vpop.f32.mrf.mxu0  ;;  %v12852_v49 = vld [vmem:[%s18445_s12 + $0x640] sm:$0xff] }
0x1bac   : > { %9392 = vmatpush.bf16.msrb.mxu2 %v12853_v63 }
0x1bae   : > { %v17517_v19 = vpop.f32.mrf.mxu2 }
0x1baf   : > { %v17525_v27 = vpop.f32.mrf.mxu3 }
0x1bb0   : > { %9393 = vmatpush.bf16.msrb.mxu2 %v12852_v49 }
0x1bb2   : > { %v17527_v40 = vpop.f32.mrf.mxu1 }
0x1bb3   : > { %18569 = vst [vmem:[#allocation10_spill] sm:$0xff] %v17527_v40  ;;  %v17535_v18 = vpop.f32.mrf.mxu0 }
0x1bb4   : > { %18570 = vst [vmem:[#allocation11_spill] sm:$0xff] %v17535_v18 }
0x1bb6   : > { %v8816_v1 = vpop.f32.mrf.mxu2 }
0x1bb7   : > { %v8817_v6 = vadd.f32 %v8816_v1, %v8788_v13  ;;  %v8845_v55 = vpop.f32.mrf.mxu3 }
0x1bb9   : > { %v8846_v59 = vadd.f32 %v8845_v55, %v8817_v6 }
0x1bba   : > { %v8946_v52 = vpop.f32.mrf.mxu1 }
0x1bbb   : > { %v17540_v25 = vadd.f32 %v8874_v20, %v8846_v59  ;;  %v9033_v39 = vpop.f32.mrf.mxu0  ;;  %v8947_v10 = vadd.f32 %v8946_v52, %v17542_v11  ;;  %v17554_v59 = vperm.slane %v12091_v57, 1  ;;  %v17556_v52 = vperm.slane %v12091_v57, 2 }
0x1bbc   : > { %v9034_v56 = vadd.f32 %v9033_v39, %v17544_v9 }
0x1bbd   : > { %v9053_v20 = vmax.f32 %v8947_v10, 0.0 }
0x1bbe   : > { %v17546_v53 = vpop.f32.mrf.mxu2  ;;  %v9056_v29 = vmax.f32 %v9034_v56, 0.0 }
0x1bbf   : > { %18571 = vst [vmem:[#allocation31_spill] sm:$0xff] %v17546_v53  ;;  %v17548_v51 = vpop.f32.mrf.mxu3 }
0x1bc0   : > { %18572 = vst [vmem:[#allocation12_spill] sm:$0xff] %v17548_v51 }
0x1bc2   : > { %v8948_v54 = vpop.f32.mrf.mxu1 }
0x1bc3   : > { %v8949_v14 = vadd.f32 %v8948_v54, %v17542_v11  ;;  %v9035_v24 = vpop.f32.mrf.mxu0 }
0x1bc4   : > { %v9036_v13 = vadd.f32 %v9035_v24, %v17544_v9 }
0x1bc5   : > { %v9057_v63 = vmax.f32 %v8949_v14, 0.0 }
0x1bc6   : > { %v9060_v49 = vmax.f32 %v9036_v13, 0.0  ;;  %v8975_v44 = vpop.f32.mrf.mxu2 }
0x1bc7   : > { %v9085_v1 = vpack.c.bf16 %v9057_v63, %v9053_v20  ;;  %v9004_v6 = vpop.f32.mrf.mxu3  ;;  %v8976_v54 = vadd.f32 %v8975_v44, %v17554_v59 }
0x1bc8   : > { %v9088_v55 = vpack.c.bf16 %v9060_v49, %v9056_v29  ;;  %v9005_v24 = vadd.f32 %v9004_v6, %v17556_v52 }
0x1bc9   : > { %9365 = vmatmul.bf16.vlgmr.msrb.gmra.mxu1 %v9085_v1  ;;  %v9054_v20 = vmax.f32 %v8976_v54, 0.0 }
0x1bca   : > { %9452 = vmatmul.bf16.vlgmr.msrb.gmra.mxu0 %v9088_v55  ;;  %v8951_v39 = vpop.f32.mrf.mxu1  ;;  %v9055_v49 = vmax.f32 %v9005_v24, 0.0 }
0x1bcb   : > { %v9038_v18 = vpop.f32.mrf.mxu0  ;;  %v8952_v63 = vadd.f32 %v8951_v39, %v17542_v11 }
0x1bcc   : > { %v9039_v57 = vadd.f32 %v9038_v18, %v17544_v9 }
0x1bce   : > { %v8977_v10 = vpop.f32.mrf.mxu2 }
0x1bcf   : > { %v8978_v56 = vadd.f32 %v8977_v10, %v17554_v59  ;;  %v9006_v14 = vpop.f32.mrf.mxu3  ;;  %v9061_v10 = vmax.f32 %v8952_v63, 0.0 }
0x1bd0   : > { %v9007_v13 = vadd.f32 %v9006_v14, %v17556_v52  ;;  %v9064_v14 = vmax.f32 %v9039_v57, 0.0 }
0x1bd1   : > { %v9058_v29 = vmax.f32 %v8978_v56, 0.0 }
0x1bd2   : > { %v9059_v1 = vmax.f32 %v9007_v13, 0.0  ;;  %v8953_v55 = vpop.f32.mrf.mxu1 }
0x1bd3   : > { %v9086_v51 = vpack.c.bf16 %v9058_v29, %v9054_v20  ;;  %v8954_v44 = vadd.f32 %v8953_v55, %v17542_v11  ;;  %v9040_v53 = vpop.f32.mrf.mxu0 }
0x1bd4   : > { %v9087_v6 = vpack.c.bf16 %v9059_v1, %v9055_v49  ;;  %v9041_v40 = vadd.f32 %v9040_v53, %v17544_v9 }
0x1bd5   : > { %v9065_v5 = vmax.f32 %v8954_v44, 0.0  ;;  %9394 = vmatmul.bf16.vlgmr.msrb.gmra.mxu2 %v9086_v51 }
0x1bd6   : > { %v9068_v54 = vmax.f32 %v9041_v40, 0.0  ;;  %9423 = vmatmul.bf16.vlgmr.msrb.gmra.mxu3 %v9087_v6  ;;  %v8980_v39 = vpop.f32.mrf.mxu2 }
0x1bd7   : > { %v9009_v56 = vpop.f32.mrf.mxu3  ;;  %v9089_v24 = vpack.c.bf16 %v9065_v5, %v9061_v10  ;;  %v8981_v20 = vadd.f32 %v8980_v39, %v17554_v59  ;;  %v12359_v5 = vld [vmem:[%s18443_s10 + $0x1b0] sm:$0xf]  ;;  %v12369_v39 = vld [vmem:[%s18443_s10 + $0x1f8] sm:$0xf0] }
0x1bd8   : > { %v9092_v37 = vpack.c.bf16 %v9068_v54, %v9064_v14  ;;  %v9010_v29 = vadd.f32 %v9009_v56, %v17556_v52  ;;  %v12881_v54 = vld [vmem:[%s18443_s10 + $0x1bc] sm:$0xf] }
0x1bd9   : > { %9370 = vmatmul.bf16.gmra.mxu1 %v9089_v24  ;;  %v9062_v40 = vmax.f32 %v8981_v20, 0.0  ;;  %v12372_v20 = vor.u32 %v12881_v54, %v12369_v39  ;;  %v12880_v39 = vld [vmem:[%s18443_s10 + $0x1b4] sm:$0xf] }
0x1bda   : > { %9457 = vmatmul.bf16.gmra.mxu0 %v9092_v37  ;;  %v8956_v18 = vpop.f32.mrf.mxu1  ;;  %v12882_v37 = vld [vmem:[%s18443_s10 + $0x1ec] sm:$0xf0]  ;;  %v9063_v55 = vmax.f32 %v9010_v29, 0.0 }
0x1bdb   : > { %v9043_v13 = vpop.f32.mrf.mxu0  ;;  %v8957_v57 = vadd.f32 %v8956_v18, %v17542_v11  ;;  %v12360_v14 = vor.u32 %v12882_v37, %v12359_v5  ;;  %9632 = vmatpush.bf16.msra.mxu0 %v12372_v20  ;;  %v12367_v20 = vld [vmem:[%s18443_s10 + $0x1b8] sm:$0xf] }
0x1bdc   : > { %v9044_v44 = vadd.f32 %v9043_v13, %v17544_v9 }
0x1bdd   : > { %9545 = vmatpush.bf16.msra.mxu1 %v12360_v14  ;;  %v9069_v13 = vmax.f32 %v8957_v57, 0.0  ;;  %v12877_v57 = vld [vmem:[%s18443_s10 + $0x13c] sm:$0xf] }
0x1bde   : > { %v8982_v49 = vpop.f32.mrf.mxu2  ;;  %v9072_v5 = vmax.f32 %v9044_v44, 0.0 }
0x1bdf   : > { %v8983_v53 = vadd.f32 %v8982_v49, %v17554_v59  ;;  %v9011_v63 = vpop.f32.mrf.mxu3 }
0x1be0   : > { %v9012_v51 = vadd.f32 %v9011_v63, %v17556_v52  ;;  %v12343_v63 = vld [vmem:[%s18443_s10 + $0x130] sm:$0xf] }
0x1be1   : > { %v9066_v1 = vmax.f32 %v8983_v53, 0.0 }
0x1be2   : > { %v9067_v6 = vmax.f32 %v9012_v51, 0.0  ;;  %v8958_v10 = vpop.f32.mrf.mxu1  ;;  %v12878_v51 = vld [vmem:[%s18443_s10 + $0x16c] sm:$0xf0] }
0x1be3   : > { %v8959_v56 = vadd.f32 %v8958_v10, %v17542_v11  ;;  %v9045_v24 = vpop.f32.mrf.mxu0  ;;  %v9090_v18 = vpack.c.bf16 %v9066_v1, %v9062_v40  ;;  %v12344_v1 = vor.u32 %v12878_v51, %v12343_v63  ;;  %v12351_v63 = vld [vmem:[%s18443_s10 + $0x138] sm:$0xf] }
0x1be4   : > { %v9046_v29 = vadd.f32 %v9045_v24, %v17544_v9  ;;  %v9091_v49 = vpack.c.bf16 %v9067_v6, %v9063_v55  ;;  %v12353_v55 = vld [vmem:[%s18443_s10 + $0x178] sm:$0xf0]  ;;  %v12879_v51 = vld [vmem:[%s18443_s10 + $0x174] sm:$0xf0] }
0x1be5   : > { %v9073_v53 = vmax.f32 %v8959_v56, 0.0  ;;  %9399 = vmatmul.bf16.gmra.mxu2 %v9090_v18  ;;  %v12356_v14 = vor.u32 %v12877_v57, %v12353_v55  ;;  %9546 = vmatpush.bf16.msra.mxu1 %v12344_v1  ;;  %v12361_v56 = vld [vmem:[%s18443_s10 + $0x1f0] sm:$0xf0]  ;;  %v12352_v55 = vor.u32 %v12879_v51, %v12351_v63 }
0x1be6   : > { %v9076_v37 = vmax.f32 %v9046_v29, 0.0  ;;  %9428 = vmatmul.bf16.gmra.mxu3 %v9091_v49  ;;  %v8985_v40 = vpop.f32.mrf.mxu2  ;;  %v12364_v18 = vor.u32 %v12880_v39, %v12361_v56  ;;  %v12883_v29 = vld [vmem:[%s18443_s10 + $0x1f4] sm:$0xf0]  ;;  %v12876_v49 = vld [vmem:[%s18443_s10 + $0x134] sm:$0xf] }
0x1be7   : > { %v9014_v6 = vpop.f32.mrf.mxu3  ;;  %v9093_v10 = vpack.c.bf16 %v9073_v53, %v9069_v13  ;;  %9633 = vmatpush.bf16.msra.mxu0 %v12356_v14  ;;  %v12368_v13 = vor.u32 %v12883_v29, %v12367_v20  ;;  %v12345_v53 = vld [vmem:[%s18443_s10 + $0x170] sm:$0xf0] }
0x1be8   : > { %v9096_v54 = vpack.c.bf16 %v9076_v37, %v9072_v5  ;;  %v8986_v5 = vadd.f32 %v8985_v40, %v17554_v59  ;;  %9574 = vmatpush.bf16.msra.mxu2 %v12364_v18  ;;  %v12348_v37 = vor.u32 %v12876_v49, %v12345_v53  ;;  %v9015_v1 = vadd.f32 %v9014_v6, %v17556_v52 }
0x1be9   : > { %9375 = vmatmul.bf16.gmra.mxu1 %v9093_v10  ;;  %9603 = vmatpush.bf16.msra.mxu3 %v12368_v13 }
0x1bea   : > { %9462 = vmatmul.bf16.gmra.mxu0 %v9096_v54  ;;  %v8961_v44 = vpop.f32.mrf.mxu1  ;;  %v9070_v39 = vmax.f32 %v8986_v5, 0.0  ;;  %v9071_v29 = vmax.f32 %v9015_v1, 0.0 }
0x1beb   : > { %v9048_v24 = vpop.f32.mrf.mxu0  ;;  %v8962_v56 = vadd.f32 %v8961_v44, %v17542_v11 }
0x1bec   : > { %9575 = vmatpush.bf16.msra.mxu2 %v12348_v37  ;;  %v9049_v40 = vadd.f32 %v9048_v24, %v17544_v9 }
0x1bed   : > { %9604 = vmatpush.bf16.msra.mxu3 %v12352_v55 }
0x1bee   : > { %v8987_v57 = vpop.f32.mrf.mxu2  ;;  %v9080_v5 = vmax.f32 %v9049_v40, 0.0 }
0x1bef   : > { %v8988_v10 = vadd.f32 %v8987_v57, %v17554_v59  ;;  %v9016_v14 = vpop.f32.mrf.mxu3  ;;  %v9077_v57 = vmax.f32 %v8962_v56, 0.0 }
0x1bf0   : > { %v9017_v54 = vadd.f32 %v9016_v14, %v17556_v52 }
0x1bf1   : > { %v9074_v20 = vmax.f32 %v8988_v10, 0.0 }
0x1bf2   : > { %v9075_v18 = vmax.f32 %v9017_v54, 0.0  ;;  %v8963_v49 = vpop.f32.mrf.mxu1 }
0x1bf3   : > { %v8964_v6 = vadd.f32 %v8963_v49, %v17542_v11  ;;  %v9050_v13 = vpop.f32.mrf.mxu0  ;;  %v9094_v53 = vpack.c.bf16 %v9074_v20, %v9070_v39 }
0x1bf4   : > { %v9051_v63 = vadd.f32 %v9050_v13, %v17544_v9  ;;  %v9095_v51 = vpack.c.bf16 %v9075_v18, %v9071_v29 }
0x1bf5   : > { %v9081_v14 = vmax.f32 %v8964_v6, 0.0  ;;  %9404 = vmatmul.bf16.gmra.mxu2 %v9094_v53  ;;  %v12915_v53 = vld [vmem:[%s18445_s12 + $0x7f8] sm:$0xff] }
0x1bf6   : > { %v9084_v44 = vmax.f32 %v9051_v63, 0.0  ;;  %9433 = vmatmul.bf16.gmra.mxu3 %v9095_v51  ;;  %v8990_v37 = vpop.f32.mrf.mxu2  ;;  %10046 = vmatpush.bf16.msrb.mxu0 %v12915_v53  ;;  %v12886_v53 = vld [vmem:[%s18445_s12 + $0x710] sm:$0xff] }
0x1bf7   : > { %v9019_v1 = vpop.f32.mrf.mxu3  ;;  %v9097_v10 = vpack.c.bf16 %v9081_v14, %v9077_v57  ;;  %v8991_v55 = vadd.f32 %v8990_v37, %v17554_v59 }
0x1bf8   : > { %v9100_v24 = vpack.c.bf16 %v9084_v44, %v9080_v5  ;;  %v9020_v11 = vadd.f32 %v9019_v1, %v17556_v52  ;;  %v12914_v5 = vld [vmem:[%s18445_s12 + $0x7f0] sm:$0xff] }
0x1bf9   : > { %9380 = vmatmul.bf16.gmra.mxu1 %v9097_v10  ;;  %v9078_v20 = vmax.f32 %v8991_v55, 0.0  ;;  %v12889_v10 = vld [vmem:[%s18445_s12 + $0x728] sm:$0xff] }
0x1bfa   : > { %9467 = vmatmul.bf16.gmra.mxu0 %v9100_v24  ;;  %v9079_v40 = vmax.f32 %v9020_v11, 0.0  ;;  %v12913_v24 = vld [vmem:[%s18445_s12 + $0x7e8] sm:$0xff] }
0x1bfb   : > { %10047 = vmatpush.bf16.msrb.mxu0 %v12914_v5 }
0x1bfe   : > { %v8992_v54 = vpop.f32.mrf.mxu2 }
0x1bff   : > { %v8993_v9 = vadd.f32 %v8992_v54, %v17554_v59  ;;  %v9021_v39 = vpop.f32.mrf.mxu3  ;;  %10048 = vmatpush.bf16.msrb.mxu0 %v12913_v24 }
0x1c00   : > { %v9022_v56 = vadd.f32 %v9021_v39, %v17556_v52 }
0x1c01   : > { %v9082_v29 = vmax.f32 %v8993_v9, 0.0 }
0x1c02   : > { %v9083_v18 = vmax.f32 %v9022_v56, 0.0  ;;  %v12888_v56 = vld [vmem:[%s18445_s12 + $0x720] sm:$0xff] }
0x1c03   : > { %v9098_v49 = vpack.c.bf16 %v9082_v29, %v9078_v20  ;;  %v12912_v20 = vld [vmem:[%s18445_s12 + $0x7e0] sm:$0xff] }
0x1c04   : > { %v9099_v6 = vpack.c.bf16 %v9083_v18, %v9079_v40  ;;  %10049 = vmatpush.bf16.msrb.mxu0 %v12912_v20  ;;  %v12887_v18 = vld [vmem:[%s18445_s12 + $0x718] sm:$0xff]  ;;  %v12908_v20 = vld [vmem:[%s18445_s12 + $0x7c0] sm:$0xff] }
0x1c05   : > { %9409 = vmatmul.bf16.gmra.mxu2 %v9098_v49  ;;  %v12911_v49 = vld [vmem:[%s18445_s12 + $0x7d8] sm:$0xff] }
0x1c06   : > { %9438 = vmatmul.bf16.gmra.mxu3 %v9099_v6 }
0x1c08   : > { %10050 = vmatpush.bf16.msrb.mxu0 %v12911_v49 }
0x1c09   : > { %12373 = vmatmul.msk.bf16.vlgmr.msra.gmra.mxu1 %vm518_vm0, %v16756_v7 }
0x1c0a   : > { %12385 = vmatmul.msk.bf16.vlgmr.msra.gmra.mxu0 %vm518_vm0, %v16756_v7 }
0x1c15   : > { %12377 = vmatmul.msk.bf16.vlgmr.msra.gmra.mxu2 %vm518_vm0, %v16756_v7 }
0x1c16   : > { %12381 = vmatmul.msk.bf16.vlgmr.msra.gmra.mxu3 %vm518_vm0, %v16756_v7 }
0x1c19   : > { %12374 = vmatmul.msk.bf16.gmra.mxu1 %vm518_vm0, %v16782_v26 }
0x1c1a   : > { %12386 = vmatmul.msk.bf16.gmra.mxu0 %vm518_vm0, %v16782_v26 }
0x1c25   : > { %12378 = vmatmul.msk.bf16.gmra.mxu2 %vm518_vm0, %v16782_v26 }
0x1c26   : > { %12382 = vmatmul.msk.bf16.gmra.mxu3 %vm518_vm0, %v16782_v26 }
0x1c29   : > { %12375 = vmatmul.msk.bf16.gmra.mxu1 %vm518_vm0, %v16804_v46 }
0x1c2a   : > { %12387 = vmatmul.msk.bf16.gmra.mxu0 %vm518_vm0, %v16804_v46 }
0x1c35   : > { %12379 = vmatmul.msk.bf16.gmra.mxu2 %vm518_vm0, %v16804_v46 }
0x1c36   : > { %12383 = vmatmul.msk.bf16.gmra.mxu3 %vm518_vm0, %v16804_v46  ;;  %v12891_v46 = vld [vmem:[%s18445_s12 + $0x738] sm:$0xff] }
0x1c37   : > { %9959 = vmatpush.bf16.msrb.mxu1 %v12891_v46 }
0x1c39   : > { %12376 = vmatmul.msk.bf16.gmra.mxu1 %vm518_vm0, %v16876_v28 }
0x1c3a   : > { %12388 = vmatmul.msk.bf16.gmra.mxu0 %vm518_vm0, %v16876_v28 }
0x1c45   : > { %12380 = vmatmul.msk.bf16.gmra.mxu2 %vm518_vm0, %v16876_v28 }
0x1c46   : > { %12384 = vmatmul.msk.bf16.gmra.mxu3 %vm518_vm0, %v16876_v28  ;;  %v9366_v7 = vpop.f32.mrf.mxu1  ;;  %v12890_v28 = vld [vmem:[%s18445_s12 + $0x730] sm:$0xff] }
0x1c47   : > { %v9453_v26 = vpop.f32.mrf.mxu0  ;;  %9960 = vmatpush.bf16.msrb.mxu1 %v12890_v28 }
0x1c4b   : > { %9961 = vmatpush.bf16.msrb.mxu1 %v12889_v10 }
0x1c4e   : > { %v9368_v59 = vpop.f32.mrf.mxu1 }
0x1c4f   : > { %v9455_v52 = vpop.f32.mrf.mxu0  ;;  %9962 = vmatpush.bf16.msrb.mxu1 %v12888_v56 }
0x1c53   : > { %9963 = vmatpush.bf16.msrb.mxu1 %v12887_v18  ;;  %v12896_v18 = vld [vmem:[%s18445_s12 + $0x760] sm:$0xff] }
0x1c56   : > { %v9371_v13 = vpop.f32.mrf.mxu1 }
0x1c57   : > { %v9458_v63 = vpop.f32.mrf.mxu0  ;;  %9964 = vmatpush.bf16.msrb.mxu1 %v12886_v53 }
0x1c58   : > { %v9395_v51 = vpop.f32.mrf.mxu2 }
0x1c59   : > { %v9396_v57 = vadd.f32 %v9395_v51, %v9366_v7  ;;  %v9424_v14 = vpop.f32.mrf.mxu3  ;;  %v12910_v51 = vld [vmem:[%s18445_s12 + $0x7d0] sm:$0xff] }
0x1c5a   : > { %10051 = vmatpush.bf16.msrb.mxu0 %v12910_v51 }
0x1c5b   : > { %v9425_v44 = vadd.f32 %v9424_v14, %v9396_v57  ;;  %v12898_v14 = vld [vmem:[%s18445_s12 + $0x770] sm:$0xff] }
0x1c5d   : > { %v9454_v37 = vadd.f32 %v9453_v26, %v9425_v44  ;;  %v12899_v26 = vld [vmem:[%s18445_s12 + $0x778] sm:$0xff]  ;;  %v12885_v44 = vld [vmem:[%s18445_s12 + $0x708] sm:$0xff] }
0x1c5e   : > { %v9373_v1 = vpop.f32.mrf.mxu1  ;;  %9988 = vmatpush.bf16.msrb.mxu2 %v12899_v26  ;;  %9965 = vmatpush.bf16.msrb.mxu1 %v12885_v44 }
0x1c5f   : > { %v17685_v55 = vadd.f32 %v9454_v37, %v17416_v42  ;;  %v9460_v11 = vpop.f32.mrf.mxu0  ;;  %v12909_v37 = vld [vmem:[%s18445_s12 + $0x7c8] sm:$0xff] }
0x1c60   : > { %v9397_v54 = vpop.f32.mrf.mxu2  ;;  %10052 = vmatpush.bf16.msrb.mxu0 %v12909_v37 }
0x1c61   : > { %v9398_v9 = vadd.f32 %v9397_v54, %v9368_v59  ;;  %v9426_v39 = vpop.f32.mrf.mxu3  ;;  %v12907_v59 = vld [vmem:[%s18445_s12 + $0x7b8] sm:$0xff] }
0x1c62   : > { %10017 = vmatpush.bf16.msrb.mxu3 %v12907_v59  ;;  %9989 = vmatpush.bf16.msrb.mxu2 %v12898_v14  ;;  %v12902_v14 = vld [vmem:[%s18445_s12 + $0x790] sm:$0xff] }
0x1c63   : > { %v9427_v29 = vadd.f32 %v9426_v39, %v9398_v9  ;;  %v12905_v9 = vld [vmem:[%s18445_s12 + $0x7a8] sm:$0xff] }
0x1c64   : > { %10053 = vmatpush.bf16.msrb.mxu0 %v12908_v20  ;;  %v12340_v20 = vld [vmem:[%s18444_s11 + $0x1c] sm:$0xf] }
0x1c65   : > { %v17693_v40 = vadd.f32 %v9455_v52, %v9427_v29 }
0x1c66   : > { %v9376_v42 = vpop.f32.mrf.mxu1 }
0x1c67   : > { %v9463_v6 = vpop.f32.mrf.mxu0 }
0x1c68   : > { %v9400_v7 = vpop.f32.mrf.mxu2 }
0x1c69   : > { %v9401_v52 = vadd.f32 %v9400_v7, %v9371_v13  ;;  %v9429_v46 = vpop.f32.mrf.mxu3  ;;  %v12906_v13 = vld [vmem:[%s18445_s12 + $0x7b0] sm:$0xff] }
0x1c6a   : > { %10018 = vmatpush.bf16.msrb.mxu3 %v12906_v13 }
0x1c6b   : > { %v9430_v57 = vadd.f32 %v9429_v46, %v9401_v52  ;;  %v12895_v52 = vld [vmem:[%s18445_s12 + $0x758] sm:$0xff] }
0x1c6c   : > { %v12903_v46 = vld [vmem:[%s18445_s12 + $0x798] sm:$0xff] }
0x1c6d   : > { %v9459_v28 = vadd.f32 %v9458_v63, %v9430_v57  ;;  %v12897_v63 = vld [vmem:[%s18445_s12 + $0x768] sm:$0xff] }
0x1c6e   : > { %v9378_v5 = vpop.f32.mrf.mxu1  ;;  %9990 = vmatpush.bf16.msrb.mxu2 %v12897_v63  ;;  %10019 = vmatpush.bf16.msrb.mxu3 %v12905_v9  ;;  %v12901_v63 = vld [vmem:[%s18445_s12 + $0x788] sm:$0xff] }
0x1c6f   : > { %v17726_v10 = vadd.f32 %v9459_v28, %v17456_v31  ;;  %v9465_v24 = vpop.f32.mrf.mxu0  ;;  %v12884_v31 = vld [vmem:[%s18445_s12 + $0x700] sm:$0xff] }
0x1c70   : > { %v9402_v54 = vpop.f32.mrf.mxu2  ;;  %9966 = vmatpush.bf16.msrb.mxu1 %v12884_v31 }
0x1c71   : > { %v9403_v39 = vadd.f32 %v9402_v54, %v9373_v1  ;;  %v9431_v56 = vpop.f32.mrf.mxu3  ;;  %v12904_v1 = vld [vmem:[%s18445_s12 + $0x7a0] sm:$0xff]  ;;  %v12893_v54 = vld [vmem:[%s18445_s12 + $0x748] sm:$0xff] }
0x1c72   : > { %9991 = vmatpush.bf16.msrb.mxu2 %v12896_v18  ;;  %10020 = vmatpush.bf16.msrb.mxu3 %v12904_v1  ;;  %v17780_v1 = vperm.slane %v12340_v20, 0 }
0x1c73   : > { %v9432_v29 = vadd.f32 %v9431_v56, %v9403_v39  ;;  %v12900_v56 = vld [vmem:[%s18445_s12 + $0x780] sm:$0xff] }
0x1c75   : > { %v17746_v49 = vadd.f32 %v9460_v11, %v9432_v29  ;;  %v12894_v11 = vld [vmem:[%s18445_s12 + $0x750] sm:$0xff] }
0x1c76   : > { %v9381_v7 = vpop.f32.mrf.mxu1  ;;  %9992 = vmatpush.bf16.msrb.mxu2 %v12895_v52  ;;  %10021 = vmatpush.bf16.msrb.mxu3 %v12903_v46  ;;  %v17782_v46 = vperm.slane %v12340_v20, 3 }
0x1c77   : > { %v9468_v26 = vpop.f32.mrf.mxu0 }
0x1c78   : > { %v9405_v59 = vpop.f32.mrf.mxu2 }
0x1c79   : > { %v9406_v53 = vadd.f32 %v9405_v59, %v9376_v42  ;;  %v9434_v51 = vpop.f32.mrf.mxu3 }
0x1c7a   : > { %9993 = vmatpush.bf16.msrb.mxu2 %v12894_v11  ;;  %10022 = vmatpush.bf16.msrb.mxu3 %v12902_v14 }
0x1c7b   : > { %v9435_v57 = vadd.f32 %v9434_v51, %v9406_v53 }
0x1c7d   : > { %v9464_v13 = vadd.f32 %v9463_v6, %v9435_v57 }
0x1c7e   : > { %v9383_v28 = vpop.f32.mrf.mxu1  ;;  %9994 = vmatpush.bf16.msrb.mxu2 %v12893_v54  ;;  %10023 = vmatpush.bf16.msrb.mxu3 %v12901_v63 }
0x1c7f   : > { %v17761_v44 = vadd.f32 %v9464_v13, %v17514_v62  ;;  %v9470_v42 = vpop.f32.mrf.mxu0  ;;  %v12892_v62 = vld [vmem:[%s18445_s12 + $0x740] sm:$0xff] }
0x1c80   : > { %v9407_v37 = vpop.f32.mrf.mxu2 }
0x1c81   : > { %v9408_v9 = vadd.f32 %v9407_v37, %v9378_v5  ;;  %v9436_v39 = vpop.f32.mrf.mxu3 }
0x1c82   : > { %9995 = vmatpush.bf16.msrb.mxu2 %v12892_v62  ;;  %10024 = vmatpush.bf16.msrb.mxu3 %v12900_v56 }
0x1c83   : > { %v9437_v6 = vadd.f32 %v9436_v39, %v9408_v9 }
0x1c85   : > { %v17775_v31 = vadd.f32 %v9465_v24, %v9437_v6 }
0x1c86   : > { %v9548_v29 = vpop.f32.mrf.mxu1 }
0x1c87   : > { %v9635_v5 = vpop.f32.mrf.mxu0  ;;  %v9549_v51 = vadd.f32 %v9548_v29, %v17780_v1 }
0x1c88   : > { %v9410_v18 = vpop.f32.mrf.mxu2  ;;  %v9636_v57 = vadd.f32 %v9635_v5, %v17782_v46 }
0x1c89   : > { %v9411_v59 = vadd.f32 %v9410_v18, %v9381_v7  ;;  %v9439_v52 = vpop.f32.mrf.mxu3  ;;  %v9655_v7 = vmax.f32 %v9549_v51, 0.0 }
0x1c8a   : > { %v9658_v62 = vmax.f32 %v9636_v57, 0.0 }
0x1c8b   : > { %v9440_v53 = vadd.f32 %v9439_v52, %v9411_v59 }
0x1c8d   : > { %v9469_v24 = vadd.f32 %v9468_v26, %v9440_v53 }
0x1c8e   : > { %v9550_v11 = vpop.f32.mrf.mxu1 }
0x1c8f   : > { %v17787_v14 = vadd.f32 %v9469_v24, %v17540_v25  ;;  %v9551_v13 = vadd.f32 %v9550_v11, %v17780_v1  ;;  %v9637_v37 = vpop.f32.mrf.mxu0  ;;  %v17793_v24 = vperm.slane %v12340_v20, 1  ;;  %v17795_v11 = vperm.slane %v12340_v20, 2 }
0x1c90   : > { %v9638_v54 = vadd.f32 %v9637_v37, %v17782_v46  ;;  %v9412_v63 = vpop.f32.mrf.mxu2 }
0x1c91   : > { %v9659_v9 = vmax.f32 %v9551_v13, 0.0  ;;  %v9413_v39 = vadd.f32 %v9412_v63, %v9383_v28  ;;  %v9441_v6 = vpop.f32.mrf.mxu3 }
0x1c92   : > { %v9662_v56 = vmax.f32 %v9638_v54, 0.0 }
0x1c93   : > { %v9687_v29 = vpack.c.bf16 %v9659_v9, %v9655_v7  ;;  %v9442_v26 = vadd.f32 %v9441_v6, %v9413_v39 }
0x1c94   : > { %v9690_v18 = vpack.c.bf16 %v9662_v56, %v9658_v62 }
0x1c95   : > { %v17791_v5 = vadd.f32 %v9470_v42, %v9442_v26  ;;  %9967 = vmatmul.bf16.vlgmr.msrb.gmra.mxu1 %v9687_v29 }
0x1c96   : > { %10054 = vmatmul.bf16.vlgmr.msrb.gmra.mxu0 %v9690_v18  ;;  %v9553_v25 = vpop.f32.mrf.mxu1 }
0x1c97   : > { %18573 = vst [vmem:[#allocation14_spill] sm:$0xff] %v17791_v5  ;;  %v9640_v59 = vpop.f32.mrf.mxu0  ;;  %v9554_v28 = vadd.f32 %v9553_v25, %v17780_v1 }
0x1c98   : > { %v9577_v52 = vpop.f32.mrf.mxu2  ;;  %v9641_v51 = vadd.f32 %v9640_v59, %v17782_v46 }
0x1c99   : > { %v9606_v53 = vpop.f32.mrf.mxu3  ;;  %v9578_v13 = vadd.f32 %v9577_v52, %v17793_v24  ;;  %v9663_v9 = vmax.f32 %v9554_v28, 0.0 }
0x1c9a   : > { %v9607_v54 = vadd.f32 %v9606_v53, %v17795_v11  ;;  %v9666_v62 = vmax.f32 %v9641_v51, 0.0 }
0x1c9b   : > { %v9656_v26 = vmax.f32 %v9578_v13, 0.0 }
0x1c9c   : > { %v9657_v59 = vmax.f32 %v9607_v54, 0.0 }
0x1c9e   : > { %v9555_v57 = vpop.f32.mrf.mxu1 }
0x1c9f   : > { %v9556_v42 = vadd.f32 %v9555_v57, %v17780_v1  ;;  %v9642_v37 = vpop.f32.mrf.mxu0 }
0x1ca0   : > { %v9643_v63 = vadd.f32 %v9642_v37, %v17782_v46  ;;  %v9579_v7 = vpop.f32.mrf.mxu2 }
0x1ca1   : > { %v9667_v39 = vmax.f32 %v9556_v42, 0.0  ;;  %v9580_v20 = vadd.f32 %v9579_v7, %v17793_v24  ;;  %v9608_v6 = vpop.f32.mrf.mxu3 }
0x1ca2   : > { %v9670_v56 = vmax.f32 %v9643_v63, 0.0  ;;  %v9609_v29 = vadd.f32 %v9608_v6, %v17795_v11 }
0x1ca3   : > { %v9691_v18 = vpack.c.bf16 %v9667_v39, %v9663_v9  ;;  %v9660_v25 = vmax.f32 %v9580_v20, 0.0 }
0x1ca4   : > { %v9694_v52 = vpack.c.bf16 %v9670_v56, %v9666_v62  ;;  %v9661_v57 = vmax.f32 %v9609_v29, 0.0 }
0x1ca5   : > { %v9688_v5 = vpack.c.bf16 %v9660_v25, %v9656_v26  ;;  %9972 = vmatmul.bf16.gmra.mxu1 %v9691_v18 }
0x1ca6   : > { %v9689_v53 = vpack.c.bf16 %v9661_v57, %v9657_v59  ;;  %10059 = vmatmul.bf16.gmra.mxu0 %v9694_v52  ;;  %v9558_v37 = vpop.f32.mrf.mxu1 }
0x1ca7   : > { %v9645_v28 = vpop.f32.mrf.mxu0  ;;  %9996 = vmatmul.bf16.vlgmr.msrb.gmra.mxu2 %v9688_v5  ;;  %v9559_v51 = vadd.f32 %v9558_v37, %v17780_v1 }
0x1ca8   : > { %10025 = vmatmul.bf16.vlgmr.msrb.gmra.mxu3 %v9689_v53  ;;  %v9582_v42 = vpop.f32.mrf.mxu2  ;;  %v9646_v63 = vadd.f32 %v9645_v28, %v17782_v46 }
0x1ca9   : > { %v9611_v7 = vpop.f32.mrf.mxu3  ;;  %v9583_v9 = vadd.f32 %v9582_v42, %v17793_v24  ;;  %v9671_v56 = vmax.f32 %v9559_v51, 0.0 }
0x1caa   : > { %v9612_v20 = vadd.f32 %v9611_v7, %v17795_v11  ;;  %v9674_v18 = vmax.f32 %v9646_v63, 0.0 }
0x1cab   : > { %v9664_v52 = vmax.f32 %v9583_v9, 0.0 }
0x1cac   : > { %v9665_v37 = vmax.f32 %v9612_v20, 0.0 }
0x1cae   : > { %v9560_v13 = vpop.f32.mrf.mxu1 }
0x1caf   : > { %v9561_v54 = vadd.f32 %v9560_v13, %v17780_v1  ;;  %v9647_v39 = vpop.f32.mrf.mxu0 }
0x1cb0   : > { %v9648_v6 = vadd.f32 %v9647_v39, %v17782_v46  ;;  %v9584_v62 = vpop.f32.mrf.mxu2 }
0x1cb1   : > { %v9675_v5 = vmax.f32 %v9561_v54, 0.0  ;;  %v9585_v29 = vadd.f32 %v9584_v62, %v17793_v24  ;;  %v9613_v26 = vpop.f32.mrf.mxu3 }
0x1cb2   : > { %v9678_v25 = vmax.f32 %v9648_v6, 0.0  ;;  %v9614_v59 = vadd.f32 %v9613_v26, %v17795_v11 }
0x1cb3   : > { %v9695_v57 = vpack.c.bf16 %v9675_v5, %v9671_v56  ;;  %v9668_v53 = vmax.f32 %v9585_v29, 0.0 }
0x1cb4   : > { %v9698_v28 = vpack.c.bf16 %v9678_v25, %v9674_v18  ;;  %v9669_v42 = vmax.f32 %v9614_v59, 0.0 }
0x1cb5   : > { %v9692_v13 = vpack.c.bf16 %v9668_v53, %v9664_v52  ;;  %9977 = vmatmul.bf16.gmra.mxu1 %v9695_v57 }
0x1cb6   : > { %v9693_v7 = vpack.c.bf16 %v9669_v42, %v9665_v37  ;;  %10064 = vmatmul.bf16.gmra.mxu0 %v9698_v28  ;;  %v9563_v39 = vpop.f32.mrf.mxu1 }
0x1cb7   : > { %v9650_v51 = vpop.f32.mrf.mxu0  ;;  %10001 = vmatmul.bf16.gmra.mxu2 %v9692_v13  ;;  %v9564_v63 = vadd.f32 %v9563_v39, %v17780_v1 }
0x1cb8   : > { %10030 = vmatmul.bf16.gmra.mxu3 %v9693_v7  ;;  %v9587_v54 = vpop.f32.mrf.mxu2  ;;  %v9651_v6 = vadd.f32 %v9650_v51, %v17782_v46 }
0x1cb9   : > { %v9616_v62 = vpop.f32.mrf.mxu3  ;;  %v9588_v56 = vadd.f32 %v9587_v54, %v17793_v24  ;;  %v9679_v25 = vmax.f32 %v9564_v63, 0.0 }
0x1cba   : > { %v9617_v29 = vadd.f32 %v9616_v62, %v17795_v11  ;;  %v9682_v53 = vmax.f32 %v9651_v6, 0.0 }
0x1cbb   : > { %v9672_v42 = vmax.f32 %v9588_v56, 0.0 }
0x1cbc   : > { %v9673_v39 = vmax.f32 %v9617_v29, 0.0 }
0x1cbe   : > { %v9565_v9 = vpop.f32.mrf.mxu1 }
0x1cbf   : > { %v9566_v20 = vadd.f32 %v9565_v9, %v17780_v1  ;;  %v9652_v5 = vpop.f32.mrf.mxu0 }
0x1cc0   : > { %v9653_v26 = vadd.f32 %v9652_v5, %v17782_v46  ;;  %v9589_v18 = vpop.f32.mrf.mxu2 }
0x1cc1   : > { %v9683_v59 = vmax.f32 %v9566_v20, 0.0  ;;  %v9590_v52 = vadd.f32 %v9589_v18, %v17793_v24  ;;  %v9618_v57 = vpop.f32.mrf.mxu3 }
0x1cc2   : > { %v9686_v37 = vmax.f32 %v9653_v26, 0.0  ;;  %v9619_v28 = vadd.f32 %v9618_v57, %v17795_v11 }
0x1cc3   : > { %v9699_v13 = vpack.c.bf16 %v9683_v59, %v9679_v25  ;;  %v9676_v7 = vmax.f32 %v9590_v52, 0.0 }
0x1cc4   : > { %v9702_v1 = vpack.c.bf16 %v9686_v37, %v9682_v53  ;;  %v9677_v51 = vmax.f32 %v9619_v28, 0.0  ;;  %v8496_v28 = vadd.f32 %v17356_v21, %v17344_v34  ;;  %v8501_v21 = vadd.f32 %v17372_v45, %v17360_v43 }
0x1cc5   : > { %v9696_v54 = vpack.c.bf16 %v9676_v7, %v9672_v42  ;;  %9982 = vmatmul.bf16.gmra.mxu1 %v9699_v13 }
0x1cc6   : > { %v9697_v62 = vpack.c.bf16 %v9677_v51, %v9673_v39  ;;  %10069 = vmatmul.bf16.gmra.mxu0 %v9702_v1  ;;  %v8525_v42 = vadd.f32 %v17358_v2, %v8496_v28 }
0x1cc7   : > { %10006 = vmatmul.bf16.gmra.mxu2 %v9696_v54 }
0x1cc8   : > { %10035 = vmatmul.bf16.gmra.mxu3 %v9697_v62  ;;  %v9592_v46 = vpop.f32.mrf.mxu2 }
0x1cc9   : > { %v9621_v63 = vpop.f32.mrf.mxu3  ;;  %v9593_v9 = vadd.f32 %v9592_v46, %v17793_v24 }
0x1cca   : > { %v9622_v6 = vadd.f32 %v9621_v63, %v17795_v11  ;;  %v17834_v63 = vld [vmem:[%s18446_s13 + $0x1] ss:$0 sm:$0xff] }
0x1ccb   : > { %v9680_v26 = vmax.f32 %v9593_v9, 0.0 }
0x1ccc   : > { %v9681_v25 = vmax.f32 %v9622_v6, 0.0 }
0x1cd0   : > { %v9594_v20 = vpop.f32.mrf.mxu2 }
0x1cd1   : > { %v9595_v56 = vadd.f32 %v9594_v20, %v17793_v24  ;;  %v9623_v5 = vpop.f32.mrf.mxu3  ;;  %v8554_v24 = vadd.f32 %v17346_v38, %v8525_v42  ;;  %v8506_v42 = vadd.f32 %v17388_v32, %v17376_v61 }
0x1cd2   : > { %v9624_v29 = vadd.f32 %v9623_v5, %v17795_v11 }
0x1cd3   : > { %v9684_v18 = vmax.f32 %v9595_v56, 0.0  ;;  %v8775_v39 = vadd.f32 %v17406_v47, %v8554_v24  ;;  %v8530_v56 = vadd.f32 %v17374_v33, %v8501_v21 }
0x1cd4   : > { %v9685_v59 = vmax.f32 %v9624_v29, 0.0 }
0x1cd5   : > { %v9700_v52 = vpack.c.bf16 %v9684_v18, %v9680_v26  ;;  %v8804_v54 = vadd.f32 %v17418_v0, %v8775_v39  ;;  %v8535_v39 = vadd.f32 %v17390_v8, %v8506_v42  ;;  %v18578_v42 = vld [vmem:[#allocation31_spill] sm:$0xff] }
0x1cd6   : > { %v9701_v57 = vpack.c.bf16 %v9685_v59, %v9681_v25 }
0x1cd7   : > { %10011 = vmatmul.bf16.gmra.mxu2 %v9700_v52  ;;  %v8833_v38 = vadd.f32 %v17426_v23, %v8804_v54 }
0x1cd8   : > { %10040 = vmatmul.bf16.gmra.mxu3 %v9701_v57 }
0x1cd9   : > { %v8862_v5 = vadd.f32 %v17408_v17, %v8833_v38 }
0x1cdb   : > { %v9474_v43 = vadd.f32 %v17693_v40, %v8862_v5 }
0x1d12   : > { %v9968_v53 = vpop.f32.mrf.mxu1 }
0x1d13   : > { %v10055_v37 = vpop.f32.mrf.mxu0 }
0x1d1a   : > { %v9970_v13 = vpop.f32.mrf.mxu1 }
0x1d1b   : > { %v10057_v7 = vpop.f32.mrf.mxu0 }
0x1d22   : > { %v9973_v34 = vpop.f32.mrf.mxu1 }
0x1d23   : > { %v10060_v20 = vpop.f32.mrf.mxu0 }
0x1d2a   : > { %v9997_v11 = vpop.f32.mrf.mxu2  ;;  %v9975_v25 = vpop.f32.mrf.mxu1 }
0x1d2b   : > { %v9998_v1 = vadd.f32 %v9997_v11, %v9968_v53  ;;  %v10026_v51 = vpop.f32.mrf.mxu3 }
0x1d2d   : > { %v10027_v62 = vadd.f32 %v10026_v51, %v9998_v1 }
0x1d2f   : > { %v10056_v46 = vadd.f32 %v10055_v37, %v10027_v62  ;;  %v10062_v37 = vpop.f32.mrf.mxu0  ;;  %v8564_v62 = vadd.f32 %v17378_v50, %v8535_v39  ;;  %v10308_v50 = vlaneseq }
0x1d31   : > { %v10075_v2 = vadd.f32 %v10056_v46, %v17685_v55  ;;  %v8559_v55 = vadd.f32 %v17362_v58, %v8530_v56  ;;  %v8785_v8 = vadd.f32 %v17480_v12, %v8564_v62  ;;  %v8511_v12 = vadd.f32 %v17402_v35, %v17392_v4 }
0x1d32   : > { %v9999_v47 = vpop.f32.mrf.mxu2  ;;  %v10309_v5 = vshrl.u32 %v10308_v50, 7 }
0x1d33   : > { %v10000_v9 = vadd.f32 %v9999_v47, %v9970_v13  ;;  %v10028_v6 = vpop.f32.mrf.mxu3  ;;  %v10088_v0 = vadd.f32 %v17834_v63, %v10075_v2  ;;  %v8780_v33 = vadd.f32 %v17428_v22, %v8559_v55 }
0x1d34   : > { %13094 = vset.pattern.permute.xlu2 %v10309_v5  ;;  %13095 = vset.pattern.permute.xlu1 %v10309_v5 }
0x1d35   : > { %v10029_v29 = vadd.f32 %v10028_v6, %v10000_v9  ;;  %v17844_v26 = vadd.f32 %v10088_v0, %v16749_v15  ;;  %v8809_v15 = vadd.f32 %v17464_v16, %v8780_v33  ;;  %13096 = vset.pattern.permute.xlu0 %v10309_v5  ;;  %v18576_v33 = vld [vmem:[#allocation28_spill] sm:$0xff] }
0x1d37   : > { %v10058_v45 = vadd.f32 %v10057_v7, %v10029_v29  ;;  %v10108_v23 = vsel %vm518_vm0, %v17844_v26, 0.0  ;;  %v8838_v22 = vadd.f32 %v17475_v60, %v8809_v15 }
0x1d38   : > { %10109 = vadd.xlane.f32.xlu2 %v10108_v23  ;;  %v18574_v23 = vld [vmem:[#allocation23_spill] sm:$0xff] }
0x1d39   : > { %v10076_v18 = vadd.f32 %v10058_v45, %v9474_v43  ;;  %v8867_v1 = vadd.f32 %v17436_v3, %v8838_v22  ;;  %v8540_v45 = vadd.f32 %v17404_v48, %v8511_v12  ;;  %v18577_v48 = vld [vmem:[#allocation10_spill] sm:$0xff]  ;;  %v17920_v12 = vld [vmem:[%s484_s26] sm:$0xff]  ;;  %s10613_s26 = sshll.u32 %s10609_s20, 4  ;;  %s10614_s26 = int_to_ptr.hbm [resolvable:$true] %s10613_s26 }
0x1d3a   : > { %v10002_v59 = vpop.f32.mrf.mxu2  ;;  %s13471_s17 = sshra.s32 %s10614_s26, 4  ;;  %s13472_s17 = int_to_ptr.hbm [resolvable:$true] %s13471_s17 }
0x1d3b   : > { %v10003_v52 = vadd.f32 %v10002_v59, %v9973_v34  ;;  %v10031_v17 = vpop.f32.mrf.mxu3  ;;  %v10089_v57 = vadd.f32 %v17834_v63, %v10076_v18  ;;  %v9476_v61 = vadd.f32 %v17746_v49, %v8867_v1  ;;  %s13473_s0 = scalar_lea.hbm %s13472_s17, 8  ;;  %p13478_p1 = scmp.lt.s32.totalorder %s13472_s17, %s18447_s14 }
0x1d3c   : > { %p13474_p12 = scmp.ne.s32.totalorder %s13472_s17, %s13473_s0  ;;  %p13479_p2 = scmp.lt.s32.totalorder %s13477_s22, %s13473_s0 }
0x1d3d   : > { %v10032_v53 = vadd.f32 %v10031_v17, %v10003_v52  ;;  %v17854_v40 = vadd.f32 %v10089_v57, %v16752_v41  ;;  %v9978_v41 = vpop.f32.mrf.mxu1  ;;  %v8569_v52 = vadd.f32 %v18576_v33, %v8540_v45 }
0x1d3e   : > { %p13475_p13 = pnand %p13474_p12, %p13649_p5  ;;  %p13480_p3 = por %p13479_p2, %p13478_p1 }
0x1d3f   : > { %v10061_v28 = vadd.f32 %v10060_v20, %v10032_v53  ;;  %v10111_v58 = vsel %vm518_vm0, %v17854_v40, 0.0  ;;  %v8790_v15 = vadd.f32 %v18577_v48, %v8569_v52 }
0x1d40   : > { %10112 = vadd.xlane.f32.xlu1 %v10111_v58  ;;  %p13476_p0 = pneg %p13475_p13 }
0x1d41   : > { %v10077_v13 = vadd.f32 %v10061_v28, %v17726_v10  ;;  %v10065_v10 = vpop.f32.mrf.mxu0 }
0x1d42   : > { %v10004_v24 = vpop.f32.mrf.mxu2  ;;  %p13481_p4 = pnand %p13480_p3, %p13476_p0 }
0x1d43   : > { %v10005_v7 = vadd.f32 %v10004_v24, %v9975_v25  ;;  %v10033_v16 = vpop.f32.mrf.mxu3  ;;  %v10090_v11 = vadd.f32 %v17834_v63, %v10077_v13  ;;  %v18575_v25 = vld [vmem:[#allocation18_spill] sm:$0xff] }
0x1d44   : > { %v18579_v13 = vld [vmem:[#allocation26_spill] sm:$0xff] }
0x1d45   : > { %v10034_v51 = vadd.f32 %v10033_v16, %v10005_v7  ;;  %v17866_v54 = vadd.f32 %v10090_v11, %v16775_v36  ;;  %v8814_v36 = vadd.f32 %v17517_v19, %v8785_v8  ;;  %v9980_v47 = vpop.f32.mrf.mxu1  ;;  %v18580_v11 = vld [vmem:[#allocation12_spill] sm:$0xff] }
0x1d47   : > { %v10063_v32 = vadd.f32 %v10062_v37, %v10034_v51  ;;  %v10114_v60 = vsel %vm518_vm0, %v17866_v54, 0.0  ;;  %v8843_v0 = vadd.f32 %v17525_v27, %v8814_v36 }
0x1d48   : > { %10115 = vadd.xlane.f32.xlu0 %v10114_v60 }
0x1d49   : > { %v10078_v46 = vadd.f32 %v10063_v32, %v9476_v61  ;;  %v10067_v56 = vpop.f32.mrf.mxu0  ;;  %v8872_v55 = vadd.f32 %v18574_v23, %v8843_v0  ;;  %v10314_v0 = vperm.slane %v17920_v12, 1 }
0x1d4a   : > { %v10007_v34 = vpop.f32.mrf.mxu2 }
0x1d4b   : > { %v10008_v21 = vadd.f32 %v10007_v34, %v9978_v41  ;;  %v10036_v3 = vpop.f32.mrf.mxu3  ;;  %v10091_v38 = vadd.f32 %v17834_v63, %v10078_v46  ;;  %v9478_v35 = vadd.f32 %v17775_v31, %v8872_v55  ;;  %v8819_v31 = vadd.f32 %v18578_v42, %v8790_v15  ;;  %v18582_v34 = vld [vmem:[#allocation27_spill] sm:$0xff] }
0x1d4d   : > { %v10037_v2 = vadd.f32 %v10036_v3, %v10008_v21  ;;  %v17876_v49 = vadd.f32 %v10091_v38, %v16778_v30  ;;  %v9983_v59 = vpop.f32.mrf.mxu1  ;;  %v8848_v41 = vadd.f32 %v18580_v11, %v8819_v31  ;;  %v18583_v3 = vld [vmem:[#allocation14_spill] sm:$0xff] }
0x1d4f   : > { %v10066_v9 = vadd.f32 %v10065_v10, %v10037_v2  ;;  %v10117_v6 = vsel %vm518_vm0, %v17876_v49, 0.0  ;;  %v18581_v10 = vld [vmem:[#allocation11_spill] sm:$0xff] }
0x1d50   : > { %10118 = vadd.xlane.f32.xlu1 %v10117_v6  ;;  %v8877_v62 = vadd.f32 %v18581_v10, %v8848_v41  ;;  %v10356_v10 = vperm.slane %v17920_v12, 7 }
0x1d51   : > { %v10079_v20 = vadd.f32 %v10066_v9, %v17761_v44  ;;  %v10070_v58 = vpop.f32.mrf.mxu0  ;;  %v18584_v9 = vld [vmem:[#allocation19_spill] sm:$0xff] }
0x1d52   : > { %v10009_v19 = vpop.f32.mrf.mxu2  ;;  %v9480_v38 = vadd.f32 %v18583_v3, %v8877_v62  ;;  %v10349_v62 = vperm.slane %v17920_v12, 6 }
0x1d53   : > { %v10010_v29 = vadd.f32 %v10009_v19, %v9980_v47  ;;  %v10038_v30 = vpop.f32.mrf.mxu3  ;;  %v10092_v43 = vadd.f32 %v17834_v63, %v10079_v20  ;;  %v10321_v20 = vperm.slane %v17920_v12, 2  ;;  %v18585_v19 = vld [vmem:[#allocation9_spill] sm:$0xff] }
0x1d55   : > { %v10039_v18 = vadd.f32 %v10038_v30, %v10010_v29  ;;  %v17888_v4 = vadd.f32 %v10092_v43, %v18575_v25  ;;  %v9985_v1 = vpop.f32.mrf.mxu1 }
0x1d57   : > { %v10068_v27 = vadd.f32 %v10067_v56, %v10039_v18  ;;  %v10120_v44 = vsel %vm518_vm0, %v17888_v4, 0.0 }
0x1d58   : > { %10121 = vadd.xlane.f32.xlu0 %v10120_v44 }
0x1d59   : > { %v10080_v17 = vadd.f32 %v10068_v27, %v9478_v35  ;;  %v10072_v21 = vpop.f32.mrf.mxu0 }
0x1d5a   : > { %v10012_v57 = vpop.f32.mrf.mxu2 }
0x1d5b   : > { %v10013_v53 = vadd.f32 %v10012_v57, %v9983_v59  ;;  %v10041_v37 = vpop.f32.mrf.mxu3  ;;  %v10093_v28 = vadd.f32 %v17834_v63, %v10080_v17 }
0x1d5d   : > { %v10042_v22 = vadd.f32 %v10041_v37, %v10013_v53  ;;  %v17898_v24 = vadd.f32 %v10093_v28, %v18579_v13  ;;  %v10335_v13 = vperm.slane %v17920_v12, 4 }
0x1d5f   : > { %v10071_v7 = vadd.f32 %v10070_v58, %v10042_v22  ;;  %v10123_v16 = vsel %vm518_vm0, %v17898_v24, 0.0  ;;  %v10342_v22 = vperm.slane %v17920_v12, 5 }
0x1d60   : > { %10124 = vadd.xlane.f32.xlu2 %v10123_v16 }
0x1d61   : > { %v10081_v39 = vadd.f32 %v10071_v7, %v17787_v14  ;;  %v10307_v7 = vperm.slane %v17920_v12, 0 }
0x1d62   : > { %v10014_v51 = vpop.f32.mrf.mxu2 }
0x1d63   : > { %v10015_v61 = vadd.f32 %v10014_v51, %v9985_v1  ;;  %v10094_v32 = vadd.f32 %v17834_v63, %v10081_v39  ;;  %v10043_v60 = vpop.f32.mrf.mxu3 }
0x1d65   : > { %v10044_v46 = vadd.f32 %v10043_v60, %v10015_v61  ;;  %v17908_v8 = vadd.f32 %v10094_v32, %v18582_v34 }
0x1d67   : > { %v10073_v36 = vadd.f32 %v10072_v21, %v10044_v46  ;;  %v10126_v14 = vsel %vm518_vm0, %v17908_v8, 0.0 }
0x1d68   : > { %10127 = vadd.xlane.f32.xlu1 %v10126_v14 }
0x1d69   : > { %v10082_v2 = vadd.f32 %v10073_v36, %v9480_v38 }
0x1d6b   : > { %v10095_v47 = vadd.f32 %v17834_v63, %v10082_v2  ;;  %v10427_v63 = vsel %vm573_vm1, %v17920_v12, 0.0 }
0x1d6d   : > { %v10103_v6 = vadd.f32 %v10095_v47, %v18584_v9 }
0x1d6f   : > { %v10129_v50 = vsel %vm518_vm0, %v10103_v6, 0.0 }
0x1d70   : > { %10130 = vadd.xlane.f32.xlu0 %v10129_v50 }
0x1d78   : > { %10319 = vperm.xlu2 %13094, %v10314_v0   ;;  %10428 = vadd.xlane.f32.xlu0 %v10427_v63 }
0x1d81   : > { %10326 = vperm.xlu1 %13095, %v10321_v20  }
0x1dab   : > { %v10110_v56 = vpop.xlane.xlu2 %10109 }
0x1dac   : > { %v10132_v5 = vmul.f32 %v10110_v56, %v18585_v19 }
0x1dae   : > { %v17928_v29 = vsub.f32 %v17844_v26, %v10132_v5 }
0x1db0   : > { %v10148_v30 = vmul.f32 %v17928_v29, %v17928_v29 }
0x1db2   : > { %v10156_v43 = vsel %vm518_vm0, %v10148_v30, 0.0 }
0x1db3   : > { %v10113_v45 = vpop.xlane.xlu1 %10112  ;;  %10157 = vadd.xlane.f32.xlu0 %v10156_v43 }
0x1db4   : > { %v10133_v23 = vmul.f32 %v10113_v45, %v18585_v19 }
0x1db6   : > { %v17935_v55 = vsub.f32 %v17854_v40, %v10133_v23 }
0x1db8   : > { %v10149_v18 = vmul.f32 %v17935_v55, %v17935_v55 }
0x1dba   : > { %v10159_v25 = vsel %vm518_vm0, %v10149_v18, 0.0 }
0x1dbb   : > { %v10116_v35 = vpop.xlane.xlu0 %10115  ;;  %10160 = vadd.xlane.f32.xlu2 %v10159_v25 }
0x1dbc   : > { %v10134_v26 = vmul.f32 %v10116_v35, %v18585_v19 }
0x1dbe   : > { %v17942_v27 = vsub.f32 %v17866_v54, %v10134_v26 }
0x1dc0   : > { %v10150_v44 = vmul.f32 %v17942_v27, %v17942_v27 }
0x1dc2   : > { %v10162_v59 = vsel %vm518_vm0, %v10150_v44, 0.0 }
0x1dc3   : > { %v10119_v33 = vpop.xlane.xlu1 %10118  ;;  %10163 = vadd.xlane.f32.xlu1 %v10162_v59 }
0x1dc4   : > { %v10135_v40 = vmul.f32 %v10119_v33, %v18585_v19 }
0x1dc6   : > { %v17949_v52 = vsub.f32 %v17876_v49, %v10135_v40 }
0x1dc8   : > { %v10151_v17 = vmul.f32 %v17949_v52, %v17949_v52 }
0x1dca   : > { %v10165_v57 = vsel %vm518_vm0, %v10151_v17, 0.0 }
0x1dcb   : > { %v10122_v48 = vpop.xlane.xlu0 %10121  ;;  %10166 = vadd.xlane.f32.xlu2 %v10165_v57 }
0x1dcc   : > { %v10136_v54 = vmul.f32 %v10122_v48, %v18585_v19 }
0x1dce   : > { %v17956_v15 = vsub.f32 %v17888_v4, %v10136_v54  ;;  %v10328_v4 = vperm.slane %v17920_v12, 3 }
0x1dd0   : > { %v10152_v53 = vmul.f32 %v17956_v15, %v17956_v15 }
0x1dd2   : > { %v10168_v37 = vsel %vm518_vm0, %v10152_v53, 0.0 }
0x1dd3   : > { %v10125_v28 = vpop.xlane.xlu2 %10124  ;;  %10169 = vadd.xlane.f32.xlu1 %v10168_v37 }
0x1dd4   : > { %v10137_v49 = vmul.f32 %v10125_v28, %v18585_v19 }
0x1dd6   : > { %v17963_v58 = vsub.f32 %v17898_v24, %v10137_v49 }
0x1dd8   : > { %v10153_v42 = vmul.f32 %v17963_v58, %v17963_v58 }
0x1dda   : > { %v10171_v31 = vsel %vm518_vm0, %v10153_v42, 0.0 }
0x1ddb   : > { %10172 = vadd.xlane.f32.xlu0 %v10171_v31  ;;  %v10128_v24 = vpop.xlane.xlu1 %10127  ;;  %v17987_v46 = vpop.permute.xlu2 %10319 }
0x1ddc   : > { %v10138_v11 = vmul.f32 %v10128_v24, %v18585_v19 }
0x1dde   : > { %v17975_v39 = vsub.f32 %v17908_v8, %v10138_v11 }
0x1de0   : > { %v10154_v51 = vmul.f32 %v17975_v39, %v17975_v39 }
0x1de2   : > { %v10174_v32 = vsel %vm518_vm0, %v10154_v51, 0.0 }
0x1de3   : > { %10333 = vperm.xlu2 %13094, %v10328_v4   ;;  %v10131_v16 = vpop.xlane.xlu0 %10130 }
0x1de4   : > { %v10139_v41 = vmul.f32 %v10131_v16, %v18585_v19 }
0x1de6   : > { %v17977_v1 = vsub.f32 %v10103_v6, %v10139_v41 }
0x1de8   : > { %v10155_v61 = vmul.f32 %v17977_v1, %v17977_v1 }
0x1dea   : > { %v10177_v60 = vsel %vm518_vm0, %v10155_v61, 0.0 }
0x1deb   : > { %10347 = vperm.xlu2 %13094, %v10342_v22   ;;  %v10429_v21 = vpop.xlane.xlu0 %10428 }
0x1dec   : > { %10340 = vperm.xlu1 %13095, %v10335_v13   ;;  %v18001_v23 = vmax.f32 %v10429_v21, 1e-09 }
0x1dee   : > { %v18013_v59 = vrot.slane %v18001_v23, 1 }
0x1def   : > { %10312 = vperm.xlu0 %13096, %v10307_v7   ;;  %v18038_v7 = vrot.slane %v18001_v23, 2 }
0x1df0   : > { %vm10467_vm13 = vweird.f32 %v18013_v59 }
0x1df3   : > { %v17989_v8 = vpop.permute.xlu1 %10326 }
0x1e14   : > { %10175 = vadd.xlane.f32.xlu2 %v10174_v32  ;;  %v18046_v32 = vrot.slane %v18001_v23, 3 }
0x1e16   : > { %10178 = vadd.xlane.f32.xlu1 %v10177_v60 }
0x1e26   : > { %v10158_v2 = vpop.xlane.xlu0 %10157 }
0x1e27   : > { %v10180_v12 = vmul.f32 %v10158_v2, %v18585_v19 }
0x1e29   : > { %v17997_v5 = vadd.f32 1e-05, %v10180_v12 }
0x1e2b   : > { %vm10202_vm10 = vweird.f32 %v17997_v5 }
0x1e2c   : > { %10361 = vperm.xlu2 %13094, %v10356_v10   ;;  %v18053_v10 = vld [vmem:[%s18441_s8 + $0x1] ss:$0 sm:$0xff] }
0x1e2e   : > { %v10161_v34 = vpop.xlane.xlu2 %10160 }
0x1e2f   : > { %10354 = vperm.xlu1 %13095, %v10349_v62   ;;  %v10181_v3 = vmul.f32 %v10161_v34, %v18585_v19 }
0x1e31   : > { %v10189_v38 = vadd.f32 1e-05, %v10181_v3 }
0x1e33   : > { %13417 = vrsqrt.f32 %v10189_v38  ;;  %vm10212_vm6 = vweird.f32 %v10189_v38 }
0x1e36   : > { %v10164_v36 = vpop.xlane.xlu1 %10163 }
0x1e37   : > { %v10182_v14 = vmul.f32 %v10164_v36, %v18585_v19 }
0x1e39   : > { %v10190_v9 = vadd.f32 1e-05, %v10182_v14  ;;  %v13418_v6 = vpop.eup %13417  ;;  %v18063_v14 = vld [vmem:[%s18442_s9 + $0x1] ss:$0 sm:$0xff] }
0x1e3a   : > { %v10207_v0 = vmul.f32 %v13418_v6, %v10189_v38  ;;  %vm10213_vm1 = vweird.f32 %v13418_v6 }
0x1e3b   : > { %13419 = vrsqrt.f32 %v10190_v9  ;;  %vm10214_vm7 = vmor %vm10212_vm6, %vm10213_vm1  ;;  %vm10222_vm9 = vweird.f32 %v10190_v9 }
0x1e3c   : > { %v10208_v43 = vmul.f32 %v13418_v6, %v10207_v0 }
0x1e3e   : > { %v10167_v47 = vpop.xlane.xlu2 %10166  ;;  %v10209_v35 = vmul.f32 0.5, %v10208_v43 }
0x1e3f   : > { %v10183_v50 = vmul.f32 %v10167_v47, %v18585_v19 }
0x1e40   : > { %v10210_v40 = vsub.f32 1.5, %v10209_v35 }
0x1e41   : > { %v17995_v56 = vadd.f32 1e-05, %v10183_v50  ;;  %v18003_v18 = vpop.eup %13419 }
0x1e42   : > { %v10217_v44 = vmul.f32 %v18003_v18, %v10190_v9  ;;  %v10211_v53 = vmul.f32 %v13418_v6, %v10210_v40  ;;  %vm10223_vm8 = vweird.f32 %v18003_v18 }
0x1e43   : > { %13421 = vrsqrt.f32 %v17995_v56  ;;  %vm10224_vm2 = vmor %vm10222_vm9, %vm10223_vm8  ;;  %vm10232_vm11 = vweird.f32 %v17995_v56 }
0x1e44   : > { %13423 = vrsqrt.f32 %v17997_v5  ;;  %v10218_v57 = vmul.f32 %v18003_v18, %v10217_v44  ;;  %v10215_v22 = vsel %vm10214_vm7, %v13418_v6, %v10211_v53 }
0x1e45   : > { %v10277_v41 = vmul.f32 %v10215_v22, %v17935_v55 }
0x1e46   : > { %v10170_v20 = vpop.xlane.xlu1 %10169  ;;  %v10219_v28 = vmul.f32 0.5, %v10218_v57  ;;  %v18068_v50 = vpop.permute.xlu2 %10333 }
0x1e47   : > { %v10184_v30 = vmul.f32 %v10170_v20, %v18585_v19  ;;  %v10288_v21 = vmul.f32 %v18053_v10, %v10277_v41  ;;  %v18075_v20 = vrot.slane %v18001_v23, 4 }
0x1e48   : > { %v10220_v24 = vsub.f32 1.5, %v10219_v28 }
0x1e49   : > { %v18007_v25 = vadd.f32 1e-05, %v10184_v30  ;;  %v18016_v33 = vpop.eup %13421  ;;  %v10299_v12 = vadd.f32 %v18063_v14, %v10288_v21 }
0x1e4a   : > { %v18019_v17 = vpop.eup %13423  ;;  %v10227_v48 = vmul.f32 %v18016_v33, %v17995_v56  ;;  %v10221_v62 = vmul.f32 %v18003_v18, %v10220_v24  ;;  %vm10233_vm3 = vweird.f32 %v18016_v33 }
0x1e4b   : > { %13425 = vrsqrt.f32 %v18007_v25  ;;  %v10197_v54 = vmul.f32 %v18019_v17, %v17997_v5  ;;  %vm10203_vm4 = vweird.f32 %v18019_v17  ;;  %vm18086_vm12 = vmor %vm10232_vm11, %vm10233_vm3  ;;  %v10473_v5 = vand.u32 2147483648, %v18013_v59 }
0x1e4c   : > { %v10228_v31 = vmul.f32 %v18016_v33, %v10227_v48  ;;  %v10225_v2 = vsel %vm10224_vm2, %v18003_v18, %v10221_v62  ;;  %vm18094_vm15 = vmor %vm10202_vm10, %vm10203_vm4  ;;  %v10364_v40 = vmul.f32 %v17987_v46, %v10299_v12  ;;  %vm10242_vm6 = vweird.f32 %v18007_v25 }
0x1e4d   : > { %v10198_v4 = vmul.f32 %v18019_v17, %v10197_v54  ;;  %v10278_v30 = vmul.f32 %v10225_v2, %v17942_v27  ;;  %v10471_v27 = vand.u32 2147483647, %v18013_v59  ;;  %vm10482_vm4 = vweird.f32 %v18038_v7 }
0x1e4e   : > { %v10173_v63 = vpop.xlane.xlu0 %10172  ;;  %v10229_v51 = vmul.f32 0.5, %v10228_v31  ;;  %v18133_v24 = vpop.permute.xlu2 %10347  ;;  %v10503_v2 = vand.u32 2147483648, %v18046_v32  ;;  %v10501_v12 = vand.u32 2147483647, %v18046_v32 }
0x1e4f   : > { %v10185_v45 = vmul.f32 %v10173_v63, %v18585_v19  ;;  %v10199_v61 = vmul.f32 0.5, %v10198_v4  ;;  %v10289_v54 = vmul.f32 %v18053_v10, %v10278_v30  ;;  %vm18142_vm3 = vcmp.eq.f32.partialorder %v10471_v27, 8.507059e+37 }
0x1e50   : > { %v10230_v3 = vsub.f32 1.5, %v10229_v51 }
0x1e51   : > { %v18009_v26 = vadd.f32 1e-05, %v10185_v45  ;;  %v18027_v37 = vpop.eup %13425  ;;  %v10200_v38 = vsub.f32 1.5, %v10199_v61 }
0x1e52   : > { %v10237_v13 = vmul.f32 %v18027_v37, %v18007_v25  ;;  %v10231_v0 = vmul.f32 %v18016_v33, %v10230_v3  ;;  %vm10243_vm5 = vweird.f32 %v18027_v37  ;;  %v10300_v25 = vadd.f32 %v18063_v14, %v10289_v54 }
0x1e53   : > { %13427 = vrsqrt.f32 %v18009_v26  ;;  %v10201_v63 = vmul.f32 %v18019_v17, %v10200_v38  ;;  %vm18125_vm8 = vmor %vm10242_vm6, %vm10243_vm5  ;;  %vm10252_vm9 = vweird.f32 %v18009_v26  ;;  %vm10512_vm5 = vweird.f32 %v18075_v20 }
0x1e54   : > { %13429 = vrcp.f32 %v18013_v59  ;;  %v10238_v60 = vmul.f32 %v18027_v37, %v10237_v13  ;;  %v10235_v57 = vsel %vm18086_vm12, %v18016_v33, %v10231_v0  ;;  %vm10497_vm12 = vweird.f32 %v18046_v32 }
0x1e55   : > { %13431 = vrcp.f32 %v18038_v7  ;;  %v10205_v28 = vsel %vm18094_vm15, %v18019_v17, %v10201_v63  ;;  %v10279_v4 = vmul.f32 %v10235_v57, %v17949_v52  ;;  %v10378_v17 = vsel %vm518_vm0, %v10364_v40, 0.0 }
0x1e56   : > { %13433 = vrcp.f32 %v18046_v32  ;;  %v10239_v36 = vmul.f32 0.5, %v10238_v60  ;;  %v10276_v52 = vmul.f32 %v10205_v28, %v17928_v29  ;;  %v10379_v62 = vrot.slane %v10378_v17, 4 }
0x1e57   : > { %13435 = vrcp.f32 %v18075_v20  ;;  %v10486_v63 = vand.u32 2147483647, %v18038_v7  ;;  %v10504_v40 = vor.u32 1.1754944e-38, %v10503_v2  ;;  %vm18206_vm15 = vcmp.eq.f32.partialorder %v10501_v12, 8.507059e+37 }
0x1e58   : > { %v10240_v43 = vsub.f32 1.5, %v10239_v36  ;;  %13437 = vrcp.f32 %v18001_v23  ;;  %v10287_v21 = vmul.f32 %v18053_v10, %v10276_v52 }
0x1e59   : > { %v18029_v49 = vpop.eup %13427 }
0x1e5a   : > { %v18031_v42 = vpop.eup %13429  ;;  %v10247_v16 = vmul.f32 %v18029_v49, %v18009_v26  ;;  %v10241_v53 = vmul.f32 %v18027_v37, %v10240_v43  ;;  %vm10253_vm1 = vweird.f32 %v18029_v49  ;;  %v10474_v26 = vor.u32 1.1754944e-38, %v10473_v5 }
0x1e5b   : > { %v10463_v11 = vmul.f32 %v18031_v42, %v18013_v59  ;;  %v18066_v6 = vpop.eup %13431  ;;  %vm10468_vm14 = vweird.f32 %v18031_v42  ;;  %vm18135_vm2 = vmor %vm10252_vm9, %vm10253_vm1  ;;  %v10298_v43 = vadd.f32 %v18063_v14, %v10287_v21  ;;  %vm18250_vm9 = vcmp.eq.f32.partialorder %v10486_v63, 8.507059e+37 }
0x1e5c   : > { %v10248_v55 = vmul.f32 %v18029_v49, %v10247_v16  ;;  %v10478_v18 = vmul.f32 %v18066_v6, %v18038_v7  ;;  %v18084_v35 = vpop.eup %13433  ;;  %vm18120_vm7 = vmor %vm10467_vm13, %vm10468_vm14  ;;  %v10245_v16 = vsel %vm18125_vm8, %v18027_v37, %v10241_v53  ;;  %v10290_v37 = vmul.f32 %v18053_v10, %v10279_v4 }
0x1e5d   : > { %v10464_v34 = vsub.f32 1.0, %v10463_v11  ;;  %v10493_v46 = vmul.f32 %v18084_v35, %v18046_v32  ;;  %v18146_v29 = vpop.eup %13435  ;;  %vm10483_vm10 = vweird.f32 %v18066_v6  ;;  %vm10498_vm13 = vweird.f32 %v18084_v35 }
0x1e5e   : > { %v10249_v47 = vmul.f32 0.5, %v10248_v55  ;;  %v10479_v33 = vsub.f32 1.0, %v10478_v18  ;;  %v10341_v55 = vpop.permute.xlu1 %10340  ;;  %v18168_v36 = vpop.eup %13437  ;;  %vm18178_vm11 = vmor %vm10482_vm4, %vm10483_vm10  ;;  %vm10513_vm1 = vweird.f32 %v18146_v29 }
0x1e5f   : > { %v10465_v9 = vmul.f32 %v18031_v42, %v10464_v34  ;;  %v10494_v41 = vsub.f32 1.0, %v10493_v46  ;;  %v10280_v34 = vmul.f32 %v10245_v16, %v17956_v15  ;;  %v10448_v5 = vmul.f32 %v18168_v36, %v18001_v23  ;;  %vm18202_vm14 = vmor %vm10497_vm12, %vm10498_vm13 }
0x1e60   : > { %v10250_v45 = vsub.f32 1.5, %v10249_v47  ;;  %v10480_v60 = vmul.f32 %v18066_v6, %v10479_v33  ;;  %vm18239_vm6 = vmor %vm10512_vm5, %vm10513_vm1  ;;  %vm10453_vm8 = vweird.f32 %v18168_v36  ;;  %v10456_v46 = vand.u32 2147483647, %v18001_v23 }
0x1e61   : > { %v10466_v48 = vadd.f32 %v18031_v42, %v10465_v9  ;;  %v10495_v15 = vmul.f32 %v18084_v35, %v10494_v41  ;;  %v10380_v9 = vadd.f32 %v10379_v62, %v10378_v17  ;;  %v10291_v30 = vmul.f32 %v18053_v10, %v10280_v34 }
0x1e62   : > { %v10251_v31 = vmul.f32 %v18029_v49, %v10250_v45  ;;  %v18173_v47 = vadd.f32 %v18066_v6, %v10480_v60  ;;  %v10313_v45 = vpop.permute.xlu0 %10312  ;;  %v10449_v52 = vsub.f32 1.0, %v10448_v5  ;;  %v18279_v5 = vrot.slane %v18001_v23, 7 }
0x1e63   : > { %v10470_v61 = vsel %vm18120_vm7, %v18031_v42, %v10466_v48  ;;  %v10508_v42 = vmul.f32 %v18146_v29, %v18075_v20  ;;  %v10381_v54 = vrot.slane %v10380_v9, 2  ;;  %v10302_v22 = vadd.f32 %v18063_v14, %v10291_v30 }
0x1e64   : > { %v10255_v51 = vsel %vm18135_vm2, %v18029_v49, %v10251_v31  ;;  %v10365_v49 = vmul.f32 %v17989_v8, %v10300_v25  ;;  %v18166_v38 = vsel %vm18142_vm3, %v10474_v26, %v10470_v61  ;;  %v10488_v8 = vand.u32 2147483648, %v18038_v7 }
0x1e65   : > { %v10281_v3 = vmul.f32 %v10255_v51, %v17963_v58  ;;  %v10301_v58 = vadd.f32 %v18063_v14, %v10290_v37  ;;  %v10509_v27 = vsub.f32 1.0, %v10508_v42  ;;  %v10496_v7 = vadd.f32 %v18084_v35, %v10495_v15 }
0x1e66   : > { %v10385_v18 = vsel %vm518_vm0, %v10365_v49, 0.0  ;;  %v10485_v57 = vsel %vm18178_vm11, %v18066_v6, %v18173_v47  ;;  %v10363_v31 = vmul.f32 %v10313_v45, %v10298_v43  ;;  %v18217_v25 = vrot.slane %v18001_v23, 5 }
0x1e67   : > { %v10292_v44 = vmul.f32 %v18053_v10, %v10281_v3  ;;  %v10366_v53 = vmul.f32 %v18068_v50, %v10301_v58  ;;  %v10386_v4 = vrot.slane %v10385_v18, 4  ;;  %v10510_v32 = vmul.f32 %v18146_v29, %v10509_v27 }
0x1e68   : > { %v10500_v59 = vsel %vm18202_vm14, %v18084_v35, %v10496_v7  ;;  %v10382_v11 = vadd.f32 %v10381_v54, %v10380_v9  ;;  %v10371_v26 = vsel %vm518_vm0, %v10363_v31, 0.0  ;;  %v10516_v51 = vand.u32 2147483647, %v18075_v20 }
0x1e69   : > { %v10303_v13 = vadd.f32 %v18063_v14, %v10292_v44  ;;  %v10387_v41 = vadd.f32 %v10386_v4, %v10385_v18  ;;  %v10367_v61 = vmul.f32 %v10341_v55, %v10302_v22  ;;  %v18233_v60 = vadd.f32 %v18146_v29, %v10510_v32 }
0x1e6a   : > { %v10450_v62 = vmul.f32 %v18168_v36, %v10449_v52  ;;  %v10518_v55 = vand.u32 2147483648, %v18075_v20  ;;  %v10489_v21 = vor.u32 1.1754944e-38, %v10488_v8  ;;  %v10372_v49 = vrot.slane %v10371_v26, 4 }
0x1e6b   : > { %v10368_v35 = vmul.f32 %v18133_v24, %v10303_v13  ;;  %v10383_v3 = vrot.slane %v10382_v11, 1  ;;  %v18246_v24 = vsel %vm18206_vm15, %v10504_v40, %v10500_v59  ;;  %vm10452_vm7 = vweird.f32 %v18001_v23 }
0x1e6c   : > { %v10388_v2 = vrot.slane %v10387_v41, 2  ;;  %v10399_v9 = vsel %vm518_vm0, %v10367_v61, 0.0  ;;  %v10458_v20 = vand.u32 2147483648, %v18001_v23  ;;  %v18257_v8 = vrot.slane %v18001_v23, 6  ;;  %vm18274_vm3 = vmor %vm10452_vm7, %vm10453_vm8 }
0x1e6d   : > { %v10406_v58 = vsel %vm518_vm0, %v10368_v35, 0.0  ;;  %v10515_v12 = vsel %vm18239_vm6, %v18146_v29, %v18233_v60  ;;  %vm18264_vm2 = vcmp.eq.f32.partialorder %v10516_v51, 8.507059e+37  ;;  %v10451_v30 = vadd.f32 %v18168_v36, %v10450_v62 }
0x1e6e   : > { %v10519_v44 = vor.u32 1.1754944e-38, %v10518_v55  ;;  %v10373_v29 = vadd.f32 %v10372_v49, %v10371_v26  ;;  %v10400_v7 = vrot.slane %v10399_v9, 4  ;;  %v10384_v40 = vadd.f32 %v10383_v3, %v10382_v11 }
0x1e6f   : > { %v10407_v28 = vrot.slane %v10406_v58, 4  ;;  %v10455_v31 = vsel %vm18274_vm3, %v18168_v36, %v10451_v30  ;;  %vm18292_vm10 = vcmp.eq.f32.partialorder %v10456_v46, 8.507059e+37  ;;  %v10490_v60 = vsel %vm18250_vm9, %v10489_v21, %v10485_v57 }
0x1e70   : > { %v10374_v13 = vrot.slane %v10373_v29, 2  ;;  %v10401_v52 = vadd.f32 %v10400_v7, %v10399_v9  ;;  %v18297_v36 = vmul.f32 %v18166_v38, %v10384_v40  ;;  %v18314_v0 = vsel %vm18264_vm2, %v10519_v44, %v10515_v12 }
0x1e71   : > { %vm10576_vm5 = vcmask 1041409   ;;  %vm10527_vm1 = vweird.f32 %v18217_v25  ;;  %vm10557_vm7 = vweird.f32 %v18279_v5  ;;  %v10533_v44 = vand.u32 2147483648, %v18217_v25 }
0x1e72   : > { %v10375_v62 = vadd.f32 %v10374_v13, %v10373_v29  ;;  %v10575_v21 = vrot.slane %v18297_v36, 7  ;;  %vm10579_vm8 = vcmask 1042434   ;;  %vm10542_vm9 = vweird.f32 %v18257_v8 }
0x1e73   : > { %v10548_v26 = vand.u32 2147483648, %v18257_v8 }
0x1e74   : > { %v10376_v42 = vrot.slane %v10375_v62, 1 }
0x1e76   : > { %v10377_v27 = vadd.f32 %v10376_v42, %v10375_v62 }
0x1e87   : > { %v10176_v56 = vpop.xlane.xlu2 %10175 }
0x1e88   : > { %v10186_v48 = vmul.f32 %v10176_v56, %v18585_v19 }
0x1e89   : > { %v10179_v33 = vpop.xlane.xlu1 %10178 }
0x1e8a   : > { %v18211_v17 = vadd.f32 1e-05, %v10186_v48  ;;  %v10187_v50 = vmul.f32 %v10179_v33, %v18585_v19  ;;  %v10392_v19 = vsel %vm518_vm0, %v10366_v53, 0.0  ;;  %v10389_v53 = vadd.f32 %v10388_v2, %v10387_v41 }
0x1e8b   : > { %v10393_v37 = vrot.slane %v10392_v19, 4  ;;  %v10459_v33 = vor.u32 1.1754944e-38, %v10458_v20 }
0x1e8c   : > { %13439 = vrsqrt.f32 %v18211_v17  ;;  %v18224_v16 = vadd.f32 1e-05, %v10187_v50  ;;  %v10390_v11 = vrot.slane %v10389_v53, 1  ;;  %vm10262_vm12 = vweird.f32 %v18211_v17 }
0x1e8d   : > { %v10394_v18 = vadd.f32 %v10393_v37, %v10392_v19  ;;  %v10408_v19 = vadd.f32 %v10407_v28, %v10406_v58  ;;  %v10402_v37 = vrot.slane %v10401_v52, 2  ;;  %v10460_v6 = vsel %vm18292_vm10, %v10459_v33, %v10455_v31 }
0x1e8e   : > { %13441 = vrsqrt.f32 %v18224_v16  ;;  %vm10272_vm15 = vweird.f32 %v18224_v16  ;;  %v10391_v57 = vadd.f32 %v10390_v11, %v10389_v53  ;;  %v10461_v13 = vmul.f32 %v10460_v6, %v10377_v27 }
0x1e8f   : > { %13443 = vrcp.f32 %v18217_v25  ;;  %v10395_v50 = vrot.slane %v10394_v18, 2  ;;  %v10409_v49 = vrot.slane %v10408_v19, 2  ;;  %v10403_v58 = vadd.f32 %v10402_v37, %v10401_v52  ;;  %v10362_v53 = vpop.permute.xlu2 %10361 }
0x1e90   : > { %13445 = vrcp.f32 %v18257_v8  ;;  %v10577_v62 = vsel %vm10576_vm5, %v10575_v21, %v10461_v13  ;;  %v10563_v37 = vand.u32 2147483648, %v18279_v5  ;;  %vm10585_vm5 = vcmask 1044484  }
0x1e91   : > { %13447 = vrcp.f32 %v18279_v5  ;;  %v10396_v35 = vadd.f32 %v10395_v50, %v10394_v18  ;;  %v10410_v30 = vadd.f32 %v10409_v49, %v10408_v19  ;;  %v10531_v18 = vand.u32 2147483647, %v18217_v25 }
0x1e92   : > { %v13440_v15 = vpop.eup %13439  ;;  %v10404_v40 = vrot.slane %v10403_v58, 1  ;;  %v10534_v50 = vor.u32 1.1754944e-38, %v10533_v44  ;;  %v10546_v19 = vand.u32 2147483647, %v18257_v8 }
0x1e93   : > { %v10257_v43 = vmul.f32 %v13440_v15, %v18211_v17  ;;  %vm10263_vm4 = vweird.f32 %v13440_v15  ;;  %v10397_v20 = vrot.slane %v10396_v35, 1  ;;  %v10411_v33 = vrot.slane %v10410_v30, 1 }
0x1e94   : > { %v13442_v45 = vpop.eup %13441  ;;  %vm10264_vm14 = vmor %vm10262_vm12, %vm10263_vm4  ;;  %vm10532_vm4 = vcmp.eq.f32.partialorder %v10531_v18, 8.507059e+37  ;;  %v10405_v52 = vadd.f32 %v10404_v40, %v10403_v58 }
0x1e95   : > { %v18281_v56 = vpop.eup %13443  ;;  %v10258_v48 = vmul.f32 %v13440_v15, %v10257_v43  ;;  %v10267_v54 = vmul.f32 %v13442_v45, %v18224_v16  ;;  %vm10273_vm13 = vweird.f32 %v13442_v45  ;;  %v10398_v46 = vadd.f32 %v10397_v20, %v10396_v35 }
0x1e96   : > { %v10523_v32 = vmul.f32 %v18281_v56, %v18217_v25  ;;  %v18300_v61 = vpop.eup %13445  ;;  %vm10274_vm11 = vmor %vm10272_vm15, %vm10273_vm13  ;;  %vm10528_vm6 = vweird.f32 %v18281_v56  ;;  %v10412_v36 = vadd.f32 %v10411_v33, %v10410_v30  ;;  %vm10582_vm15 = vcmask 1043459  }
0x1e97   : > { %v10259_v4 = vmul.f32 0.5, %v10258_v48  ;;  %v10268_v22 = vmul.f32 %v13442_v45, %v10267_v54  ;;  %v18310_v55 = vpop.eup %13447  ;;  %v10538_v16 = vmul.f32 %v18300_v61, %v18257_v8  ;;  %v10491_v48 = vmul.f32 %v10490_v60, %v10391_v57  ;;  %vm18343_vm2 = vmor %vm10527_vm1, %vm10528_vm6 }
0x1e98   : > { %v10524_v38 = vsub.f32 1.0, %v10523_v32  ;;  %vm10543_vm3 = vweird.f32 %v18300_v61  ;;  %vm10558_vm10 = vweird.f32 %v18310_v55  ;;  %v10549_v57 = vor.u32 1.1754944e-38, %v10548_v26 }
0x1e99   : > { %v10260_v59 = vsub.f32 1.5, %v10259_v4  ;;  %v10269_v23 = vmul.f32 0.5, %v10268_v22  ;;  %v10539_v43 = vsub.f32 1.0, %v10538_v16  ;;  %vm18366_vm12 = vmor %vm10542_vm9, %vm10543_vm3  ;;  %vm10588_vm1 = vcmask 1045509  }
0x1e9a   : > { %v10525_v9 = vmul.f32 %v18281_v56, %v10524_v38  ;;  %v10578_v38 = vrot.slane %v10491_v48, 6  ;;  %vm18377_vm13 = vmor %vm10557_vm7, %vm10558_vm10  ;;  %vm10591_vm6 = vcmask 1046534   ;;  %vm10594_vm7 = vcmask 1047559  }
0x1e9b   : > { %v10261_v41 = vmul.f32 %v13440_v15, %v10260_v59  ;;  %v10270_v51 = vsub.f32 1.5, %v10269_v23  ;;  %v10540_v4 = vmul.f32 %v18300_v61, %v10539_v43 }
0x1e9c   : > { %v10526_v7 = vadd.f32 %v18281_v56, %v10525_v9 }
0x1e9d   : > { %v10271_v34 = vmul.f32 %v13442_v45, %v10270_v51  ;;  %v10265_v17 = vsel %vm10264_vm14, %v13440_v15, %v10261_v41  ;;  %v10541_v51 = vadd.f32 %v18300_v61, %v10540_v4  ;;  %vm18381_vm14 = vcmp.eq.f32.partialorder %v10546_v19, 8.507059e+37 }
0x1e9e   : > { %v10282_v47 = vmul.f32 %v10265_v17, %v17975_v39  ;;  %v10553_v39 = vmul.f32 %v18310_v55, %v18279_v5  ;;  %v10530_v25 = vsel %vm18343_vm2, %v18281_v56, %v10526_v7  ;;  %v10506_v56 = vmul.f32 %v18246_v24, %v10398_v46 }
0x1e9f   : > { %v10275_v3 = vsel %vm10274_vm11, %v13442_v45, %v10271_v34  ;;  %v10535_v60 = vsel %vm10532_vm4, %v10534_v50, %v10530_v25  ;;  %v10521_v17 = vmul.f32 %v18314_v0, %v10405_v52  ;;  %v10580_v0 = vsel %vm10579_vm8, %v10578_v38, %v10577_v62 }
0x1ea0   : > { %v10283_v15 = vmul.f32 %v10275_v3, %v17977_v1  ;;  %v10293_v2 = vmul.f32 %v18053_v10, %v10282_v47  ;;  %v10561_v1 = vand.u32 2147483647, %v18279_v5  ;;  %v10554_v54 = vsub.f32 1.0, %v10553_v39 }
0x1ea1   : > { %v10355_v45 = vpop.permute.xlu1 %10354  ;;  %v10536_v21 = vmul.f32 %v10535_v60, %v10412_v36  ;;  %v10545_v16 = vsel %vm18366_vm12, %v18300_v61, %v10541_v51  ;;  %v10581_v42 = vrot.slane %v10506_v56, 5 }
0x1ea2   : > { %v10294_v12 = vmul.f32 %v18053_v10, %v10283_v15  ;;  %v10304_v63 = vadd.f32 %v18063_v14, %v10293_v2  ;;  %v10555_v59 = vmul.f32 %v18310_v55, %v10554_v54  ;;  %vm10562_vm11 = vcmp.eq.f32.partialorder %v10561_v1, 8.507059e+37 }
0x1ea3   : > { %v10564_v15 = vor.u32 1.1754944e-38, %v10563_v37  ;;  %v10584_v2 = vrot.slane %v10521_v17, 4  ;;  %v10550_v39 = vsel %vm18381_vm14, %v10549_v57, %v10545_v16  ;;  %v10587_v61 = vrot.slane %v10536_v21, 3 }
0x1ea4   : > { %v10305_v29 = vadd.f32 %v18063_v14, %v10294_v12  ;;  %v10369_v10 = vmul.f32 %v10355_v45, %v10304_v63  ;;  %v10556_v49 = vadd.f32 %v18310_v55, %v10555_v59  ;;  %v10583_v12 = vsel %vm10582_vm15, %v10581_v42, %v10580_v0 }
0x1ea5   : > { %v10586_v45 = vsel %vm10585_vm5, %v10584_v2, %v10583_v12 }
0x1ea6   : > { %v10370_v31 = vmul.f32 %v10362_v53, %v10305_v29  ;;  %v10413_v14 = vsel %vm518_vm0, %v10369_v10, 0.0  ;;  %v10560_v9 = vsel %vm18377_vm13, %v18310_v55, %v10556_v49  ;;  %v10589_v18 = vsel %vm10588_vm1, %v10587_v61, %v10586_v45 }
0x1ea7   : > { %v10414_v22 = vrot.slane %v10413_v14, 4  ;;  %v10565_v1 = vsel %vm10562_vm11, %v10564_v15, %v10560_v9 }
0x1ea8   : > { %v10420_v32 = vsel %vm518_vm0, %v10370_v31, 0.0 }
0x1ea9   : > { %v10421_v23 = vrot.slane %v10420_v32, 4  ;;  %v10415_v11 = vadd.f32 %v10414_v22, %v10413_v14 }
0x1eab   : > { %v10422_v41 = vadd.f32 %v10421_v23, %v10420_v32  ;;  %v10416_v35 = vrot.slane %v10415_v11, 2 }
0x1ead   : > { %v10423_v24 = vrot.slane %v10422_v41, 2  ;;  %v10417_v6 = vadd.f32 %v10416_v35, %v10415_v11 }
0x1eaf   : > { %v10424_v3 = vadd.f32 %v10423_v24, %v10422_v41  ;;  %v10418_v5 = vrot.slane %v10417_v6, 1 }
0x1eb1   : > { %v10425_v20 = vrot.slane %v10424_v3, 1  ;;  %v10419_v58 = vadd.f32 %v10418_v5, %v10417_v6 }
0x1eb3   : > { %v10426_v63 = vadd.f32 %v10425_v20, %v10424_v3  ;;  %v10551_v30 = vmul.f32 %v10550_v39, %v10419_v58 }
0x1eb5   : > { %v10566_v55 = vmul.f32 %v10565_v1, %v10426_v63  ;;  %v10590_v43 = vrot.slane %v10551_v30, 2 }
0x1eb7   : > { %v10593_v44 = vrot.slane %v10566_v55, 1  ;;  %v10592_v27 = vsel %vm10591_vm6, %v10590_v43, %v10589_v18 }
0x1eb9   : > { %v10595_v29 = vsel %vm10594_vm7, %v10593_v44, %v10592_v27 }
0x1eba   : > { %10597 = vst.msk [vmem:[%s474_s15] sm:$0xff] %vm518_vm0, %v10595_v29 }
0x1ebb   : > { %13484 = shalt.err (!%p13481_p4)
}
0x1ebc   : > { %12920 = dma.vmem_to_hbm [thread:$0]  (%p13649_p5), %s10612_s21, 128, %s10614_s26, %s10599_s27  }
0x1ebd PF: > { %p12926_p7 = scmp.ge.s32.totalorder %s13519_s16, 2  ;;  %s10625_s20 = sand.u32 1, %s13507_s29  }
0x1ebe   : > { %s10626_s15 = scalar_lea.sflag [#allocation3], %s10625_s20 }
0x1ebf   : > { %p12923_p8 = pnand %p12926_p7, %p13653_p6 }
0x1ec1   : > { %p12924_p9 = pneg %p12923_p8 }
0x1ec3   : > { %13502 = dma.done.wait (%p12924_p9), %s10626_s15, 128  }
0x1ec4   : > { %13504 = vsyncadd (%p12924_p9), %s10626_s15, 4294967168  ;;  %s18623_s16 = sld [smem:[#allocation6_spill]]  ;;  %s18626_s29 = smov %s13511_s30 }
0x1ec5   : > { %s18624_s17 = sld [smem:[#allocation5_spill]] }
0x1ec6   : > { %s18625_s15 = sld [smem:[#allocation7_spill]] }
0x1eca   : > { %p24_p10 = scmp.ge.s32.totalorder %s18623_s16, 4  }
0x1ecb   : > { %s18627_s30 = smov %s18624_s17 }
0x1ecc   :  { %26 = sbr.rel (!%p24_p10) target bundleno = 5 (0x5), region = 126 }
0x1ed1   :  { %10632 = vsyncpa [#allocation3], 1 }
0x1ed2   :  { %10634 = vsyncpa [#allocation3 + $0x1], 1 }

</bundles_post_ra>
